<compile_context>
chip_gen: v5e
topology: v5e:2x2
jax: 0.10.0
libtpu: 0.0.40
codegen_flags: <defaults>
</compile_context>

<pallas_src>
import functools

import jax
import jax.numpy as jnp
from jax import lax
from jax.experimental import pallas as pl
from jax.experimental.pallas import tpu as pltpu


# ----------------------------------------------------------------------------
# Helpers
# ----------------------------------------------------------------------------
def _round_up(x, m):
    return (x + m - 1) // m * m


def _phase_stack(xp, stride, pad_value=0.0):
    """Split a (spatially padded) NDHWC tensor into stride-phases.

    Returns (S, N, Dq, Hq, Wq, C) where S = sd*sh*sw and phase p=(pa,pb,pc)
    holds xp[:, pa::sd, pb::sh, pc::sw, :] (padded to a common spatial shape).
    For stride 1 this is a free reshape of xp itself.
    """
    sd, sh, sw = stride
    if (sd, sh, sw) == (1, 1, 1):
        return xp[None], tuple(xp.shape[1:4])
    Dq = -(-xp.shape[1] // sd)
    Hq = -(-xp.shape[2] // sh)
    Wq = -(-xp.shape[3] // sw)
    phases = []
    for pa in range(sd):
        for pb in range(sh):
            for pc in range(sw):
                t = xp[:, pa::sd, pb::sh, pc::sw, :]
                t = jnp.pad(
                    t,
                    ((0, 0), (0, Dq - t.shape[1]), (0, Hq - t.shape[2]),
                     (0, Wq - t.shape[3]), (0, 0)),
                    constant_values=pad_value)
                phases.append(t)
    return jnp.stack(phases, axis=0), (Dq, Hq, Wq)


def _pick_tn(T, Cinp, Coutp):
    """Largest cout tile whose (double-buffered) weight block stays ~<=12 MiB."""
    for cand in (512, 256):
        if Coutp % cand == 0 and T * Cinp * cand * 2 <= 6 * 1024 * 1024:
            return cand
    return 128


# ----------------------------------------------------------------------------
# Direct-conv Pallas kernels (no im2col in HBM)
# ----------------------------------------------------------------------------
def _conv_accum(x_ref, w_ref, taps, kstride, odims):
    """Sum over taps of A_tap @ W_tap, accumulated in f32 (MXU)."""
    Do, Ho, Wo = odims
    sd, sh, sw = kstride
    P = Do * Ho * Wo
    C = x_ref.shape[-1]
    loaded = {}
    acc = None
    for t, (a, b, c) in enumerate(taps):
        phase = ((a % sd) * sh + (b % sh)) * sw + (c % sw)
        if phase not in loaded:
            loaded[phase] = x_ref[phase, 0]          # (Dq, Hq, Wq, C) in VMEM
        xv = loaded[phase]
        da, db, dc = a // sd, b // sh, c // sw
        if (da, db, dc) == (0, 0, 0) and xv.shape == (Do, Ho, Wo, C):
            xt = xv
        else:
            xt = lax.slice(xv, (da, db, dc, 0), (da + Do, db + Ho, dc + Wo, C))
        contrib = jnp.dot(xt.reshape(P, C), w_ref[t],
                          preferred_element_type=jnp.float32)
        acc = contrib if acc is None else acc + contrib   # first tap: direct write
    return acc                                             # (P, tn) f32


def _conv_bn_kernel(x_ref, w_ref, s_ref, c_ref, o_ref, *, taps, kstride, odims,
                    relu):
    Do, Ho, Wo = odims
    y = _conv_accum(x_ref, w_ref, taps, kstride, odims) * s_ref[...] + c_ref[...]
    if relu:
        y = jnp.maximum(y, 0.0)
    o_ref[0] = y.astype(o_ref.dtype).reshape(Do, Ho, Wo, y.shape[-1])


def _conv_bn_res_kernel(x_ref, w_ref, s_ref, c_ref, r_ref, o_ref, *, taps,
                        kstride, odims):
    Do, Ho, Wo = odims
    acc = _conv_accum(x_ref, w_ref, taps, kstride, odims)
    r = r_ref[0].reshape(Do * Ho * Wo, r_ref.shape[-1]).astype(jnp.float32)
    y = jnp.maximum(acc * s_ref[...] + c_ref[...] + r, 0.0)
    o_ref[0] = y.astype(o_ref.dtype).reshape(Do, Ho, Wo, y.shape[-1])


def conv3d_direct(x, cp, relu=True, residual=None):
    """Direct 3D conv + fused BN(+residual)+ReLU.

    x: (N, D, H, W, Cinp) bf16 with Cinp a multiple of 128 (padded layout carried
    between layers).  Output: (N, Do, Ho, Wo, Coutp) bf16 (lane-dense).
    """
    N, D, H, W, Cx = x.shape
    assert Cx == cp["Cinp"], (Cx, cp["Cinp"])
    kd, kh, kw = cp["ksize"]
    sd, sh, sw = cp["stride"]
    pd, ph_, pw = cp["pad"]
    Do = (D + 2 * pd - kd) // sd + 1
    Ho = (H + 2 * ph_ - kh) // sh + 1
    Wo = (W + 2 * pw - kw) // sw + 1

    if (kd, kh, kw) == (1, 1, 1):
        if (sd, sh, sw) != (1, 1, 1):
            x = x[:, ::sd, ::sh, ::sw, :]           # minimal strided subsample
        xph = x[None]                               # free reshape (zero-copy A)
        Dq, Hq, Wq = xph.shape[2:5]
        taps = [(0, 0, 0)]
        kstride = (1, 1, 1)
    else:
        xp = jnp.pad(x, ((0, 0), (pd, pd), (ph_, ph_), (pw, pw), (0, 0)))
        xph, (Dq, Hq, Wq) = _phase_stack(xp, (sd, sh, sw))
        taps = [(a, b, c) for a in range(kd) for b in range(kh) for c in range(kw)]
        kstride = (sd, sh, sw)

    S, T = xph.shape[0], len(taps)
    Cinp, Coutp = cp["Cinp"], cp["Coutp"]
    tn = _pick_tn(T, Cinp, Coutp)
    grid = (Coutp // tn, N)                         # j outer so W is fetched once

    x_spec = pl.BlockSpec((S, 1, Dq, Hq, Wq, Cinp), lambda j, n: (0, n, 0, 0, 0, 0))
    w_spec = pl.BlockSpec((T, Cinp, tn), lambda j, n: (0, 0, j))
    v_spec = pl.BlockSpec((1, tn), lambda j, n: (0, j))
    o_spec = pl.BlockSpec((1, Do, Ho, Wo, tn), lambda j, n: (n, 0, 0, 0, j))

    in_specs = [x_spec, w_spec, v_spec, v_spec]
    args = [xph, cp["W"], cp["scale"], cp["bias"]]
    if residual is not None:
        assert residual.shape == (N, Do, Ho, Wo, Coutp)
        kern = functools.partial(_conv_bn_res_kernel, taps=taps, kstride=kstride,
                                 odims=(Do, Ho, Wo))
        in_specs.append(o_spec)
        args.append(residual.astype(jnp.bfloat16))
    else:
        kern = functools.partial(_conv_bn_kernel, taps=taps, kstride=kstride,
                                 odims=(Do, Ho, Wo), relu=relu)

    return pl.pallas_call(
        kern,
        out_shape=jax.ShapeDtypeStruct((N, Do, Ho, Wo, Coutp), jnp.bfloat16),
        grid_spec=pltpu.PrefetchScalarGridSpec(
            num_scalar_prefetch=0, grid=grid,
            in_specs=in_specs, out_specs=o_spec),
        compiler_params=pltpu.CompilerParams(
            dimension_semantics=("parallel", "parallel")),
    )(*args)


# ----------------------------------------------------------------------------
# Fused matmul + BN + ReLU (used by the 7x7x7 stem via im2col and by the fc)
# ----------------------------------------------------------------------------
def _mm_bn_kernel(a_ref, b_ref, s_ref, c_ref, o_ref, acc_ref, *, relu):
    k = pl.program_id(2)
    d = jnp.dot(a_ref[...], b_ref[...], preferred_element_type=jnp.float32)

    @pl.when(k == 0)
    def _():
        acc_ref[...] = d                 # direct write, no zero-init pass

    @pl.when(k > 0)
    def _():
        acc_ref[...] += d

    @pl.when(k == pl.num_programs(2) - 1)
    def _():
        y = acc_ref[...] * s_ref[...] + c_ref[...]
        if relu:
            y = jnp.maximum(y, 0.0)
        o_ref[...] = y.astype(o_ref.dtype)


def _fused_matmul(A, Bm, scale, bias, relu=True, out_dtype=jnp.bfloat16):
    """A:(M,Kp) @ Bm:(Kp,Np) with fused scale/bias(/relu).  Returns (Mp,Np)."""
    M, Kp = A.shape
    Kp2, Np = Bm.shape
    assert Kp == Kp2, (Kp, Kp2)

    if M >= 128:
        tm = next((t for t in (1024, 512, 256, 128) if M % t == 0), 128)
        Mp = _round_up(M, tm)
    else:
        tm = _round_up(M, 16)
        Mp = tm
    tn = 512 if Np % 512 == 0 else (256 if Np % 256 == 0 else 128)
    # 128-granular K; single k-step whenever it fits (all calls here do).
    tk = Kp if Kp <= 2048 else next(
        (t for t in range(1024, 0, -128) if Kp % t == 0), 128)

    A = A.astype(jnp.bfloat16)
    if Mp != M:
        A = jnp.pad(A, ((0, Mp - M), (0, 0)))

    grid = (Mp // tm, Np // tn, Kp // tk)
    a_spec = pl.BlockSpec((tm, tk), lambda i, j, k: (i, k))
    b_spec = pl.BlockSpec((tk, tn), lambda i, j, k: (k, j))
    v_spec = pl.BlockSpec((1, tn), lambda i, j, k: (0, j))
    o_spec = pl.BlockSpec((tm, tn), lambda i, j, k: (i, j))

    return pl.pallas_call(
        functools.partial(_mm_bn_kernel, relu=relu),
        out_shape=jax.ShapeDtypeStruct((Mp, Np), out_dtype),
        grid_spec=pltpu.PrefetchScalarGridSpec(
            num_scalar_prefetch=0, grid=grid,
            in_specs=[a_spec, b_spec, v_spec, v_spec],
            out_specs=o_spec,
            scratch_shapes=[pltpu.VMEM((tm, tn), jnp.float32)]),
        compiler_params=pltpu.CompilerParams(
            dimension_semantics=("parallel", "parallel", "arbitrary")),
    )(A, Bm, scale, bias)


def _im2col(x, ksize, stride, padding, Kp):
    N, D, H, W, Cin = x.shape
    kd, kh, kw = ksize
    sd, sh, sw = stride
    pd, ph, pw = padding
    Do = (D + 2 * pd - kd) // sd + 1
    Ho = (H + 2 * ph - kh) // sh + 1
    Wo = (W + 2 * pw - kw) // sw + 1
    M = N * Do * Ho * Wo
    K = kd * kh * kw * Cin

    xp = jnp.pad(x, ((0, 0), (pd, pd), (ph, ph), (pw, pw), (0, 0)))
    cols = []
    for a in range(kd):
        for b in range(kh):
            for c in range(kw):
                cols.append(lax.slice(
                    xp,
                    (0, a, b, c, 0),
                    (N, a + sd * (Do - 1) + 1, b + sh * (Ho - 1) + 1,
                     c + sw * (Wo - 1) + 1, Cin),
                    (1, sd, sh, sw, 1)).reshape(M, Cin))
    if Kp > K:
        cols.append(jnp.zeros((M, Kp - K), x.dtype))
    A = jnp.concatenate(cols, axis=1)
    return A, (N, Do, Ho, Wo), M


def stem_conv(x, cp):
    Kp = cp["B"].shape[0]
    A, (N, Do, Ho, Wo), M = _im2col(x, cp["ksize"], cp["stride"], cp["pad"], Kp)
    out = _fused_matmul(A, cp["B"], cp["scale"], cp["bias"], relu=True)
    if out.shape[0] != M:
        out = out[:M]
    # keep all 128 (padded) channels: lane-dense into the max-pool and layer1
    return out.reshape(N, Do, Ho, Wo, cp["B"].shape[1])


# ----------------------------------------------------------------------------
# Fused 3x3x3 / stride 2 / pad 1 max-pool (whole separable max in one kernel)
# ----------------------------------------------------------------------------
def _maxpool_kernel(x_ref, o_ref, *, odims):
    Do, Ho, Wo = odims

    def ph(rd, rh, rw):
        return x_ref[(rd * 2 + rh) * 2 + rw, 0]     # (Dq, Hq, Wq, tc)

    dval = {}
    for rh in range(2):
        for rw in range(2):
            p0, p1 = ph(0, rh, rw), ph(1, rh, rw)
            dval[(rh, rw)] = jnp.maximum(jnp.maximum(p0[:Do], p1[:Do]),
                                         p0[1:Do + 1])
    hval = {}
    for rw in range(2):
        a0, a1 = dval[(0, rw)], dval[(1, rw)]
        hval[rw] = jnp.maximum(jnp.maximum(a0[:, :Ho], a1[:, :Ho]),
                               a0[:, 1:Ho + 1])
    a0, a1 = hval[0], hval[1]
    o_ref[0] = jnp.maximum(jnp.maximum(a0[:, :, :Wo, :], a1[:, :, :Wo, :]),
                           a0[:, :, 1:Wo + 1, :])


def maxpool3d(x):
    N, D, H, W, C = x.shape
    assert C % 128 == 0
    Do, Ho, Wo = (D - 1) // 2 + 1, (H - 1) // 2 + 1, (W - 1) // 2 + 1
    xp = jnp.pad(x, ((0, 0), (1, 1), (1, 1), (1, 1), (0, 0)),
                 constant_values=-jnp.inf)
    xph, (Dq, Hq, Wq) = _phase_stack(xp, (2, 2, 2), pad_value=-jnp.inf)
    tc = 128
    return pl.pallas_call(
        functools.partial(_maxpool_kernel, odims=(Do, Ho, Wo)),
        out_shape=jax.ShapeDtypeStruct((N, Do, Ho, Wo, C), x.dtype),
        grid_spec=pltpu.PrefetchScalarGridSpec(
            num_scalar_prefetch=0, grid=(N, C // tc),
            in_specs=[pl.BlockSpec((8, 1, Dq, Hq, Wq, tc),
                                   lambda n, c: (0, n, 0, 0, 0, c))],
            out_specs=pl.BlockSpec((1, Do, Ho, Wo, tc),
                                   lambda n, c: (n, 0, 0, 0, c))),
        compiler_params=pltpu.CompilerParams(
            dimension_semantics=("parallel", "parallel")),
    )(xph)


# ----------------------------------------------------------------------------
# Global average pool
# ----------------------------------------------------------------------------
def _gap_kernel(x_ref, o_ref, *, inv_s):
    part = jnp.sum(x_ref[...].astype(jnp.float32), axis=1)

    @pl.when(pl.program_id(0) == 0)
    def _():
        o_ref[...] = part

    @pl.when(pl.program_id(0) > 0)
    def _():
        o_ref[...] += part

    @pl.when(pl.program_id(0) == pl.num_programs(0) - 1)
    def _():
        o_ref[...] *= inv_s


def global_avg_pool(x):
    N, D, H, W, C = x.shape
    S = D * H * W
    x3 = x.reshape(N, S, C)
    ts = min(512, _round_up(S, 16))
    Sp = _round_up(S, ts)
    if Sp != S:
        x3 = jnp.pad(x3, ((0, 0), (0, Sp - S), (0, 0)))
    return pl.pallas_call(
        functools.partial(_gap_kernel, inv_s=1.0 / S),
        out_shape=jax.ShapeDtypeStruct((N, C), jnp.float32),
        grid_spec=pltpu.PrefetchScalarGridSpec(
            num_scalar_prefetch=0, grid=(Sp // ts,),
            in_specs=[pl.BlockSpec((N, ts, C), lambda s: (0, s, 0))],
            out_specs=pl.BlockSpec((N, C), lambda s: (0, 0))),
        compiler_params=pltpu.CompilerParams(dimension_semantics=("arbitrary",)),
    )(x3)


# ----------------------------------------------------------------------------
# ResNet50-3D parameters (weights prepped / padded / cast at init time)
# ----------------------------------------------------------------------------
EXPANSION = 4
BLOCK_COUNTS = (3, 4, 6, 3)        # resnet50
PLANES = (64, 128, 256, 512)
BN_EPS = 1e-5


def _init_conv(key, kshape, cin, cout):
    kd, kh, kw = kshape
    fan_in = kd * kh * kw * cin
    std = (2.0 / fan_in) ** 0.5
    return std * jax.random.normal(key, (kd, kh, kw, cin, cout), jnp.float32)


def _init_bn(key, c):
    k1, k2, k3, k4 = jax.random.split(key, 4)
    gamma = 1.0 + 0.1 * jax.random.normal(k1, (c,), jnp.float32)
    beta = 0.1 * jax.random.normal(k2, (c,), jnp.float32)
    running_mean = 0.1 * jax.random.normal(k3, (c,), jnp.float32)
    running_var = jax.random.uniform(k4, (c,), jnp.float32, 0.5, 1.5)
    scale = gamma / jnp.sqrt(running_var + BN_EPS)
    bias = beta - running_mean * scale
    return scale, bias


def _prep_conv_direct(w, bn, stride, pad):
    """Weight as (T, Cinp, Coutp) bf16 (cin/cout zero-padded to 128 multiples)."""
    kd, kh, kw, cin, cout = w.shape
    Cinp, Coutp = _round_up(cin, 128), _round_up(cout, 128)
    T = kd * kh * kw
    Wm = jnp.pad(w.reshape(T, cin, cout),
                 ((0, 0), (0, Cinp - cin), (0, Coutp - cout))).astype(jnp.bfloat16)
    scale, bias = bn
    s = jnp.pad(scale, (0, Coutp - cout), constant_values=1.0).reshape(1, Coutp)
    b = jnp.pad(bias, (0, Coutp - cout)).reshape(1, Coutp)
    return {"W": Wm, "scale": s.astype(jnp.float32), "bias": b.astype(jnp.float32),
            "ksize": (kd, kh, kw), "stride": stride, "pad": pad,
            "Cinp": Cinp, "Coutp": Coutp, "cout": cout}


def _prep_conv_matmul(w, bn, stride, pad):
    """Weight as (Kp, Np) bf16 for the im2col/matmul path (stem)."""
    kd, kh, kw, cin, cout = w.shape
    K = kd * kh * kw * cin
    Kp, Np = _round_up(K, 128), _round_up(cout, 128)
    Bm = jnp.pad(w.reshape(K, cout),
                 ((0, Kp - K), (0, Np - cout))).astype(jnp.bfloat16)
    scale, bias = bn
    s = jnp.pad(scale, (0, Np - cout), constant_values=1.0).reshape(1, Np)
    b = jnp.pad(bias, (0, Np - cout)).reshape(1, Np)
    return {"B": Bm, "scale": s.astype(jnp.float32), "bias": b.astype(jnp.float32),
            "ksize": (kd, kh, kw), "stride": stride, "pad": pad, "cout": cout}


def init_params(key, in_channels, num_classes):
    keys = iter(jax.random.split(key, 512))

    def conv_bn(kshape, cin, cout, stride, pad):
        w = _init_conv(next(keys), kshape, cin, cout)
        bn = _init_bn(next(keys), cout)
        return _prep_conv_direct(w, bn, stride, pad)

    params = {}
    # conv1: kernel (7,7,7), stride (1,2,2), pad (3,3,3), bias=False
    w_stem = _init_conv(next(keys), (7, 7, 7), in_channels, 64)
    bn_stem = _init_bn(next(keys), 64)
    params["stem"] = _prep_conv_matmul(w_stem, bn_stem, (1, 2, 2), (3, 3, 3))

    in_planes = 64
    layers = []
    for li, (planes, nblocks) in enumerate(zip(PLANES, BLOCK_COUNTS)):
        layer_stride = 1 if li == 0 else 2
        blocks = []
        for bi in range(nblocks):
            s = layer_stride if bi == 0 else 1
            blk = {
                "c1": conv_bn((1, 1, 1), in_planes, planes, (1, 1, 1), (0, 0, 0)),
                "c2": conv_bn((3, 3, 3), planes, planes, (s, s, s), (1, 1, 1)),
                "c3": conv_bn((1, 1, 1), planes, planes * EXPANSION,
                              (1, 1, 1), (0, 0, 0)),
            }
            if s != 1 or in_planes != planes * EXPANSION:
                # shortcut_type='B' downsample, bias_downsample=False
                blk["down"] = conv_bn((1, 1, 1), in_planes, planes * EXPANSION,
                                      (s, s, s), (0, 0, 0))
            blocks.append(blk)
            in_planes = planes * EXPANSION
        layers.append(blocks)
    params["layers"] = layers

    # classifier: nn.Linear(2048, num_classes)
    kw_, kb_ = jax.random.split(next(keys))
    bound = 1.0 / (in_planes ** 0.5)
    fc_w = jax.random.uniform(kw_, (in_planes, num_classes), jnp.float32,
                              -bound, bound)
    fc_b = jax.random.uniform(kb_, (num_classes,), jnp.float32, -bound, bound)
    Kp, Np = _round_up(in_planes, 128), _round_up(num_classes, 128)
    params["fc"] = {
        "B": jnp.pad(fc_w, ((0, Kp - in_planes),
                            (0, Np - num_classes))).astype(jnp.bfloat16),
        "scale": jnp.ones((1, Np), jnp.float32),
        "bias": jnp.pad(fc_b, (0, Np - num_classes)).reshape(1, Np).astype(jnp.float32),
        "nout": num_classes,
    }
    return params


# ----------------------------------------------------------------------------
# Forward
# ----------------------------------------------------------------------------
def bottleneck(x, blk):
    out = conv3d_direct(x, blk["c1"], relu=True)
    out = conv3d_direct(out, blk["c2"], relu=True)
    if "down" in blk:
        identity = conv3d_direct(x, blk["down"], relu=False)
    else:
        identity = x
    # conv3 + BN + residual-add + ReLU fully fused in the epilogue
    return conv3d_direct(out, blk["c3"], residual=identity)


def resnet3d_classifier_forward(params, x_ncdhw):
    """x_ncdhw: (N, C, D, H, W) float32, matching the PyTorch layout."""
    x = jnp.transpose(x_ncdhw, (0, 2, 3, 4, 1)).astype(jnp.bfloat16)  # NDHWC bf16

    x = stem_conv(x, params["stem"])                # conv1 + bn1 + relu (im2col)
    x = maxpool3d(x)                                # fused 3x3x3/2 max pool

    for blocks in params["layers"]:
        for blk in blocks:
            x = bottleneck(x, blk)

    feat = global_avg_pool(x)                       # (N, 2048) f32

    fc = params["fc"]
    logits = _fused_matmul(feat, fc["B"], fc["scale"], fc["bias"],
                           relu=False, out_dtype=jnp.float32)
    return logits[:feat.shape[0], :fc["nout"]]


# ----------------------------------------------------------------------------
if __name__ == "__main__":
    batch, in_channels, spatial, num_classes = 2, 4, 16, 5

    root = jax.random.PRNGKey(0)
    k_params, k_x = jax.random.split(root)
    params = init_params(k_params, in_channels, num_classes)

    x = jax.random.normal(k_x, (batch, in_channels, spatial, spatial, spatial),
                          jnp.float32)

    logits = resnet3d_classifier_forward(params, x)
    logits = jax.block_until_ready(logits)

    assert logits.shape == (batch, num_classes), logits.shape
    assert bool(jnp.all(jnp.isfinite(logits)))
    print("KERNEL_OK")
</pallas_src>

<mosaic_0001>
module attributes {stable_mosaic.version = 11 : i64} {
  func.func @_mm_bn_kernel(%arg0: i32, %arg1: i32, %arg2: i32, %arg3: memref<1024x1408xbf16, #tpu.memory_space<vmem>>, %arg4: memref<1408x128xbf16, #tpu.memory_space<vmem>>, %arg5: memref<1x128xf32, #tpu.memory_space<vmem>>, %arg6: memref<1x128xf32, #tpu.memory_space<vmem>>, %arg7: memref<1024x128xbf16, #tpu.memory_space<vmem>>, %arg8: memref<1024x128xf32, #tpu.memory_space<vmem>>) attributes {dimension_semantics = [#tpu.dimension_semantics<parallel>, #tpu.dimension_semantics<parallel>, #tpu.dimension_semantics<arbitrary>], iteration_bounds = array<i64: 2, 1, 1>, scalar_prefetch = 0 : i64, scratch_operands = 1 : i64, tpu.core_type = #tpu.core_type<tc>, window_params = [{transform_indices = @transform_0, window_bounds = array<i64: 1024, 1408>}, {transform_indices = @transform_1, window_bounds = array<i64: 1408, 128>}, {transform_indices = @transform_2, window_bounds = array<i64: 1, 128>}, {transform_indices = @transform_3, window_bounds = array<i64: 1, 128>}, {transform_indices = @transform_4, window_bounds = array<i64: 1024, 128>}]} {
    %c0 = arith.constant 0 : index
    %c0_0 = arith.constant 0 : index
    %0 = vector.load %arg3[%c0, %c0_0] : memref<1024x1408xbf16, #tpu.memory_space<vmem>>, vector<1024x1408xbf16>
    %c0_1 = arith.constant 0 : index
    %c0_2 = arith.constant 0 : index
    %1 = vector.load %arg4[%c0_1, %c0_2] : memref<1408x128xbf16, #tpu.memory_space<vmem>>, vector<1408x128xbf16>
    %cst = arith.constant dense<0.000000e+00> : vector<1024x128xf32>
    %2 = tpu.matmul %0, %1, %cst {dimension_numbers = #tpu.dot_dimension_numbers<[1], [0], [0], [1], [0, 0, 1, 1], [], []>} : vector<1024x1408xbf16>, vector<1408x128xbf16>, vector<1024x128xf32> -> vector<1024x128xf32>
    %c0_i32 = arith.constant 0 : i32
    %3 = arith.cmpi eq, %arg2, %c0_i32 : i32
    %4 = arith.extui %3 : i1 to i32
    %c0_i32_3 = arith.constant 0 : i32
    %5 = arith.cmpi ne, %4, %c0_i32_3 : i32
    scf.if %5 {
      %c0_8 = arith.constant 0 : index
      %c0_9 = arith.constant 0 : index
      %12 = vector.load %arg8[%c0_8, %c0_9] : memref<1024x128xf32, #tpu.memory_space<vmem>>, vector<1024x128xf32>
      tpu.vector_store %arg8[%c0_8, %c0_9], %2 {strides = array<i32>} : memref<1024x128xf32, #tpu.memory_space<vmem>>, vector<1024x128xf32>,
    } else {
    }
    %c0_i32_4 = arith.constant 0 : i32
    %6 = arith.cmpi sgt, %arg2, %c0_i32_4 : i32
    %7 = arith.extui %6 : i1 to i32
    %c0_i32_5 = arith.constant 0 : i32
    %8 = arith.cmpi ne, %7, %c0_i32_5 : i32
    scf.if %8 {
      %c0_8 = arith.constant 0 : index
      %c0_9 = arith.constant 0 : index
      %12 = vector.load %arg8[%c0_8, %c0_9] : memref<1024x128xf32, #tpu.memory_space<vmem>>, vector<1024x128xf32>
      %13 = arith.addf %12, %2 : vector<1024x128xf32>
      %c0_10 = arith.constant 0 : index
      %c0_11 = arith.constant 0 : index
      %14 = vector.load %arg8[%c0_10, %c0_11] : memref<1024x128xf32, #tpu.memory_space<vmem>>, vector<1024x128xf32>
      tpu.vector_store %arg8[%c0_10, %c0_11], %13 {strides = array<i32>} : memref<1024x128xf32, #tpu.memory_space<vmem>>, vector<1024x128xf32>,
    } else {
    }
    %c0_i32_6 = arith.constant 0 : i32
    %9 = arith.cmpi eq, %arg2, %c0_i32_6 : i32
    %10 = arith.extui %9 : i1 to i32
    %c0_i32_7 = arith.constant 0 : i32
    %11 = arith.cmpi ne, %10, %c0_i32_7 : i32
    scf.if %11 {
      %c0_8 = arith.constant 0 : index
      %c0_9 = arith.constant 0 : index
      %12 = vector.load %arg8[%c0_8, %c0_9] : memref<1024x128xf32, #tpu.memory_space<vmem>>, vector<1024x128xf32>
      %c0_10 = arith.constant 0 : index
      %c0_11 = arith.constant 0 : index
      %13 = vector.load %arg5[%c0_10, %c0_11] : memref<1x128xf32, #tpu.memory_space<vmem>>, vector<1x128xf32>
      %14 = vector.broadcast %13 : vector<1x128xf32> to vector<1024x128xf32>
      %15 = arith.mulf %12, %14 : vector<1024x128xf32>
      %c0_12 = arith.constant 0 : index
      %c0_13 = arith.constant 0 : index
      %16 = vector.load %arg6[%c0_12, %c0_13] : memref<1x128xf32, #tpu.memory_space<vmem>>, vector<1x128xf32>
      %17 = vector.broadcast %16 : vector<1x128xf32> to vector<1024x128xf32>
      %18 = arith.addf %15, %17 : vector<1024x128xf32>
      %cst_14 = arith.constant 0.000000e+00 : f32
      %19 = vector.broadcast %cst_14 : f32 to vector<1024x128xf32>
      %20 = arith.maximumf %18, %19 : vector<1024x128xf32>
      %21 = arith.truncf %20 : vector<1024x128xf32> to vector<1024x128xbf16>
      %c0_15 = arith.constant 0 : index
      %c0_16 = arith.constant 0 : index
      %22 = vector.load %arg7[%c0_15, %c0_16] : memref<1024x128xbf16, #tpu.memory_space<vmem>>, vector<1024x128xbf16>
      tpu.vector_store %arg7[%c0_15, %c0_16], %21 {strides = array<i32>} : memref<1024x128xbf16, #tpu.memory_space<vmem>>, vector<1024x128xbf16>,
    } else {
    }
    return
  }
  func.func @transform_0(%arg0: i32, %arg1: i32, %arg2: i32) -> (i32, i32) {
    %c0_i32 = arith.constant 0 : i32
    return %arg0, %arg2 : i32, i32
  }
  func.func @transform_1(%arg0: i32, %arg1: i32, %arg2: i32) -> (i32, i32) {
    %c0_i32 = arith.constant 0 : i32
    return %arg2, %arg1 : i32, i32
  }
  func.func @transform_2(%arg0: i32, %arg1: i32, %arg2: i32) -> (i32, i32) {
    %c0_i32 = arith.constant 0 : i32
    %c0_i32_0 = arith.constant 0 : i32
    return %c0_i32, %arg1 : i32, i32
  }
  func.func @transform_3(%arg0: i32, %arg1: i32, %arg2: i32) -> (i32, i32) {
    %c0_i32 = arith.constant 0 : i32
    %c0_i32_0 = arith.constant 0 : i32
    return %c0_i32, %arg1 : i32, i32
  }
  func.func @transform_4(%arg0: i32, %arg1: i32, %arg2: i32) -> (i32, i32) {
    %c0_i32 = arith.constant 0 : i32
    return %arg0, %arg1 : i32, i32
  }
}

</mosaic_0001>

<bundles_post_ra>
// kernel: tpu_custom_call.1
= control target key start
LH: loop header
LB: loop body
LE: loop exit
PB: predicated region body
PF: predicated region fallthrough
CT: control target
= control target key end

     0   :  { %s18107_s0 = inlined_call_operand.hbm [shape: bf16[2048,1408], index: 0, kind: input, shape index: {}]   ;;  %s18108_s1 = inlined_call_operand.hbm [shape: bf16[1408,128], index: 1, kind: input, shape index: {}]   ;;  %s18109_s2 = inlined_call_operand.hbm [shape: f32[1,128], index: 2, kind: input, shape index: {}]   ;;  %s18110_s3 = inlined_call_operand.hbm [shape: f32[1,128], index: 3, kind: input, shape index: {}]   ;;  %s18111_s4 = inlined_call_operand.hbm [shape: bf16[2048,128], index: 4, kind: output, shape index: {}]  }
   0x1   :  { %18112 = sst [smem:[#allocation115_spill]] %s18108_s1 }
   0x2   :  { %9 = vsyncpa [#allocation4], 0 }
   0x3   :  { %11 = vsyncpa [#allocation4 + $0x1], 0 }
   0x4   :  { %12 = vsyncpa [#allocation7], 0 }
   0x5   :  { %13 = vsyncpa [#allocation10], 0 }
   0x6   :  { %14 = vsyncpa [#allocation5], 0 }
   0x7   :  { %16 = vsyncpa [#allocation5 + $0x1], 0  ;;  %s15178_s15 = smov 0   ;;  %s15180_s16 = smov 0  }
   0x8   :  { %s15182_s17 = smov 0   ;;  %s15184_s18 = smov 0  }
   0x9   :  { %s15186_s19 = smov 0   ;;  %s15188_s20 = smov 0  }
   0xa LB: > { %s10432_s21 = sadd.s32 4294967295, %s15142_s20   ;;  %s10433_s22 = sadd.s32 4294967294, %s15142_s20   ;;  %s15142_s20 = sphi %s15188_s20, %s22_s20   ;;  %s15138_s19 = sphi %s15186_s19, %s18533_s19   ;;  %s15134_s18 = sphi %s15184_s18, %s18532_s18   ;;  %s15130_s17 = sphi %s15182_s17, %s18531_s17   ;;  %s15126_s16 = sphi %s15180_s16, %s18530_s16   ;;  %s15122_s15 = sphi %s15178_s15, %s18529_s15  }
   0xb   : > { %p63_p0 = scmp.ne.s32.totalorder %s15126_s16, %s15122_s15  ;;  %p15212_p1 = scmp.eq.s32.totalorder %s10432_s21, 0 }
   0xc   : > { %p15216_p2 = scmp.eq.s32.totalorder %s10432_s21, 1  ;;  %p175_p3 = scmp.eq.s32.totalorder %s10433_s22, 1 }
   0xd   : > { %p15222_p4 = por %p15212_p1, %p63_p0  ;;  %p10434_p5 = scmp.ge.s32.totalorder %s15142_s20, 1 }
   0xe   : > { %p15227_p6 = por %p175_p3, %p63_p0  ;;  %p182_p7 = scmp.lt.s32.totalorder %s15142_s20, 3 }
   0xf   : > { %s18117_s1 = sld [smem:[#allocation115_spill]]  ;;  %s15144_s5 = smov [#allocation6]  }
  0x10   : > { %p15235_p8 = pnand %p10434_p5, %p182_p7  ;;  %s199_s6 = sshll.u32 %s15144_s5, 4  ;;  %s200_s6 = int_to_ptr.vmem [resolvable:$true] %s199_s6 }
  0x11   : > { %p10438_p11 = scmp.ge.s32.totalorder %s15142_s20, 2  ;;  %s213_s10 = sshll.u32 %s18109_s2, 4  ;;  %s214_s10 = int_to_ptr.hbm [resolvable:$true] %s213_s10 }
  0x12   : > { %p14839_p9 = pneg %p15235_p8  ;;  %s15145_s11 = smov 64  }
  0x13   : > { %s15146_s12 = smov 4   ;;  %s15147_s13 = smov [#allocation8]  }
  0x14   : > { %p15243_p10 = pnand %p14839_p9, %p15212_p1  ;;  %s215_s14 = sshll.u32 %s15147_s13, 4  ;;  %s216_s14 = int_to_ptr.vmem [resolvable:$true] %s215_s14 }
  0x15   : > { %s197_s29 = sshll.u32 %s18117_s1, 4  ;;  %s226_s27 = sshll.u32 %s18110_s3, 4  ;;  %s198_s29 = int_to_ptr.hbm [resolvable:$true] %s197_s29  ;;  %s227_s27 = int_to_ptr.hbm [resolvable:$true] %s226_s27 }
  0x16   : > { %14842 = dma.hbm_to_vmem [thread:$0]  (!%p15243_p10), %s198_s29, 11264, %s200_s6, [#allocation7], %s15145_s11, %s15145_s11, %s15146_s12  }
  0x17   : > { %14845 = dma.hbm_to_vmem [thread:$0]  (!%p15243_p10), %s214_s10, 16, %s216_s14, [#allocation7]  }
  0x18   : > { %s15148_s28 = smov [#allocation9]   ;;  %s41_s29 = sadd.s32 1, %s15138_s19 }
  0x19   : > { %s228_s5 = sshll.u32 %s15148_s28, 4  ;;  %p43_p12 = scmp.ge.s32.totalorder %s41_s29, 2  ;;  %s229_s5 = int_to_ptr.vmem [resolvable:$true] %s228_s5 }
  0x1a   : > { %14848 = dma.hbm_to_vmem [thread:$0]  (!%p15243_p10), %s227_s27, 16, %s229_s5, [#allocation10]  }
  0x1b   : > { %s50_s6 = sadd.s32 1, %s15130_s17  ;;  %p57_p13 = scmp.ne.s32.totalorder %s15130_s17, %s15126_s16 }
  0x1c   : > { %p58_p0 = scmp.eq.s32.totalorder %s15142_s20, 0  ;;  %s18535_s29 = smov (%p43_p12, %s41_s29), 0 }
  0x1d   : > { %p15269_p5 = por %p15216_p2, %p57_p13  ;;  %s45_s9 = ssub.s32 %s15138_s19, %s18535_s29 }
  0x1e   : > { %p59_p3 = por %p58_p0, %p57_p13  ;;  %p14860_p7 = scmp.lt.s32.totalorder %s15142_s20, 2 }
  0x1f   : > { %p48_p9 = scmp.eq.s32.totalorder %s45_s9, 0  ;;  %s239_s7 = sand.u32 1, %s15130_s17  }
  0x20   : > { %s14820_s10 = smul.u32 5632, %s239_s7  ;;  %p14850_p10 = pnand %p14860_p7, %p59_p3 }
  0x21   : > { %s15278_s11 = scalar_select %p48_p9, %s15130_s17, %s50_s6  }
  0x22   : > { %s14821_s12 = smul.u32 5632, %s15138_s19  ;;  %s243_s13 = scalar_lea.vmem [#allocation3], %s14820_s10 }
  0x23   : > { %s254_s14 = sshll.u32 %s243_s13, 4  ;;  %s240_s28 = scalar_lea.sflag [#allocation4], %s239_s7  ;;  %s255_s14 = int_to_ptr.vmem [resolvable:$true] %s254_s14 }
  0x24   : > { %s251_s27 = scalar_lea.hbm %s18107_s0, %s14821_s12  ;;  %s15149_s5 = smov 704  }
  0x25   : > { %s252_s24 = sshll.u32 %s251_s27, 4  ;;  %s15150_s1 = smov 44   ;;  %s253_s24 = int_to_ptr.hbm [resolvable:$true] %s252_s24 }
  0x26   : > { %14852 = dma.hbm_to_vmem [thread:$0]  (!%p14850_p10), %s253_s24, 90112, %s255_s14, %s240_s28, %s15149_s5, %s15149_s5, %s15150_s1  }
  0x27   : > { %266 = sbr.rel (%p15235_p8) target bundleno = 3045 (0xbe5), region = 36 }
  0x2c   : > { %s15287_s6 = sand.u32 1, %s15126_s16  }
  0x2d   : > { %s14822_s9 = smul.u32 5632, %s15287_s6  ;;  %s269_s10 = scalar_lea.sflag [#allocation4], %s15287_s6 }
  0x2f   : > { %s15291_s13 = scalar_lea.vmem [#allocation3], %s14822_s9 }
  0x30   : > { %15105 = dma.done.wait (%p15222_p4), %s269_s10, 90112  }
  0x31   : > { %15107 = vsyncadd (%p15222_p4), %s269_s10, 4294877184 }
  0x32   : > { %15109 = dma.done.wait (%p15212_p1), [#allocation7], 11280  }
  0x33   : > { %15111 = vsyncadd (%p15212_p1), [#allocation7], 4294956016 }
  0x34   : > { %15113 = dma.done.wait (%p15212_p1), [#allocation10], 16  }
  0x35   : > { %15115 = vsyncadd (%p15212_p1), [#allocation10], 4294967280  ;;  %v14331_v0 = vld [vmem:[#allocation6 + $0x38] sm:$0xff]  ;;  %v14330_v3 = vld [vmem:[#allocation6 + $0x30] sm:$0xff]  ;;  %s10446_s1 = sshll.u32 %s15287_s6, 9  ;;  %s14412_s25 = sshll.u32 %s15134_s18, 9 }
  0x36   : > { %v15305_v1 = vld [vmem:[#allocation6 + $0x78] sm:$0xff]  ;;  %5373 = vmatpush.bf16.msra.mxu0 %v14331_v0  ;;  %14796 = vmatpush.bf16.msra.mxu3 %v14331_v0  ;;  %v15311_v4 = vld [vmem:[#allocation6 + $0x70] sm:$0xff]  ;;  %v14329_v6 = vld [vmem:[#allocation6 + $0x28] sm:$0xff]  ;;  %s17185_s23 = scalar_lea.vmem [#allocation11], %s10446_s1  ;;  %s10304_s12 = scalar_lea.hbm %s18111_s4, %s14412_s25 }
  0x37   : > { %v15307_v2 = vld [vmem:[#allocation6 + $0xb8] sm:$0xff]  ;;  %5702 = vmatpush.bf16.msra.mxu1 %v15305_v1  ;;  %v15313_v5 = vld [vmem:[#allocation6 + $0xb0] sm:$0xff]  ;;  %v15317_v7 = vld [vmem:[#allocation6 + $0x68] sm:$0xff]  ;;  %s10305_s14 = sshll.u32 %s17185_s23, 4  ;;  %s10307_s21 = sshll.u32 %s10304_s12, 4  ;;  %s10306_s14 = int_to_ptr.vmem [resolvable:$true] %s10305_s14  ;;  %s10308_s21 = int_to_ptr.hbm [resolvable:$true] %s10307_s21 }
  0x38   : > { %6031 = vmatpush.bf16.msra.mxu2 %v15307_v2  ;;  %v15319_v8 = vld [vmem:[#allocation6 + $0xa8] sm:$0xff]  ;;  %v14328_v9 = vld [vmem:[#allocation6 + $0x20] sm:$0xff]  ;;  %v14327_v12 = vld [vmem:[#allocation6 + $0x18] sm:$0xff]  ;;  %s10292_s18 = scalar_lea.sflag [#allocation5], %s15287_s6  ;;  %s15066_s22 = sshra.s32 %s10308_s21, 4  ;;  %s15067_s22 = int_to_ptr.hbm [resolvable:$true] %s15066_s22 }
  0x39   : > { %v15323_v10 = vld [vmem:[#allocation6 + $0x60] sm:$0xff]  ;;  %v15329_v13 = vld [vmem:[#allocation6 + $0x58] sm:$0xff]  ;;  %v14326_v15 = vld [vmem:[#allocation6 + $0x10] sm:$0xff]  ;;  %s15068_s27 = scalar_lea.hbm %s15067_s22, 512  ;;  %s15072_s5 = scalar_lea.hbm %s18111_s4, 1024 }
  0x3a   : > { %5374 = vmatpush.bf16.msra.mxu0 %v14330_v3  ;;  %14797 = vmatpush.bf16.msra.mxu3 %v14330_v3  ;;  %v15325_v11 = vld [vmem:[#allocation6 + $0xa0] sm:$0xff]  ;;  %v15331_v14 = vld [vmem:[#allocation6 + $0x98] sm:$0xff]  ;;  %v14334_v16 = vld [vmem:[#allocation6 + $0x50] sm:$0xff]  ;;  %p15069_p1 = scmp.ne.s32.totalorder %s15067_s22, %s15068_s27  ;;  %p15073_p8 = scmp.lt.s32.totalorder %s15067_s22, %s18111_s4 }
  0x3b   : > { %5703 = vmatpush.bf16.msra.mxu1 %v15311_v4  ;;  %v15335_v17 = vld [vmem:[#allocation6 + $0x90] sm:$0xff]  ;;  %v14325_v18 = vld [vmem:[#allocation6 + $0x8] sm:$0xff]  ;;  %v14324_v21 = vld [vmem:[#allocation6] sm:$0xff]  ;;  %p15074_p12 = scmp.lt.s32.totalorder %s15072_s5, %s15068_s27 }
  0x3c   : > { %6032 = vmatpush.bf16.msra.mxu2 %v15313_v5  ;;  %v14333_v19 = vld [vmem:[#allocation6 + $0x48] sm:$0xff]  ;;  %v14332_v22 = vld [vmem:[#allocation6 + $0x40] sm:$0xff]  ;;  %v10451_v29 = vld [vmem:[%s15291_s13 + $0x2c] sm:$0xf0]  ;;  %p15070_p2 = pnand %p15069_p1, %p15269_p5 }
  0x3d   : > { %v15338_v20 = vld [vmem:[#allocation6 + $0x88] sm:$0xff]  ;;  %v15340_v23 = vld [vmem:[#allocation6 + $0x80] sm:$0xff]  ;;  %v13626_v31 = vld [vmem:[%s15291_s13 + $0x30] sm:$0xf0]  ;;  %p15075_p13 = por %p15074_p12, %p15073_p8 }
  0x3e   : > { %5375 = vmatpush.bf16.msra.mxu0 %v14329_v6  ;;  %14798 = vmatpush.bf16.msra.mxu3 %v14329_v6  ;;  %v10449_v24 = vld [vmem:[%s15291_s13] sm:$0xf]  ;;  %v13625_v25 = vld [vmem:[%s15291_s13 + $0x28] sm:$0xf0]  ;;  %v13620_v28 = vld [vmem:[%s15291_s13 + $0x4] sm:$0xf]  ;;  %p15071_p4 = pneg %p15070_p2 }
  0x3f   : > { %5704 = vmatpush.bf16.msra.mxu1 %v15317_v7  ;;  %v12561_v26 = vld [vmem:[%s15291_s13 + $0x1080] sm:$0xf]  ;;  %v14153_v27 = vld [vmem:[%s15291_s13 + $0x10a8] sm:$0xf0]  ;;  %v10457_v30 = vld [vmem:[%s15291_s13 + $0x8] sm:$0xf]  ;;  %v10450_v33 = vor.u32 %v13625_v25, %v10449_v24  ;;  %v10454_v35 = vor.u32 %v13620_v28, %v10451_v29 }
  0x40   : > { %6033 = vmatpush.bf16.msra.mxu2 %v15319_v8  ;;  %v14379_v32 = vld [vmem:[#allocation6 + $0x1b8] sm:$0xff]  ;;  %v12562_v34 = vor.u32 %v14153_v27, %v12561_v26  ;;  %v10458_v36 = vor.u32 %v13626_v31, %v10457_v30  ;;  %v13636_v40 = vld [vmem:[%s15291_s13 + $0x80] sm:$0xf0]  ;;  %v10495_v44 = vld [vmem:[%s15291_s13 + $0x84] sm:$0xf0]  ;;  %p15076_p0 = pnand %p15075_p13, %p15071_p4 }
  0x41   : > { %v14363_v37 = vld [vmem:[#allocation6 + $0x138] sm:$0xff]  ;;  %v14164_v42 = vld [vmem:[%s15291_s13 + $0x1100] sm:$0xf0]  ;;  %v10501_v45 = vld [vmem:[%s15291_s13 + $0x60] sm:$0xf] }
  0x42   : > { %5376 = vmatpush.bf16.msra.mxu0 %v14328_v9  ;;  %14799 = vmatpush.bf16.msra.mxu3 %v14328_v9  ;;  %v14371_v38 = vld [vmem:[#allocation6 + $0x178] sm:$0xff]  ;;  %v13637_v46 = vld [vmem:[%s15291_s13 + $0x88] sm:$0xf0]  ;;  %v10537_v51 = vld [vmem:[%s15291_s13 + $0xb0] sm:$0xf] }
  0x43   : > { %5705 = vmatpush.bf16.msra.mxu1 %v15323_v10  ;;  %v10493_v39 = vld [vmem:[%s15291_s13 + $0x58] sm:$0xf]  ;;  %v13631_v43 = vld [vmem:[%s15291_s13 + $0x5c] sm:$0xf]  ;;  %v10502_v50 = vor.u32 %v13637_v46, %v10501_v45  ;;  %v12649_v53 = vld [vmem:[%s15291_s13 + $0x1130] sm:$0xf] }
  0x44   : > { %6034 = vmatpush.bf16.msra.mxu2 %v15325_v11  ;;  %v12605_v41 = vld [vmem:[%s15291_s13 + $0x10d8] sm:$0xf]  ;;  %v10494_v47 = vor.u32 %v13636_v40, %v10493_v39  ;;  %v10498_v49 = vor.u32 %v13631_v43, %v10495_v44  ;;  %v13647_v52 = vld [vmem:[%s15291_s13 + $0xd8] sm:$0xf0]  ;;  %v13642_v55 = vld [vmem:[%s15291_s13 + $0xb4] sm:$0xf] }
  0x45   : > { %v12606_v48 = vor.u32 %v14164_v42, %v12605_v41  ;;  %v14175_v54 = vld [vmem:[%s15291_s13 + $0x1158] sm:$0xf0]  ;;  %v10539_v56 = vld [vmem:[%s15291_s13 + $0xdc] sm:$0xf0]  ;;  %v10545_v57 = vld [vmem:[%s15291_s13 + $0xb8] sm:$0xf]  ;;  %v10538_v59 = vor.u32 %v13647_v52, %v10537_v51 }
  0x46   : > { %5377 = vmatpush.bf16.msra.mxu0 %v14327_v12  ;;  %14800 = vmatpush.bf16.msra.mxu3 %v14327_v12  ;;  %v13648_v58 = vld [vmem:[%s15291_s13 + $0xe0] sm:$0xf0]  ;;  %v12650_v60 = vor.u32 %v14175_v54, %v12649_v53  ;;  %v10542_v61 = vor.u32 %v13642_v55, %v10539_v56  ;;  %v10581_v63 = vld [vmem:[%s15291_s13 + $0x108] sm:$0xf]  ;;  %v13658_v0 = vld [vmem:[%s15291_s13 + $0x130] sm:$0xf0] }
  0x47   : > { %5706 = vmatpush.bf16.msra.mxu1 %v15329_v13  ;;  %v10546_v62 = vor.u32 %v13648_v58, %v10545_v57  ;;  %v14186_v3 = vld [vmem:[%s15291_s13 + $0x11b0] sm:$0xf0]  ;;  %v10583_v6 = vld [vmem:[%s15291_s13 + $0x134] sm:$0xf0]  ;;  %v10582_v9 = vor.u32 %v13658_v0, %v10581_v63  ;;  %v10625_v12 = vld [vmem:[%s15291_s13 + $0x160] sm:$0xf] }
  0x48   : > { %6035 = vmatpush.bf16.msra.mxu2 %v15331_v14  ;;  %v14362_v25 = vld [vmem:[#allocation6 + $0x130] sm:$0xff]  ;;  %v13680_v27 = vld [vmem:[%s15291_s13 + $0x1e0] sm:$0xf0]  ;;  %v12781_v28 = vld [vmem:[%s15291_s13 + $0x1238] sm:$0xf] }
  0x49   : > { %v14370_v26 = vld [vmem:[#allocation6 + $0x170] sm:$0xff]  ;;  %v14208_v29 = vld [vmem:[%s15291_s13 + $0x1260] sm:$0xf0]  ;;  %v13675_v30 = vld [vmem:[%s15291_s13 + $0x1bc] sm:$0xf] }
  0x4a   : > { %5378 = vmatpush.bf16.msra.mxu0 %v14326_v15  ;;  %14801 = vmatpush.bf16.msra.mxu3 %v14326_v15  ;;  %v14197_v15 = vld [vmem:[%s15291_s13 + $0x1208] sm:$0xf0]  ;;  %v10671_v31 = vld [vmem:[%s15291_s13 + $0x1e4] sm:$0xf0]  ;;  %v13691_v39 = vld [vmem:[%s15291_s13 + $0x238] sm:$0xf0] }
  0x4b   : > { %5707 = vmatpush.bf16.msra.mxu1 %v14334_v16  ;;  %v12825_v40 = vld [vmem:[%s15291_s13 + $0x1290] sm:$0xf]  ;;  %v14219_v41 = vld [vmem:[%s15291_s13 + $0x12b8] sm:$0xf0]  ;;  %v13686_v42 = vld [vmem:[%s15291_s13 + $0x214] sm:$0xf] }
  0x4c   : > { %6036 = vmatpush.bf16.msra.mxu2 %v15335_v17  ;;  %v10715_v43 = vld [vmem:[%s15291_s13 + $0x23c] sm:$0xf0]  ;;  %v10721_v44 = vld [vmem:[%s15291_s13 + $0x218] sm:$0xf]  ;;  %v13692_v45 = vld [vmem:[%s15291_s13 + $0x240] sm:$0xf0] }
  0x4d   : > { %v13702_v51 = vld [vmem:[%s15291_s13 + $0x290] sm:$0xf0]  ;;  %v12869_v52 = vld [vmem:[%s15291_s13 + $0x12e8] sm:$0xf]  ;;  %v13697_v54 = vld [vmem:[%s15291_s13 + $0x26c] sm:$0xf] }
  0x4e   : > { %5379 = vmatpush.bf16.msra.mxu0 %v14325_v18  ;;  %14802 = vmatpush.bf16.msra.mxu3 %v14325_v18  ;;  %v10627_v18 = vld [vmem:[%s15291_s13 + $0x18c] sm:$0xf0]  ;;  %v14230_v53 = vld [vmem:[%s15291_s13 + $0x1310] sm:$0xf0]  ;;  %v10759_v55 = vld [vmem:[%s15291_s13 + $0x294] sm:$0xf0] }
  0x4f   : > { %5708 = vmatpush.bf16.msra.mxu1 %v14333_v19  ;;  %v10765_v56 = vld [vmem:[%s15291_s13 + $0x270] sm:$0xf]  ;;  %v13703_v57 = vld [vmem:[%s15291_s13 + $0x298] sm:$0xf0]  ;;  %v13713_v63 = vld [vmem:[%s15291_s13 + $0x2e8] sm:$0xf0] }
  0x50   : > { %6037 = vmatpush.bf16.msra.mxu2 %v15338_v20  ;;  %v12913_v0 = vld [vmem:[%s15291_s13 + $0x1340] sm:$0xf] }
  0x52   : > { %5380 = vmatpush.bf16.msra.mxu0 %v14324_v21  ;;  %14803 = vmatpush.bf16.msra.mxu3 %v14324_v21  ;;  %v13670_v21 = vld [vmem:[%s15291_s13 + $0x190] sm:$0xf0] }
  0x53   : > { %5709 = vmatpush.bf16.msra.mxu1 %v14332_v22 }
  0x54   : > { %6038 = vmatpush.bf16.msra.mxu2 %v15340_v23 }
  0x55   : > { %5381 = vmatmul.bf16.vlgmr.msra.gmra.mxu0 %v10450_v33  ;;  %5621 = vmatmul.bf16.vlgmr.msra.gmra.mxu3 %v12562_v34  ;;  %v13681_v33 = vld [vmem:[%s15291_s13 + $0x1e8] sm:$0xf0] }
  0x56   : > { %14804 = vmatpush.bf16.msrb.mxu3 %v15305_v1  ;;  %5710 = vmatmul.bf16.vlgmr.msra.gmra.mxu1 %v10454_v35  ;;  %v12693_v1 = vld [vmem:[%s15291_s13 + $0x1188] sm:$0xf]  ;;  %v12782_v35 = vor.u32 %v14208_v29, %v12781_v28 }
  0x57   : > { %6039 = vmatmul.bf16.vlgmr.msra.gmra.mxu2 %v10458_v36  ;;  %6689 = vmatpush.bf16.msrb.mxu0 %v14363_v37  ;;  %v10674_v36 = vor.u32 %v13675_v30, %v10671_v31 }
  0x58   : > { %7347 = vmatpush.bf16.msrb.mxu2 %v14379_v32  ;;  %7018 = vmatpush.bf16.msrb.mxu1 %v14371_v38  ;;  %v10677_v32 = vld [vmem:[%s15291_s13 + $0x1c0] sm:$0xf]  ;;  %v10713_v38 = vld [vmem:[%s15291_s13 + $0x210] sm:$0xf] }
  0x59   : > { %v10678_v37 = vor.u32 %v13681_v33, %v10677_v32  ;;  %v10714_v46 = vor.u32 %v13691_v39, %v10713_v38 }
  0x5a   : > { %14805 = vmatpush.bf16.msrb.mxu3 %v15311_v4  ;;  %v13653_v4 = vld [vmem:[%s15291_s13 + $0x10c] sm:$0xf] }
  0x5b   : > { %6690 = vmatpush.bf16.msrb.mxu0 %v14362_v25  ;;  %v10847_v25 = vld [vmem:[%s15291_s13 + $0x344] sm:$0xf0] }
  0x5c   : > { %7019 = vmatpush.bf16.msrb.mxu1 %v14370_v26  ;;  %v10853_v26 = vld [vmem:[%s15291_s13 + $0x320] sm:$0xf] }
  0x5e   : > { %14806 = vmatpush.bf16.msrb.mxu3 %v15317_v7  ;;  %v13659_v7 = vld [vmem:[%s15291_s13 + $0x138] sm:$0xf0] }
  0x62   : > { %14807 = vmatpush.bf16.msrb.mxu3 %v15323_v10 }
  0x65   : > { %5386 = vmatmul.bf16.gmra.mxu0 %v10494_v47  ;;  %5626 = vmatmul.bf16.gmra.mxu3 %v12606_v48  ;;  %v12826_v47 = vor.u32 %v14219_v41, %v12825_v40  ;;  %v10718_v48 = vor.u32 %v13686_v42, %v10715_v43  ;;  %v10889_v43 = vld [vmem:[%s15291_s13 + $0x370] sm:$0xf] }
  0x66   : > { %14808 = vmatpush.bf16.msrb.mxu3 %v15329_v13  ;;  %5715 = vmatmul.bf16.gmra.mxu1 %v10498_v49  ;;  %v12737_v13 = vld [vmem:[%s15291_s13 + $0x11e0] sm:$0xf]  ;;  %v10722_v49 = vor.u32 %v13692_v45, %v10721_v44  ;;  %v13735_v44 = vld [vmem:[%s15291_s13 + $0x398] sm:$0xf0]  ;;  %v13001_v45 = vld [vmem:[%s15291_s13 + $0x13f0] sm:$0xf] }
  0x67   : > { %6044 = vmatmul.bf16.gmra.mxu2 %v10502_v50  ;;  %v10757_v50 = vld [vmem:[%s15291_s13 + $0x268] sm:$0xf] }
  0x68   : > { %v10758_v58 = vor.u32 %v13702_v51, %v10757_v50  ;;  %v13736_v50 = vld [vmem:[%s15291_s13 + $0x3a0] sm:$0xf0] }
  0x6a   : > { %14809 = vmatpush.bf16.msrb.mxu3 %v14334_v16  ;;  %v13664_v16 = vld [vmem:[%s15291_s13 + $0x164] sm:$0xf] }
  0x6b   : > { %v10630_v24 = vor.u32 %v13664_v16, %v10627_v18 }
  0x6e   : > { %14810 = vmatpush.bf16.msrb.mxu3 %v14333_v19  ;;  %v10633_v19 = vld [vmem:[%s15291_s13 + $0x168] sm:$0xf] }
  0x72   : > { %14811 = vmatpush.bf16.msrb.mxu3 %v14332_v22  ;;  %v12738_v22 = vor.u32 %v14197_v15, %v12737_v13 }
  0x75   : > { %5391 = vmatmul.bf16.gmra.mxu0 %v10538_v59  ;;  %5631 = vmatmul.bf16.gmra.mxu3 %v12650_v60  ;;  %v12870_v59 = vor.u32 %v14230_v53, %v12869_v52  ;;  %v10762_v60 = vor.u32 %v13697_v54, %v10759_v55  ;;  %v10890_v53 = vor.u32 %v13735_v44, %v10889_v43  ;;  %v13758_v43 = vld [vmem:[%s15291_s13 + $0x450] sm:$0xf0] }
  0x76   : > { %14812 = vmatpush.bf16.msra.mxu3 %v15307_v2  ;;  %5720 = vmatmul.bf16.gmra.mxu1 %v10542_v61  ;;  %v10589_v2 = vld [vmem:[%s15291_s13 + $0x110] sm:$0xf]  ;;  %v10766_v61 = vor.u32 %v13703_v57, %v10765_v56 }
  0x77   : > { %6049 = vmatmul.bf16.gmra.mxu2 %v10546_v62  ;;  %v10590_v10 = vor.u32 %v13659_v7, %v10589_v2  ;;  %v10801_v62 = vld [vmem:[%s15291_s13 + $0x2c0] sm:$0xf]  ;;  %v13714_v2 = vld [vmem:[%s15291_s13 + $0x2f0] sm:$0xf0] }
  0x78   : > { %v10802_v7 = vor.u32 %v13713_v63, %v10801_v62 }
  0x7a   : > { %14813 = vmatpush.bf16.msra.mxu3 %v15313_v5  ;;  %v12694_v5 = vor.u32 %v14186_v3, %v12693_v1  ;;  %v14241_v1 = vld [vmem:[%s15291_s13 + $0x1368] sm:$0xf0]  ;;  %v13708_v3 = vld [vmem:[%s15291_s13 + $0x2c4] sm:$0xf] }
  0x7e   : > { %14814 = vmatpush.bf16.msra.mxu3 %v15319_v8  ;;  %v10586_v8 = vor.u32 %v13653_v4, %v10583_v6  ;;  %v10803_v4 = vld [vmem:[%s15291_s13 + $0x2ec] sm:$0xf0]  ;;  %v10809_v6 = vld [vmem:[%s15291_s13 + $0x2c8] sm:$0xf] }
  0x82   : > { %14815 = vmatpush.bf16.msra.mxu3 %v15325_v11  ;;  %v13669_v11 = vld [vmem:[%s15291_s13 + $0x188] sm:$0xf0] }
  0x85   : > { %5396 = vmatmul.bf16.gmra.mxu0 %v10582_v9  ;;  %5636 = vmatmul.bf16.gmra.mxu3 %v12694_v5  ;;  %v12914_v9 = vor.u32 %v14241_v1, %v12913_v0 }
  0x86   : > { %14816 = vmatpush.bf16.msra.mxu3 %v15331_v14  ;;  %5725 = vmatmul.bf16.gmra.mxu1 %v10586_v8  ;;  %v10626_v14 = vor.u32 %v13669_v11, %v10625_v12  ;;  %v10806_v8 = vor.u32 %v13708_v3, %v10803_v4  ;;  %v14377_v4 = vld [vmem:[#allocation6 + $0x1a8] sm:$0xff] }
  0x87   : > { %6054 = vmatmul.bf16.gmra.mxu2 %v10590_v10  ;;  %v10810_v10 = vor.u32 %v13714_v2, %v10809_v6  ;;  %v14361_v6 = vld [vmem:[#allocation6 + $0x128] sm:$0xff] }
  0x88   : > { %v14369_v2 = vld [vmem:[#allocation6 + $0x168] sm:$0xff]  ;;  %6691 = vmatpush.bf16.msrb.mxu0 %v14361_v6  ;;  %v13763_v6 = vld [vmem:[%s15291_s13 + $0x47c] sm:$0xf] }
  0x89   : > { %7020 = vmatpush.bf16.msrb.mxu1 %v14369_v2  ;;  %v11023_v2 = vld [vmem:[%s15291_s13 + $0x4a4] sm:$0xf0] }
  0x8a   : > { %14817 = vmatpush.bf16.msra.mxu3 %v15335_v17  ;;  %v10634_v17 = vor.u32 %v13670_v21, %v10633_v19 }
  0x8e   : > { %14818 = vmatpush.bf16.msra.mxu3 %v15338_v20  ;;  %v14378_v20 = vld [vmem:[#allocation6 + $0x1b0] sm:$0xff] }
  0x8f   : > { %7348 = vmatpush.bf16.msrb.mxu2 %v14378_v20  ;;  %v13719_v20 = vld [vmem:[%s15291_s13 + $0x31c] sm:$0xf] }
  0x90   : > { %v10850_v33 = vor.u32 %v13719_v20, %v10847_v25 }
  0x92   : > { %14819 = vmatpush.bf16.msra.mxu3 %v15340_v23  ;;  %v10669_v23 = vld [vmem:[%s15291_s13 + $0x1b8] sm:$0xf] }
  0x93   : > { %v10670_v34 = vor.u32 %v13680_v27, %v10669_v23  ;;  %v13725_v23 = vld [vmem:[%s15291_s13 + $0x348] sm:$0xf0]  ;;  %7349 = vmatpush.bf16.msrb.mxu2 %v14377_v4  ;;  %v14296_v4 = vld [vmem:[%s15291_s13 + $0x1520] sm:$0xf0] }
  0x95   : > { %5401 = vmatmul.bf16.gmra.mxu0 %v10626_v14  ;;  %5641 = vmatmul.bf16.gmra.mxu3 %v12738_v22  ;;  %v10845_v14 = vld [vmem:[%s15291_s13 + $0x318] sm:$0xf]  ;;  %v13724_v22 = vld [vmem:[%s15291_s13 + $0x340] sm:$0xf0] }
  0x96   : > { %5730 = vmatmul.bf16.gmra.mxu1 %v10630_v24  ;;  %v12957_v24 = vld [vmem:[%s15291_s13 + $0x1398] sm:$0xf]  ;;  %v10846_v29 = vor.u32 %v13724_v22, %v10845_v14 }
  0x97   : > { %6059 = vmatmul.bf16.gmra.mxu2 %v10634_v17  ;;  %v14252_v17 = vld [vmem:[%s15291_s13 + $0x13c0] sm:$0xf0] }
  0x98   : > { %v12958_v30 = vor.u32 %v14252_v17, %v12957_v24 }
  0xa5   : > { %5406 = vmatmul.bf16.gmra.mxu0 %v10670_v34  ;;  %5646 = vmatmul.bf16.gmra.mxu3 %v12782_v35  ;;  %v10854_v34 = vor.u32 %v13725_v23, %v10853_v26 }
  0xa6   : > { %5735 = vmatmul.bf16.gmra.mxu1 %v10674_v36 }
  0xa7   : > { %6064 = vmatmul.bf16.gmra.mxu2 %v10678_v37 }
  0xb5   : > { %5411 = vmatmul.bf16.gmra.mxu0 %v10714_v46  ;;  %5651 = vmatmul.bf16.gmra.mxu3 %v12826_v47  ;;  %v14263_v46 = vld [vmem:[%s15291_s13 + $0x1418] sm:$0xf0]  ;;  %v13730_v47 = vld [vmem:[%s15291_s13 + $0x374] sm:$0xf] }
  0xb6   : > { %5740 = vmatmul.bf16.gmra.mxu1 %v10718_v48  ;;  %v10891_v48 = vld [vmem:[%s15291_s13 + $0x39c] sm:$0xf0]  ;;  %v13002_v54 = vor.u32 %v14263_v46, %v13001_v45 }
  0xb7   : > { %6069 = vmatmul.bf16.gmra.mxu2 %v10722_v49  ;;  %v10897_v49 = vld [vmem:[%s15291_s13 + $0x378] sm:$0xf]  ;;  %v10894_v57 = vor.u32 %v13730_v47, %v10891_v48 }
  0xc5   : > { %5416 = vmatmul.bf16.gmra.mxu0 %v10758_v58  ;;  %5656 = vmatmul.bf16.gmra.mxu3 %v12870_v59  ;;  %v10898_v58 = vor.u32 %v13736_v50, %v10897_v49 }
  0xc6   : > { %5745 = vmatmul.bf16.gmra.mxu1 %v10762_v60 }
  0xc7   : > { %6074 = vmatmul.bf16.gmra.mxu2 %v10766_v61 }
  0xd2   : > { %v5382_v5 = vpop.f32.mrf.mxu0 }
  0xd3   : > { %v5711_v12 = vpop.f32.mrf.mxu1 }
  0xd4   : > { %v5712_v11 = vadd.f32 %v5711_v12, %v5382_v5  ;;  %v13045_v5 = vld [vmem:[%s15291_s13 + $0x1448] sm:$0xf]  ;;  %v10935_v12 = vld [vmem:[%s15291_s13 + $0x3f4] sm:$0xf0] }
  0xd5   : > { %5421 = vmatmul.bf16.gmra.mxu0 %v10802_v7  ;;  %5661 = vmatmul.bf16.gmra.mxu3 %v12914_v9  ;;  %v10933_v7 = vld [vmem:[%s15291_s13 + $0x3c8] sm:$0xf]  ;;  %v13746_v9 = vld [vmem:[%s15291_s13 + $0x3f0] sm:$0xf0] }
  0xd6   : > { %5750 = vmatmul.bf16.gmra.mxu1 %v10806_v8  ;;  %v14274_v8 = vld [vmem:[%s15291_s13 + $0x1470] sm:$0xf0] }
  0xd7   : > { %6079 = vmatmul.bf16.gmra.mxu2 %v10810_v10  ;;  %v13741_v10 = vld [vmem:[%s15291_s13 + $0x3cc] sm:$0xf]  ;;  %v13046_v14 = vor.u32 %v14274_v8, %v13045_v5 }
  0xd8   : > { %v15429_v13 = vpop.f32.mrf.mxu3  ;;  %v10938_v17 = vor.u32 %v13741_v10, %v10935_v12 }
  0xda   : > { %v6040_v15 = vpop.f32.mrf.mxu2  ;;  %v5384_v18 = vpop.f32.mrf.mxu0 }
  0xdb   : > { %v15431_v16 = vadd.f32 %v6040_v15, %v5712_v11  ;;  %v5713_v19 = vpop.f32.mrf.mxu1  ;;  %v10941_v11 = vld [vmem:[%s15291_s13 + $0x3d0] sm:$0xf]  ;;  %v13747_v15 = vld [vmem:[%s15291_s13 + $0x3f8] sm:$0xf0] }
  0xdc   : > { %v5714_v21 = vadd.f32 %v5713_v19, %v5384_v18  ;;  %v10942_v20 = vor.u32 %v13747_v15, %v10941_v11 }
  0xdd   : > { %18121 = vst [vmem:[#allocation16_spill] sm:$0xff] %v15431_v16 }
  0xe0   : > { %v15441_v27 = vpop.f32.mrf.mxu3 }
  0xe2   : > { %v6042_v28 = vpop.f32.mrf.mxu2  ;;  %v5387_v32 = vpop.f32.mrf.mxu0 }
  0xe3   : > { %v15443_v31 = vadd.f32 %v6042_v28, %v5714_v21  ;;  %v5716_v35 = vpop.f32.mrf.mxu1  ;;  %v10934_v21 = vor.u32 %v13746_v9, %v10933_v7  ;;  %v11029_v7 = vld [vmem:[%s15291_s13 + $0x480] sm:$0xf]  ;;  %v13769_v9 = vld [vmem:[%s15291_s13 + $0x4a8] sm:$0xf0] }
  0xe4   : > { %v5717_v36 = vadd.f32 %v5716_v35, %v5387_v32  ;;  %v13757_v35 = vld [vmem:[%s15291_s13 + $0x448] sm:$0xf0] }
  0xe5   : > { %18122 = vst [vmem:[#allocation17_spill] sm:$0xff] %v15443_v31  ;;  %5426 = vmatmul.bf16.gmra.mxu0 %v10846_v29  ;;  %5666 = vmatmul.bf16.gmra.mxu3 %v12958_v30 }
  0xe6   : > { %5755 = vmatmul.bf16.gmra.mxu1 %v10850_v33 }
  0xe7   : > { %6084 = vmatmul.bf16.gmra.mxu2 %v10854_v34  ;;  %v10977_v34 = vld [vmem:[%s15291_s13 + $0x420] sm:$0xf] }
  0xe8   : > { %v15445_v37 = vpop.f32.mrf.mxu3  ;;  %v10978_v46 = vor.u32 %v13757_v35, %v10977_v34  ;;  %v13177_v34 = vld [vmem:[%s15291_s13 + $0x1550] sm:$0xf]  ;;  %v14307_v35 = vld [vmem:[%s15291_s13 + $0x1578] sm:$0xf0] }
  0xea   : > { %v6045_v38 = vpop.f32.mrf.mxu2  ;;  %v5389_v40 = vpop.f32.mrf.mxu0 }
  0xeb   : > { %v15447_v39 = vadd.f32 %v6045_v38, %v5717_v36  ;;  %v5718_v41 = vpop.f32.mrf.mxu1  ;;  %v13089_v36 = vld [vmem:[%s15291_s13 + $0x14a0] sm:$0xf]  ;;  %v14285_v38 = vld [vmem:[%s15291_s13 + $0x14c8] sm:$0xf0] }
  0xec   : > { %v5719_v42 = vadd.f32 %v5718_v41, %v5389_v40  ;;  %v13752_v40 = vld [vmem:[%s15291_s13 + $0x424] sm:$0xf]  ;;  %v10979_v41 = vld [vmem:[%s15291_s13 + $0x44c] sm:$0xf0]  ;;  %v13090_v47 = vor.u32 %v14285_v38, %v13089_v36  ;;  %v13774_v36 = vld [vmem:[%s15291_s13 + $0x4d4] sm:$0xf] }
  0xed   : > { %18123 = vst [vmem:[#allocation18_spill] sm:$0xff] %v15447_v39  ;;  %v10982_v50 = vor.u32 %v13752_v40, %v10979_v41  ;;  %v11067_v38 = vld [vmem:[%s15291_s13 + $0x4fc] sm:$0xf0]  ;;  %v11073_v40 = vld [vmem:[%s15291_s13 + $0x4d8] sm:$0xf] }
  0xee   : > { %v13780_v41 = vld [vmem:[%s15291_s13 + $0x500] sm:$0xf0] }
  0xf0   : > { %v15457_v51 = vpop.f32.mrf.mxu3 }
  0xf2   : > { %v6047_v52 = vpop.f32.mrf.mxu2  ;;  %v5392_v56 = vpop.f32.mrf.mxu0 }
  0xf3   : > { %v15459_v55 = vadd.f32 %v6047_v52, %v5719_v42  ;;  %v5721_v59 = vpop.f32.mrf.mxu1  ;;  %v10985_v42 = vld [vmem:[%s15291_s13 + $0x428] sm:$0xf] }
  0xf4   : > { %v5722_v60 = vadd.f32 %v5721_v59, %v5392_v56  ;;  %v10986_v52 = vor.u32 %v13758_v43, %v10985_v42 }
  0xf5   : > { %18124 = vst [vmem:[#allocation19_spill] sm:$0xff] %v15459_v55  ;;  %5431 = vmatmul.bf16.gmra.mxu0 %v10890_v53  ;;  %5671 = vmatmul.bf16.gmra.mxu3 %v13002_v54 }
  0xf6   : > { %5760 = vmatmul.bf16.gmra.mxu1 %v10894_v57 }
  0xf7   : > { %6089 = vmatmul.bf16.gmra.mxu2 %v10898_v58 }
  0xf8   : > { %v15461_v61 = vpop.f32.mrf.mxu3 }
  0xfa   : > { %v6050_v62 = vpop.f32.mrf.mxu2  ;;  %v5394_v0 = vpop.f32.mrf.mxu0 }
  0xfb   : > { %v15463_v63 = vadd.f32 %v6050_v62, %v5722_v60  ;;  %v5723_v1 = vpop.f32.mrf.mxu1 }
  0xfc   : > { %v5724_v3 = vadd.f32 %v5723_v1, %v5394_v0  ;;  %v11021_v0 = vld [vmem:[%s15291_s13 + $0x478] sm:$0xf]  ;;  %v13768_v1 = vld [vmem:[%s15291_s13 + $0x4a0] sm:$0xf0] }
  0xfd   : > { %18125 = vst [vmem:[#allocation20_spill] sm:$0xff] %v15463_v63  ;;  %v11022_v10 = vor.u32 %v13768_v1, %v11021_v0 }
 0x100   : > { %v15473_v18 = vpop.f32.mrf.mxu3 }
 0x102   : > { %v6052_v19 = vpop.f32.mrf.mxu2  ;;  %v5397_v24 = vpop.f32.mrf.mxu0 }
 0x103   : > { %v15475_v22 = vadd.f32 %v6052_v19, %v5724_v3  ;;  %v5726_v25 = vpop.f32.mrf.mxu1  ;;  %v13133_v3 = vld [vmem:[%s15291_s13 + $0x14f8] sm:$0xf]  ;;  %v11026_v19 = vor.u32 %v13763_v6, %v11023_v2  ;;  %v13221_v6 = vld [vmem:[%s15291_s13 + $0x15a8] sm:$0xf]  ;;  %v14318_v2 = vld [vmem:[%s15291_s13 + $0x15d0] sm:$0xf0] }
 0x104   : > { %v5727_v26 = vadd.f32 %v5726_v25, %v5397_v24  ;;  %v13134_v12 = vor.u32 %v14296_v4, %v13133_v3  ;;  %v11109_v3 = vld [vmem:[%s15291_s13 + $0x528] sm:$0xf]  ;;  %v13790_v4 = vld [vmem:[%s15291_s13 + $0x550] sm:$0xf0] }
 0x105   : > { %18126 = vst [vmem:[#allocation21_spill] sm:$0xff] %v15475_v22  ;;  %5436 = vmatmul.bf16.gmra.mxu0 %v10934_v21  ;;  %5676 = vmatmul.bf16.gmra.mxu3 %v13046_v14  ;;  %v11030_v21 = vor.u32 %v13769_v9, %v11029_v7  ;;  %v13785_v7 = vld [vmem:[%s15291_s13 + $0x52c] sm:$0xf]  ;;  %v11111_v9 = vld [vmem:[%s15291_s13 + $0x554] sm:$0xf0] }
 0x106   : > { %5765 = vmatmul.bf16.gmra.mxu1 %v10938_v17 }
 0x107   : > { %6094 = vmatmul.bf16.gmra.mxu2 %v10942_v20 }
 0x108   : > { %v15477_v23 = vpop.f32.mrf.mxu3 }
 0x10a   : > { %v6055_v28 = vpop.f32.mrf.mxu2  ;;  %v5399_v30 = vpop.f32.mrf.mxu0 }
 0x10b   : > { %v15479_v29 = vadd.f32 %v6055_v28, %v5727_v26  ;;  %v5728_v32 = vpop.f32.mrf.mxu1 }
 0x10c   : > { %v5729_v33 = vadd.f32 %v5728_v32, %v5399_v30  ;;  %v11065_v32 = vld [vmem:[%s15291_s13 + $0x4d0] sm:$0xf] }
 0x10d   : > { %18127 = vst [vmem:[#allocation22_spill] sm:$0xff] %v15479_v29 }
 0x110   : > { %v15489_v44 = vpop.f32.mrf.mxu3 }
 0x112   : > { %v6057_v45 = vpop.f32.mrf.mxu2  ;;  %v5402_v49 = vpop.f32.mrf.mxu0 }
 0x113   : > { %v15491_v48 = vadd.f32 %v6057_v45, %v5729_v33  ;;  %v5731_v53 = vpop.f32.mrf.mxu1  ;;  %v13779_v33 = vld [vmem:[%s15291_s13 + $0x4f8] sm:$0xf0] }
 0x114   : > { %v5732_v54 = vadd.f32 %v5731_v53, %v5402_v49  ;;  %v11066_v45 = vor.u32 %v13779_v33, %v11065_v32 }
 0x115   : > { %18128 = vst [vmem:[#allocation23_spill] sm:$0xff] %v15491_v48  ;;  %5441 = vmatmul.bf16.gmra.mxu0 %v10978_v46  ;;  %5681 = vmatmul.bf16.gmra.mxu3 %v13090_v47  ;;  %v13178_v46 = vor.u32 %v14307_v35, %v13177_v34 }
 0x116   : > { %5770 = vmatmul.bf16.gmra.mxu1 %v10982_v50  ;;  %v11070_v50 = vor.u32 %v13774_v36, %v11067_v38 }
 0x117   : > { %6099 = vmatmul.bf16.gmra.mxu2 %v10986_v52  ;;  %v11074_v52 = vor.u32 %v13780_v41, %v11073_v40  ;;  %v11153_v40 = vld [vmem:[%s15291_s13 + $0x580] sm:$0xf]  ;;  %v13801_v41 = vld [vmem:[%s15291_s13 + $0x5a8] sm:$0xf0] }
 0x118   : > { %v15493_v56 = vpop.f32.mrf.mxu3 }
 0x11a   : > { %v6060_v57 = vpop.f32.mrf.mxu2  ;;  %v5404_v59 = vpop.f32.mrf.mxu0 }
 0x11b   : > { %v15495_v58 = vadd.f32 %v6060_v57, %v5732_v54  ;;  %v5733_v60 = vpop.f32.mrf.mxu1 }
 0x11c   : > { %v5734_v62 = vadd.f32 %v5733_v60, %v5404_v59 }
 0x11d   : > { %18129 = vst [vmem:[#allocation24_spill] sm:$0xff] %v15495_v58 }
 0x120   : > { %v15505_v5 = vpop.f32.mrf.mxu3 }
 0x122   : > { %v6062_v8 = vpop.f32.mrf.mxu2  ;;  %v5407_v15 = vpop.f32.mrf.mxu0 }
 0x123   : > { %v15507_v11 = vadd.f32 %v6062_v8, %v5734_v62  ;;  %v5736_v14 = vpop.f32.mrf.mxu1  ;;  %v11117_v8 = vld [vmem:[%s15291_s13 + $0x530] sm:$0xf] }
 0x124   : > { %v5737_v24 = vadd.f32 %v5736_v14, %v5407_v15 }
 0x125   : > { %18130 = vst [vmem:[#allocation25_spill] sm:$0xff] %v15507_v11  ;;  %5446 = vmatmul.bf16.gmra.mxu0 %v11022_v10  ;;  %5686 = vmatmul.bf16.gmra.mxu3 %v13134_v12  ;;  %v13791_v10 = vld [vmem:[%s15291_s13 + $0x558] sm:$0xf0] }
 0x126   : > { %5775 = vmatmul.bf16.gmra.mxu1 %v11026_v19  ;;  %v11110_v19 = vor.u32 %v13790_v4, %v11109_v3 }
 0x127   : > { %6104 = vmatmul.bf16.gmra.mxu2 %v11030_v21  ;;  %v13222_v21 = vor.u32 %v14318_v2, %v13221_v6 }
 0x128   : > { %v15509_v17 = vpop.f32.mrf.mxu3 }
 0x12a   : > { %v6065_v20 = vpop.f32.mrf.mxu2  ;;  %v5409_v26 = vpop.f32.mrf.mxu0 }
 0x12b   : > { %v15511_v25 = vadd.f32 %v6065_v20, %v5737_v24  ;;  %v5738_v28 = vpop.f32.mrf.mxu1  ;;  %v11114_v20 = vor.u32 %v13785_v7, %v11111_v9 }
 0x12c   : > { %v5739_v30 = vadd.f32 %v5738_v28, %v5409_v26  ;;  %v11118_v26 = vor.u32 %v13791_v10, %v11117_v8 }
 0x12d   : > { %18131 = vst [vmem:[#allocation26_spill] sm:$0xff] %v15511_v25 }
 0x130   : > { %v15521_v42 = vpop.f32.mrf.mxu3 }
 0x132   : > { %v6067_v43 = vpop.f32.mrf.mxu2  ;;  %v5412_v49 = vpop.f32.mrf.mxu0 }
 0x133   : > { %v15523_v47 = vadd.f32 %v6067_v43, %v5739_v30  ;;  %v5741_v53 = vpop.f32.mrf.mxu1  ;;  %v13796_v43 = vld [vmem:[%s15291_s13 + $0x584] sm:$0xf] }
 0x134   : > { %v5742_v54 = vadd.f32 %v5741_v53, %v5412_v49  ;;  %v11155_v49 = vld [vmem:[%s15291_s13 + $0x5ac] sm:$0xf0] }
 0x135   : > { %18132 = vst [vmem:[#allocation27_spill] sm:$0xff] %v15523_v47  ;;  %5451 = vmatmul.bf16.gmra.mxu0 %v11066_v45  ;;  %5691 = vmatmul.bf16.gmra.mxu3 %v13178_v46  ;;  %v14148_v45 = vld [vmem:[%s15291_s13 + $0x1084] sm:$0xf]  ;;  %v12563_v46 = vld [vmem:[%s15291_s13 + $0x10ac] sm:$0xf0]  ;;  %v11158_v3 = vor.u32 %v13796_v43, %v11155_v49 }
 0x136   : > { %5780 = vmatmul.bf16.gmra.mxu1 %v11070_v50  ;;  %v11161_v50 = vld [vmem:[%s15291_s13 + $0x588] sm:$0xf] }
 0x137   : > { %6109 = vmatmul.bf16.gmra.mxu2 %v11074_v52  ;;  %v13802_v52 = vld [vmem:[%s15291_s13 + $0x5b0] sm:$0xf0] }
 0x138   : > { %v15525_v57 = vpop.f32.mrf.mxu3  ;;  %v11162_v4 = vor.u32 %v13802_v52, %v11161_v50 }
 0x13a   : > { %v6070_v59 = vpop.f32.mrf.mxu2  ;;  %v5414_v62 = vpop.f32.mrf.mxu0 }
 0x13b   : > { %v15527_v60 = vadd.f32 %v6070_v59, %v5742_v54  ;;  %v5743_v0 = vpop.f32.mrf.mxu1  ;;  %v11154_v59 = vor.u32 %v13801_v41, %v11153_v40  ;;  %v13813_v40 = vld [vmem:[%s15291_s13 + $0x608] sm:$0xf0] }
 0x13c   : > { %v5744_v1 = vadd.f32 %v5743_v0, %v5414_v62  ;;  %v12566_v62 = vor.u32 %v14148_v45, %v12563_v46 }
 0x13d   : > { %18133 = vst [vmem:[#allocation28_spill] sm:$0xff] %v15527_v60 }
 0x140   : > { %v15537_v12 = vpop.f32.mrf.mxu3 }
 0x142   : > { %v6072_v15 = vpop.f32.mrf.mxu2  ;;  %v5417_v24 = vpop.f32.mrf.mxu0 }
 0x143   : > { %v15539_v14 = vadd.f32 %v6072_v15, %v5744_v1  ;;  %v5746_v28 = vpop.f32.mrf.mxu1 }
 0x144   : > { %v5747_v30 = vadd.f32 %v5746_v28, %v5417_v24  ;;  %v14360_v24 = vld [vmem:[#allocation6 + $0x120] sm:$0xff] }
 0x145   : > { %18134 = vst [vmem:[#allocation29_spill] sm:$0xff] %v15539_v14  ;;  %5456 = vmatmul.bf16.gmra.mxu0 %v11110_v19  ;;  %5696 = vmatmul.bf16.gmra.mxu3 %v13222_v21  ;;  %v14376_v21 = vld [vmem:[#allocation6 + $0x1a0] sm:$0xff] }
 0x146   : > { %5785 = vmatmul.bf16.gmra.mxu1 %v11114_v20  ;;  %v14368_v20 = vld [vmem:[#allocation6 + $0x160] sm:$0xff]  ;;  %7350 = vmatpush.bf16.msrb.mxu2 %v14376_v21  ;;  %v14170_v21 = vld [vmem:[%s15291_s13 + $0x1134] sm:$0xf] }
 0x147   : > { %6114 = vmatmul.bf16.gmra.mxu2 %v11118_v26  ;;  %v11197_v26 = vld [vmem:[%s15291_s13 + $0x5d8] sm:$0xf]  ;;  %v13812_v28 = vld [vmem:[%s15291_s13 + $0x600] sm:$0xf0]  ;;  %6692 = vmatpush.bf16.msrb.mxu0 %v14360_v24  ;;  %v12651_v24 = vld [vmem:[%s15291_s13 + $0x115c] sm:$0xf0] }
 0x148   : > { %v15541_v32 = vpop.f32.mrf.mxu3  ;;  %7021 = vmatpush.bf16.msrb.mxu1 %v14368_v20  ;;  %v11198_v45 = vor.u32 %v13812_v28, %v11197_v26  ;;  %v11243_v20 = vld [vmem:[%s15291_s13 + $0x65c] sm:$0xf0]  ;;  %v11249_v26 = vld [vmem:[%s15291_s13 + $0x638] sm:$0xf]  ;;  %v13824_v28 = vld [vmem:[%s15291_s13 + $0x660] sm:$0xf0] }
 0x14a   : > { %v6075_v33 = vpop.f32.mrf.mxu2  ;;  %v5419_v35 = vpop.f32.mrf.mxu0 }
 0x14b   : > { %v15543_v34 = vadd.f32 %v6075_v33, %v5747_v30  ;;  %v5748_v36 = vpop.f32.mrf.mxu1  ;;  %v13807_v30 = vld [vmem:[%s15291_s13 + $0x5dc] sm:$0xf] }
 0x14c   : > { %v5749_v38 = vadd.f32 %v5748_v36, %v5419_v35  ;;  %v14159_v33 = vld [vmem:[%s15291_s13 + $0x10dc] sm:$0xf]  ;;  %v12607_v35 = vld [vmem:[%s15291_s13 + $0x1104] sm:$0xf0] }
 0x14d   : > { %18135 = vst [vmem:[#allocation30_spill] sm:$0xff] %v15543_v34  ;;  %v11199_v36 = vld [vmem:[%s15291_s13 + $0x604] sm:$0xf0]  ;;  %v12610_v46 = vor.u32 %v14159_v33, %v12607_v35 }
 0x14e   : > { %v11202_v52 = vor.u32 %v13807_v30, %v11199_v36  ;;  %v12654_v36 = vor.u32 %v14170_v21, %v12651_v24  ;;  %v11287_v21 = vld [vmem:[%s15291_s13 + $0x6b4] sm:$0xf0]  ;;  %v11293_v24 = vld [vmem:[%s15291_s13 + $0x690] sm:$0xf] }
 0x150   : > { %v15553_v53 = vpop.f32.mrf.mxu3 }
 0x152   : > { %v6077_v54 = vpop.f32.mrf.mxu2  ;;  %v5422_v1 = vpop.f32.mrf.mxu0 }
 0x153   : > { %v15555_v0 = vadd.f32 %v6077_v54, %v5749_v38  ;;  %v5751_v6 = vpop.f32.mrf.mxu1  ;;  %v11205_v38 = vld [vmem:[%s15291_s13 + $0x5e0] sm:$0xf] }
 0x154   : > { %v5752_v2 = vadd.f32 %v5751_v6, %v5422_v1  ;;  %v11206_v54 = vor.u32 %v13813_v40, %v11205_v38 }
 0x155   : > { %18136 = vst [vmem:[#allocation31_spill] sm:$0xff] %v15555_v0  ;;  %5461 = vmatmul.bf16.gmra.mxu0 %v11154_v59  ;;  %5950 = vmatmul.bf16.vlgmr.msrb.gmra.mxu3 %v12566_v62 }
 0x156   : > { %5790 = vmatmul.bf16.gmra.mxu1 %v11158_v3 }
 0x157   : > { %6119 = vmatmul.bf16.gmra.mxu2 %v11162_v4 }
 0x158   : > { %v15557_v7 = vpop.f32.mrf.mxu3 }
 0x15a   : > { %v6080_v9 = vpop.f32.mrf.mxu2  ;;  %v5424_v10 = vpop.f32.mrf.mxu0 }
 0x15b   : > { %v15559_v8 = vadd.f32 %v6080_v9, %v5752_v2  ;;  %v5753_v15 = vpop.f32.mrf.mxu1 }
 0x15c   : > { %v5754_v19 = vadd.f32 %v5753_v15, %v5424_v10  ;;  %v11241_v10 = vld [vmem:[%s15291_s13 + $0x630] sm:$0xf]  ;;  %v13823_v15 = vld [vmem:[%s15291_s13 + $0x658] sm:$0xf0] }
 0x15d   : > { %18137 = vst [vmem:[#allocation32_spill] sm:$0xff] %v15559_v8  ;;  %v11242_v35 = vor.u32 %v13823_v15, %v11241_v10  ;;  %v13829_v10 = vld [vmem:[%s15291_s13 + $0x68c] sm:$0xf] }
 0x15e   : > { %v14181_v15 = vld [vmem:[%s15291_s13 + $0x118c] sm:$0xf] }
 0x160   : > { %v15569_v41 = vpop.f32.mrf.mxu3 }
 0x162   : > { %v6082_v43 = vpop.f32.mrf.mxu2  ;;  %v5427_v50 = vpop.f32.mrf.mxu0 }
 0x163   : > { %v15571_v49 = vadd.f32 %v6082_v43, %v5754_v19  ;;  %v5756_v59 = vpop.f32.mrf.mxu1  ;;  %v13818_v19 = vld [vmem:[%s15291_s13 + $0x634] sm:$0xf] }
 0x164   : > { %v5757_v62 = vadd.f32 %v5756_v59, %v5427_v50  ;;  %v11246_v43 = vor.u32 %v13818_v19, %v11243_v20  ;;  %v12695_v19 = vld [vmem:[%s15291_s13 + $0x11b4] sm:$0xf0]  ;;  %v13835_v20 = vld [vmem:[%s15291_s13 + $0x6b8] sm:$0xf0] }
 0x165   : > { %18138 = vst [vmem:[#allocation33_spill] sm:$0xff] %v15571_v49  ;;  %5466 = vmatmul.bf16.gmra.mxu0 %v11198_v45  ;;  %5955 = vmatmul.bf16.gmra.mxu3 %v12610_v46  ;;  %v11250_v45 = vor.u32 %v13824_v28, %v11249_v26 }
 0x166   : > { %5795 = vmatmul.bf16.gmra.mxu1 %v11202_v52 }
 0x167   : > { %6124 = vmatmul.bf16.gmra.mxu2 %v11206_v54 }
 0x168   : > { %v15573_v1 = vpop.f32.mrf.mxu3 }
 0x16a   : > { %v6085_v3 = vpop.f32.mrf.mxu2  ;;  %v5429_v6 = vpop.f32.mrf.mxu0 }
 0x16b   : > { %v15575_v4 = vadd.f32 %v6085_v3, %v5757_v62  ;;  %v5758_v2 = vpop.f32.mrf.mxu1 }
 0x16c   : > { %v5759_v9 = vadd.f32 %v5758_v2, %v5429_v6  ;;  %v11285_v2 = vld [vmem:[%s15291_s13 + $0x688] sm:$0xf] }
 0x16d   : > { %18139 = vst [vmem:[#allocation34_spill] sm:$0xff] %v15575_v4 }
 0x170   : > { %v15585_v30 = vpop.f32.mrf.mxu3 }
 0x172   : > { %v6087_v33 = vpop.f32.mrf.mxu2  ;;  %v5432_v40 = vpop.f32.mrf.mxu0 }
 0x173   : > { %v15587_v38 = vadd.f32 %v6087_v33, %v5759_v9  ;;  %v5761_v46 = vpop.f32.mrf.mxu1  ;;  %v13834_v9 = vld [vmem:[%s15291_s13 + $0x6b0] sm:$0xf0] }
 0x174   : > { %v5762_v50 = vadd.f32 %v5761_v46, %v5432_v40  ;;  %v11286_v33 = vor.u32 %v13834_v9, %v11285_v2 }
 0x175   : > { %18140 = vst [vmem:[#allocation35_spill] sm:$0xff] %v15587_v38  ;;  %5471 = vmatmul.bf16.gmra.mxu0 %v11242_v35  ;;  %5960 = vmatmul.bf16.gmra.mxu3 %v12654_v36  ;;  %v12698_v35 = vor.u32 %v14181_v15, %v12695_v19  ;;  %v13845_v15 = vld [vmem:[%s15291_s13 + $0x708] sm:$0xf0]  ;;  %v13840_v19 = vld [vmem:[%s15291_s13 + $0x6e4] sm:$0xf] }
 0x176   : > { %5800 = vmatmul.bf16.gmra.mxu1 %v11246_v43  ;;  %v11290_v43 = vor.u32 %v13829_v10, %v11287_v21  ;;  %v11329_v10 = vld [vmem:[%s15291_s13 + $0x6e0] sm:$0xf]  ;;  %v14192_v21 = vld [vmem:[%s15291_s13 + $0x11e4] sm:$0xf] }
 0x177   : > { %6129 = vmatmul.bf16.gmra.mxu2 %v11250_v45  ;;  %v11294_v45 = vor.u32 %v13835_v20, %v11293_v24  ;;  %v12739_v24 = vld [vmem:[%s15291_s13 + $0x120c] sm:$0xf0] }
 0x178   : > { %v15589_v52 = vpop.f32.mrf.mxu3  ;;  %v11331_v20 = vld [vmem:[%s15291_s13 + $0x70c] sm:$0xf0] }
 0x17a   : > { %v6090_v54 = vpop.f32.mrf.mxu2  ;;  %v5434_v62 = vpop.f32.mrf.mxu0 }
 0x17b   : > { %v15591_v59 = vadd.f32 %v6090_v54, %v5762_v50  ;;  %v5763_v3 = vpop.f32.mrf.mxu1 }
 0x17c   : > { %v5764_v6 = vadd.f32 %v5763_v3, %v5434_v62 }
 0x17d   : > { %18141 = vst [vmem:[#allocation36_spill] sm:$0xff] %v15591_v59 }
 0x180   : > { %v15601_v26 = vpop.f32.mrf.mxu3 }
 0x182   : > { %v6092_v28 = vpop.f32.mrf.mxu2  ;;  %v5437_v40 = vpop.f32.mrf.mxu0 }
 0x183   : > { %v15603_v36 = vadd.f32 %v6092_v28, %v5764_v6  ;;  %v5766_v46 = vpop.f32.mrf.mxu1  ;;  %v11337_v28 = vld [vmem:[%s15291_s13 + $0x6e8] sm:$0xf] }
 0x184   : > { %v5767_v50 = vadd.f32 %v5766_v46, %v5437_v40 }
 0x185   : > { %18142 = vst [vmem:[#allocation37_spill] sm:$0xff] %v15603_v36  ;;  %5476 = vmatmul.bf16.gmra.mxu0 %v11286_v33  ;;  %5965 = vmatmul.bf16.gmra.mxu3 %v12698_v35  ;;  %v13846_v33 = vld [vmem:[%s15291_s13 + $0x710] sm:$0xf0] }
 0x186   : > { %5805 = vmatmul.bf16.gmra.mxu1 %v11290_v43  ;;  %v11330_v43 = vor.u32 %v13845_v15, %v11329_v10 }
 0x187   : > { %6134 = vmatmul.bf16.gmra.mxu2 %v11294_v45  ;;  %v12742_v45 = vor.u32 %v14192_v21, %v12739_v24 }
 0x188   : > { %v15605_v54 = vpop.f32.mrf.mxu3 }
 0x189   : > { %18143 = vst [vmem:[#allocation38_spill] sm:$0xff] %v15605_v54 }
 0x18a   : > { %v6095_v62 = vpop.f32.mrf.mxu2  ;;  %v5439_v6 = vpop.f32.mrf.mxu0 }
 0x18b   : > { %v15607_v3 = vadd.f32 %v6095_v62, %v5767_v50  ;;  %v5768_v2 = vpop.f32.mrf.mxu1  ;;  %v11334_v62 = vor.u32 %v13840_v19, %v11331_v20  ;;  %v11373_v20 = vld [vmem:[%s15291_s13 + $0x738] sm:$0xf] }
 0x18c   : > { %v5769_v9 = vadd.f32 %v5768_v2, %v5439_v6  ;;  %v11338_v6 = vor.u32 %v13846_v33, %v11337_v28  ;;  %v13856_v28 = vld [vmem:[%s15291_s13 + $0x760] sm:$0xf0]  ;;  %v13851_v33 = vld [vmem:[%s15291_s13 + $0x73c] sm:$0xf] }
 0x18d   : > { %18144 = vst [vmem:[#allocation39_spill] sm:$0xff] %v15607_v3 }
 0x190   : > { %v15617_v35 = vpop.f32.mrf.mxu3 }
 0x191   : > { %18145 = vst [vmem:[#allocation40_spill] sm:$0xff] %v15617_v35 }
 0x192   : > { %v6097_v40 = vpop.f32.mrf.mxu2  ;;  %v5442_v50 = vpop.f32.mrf.mxu0 }
 0x193   : > { %v15619_v46 = vadd.f32 %v6097_v40, %v5769_v9  ;;  %v5771_v2 = vpop.f32.mrf.mxu1  ;;  %v14203_v40 = vld [vmem:[%s15291_s13 + $0x123c] sm:$0xf] }
 0x194   : > { %v5772_v3 = vadd.f32 %v5771_v2, %v5442_v50  ;;  %v12783_v50 = vld [vmem:[%s15291_s13 + $0x1264] sm:$0xf0] }
 0x195   : > { %18146 = vst [vmem:[#allocation41_spill] sm:$0xff] %v15619_v46  ;;  %5481 = vmatmul.bf16.gmra.mxu0 %v11330_v43  ;;  %5970 = vmatmul.bf16.gmra.mxu3 %v12742_v45  ;;  %v11375_v2 = vld [vmem:[%s15291_s13 + $0x764] sm:$0xf0]  ;;  %v11381_v43 = vld [vmem:[%s15291_s13 + $0x740] sm:$0xf]  ;;  %v12786_v36 = vor.u32 %v14203_v40, %v12783_v50 }
 0x196   : > { %5810 = vmatmul.bf16.gmra.mxu1 %v11334_v62  ;;  %v13857_v46 = vld [vmem:[%s15291_s13 + $0x768] sm:$0xf0] }
 0x197   : > { %6139 = vmatmul.bf16.gmra.mxu2 %v11338_v6  ;;  %v11374_v6 = vor.u32 %v13856_v28, %v11373_v20 }
 0x198   : > { %v15621_v10 = vpop.f32.mrf.mxu3 }
 0x199   : > { %18147 = vst [vmem:[#allocation42_spill] sm:$0xff] %v15621_v10 }
 0x19a   : > { %v6100_v9 = vpop.f32.mrf.mxu2  ;;  %v5444_v21 = vpop.f32.mrf.mxu0 }
 0x19b   : > { %v15623_v15 = vadd.f32 %v6100_v9, %v5772_v3  ;;  %v5773_v19 = vpop.f32.mrf.mxu1  ;;  %v11378_v9 = vor.u32 %v13851_v33, %v11375_v2  ;;  %v13867_v2 = vld [vmem:[%s15291_s13 + $0x7b8] sm:$0xf0] }
 0x19c   : > { %v5774_v24 = vadd.f32 %v5773_v19, %v5444_v21  ;;  %v11382_v21 = vor.u32 %v13857_v46, %v11381_v43  ;;  %v11417_v46 = vld [vmem:[%s15291_s13 + $0x790] sm:$0xf]  ;;  %v13862_v43 = vld [vmem:[%s15291_s13 + $0x794] sm:$0xf] }
 0x19d   : > { %18148 = vst [vmem:[#allocation43_spill] sm:$0xff] %v15623_v15 }
 0x1a0   : > { %v15633_v45 = vpop.f32.mrf.mxu3 }
 0x1a1   : > { %18149 = vst [vmem:[#allocation44_spill] sm:$0xff] %v15633_v45 }
 0x1a2   : > { %v6102_v62 = vpop.f32.mrf.mxu2  ;;  %v5447_v3 = vpop.f32.mrf.mxu0 }
 0x1a3   : > { %v15635_v59 = vadd.f32 %v6102_v62, %v5774_v24  ;;  %v5776_v19 = vpop.f32.mrf.mxu1  ;;  %v14214_v62 = vld [vmem:[%s15291_s13 + $0x1294] sm:$0xf] }
 0x1a4   : > { %v5777_v15 = vadd.f32 %v5776_v19, %v5447_v3  ;;  %v12827_v3 = vld [vmem:[%s15291_s13 + $0x12bc] sm:$0xf0] }
 0x1a5   : > { %18150 = vst [vmem:[#allocation45_spill] sm:$0xff] %v15635_v59  ;;  %5486 = vmatmul.bf16.gmra.mxu0 %v11374_v6  ;;  %5975 = vmatmul.bf16.gmra.mxu3 %v12786_v36  ;;  %v11419_v19 = vld [vmem:[%s15291_s13 + $0x7bc] sm:$0xf0]  ;;  %v11425_v6 = vld [vmem:[%s15291_s13 + $0x798] sm:$0xf]  ;;  %v12830_v38 = vor.u32 %v14214_v62, %v12827_v3 }
 0x1a6   : > { %5815 = vmatmul.bf16.gmra.mxu1 %v11378_v9  ;;  %v13868_v59 = vld [vmem:[%s15291_s13 + $0x7c0] sm:$0xf0]  ;;  %v14375_v62 = vld [vmem:[#allocation6 + $0x198] sm:$0xff] }
 0x1a7   : > { %6144 = vmatmul.bf16.gmra.mxu2 %v11382_v21  ;;  %v11418_v21 = vor.u32 %v13867_v2, %v11417_v46  ;;  %v14359_v3 = vld [vmem:[#allocation6 + $0x118] sm:$0xff] }
 0x1a8   : > { %v15637_v20 = vpop.f32.mrf.mxu3  ;;  %7351 = vmatpush.bf16.msrb.mxu2 %v14375_v62  ;;  %6693 = vmatpush.bf16.msrb.mxu0 %v14359_v3 }
 0x1a9   : > { %18151 = vst [vmem:[#allocation46_spill] sm:$0xff] %v15637_v20 }
 0x1aa   : > { %v6105_v24 = vpop.f32.mrf.mxu2  ;;  %v5449_v40 = vpop.f32.mrf.mxu0 }
 0x1ab   : > { %v15639_v28 = vadd.f32 %v6105_v24, %v5777_v15  ;;  %v5778_v33 = vpop.f32.mrf.mxu1  ;;  %v11422_v24 = vor.u32 %v13862_v43, %v11419_v19  ;;  %v14367_v19 = vld [vmem:[#allocation6 + $0x158] sm:$0xff] }
 0x1ac   : > { %v5779_v50 = vadd.f32 %v5778_v33, %v5449_v40  ;;  %7022 = vmatpush.bf16.msrb.mxu1 %v14367_v19 }
 0x1ad   : > { %18152 = vst [vmem:[#allocation47_spill] sm:$0xff] %v15639_v28  ;;  %v11426_v28 = vor.u32 %v13868_v59, %v11425_v6  ;;  %v11461_v6 = vld [vmem:[%s15291_s13 + $0x7e8] sm:$0xf] }
 0x1b0   : > { %v15649_v36 = vpop.f32.mrf.mxu3 }
 0x1b1   : > { %18153 = vst [vmem:[#allocation48_spill] sm:$0xff] %v15649_v36 }
 0x1b2   : > { %v6107_v9 = vpop.f32.mrf.mxu2  ;;  %v5452_v15 = vpop.f32.mrf.mxu0 }
 0x1b3   : > { %v15651_v4 = vadd.f32 %v6107_v9, %v5779_v50  ;;  %v5781_v40 = vpop.f32.mrf.mxu1  ;;  %v13878_v9 = vld [vmem:[%s15291_s13 + $0x810] sm:$0xf0] }
 0x1b4   : > { %v5782_v33 = vadd.f32 %v5781_v40, %v5452_v15  ;;  %v12871_v15 = vld [vmem:[%s15291_s13 + $0x1314] sm:$0xf0]  ;;  %v13879_v40 = vld [vmem:[%s15291_s13 + $0x818] sm:$0xf0] }
 0x1b5   : > { %18154 = vst [vmem:[#allocation49_spill] sm:$0xff] %v15651_v4  ;;  %5491 = vmatmul.bf16.gmra.mxu0 %v11418_v21  ;;  %5980 = vmatmul.bf16.gmra.mxu3 %v12830_v38  ;;  %v13873_v38 = vld [vmem:[%s15291_s13 + $0x7ec] sm:$0xf] }
 0x1b6   : > { %5820 = vmatmul.bf16.gmra.mxu1 %v11422_v24  ;;  %v14225_v21 = vld [vmem:[%s15291_s13 + $0x12ec] sm:$0xf]  ;;  %v11469_v24 = vld [vmem:[%s15291_s13 + $0x7f0] sm:$0xf] }
 0x1b7   : > { %6149 = vmatmul.bf16.gmra.mxu2 %v11426_v28  ;;  %v11463_v28 = vld [vmem:[%s15291_s13 + $0x814] sm:$0xf0]  ;;  %v12874_v4 = vor.u32 %v14225_v21, %v12871_v15  ;;  %v11470_v0 = vor.u32 %v13879_v40, %v11469_v24  ;;  %v11505_v15 = vld [vmem:[%s15291_s13 + $0x840] sm:$0xf]  ;;  %v13884_v24 = vld [vmem:[%s15291_s13 + $0x844] sm:$0xf] }
 0x1b8   : > { %v15653_v49 = vpop.f32.mrf.mxu3  ;;  %v11466_v8 = vor.u32 %v13873_v38, %v11463_v28  ;;  %v13889_v28 = vld [vmem:[%s15291_s13 + $0x868] sm:$0xf0]  ;;  %v14236_v40 = vld [vmem:[%s15291_s13 + $0x1344] sm:$0xf] }
 0x1b9   : > { %18155 = vst [vmem:[#allocation50_spill] sm:$0xff] %v15653_v49 }
 0x1ba   : > { %v6110_v46 = vpop.f32.mrf.mxu2  ;;  %v5454_v59 = vpop.f32.mrf.mxu0 }
 0x1bb   : > { %v15655_v50 = vadd.f32 %v6110_v46, %v5782_v33  ;;  %v5783_v2 = vpop.f32.mrf.mxu1 }
 0x1bc   : > { %v5784_v43 = vadd.f32 %v5783_v2, %v5454_v59 }
 0x1bd   : > { %18156 = vst [vmem:[#allocation51_spill] sm:$0xff] %v15655_v50  ;;  %v11462_v50 = vor.u32 %v13878_v9, %v11461_v6 }
 0x1c0   : > { %v15665_v33 = vpop.f32.mrf.mxu3 }
 0x1c1   : > { %18157 = vst [vmem:[#allocation52_spill] sm:$0xff] %v15665_v33 }
 0x1c2   : > { %v6112_v46 = vpop.f32.mrf.mxu2  ;;  %v5457_v2 = vpop.f32.mrf.mxu0 }
 0x1c3   : > { %v15667_v59 = vadd.f32 %v6112_v46, %v5784_v43  ;;  %v5786_v62 = vpop.f32.mrf.mxu1  ;;  %v12915_v46 = vld [vmem:[%s15291_s13 + $0x136c] sm:$0xf0] }
 0x1c4   : > { %v5787_v3 = vadd.f32 %v5786_v62, %v5457_v2  ;;  %v11507_v2 = vld [vmem:[%s15291_s13 + $0x86c] sm:$0xf0]  ;;  %v13890_v62 = vld [vmem:[%s15291_s13 + $0x870] sm:$0xf0] }
 0x1c5   : > { %18158 = vst [vmem:[#allocation53_spill] sm:$0xff] %v15667_v59  ;;  %5496 = vmatmul.bf16.gmra.mxu0 %v11462_v50  ;;  %5985 = vmatmul.bf16.gmra.mxu3 %v12874_v4  ;;  %v11513_v50 = vld [vmem:[%s15291_s13 + $0x848] sm:$0xf]  ;;  %v12918_v59 = vor.u32 %v14236_v40, %v12915_v46 }
 0x1c6   : > { %5825 = vmatmul.bf16.gmra.mxu1 %v11466_v8 }
 0x1c7   : > { %6154 = vmatmul.bf16.gmra.mxu2 %v11470_v0  ;;  %v11506_v0 = vor.u32 %v13889_v28, %v11505_v15 }
 0x1c8   : > { %v15669_v19 = vpop.f32.mrf.mxu3 }
 0x1c9   : > { %18159 = vst [vmem:[#allocation54_spill] sm:$0xff] %v15669_v19 }
 0x1ca   : > { %v6115_v43 = vpop.f32.mrf.mxu2  ;;  %v5459_v9 = vpop.f32.mrf.mxu0 }
 0x1cb   : > { %v15671_v6 = vadd.f32 %v6115_v43, %v5787_v3  ;;  %v5788_v38 = vpop.f32.mrf.mxu1  ;;  %v11510_v43 = vor.u32 %v13884_v24, %v11507_v2  ;;  %v11549_v2 = vld [vmem:[%s15291_s13 + $0x898] sm:$0xf] }
 0x1cc   : > { %v5789_v21 = vadd.f32 %v5788_v38, %v5459_v9  ;;  %v11514_v9 = vor.u32 %v13890_v62, %v11513_v50  ;;  %v13900_v50 = vld [vmem:[%s15291_s13 + $0x8c0] sm:$0xf0]  ;;  %v13895_v62 = vld [vmem:[%s15291_s13 + $0x89c] sm:$0xf] }
 0x1cd   : > { %18160 = vst [vmem:[#allocation55_spill] sm:$0xff] %v15671_v6 }
 0x1d0   : > { %v15681_v4 = vpop.f32.mrf.mxu3 }
 0x1d1   : > { %18161 = vst [vmem:[#allocation56_spill] sm:$0xff] %v15681_v4 }
 0x1d2   : > { %v6117_v8 = vpop.f32.mrf.mxu2  ;;  %v5462_v3 = vpop.f32.mrf.mxu0 }
 0x1d3   : > { %v15683_v34 = vadd.f32 %v6117_v8, %v5789_v21  ;;  %v5791_v38 = vpop.f32.mrf.mxu1  ;;  %v14247_v8 = vld [vmem:[%s15291_s13 + $0x139c] sm:$0xf] }
 0x1d4   : > { %v5792_v6 = vadd.f32 %v5791_v38, %v5462_v3  ;;  %v12959_v3 = vld [vmem:[%s15291_s13 + $0x13c4] sm:$0xf0] }
 0x1d5   : > { %18162 = vst [vmem:[#allocation57_spill] sm:$0xff] %v15683_v34  ;;  %5501 = vmatmul.bf16.gmra.mxu0 %v11506_v0  ;;  %5990 = vmatmul.bf16.gmra.mxu3 %v12918_v59  ;;  %v11551_v38 = vld [vmem:[%s15291_s13 + $0x8c4] sm:$0xf0]  ;;  %v11557_v0 = vld [vmem:[%s15291_s13 + $0x8a0] sm:$0xf]  ;;  %v12962_v14 = vor.u32 %v14247_v8, %v12959_v3 }
 0x1d6   : > { %5830 = vmatmul.bf16.gmra.mxu1 %v11510_v43  ;;  %v13901_v34 = vld [vmem:[%s15291_s13 + $0x8c8] sm:$0xf0] }
 0x1d7   : > { %6159 = vmatmul.bf16.gmra.mxu2 %v11514_v9  ;;  %v11550_v9 = vor.u32 %v13900_v50, %v11549_v2 }
 0x1d8   : > { %v15685_v15 = vpop.f32.mrf.mxu3 }
 0x1da   : > { %v6120_v21 = vpop.f32.mrf.mxu2  ;;  %v5464_v40 = vpop.f32.mrf.mxu0 }
 0x1db   : > { %v15687_v28 = vadd.f32 %v6120_v21, %v5792_v6  ;;  %v5793_v24 = vpop.f32.mrf.mxu1  ;;  %v11554_v21 = vor.u32 %v13895_v62, %v11551_v38  ;;  %v13911_v38 = vld [vmem:[%s15291_s13 + $0x918] sm:$0xf0] }
 0x1dc   : > { %v5794_v46 = vadd.f32 %v5793_v24, %v5464_v40  ;;  %v11558_v40 = vor.u32 %v13901_v34, %v11557_v0  ;;  %v11593_v34 = vld [vmem:[%s15291_s13 + $0x8f0] sm:$0xf]  ;;  %v13906_v0 = vld [vmem:[%s15291_s13 + $0x8f4] sm:$0xf] }
 0x1dd   : > { %18163 = vst [vmem:[#allocation58_spill] sm:$0xff] %v15687_v28 }
 0x1e0   : > { %v15697_v59 = vpop.f32.mrf.mxu3 }
 0x1e2   : > { %v6122_v43 = vpop.f32.mrf.mxu2  ;;  %v5467_v6 = vpop.f32.mrf.mxu0 }
 0x1e3   : > { %v15699_v60 = vadd.f32 %v6122_v43, %v5794_v46  ;;  %v5796_v24 = vpop.f32.mrf.mxu1  ;;  %v14258_v43 = vld [vmem:[%s15291_s13 + $0x13f4] sm:$0xf] }
 0x1e4   : > { %v5797_v28 = vadd.f32 %v5796_v24, %v5467_v6  ;;  %v13003_v6 = vld [vmem:[%s15291_s13 + $0x141c] sm:$0xf0] }
 0x1e5   : > { %18164 = vst [vmem:[#allocation59_spill] sm:$0xff] %v15699_v60  ;;  %5506 = vmatmul.bf16.gmra.mxu0 %v11550_v9  ;;  %5995 = vmatmul.bf16.gmra.mxu3 %v12962_v14  ;;  %v11595_v24 = vld [vmem:[%s15291_s13 + $0x91c] sm:$0xf0]  ;;  %v11601_v9 = vld [vmem:[%s15291_s13 + $0x8f8] sm:$0xf]  ;;  %v13006_v47 = vor.u32 %v14258_v43, %v13003_v6 }
 0x1e6   : > { %5835 = vmatmul.bf16.gmra.mxu1 %v11554_v21  ;;  %v13912_v60 = vld [vmem:[%s15291_s13 + $0x920] sm:$0xf0] }
 0x1e7   : > { %6164 = vmatmul.bf16.gmra.mxu2 %v11558_v40  ;;  %v11594_v40 = vor.u32 %v13911_v38, %v11593_v34 }
 0x1e8   : > { %v15701_v2 = vpop.f32.mrf.mxu3 }
 0x1ea   : > { %v6125_v46 = vpop.f32.mrf.mxu2  ;;  %v5469_v8 = vpop.f32.mrf.mxu0 }
 0x1eb   : > { %v15703_v50 = vadd.f32 %v6125_v46, %v5797_v28  ;;  %v5798_v62 = vpop.f32.mrf.mxu1  ;;  %v11598_v46 = vor.u32 %v13906_v0, %v11595_v24  ;;  %v13922_v24 = vld [vmem:[%s15291_s13 + $0x970] sm:$0xf0] }
 0x1ec   : > { %v5799_v3 = vadd.f32 %v5798_v62, %v5469_v8  ;;  %v11602_v8 = vor.u32 %v13912_v60, %v11601_v9  ;;  %v11637_v60 = vld [vmem:[%s15291_s13 + $0x948] sm:$0xf]  ;;  %v13917_v9 = vld [vmem:[%s15291_s13 + $0x94c] sm:$0xf] }
 0x1ed   : > { %18165 = vst [vmem:[#allocation60_spill] sm:$0xff] %v15703_v50 }
 0x1f0   : > { %v15713_v14 = vpop.f32.mrf.mxu3 }
 0x1f2   : > { %v6127_v21 = vpop.f32.mrf.mxu2  ;;  %v5472_v28 = vpop.f32.mrf.mxu0 }
 0x1f3   : > { %v15715_v25 = vadd.f32 %v6127_v21, %v5799_v3  ;;  %v5801_v62 = vpop.f32.mrf.mxu1  ;;  %v14269_v21 = vld [vmem:[%s15291_s13 + $0x144c] sm:$0xf] }
 0x1f4   : > { %v5802_v50 = vadd.f32 %v5801_v62, %v5472_v28  ;;  %v13047_v28 = vld [vmem:[%s15291_s13 + $0x1474] sm:$0xf0] }
 0x1f5   : > { %18166 = vst [vmem:[#allocation61_spill] sm:$0xff] %v15715_v25  ;;  %5511 = vmatmul.bf16.gmra.mxu0 %v11594_v40  ;;  %6000 = vmatmul.bf16.gmra.mxu3 %v13006_v47  ;;  %v11639_v62 = vld [vmem:[%s15291_s13 + $0x974] sm:$0xf0]  ;;  %v11645_v40 = vld [vmem:[%s15291_s13 + $0x950] sm:$0xf]  ;;  %v13050_v11 = vor.u32 %v14269_v21, %v13047_v28 }
 0x1f6   : > { %5840 = vmatmul.bf16.gmra.mxu1 %v11598_v46  ;;  %v13923_v25 = vld [vmem:[%s15291_s13 + $0x978] sm:$0xf0] }
 0x1f7   : > { %6169 = vmatmul.bf16.gmra.mxu2 %v11602_v8  ;;  %v11638_v8 = vor.u32 %v13922_v24, %v11637_v60 }
 0x1f8   : > { %v15717_v34 = vpop.f32.mrf.mxu3 }
 0x1fa   : > { %v6130_v3 = vpop.f32.mrf.mxu2  ;;  %v5474_v43 = vpop.f32.mrf.mxu0 }
 0x1fb   : > { %v15719_v38 = vadd.f32 %v6130_v3, %v5802_v50  ;;  %v5803_v0 = vpop.f32.mrf.mxu1  ;;  %v11642_v3 = vor.u32 %v13917_v9, %v11639_v62  ;;  %v13933_v62 = vld [vmem:[%s15291_s13 + $0x9c8] sm:$0xf0] }
 0x1fc   : > { %v5804_v6 = vadd.f32 %v5803_v0, %v5474_v43  ;;  %v11646_v43 = vor.u32 %v13923_v25, %v11645_v40  ;;  %v11681_v25 = vld [vmem:[%s15291_s13 + $0x9a0] sm:$0xf]  ;;  %v13928_v40 = vld [vmem:[%s15291_s13 + $0x9a4] sm:$0xf] }
 0x1fd   : > { %18167 = vst [vmem:[#allocation62_spill] sm:$0xff] %v15719_v38 }
 0x200   : > { %v15729_v47 = vpop.f32.mrf.mxu3 }
 0x202   : > { %v6132_v46 = vpop.f32.mrf.mxu2  ;;  %v5477_v50 = vpop.f32.mrf.mxu0 }
 0x203   : > { %v15731_v58 = vadd.f32 %v6132_v46, %v5804_v6  ;;  %v5806_v0 = vpop.f32.mrf.mxu1  ;;  %v14280_v46 = vld [vmem:[%s15291_s13 + $0x14a4] sm:$0xf] }
 0x204   : > { %v5807_v38 = vadd.f32 %v5806_v0, %v5477_v50  ;;  %v13091_v50 = vld [vmem:[%s15291_s13 + $0x14cc] sm:$0xf0] }
 0x205   : > { %18168 = vst [vmem:[#allocation63_spill] sm:$0xff] %v15731_v58  ;;  %5516 = vmatmul.bf16.gmra.mxu0 %v11638_v8  ;;  %6005 = vmatmul.bf16.gmra.mxu3 %v13050_v11  ;;  %v11683_v0 = vld [vmem:[%s15291_s13 + $0x9cc] sm:$0xf0]  ;;  %v11689_v8 = vld [vmem:[%s15291_s13 + $0x9a8] sm:$0xf]  ;;  %v13094_v48 = vor.u32 %v14280_v46, %v13091_v50 }
 0x206   : > { %5845 = vmatmul.bf16.gmra.mxu1 %v11642_v3  ;;  %v13934_v58 = vld [vmem:[%s15291_s13 + $0x9d0] sm:$0xf0] }
 0x207   : > { %6174 = vmatmul.bf16.gmra.mxu2 %v11646_v43  ;;  %v11682_v43 = vor.u32 %v13933_v62, %v11681_v25  ;;  %v14374_v46 = vld [vmem:[#allocation6 + $0x190] sm:$0xff] }
 0x208   : > { %v15733_v60 = vpop.f32.mrf.mxu3  ;;  %v14358_v50 = vld [vmem:[#allocation6 + $0x110] sm:$0xff]  ;;  %7352 = vmatpush.bf16.msrb.mxu2 %v14374_v46 }
 0x209   : > { %6694 = vmatpush.bf16.msrb.mxu0 %v14358_v50 }
 0x20a   : > { %v6135_v6 = vpop.f32.mrf.mxu2  ;;  %v5479_v21 = vpop.f32.mrf.mxu0 }
 0x20b   : > { %v15735_v24 = vadd.f32 %v6135_v6, %v5807_v38  ;;  %v5808_v9 = vpop.f32.mrf.mxu1  ;;  %v11686_v6 = vor.u32 %v13928_v40, %v11683_v0  ;;  %v14366_v0 = vld [vmem:[#allocation6 + $0x150] sm:$0xff] }
 0x20c   : > { %v5809_v28 = vadd.f32 %v5808_v9, %v5479_v21  ;;  %7023 = vmatpush.bf16.msrb.mxu1 %v14366_v0 }
 0x20d   : > { %18169 = vst [vmem:[#allocation64_spill] sm:$0xff] %v15735_v24  ;;  %v11690_v24 = vor.u32 %v13934_v58, %v11689_v8  ;;  %v11725_v8 = vld [vmem:[%s15291_s13 + $0x9f8] sm:$0xf] }
 0x210   : > { %v15745_v11 = vpop.f32.mrf.mxu3 }
 0x212   : > { %v6137_v3 = vpop.f32.mrf.mxu2  ;;  %v5482_v38 = vpop.f32.mrf.mxu0 }
 0x213   : > { %v15747_v29 = vadd.f32 %v6137_v3, %v5809_v28  ;;  %v5811_v21 = vpop.f32.mrf.mxu1  ;;  %v13944_v3 = vld [vmem:[%s15291_s13 + $0xa20] sm:$0xf0] }
 0x214   : > { %v5812_v9 = vadd.f32 %v5811_v21, %v5482_v38  ;;  %v13135_v38 = vld [vmem:[%s15291_s13 + $0x1524] sm:$0xf0]  ;;  %v13945_v21 = vld [vmem:[%s15291_s13 + $0xa28] sm:$0xf0] }
 0x215   : > { %18170 = vst [vmem:[#allocation65_spill] sm:$0xff] %v15747_v29  ;;  %5521 = vmatmul.bf16.gmra.mxu0 %v11682_v43  ;;  %6010 = vmatmul.bf16.gmra.mxu3 %v13094_v48  ;;  %v13939_v48 = vld [vmem:[%s15291_s13 + $0x9fc] sm:$0xf] }
 0x216   : > { %5850 = vmatmul.bf16.gmra.mxu1 %v11686_v6  ;;  %v14291_v43 = vld [vmem:[%s15291_s13 + $0x14fc] sm:$0xf]  ;;  %v11733_v6 = vld [vmem:[%s15291_s13 + $0xa00] sm:$0xf] }
 0x217   : > { %6179 = vmatmul.bf16.gmra.mxu2 %v11690_v24  ;;  %v11727_v24 = vld [vmem:[%s15291_s13 + $0xa24] sm:$0xf0]  ;;  %v13138_v29 = vor.u32 %v14291_v43, %v13135_v38  ;;  %v11734_v55 = vor.u32 %v13945_v21, %v11733_v6  ;;  %v11769_v38 = vld [vmem:[%s15291_s13 + $0xa50] sm:$0xf]  ;;  %v13950_v6 = vld [vmem:[%s15291_s13 + $0xa54] sm:$0xf] }
 0x218   : > { %v15749_v22 = vpop.f32.mrf.mxu3  ;;  %v11730_v63 = vor.u32 %v13939_v48, %v11727_v24  ;;  %v13955_v24 = vld [vmem:[%s15291_s13 + $0xa78] sm:$0xf0]  ;;  %v14302_v21 = vld [vmem:[%s15291_s13 + $0x1554] sm:$0xf] }
 0x21a   : > { %v6140_v25 = vpop.f32.mrf.mxu2  ;;  %v5484_v58 = vpop.f32.mrf.mxu0 }
 0x21b   : > { %v15751_v28 = vadd.f32 %v6140_v25, %v5812_v9  ;;  %v5813_v62 = vpop.f32.mrf.mxu1 }
 0x21c   : > { %v5814_v40 = vadd.f32 %v5813_v62, %v5484_v58 }
 0x21d   : > { %18171 = vst [vmem:[#allocation66_spill] sm:$0xff] %v15751_v28  ;;  %v11726_v28 = vor.u32 %v13944_v3, %v11725_v8 }
 0x220   : > { %v15761_v9 = vpop.f32.mrf.mxu3 }
 0x222   : > { %v6142_v25 = vpop.f32.mrf.mxu2  ;;  %v5487_v62 = vpop.f32.mrf.mxu0 }
 0x223   : > { %v15763_v58 = vadd.f32 %v6142_v25, %v5814_v40  ;;  %v5816_v46 = vpop.f32.mrf.mxu1  ;;  %v13179_v25 = vld [vmem:[%s15291_s13 + $0x157c] sm:$0xf0] }
 0x224   : > { %v5817_v50 = vadd.f32 %v5816_v46, %v5487_v62  ;;  %v11771_v62 = vld [vmem:[%s15291_s13 + $0xa7c] sm:$0xf0]  ;;  %v13956_v46 = vld [vmem:[%s15291_s13 + $0xa80] sm:$0xf0] }
 0x225   : > { %18172 = vst [vmem:[#allocation67_spill] sm:$0xff] %v15763_v58  ;;  %5526 = vmatmul.bf16.gmra.mxu0 %v11726_v28  ;;  %6015 = vmatmul.bf16.gmra.mxu3 %v13138_v29  ;;  %v11777_v28 = vld [vmem:[%s15291_s13 + $0xa58] sm:$0xf]  ;;  %v13182_v58 = vor.u32 %v14302_v21, %v13179_v25 }
 0x226   : > { %5855 = vmatmul.bf16.gmra.mxu1 %v11730_v63 }
 0x227   : > { %6184 = vmatmul.bf16.gmra.mxu2 %v11734_v55  ;;  %v11770_v55 = vor.u32 %v13955_v24, %v11769_v38  ;;  %v14355_v38 = vld [vmem:[#allocation6 + $0xf8] sm:$0xff] }
 0x228   : > { %v15765_v0 = vpop.f32.mrf.mxu3  ;;  %6360 = vmatpush.bf16.msrb.mxu3 %v14355_v38 }
 0x22a   : > { %v6145_v40 = vpop.f32.mrf.mxu2  ;;  %v5489_v3 = vpop.f32.mrf.mxu0 }
 0x22b   : > { %v15767_v8 = vadd.f32 %v6145_v40, %v5817_v50  ;;  %v5818_v48 = vpop.f32.mrf.mxu1  ;;  %v11774_v40 = vor.u32 %v13950_v6, %v11771_v62 }
 0x22c   : > { %v5819_v43 = vadd.f32 %v5818_v48, %v5489_v3 }
 0x22d   : > { %18173 = vst [vmem:[#allocation68_spill] sm:$0xff] %v15767_v8  ;;  %v11778_v8 = vor.u32 %v13956_v46, %v11777_v28  ;;  %v11813_v28 = vld [vmem:[%s15291_s13 + $0xaa8] sm:$0xf]  ;;  %v13966_v46 = vld [vmem:[%s15291_s13 + $0xad0] sm:$0xf0] }
 0x22e   : > { %v11814_v31 = vor.u32 %v13966_v46, %v11813_v28 }
 0x230   : > { %v15777_v29 = vpop.f32.mrf.mxu3 }
 0x232   : > { %v6147_v63 = vpop.f32.mrf.mxu2  ;;  %v5492_v50 = vpop.f32.mrf.mxu0 }
 0x233   : > { %v15779_v39 = vadd.f32 %v6147_v63, %v5819_v43  ;;  %v5821_v3 = vpop.f32.mrf.mxu1  ;;  %v13961_v63 = vld [vmem:[%s15291_s13 + $0xaac] sm:$0xf] }
 0x234   : > { %v5822_v48 = vadd.f32 %v5821_v3, %v5492_v50  ;;  %v11815_v50 = vld [vmem:[%s15291_s13 + $0xad4] sm:$0xf0]  ;;  %v13967_v3 = vld [vmem:[%s15291_s13 + $0xad8] sm:$0xf0] }
 0x235   : > { %18174 = vst [vmem:[#allocation69_spill] sm:$0xff] %v15779_v39  ;;  %5531 = vmatmul.bf16.gmra.mxu0 %v11770_v55  ;;  %6020 = vmatmul.bf16.gmra.mxu3 %v13182_v58  ;;  %v14313_v55 = vld [vmem:[%s15291_s13 + $0x15ac] sm:$0xf]  ;;  %v13223_v58 = vld [vmem:[%s15291_s13 + $0x15d4] sm:$0xf0] }
 0x236   : > { %5860 = vmatmul.bf16.gmra.mxu1 %v11774_v40  ;;  %v11821_v40 = vld [vmem:[%s15291_s13 + $0xab0] sm:$0xf]  ;;  %v13226_v16 = vor.u32 %v14313_v55, %v13223_v58  ;;  %v11857_v58 = vld [vmem:[%s15291_s13 + $0xb00] sm:$0xf] }
 0x237   : > { %6189 = vmatmul.bf16.gmra.mxu2 %v11778_v8 }
 0x238   : > { %v15781_v43 = vpop.f32.mrf.mxu3 }
 0x23a   : > { %v6150_v24 = vpop.f32.mrf.mxu2  ;;  %v5494_v21 = vpop.f32.mrf.mxu0 }
 0x23b   : > { %v15783_v6 = vadd.f32 %v6150_v24, %v5822_v48  ;;  %v5823_v25 = vpop.f32.mrf.mxu1  ;;  %v11818_v24 = vor.u32 %v13961_v63, %v11815_v50  ;;  %v13977_v50 = vld [vmem:[%s15291_s13 + $0xb28] sm:$0xf0] }
 0x23c   : > { %v5824_v62 = vadd.f32 %v5823_v25, %v5494_v21  ;;  %v11822_v21 = vor.u32 %v13967_v3, %v11821_v40  ;;  %v13972_v40 = vld [vmem:[%s15291_s13 + $0xb04] sm:$0xf]  ;;  %v12569_v3 = vld [vmem:[%s15291_s13 + $0x1088] sm:$0xf] }
 0x23d   : > { %18175 = vst [vmem:[#allocation70_spill] sm:$0xff] %v15783_v6 }
 0x240   : > { %v15793_v8 = vpop.f32.mrf.mxu3 }
 0x242   : > { %v6152_v39 = vpop.f32.mrf.mxu2  ;;  %v5497_v48 = vpop.f32.mrf.mxu0 }
 0x243   : > { %v15795_v38 = vadd.f32 %v6152_v39, %v5824_v62  ;;  %v5826_v25 = vpop.f32.mrf.mxu1 }
 0x244   : > { %v5827_v6 = vadd.f32 %v5826_v25, %v5497_v48  ;;  %v14154_v48 = vld [vmem:[%s15291_s13 + $0x10b0] sm:$0xf0]  ;;  %v11859_v25 = vld [vmem:[%s15291_s13 + $0xb2c] sm:$0xf0] }
 0x245   : > { %18176 = vst [vmem:[#allocation71_spill] sm:$0xff] %v15795_v38  ;;  %5536 = vmatmul.bf16.gmra.mxu0 %v11814_v31  ;;  %6025 = vmatmul.bf16.gmra.mxu3 %v13226_v16  ;;  %v11865_v31 = vld [vmem:[%s15291_s13 + $0xb08] sm:$0xf]  ;;  %v13978_v38 = vld [vmem:[%s15291_s13 + $0xb30] sm:$0xf0]  ;;  %v12570_v4 = vor.u32 %v14154_v48, %v12569_v3 }
 0x246   : > { %5865 = vmatmul.bf16.gmra.mxu1 %v11818_v24 }
 0x247   : > { %6194 = vmatmul.bf16.gmra.mxu2 %v11822_v21  ;;  %v11858_v21 = vor.u32 %v13977_v50, %v11857_v58  ;;  %v14354_v58 = vld [vmem:[#allocation6 + $0xf0] sm:$0xff] }
 0x248   : > { %v15797_v28 = vpop.f32.mrf.mxu3  ;;  %6361 = vmatpush.bf16.msrb.mxu3 %v14354_v58 }
 0x24a   : > { %v6155_v39 = vpop.f32.mrf.mxu2  ;;  %v5499_v46 = vpop.f32.mrf.mxu0 }
 0x24b   : > { %v15799_v62 = vadd.f32 %v6155_v39, %v5827_v6  ;;  %v5828_v63 = vpop.f32.mrf.mxu1  ;;  %v11862_v39 = vor.u32 %v13972_v40, %v11859_v25  ;;  %v11901_v25 = vld [vmem:[%s15291_s13 + $0xb58] sm:$0xf] }
 0x24c   : > { %v5829_v55 = vadd.f32 %v5828_v63, %v5499_v46 }
 0x24d   : > { %18177 = vst [vmem:[#allocation72_spill] sm:$0xff] %v15799_v62  ;;  %v11866_v62 = vor.u32 %v13978_v38, %v11865_v31  ;;  %v13988_v31 = vld [vmem:[%s15291_s13 + $0xb80] sm:$0xf0] }
 0x24e   : > { %v11902_v33 = vor.u32 %v13988_v31, %v11901_v25 }
 0x250   : > { %v15809_v16 = vpop.f32.mrf.mxu3 }
 0x252   : > { %v6157_v24 = vpop.f32.mrf.mxu2  ;;  %v5502_v6 = vpop.f32.mrf.mxu0 }
 0x253   : > { %v15811_v19 = vadd.f32 %v6157_v24, %v5829_v55  ;;  %v5831_v46 = vpop.f32.mrf.mxu1  ;;  %v13983_v24 = vld [vmem:[%s15291_s13 + $0xb5c] sm:$0xf] }
 0x254   : > { %v5832_v63 = vadd.f32 %v5831_v46, %v5502_v6  ;;  %v11903_v6 = vld [vmem:[%s15291_s13 + $0xb84] sm:$0xf0]  ;;  %v13989_v46 = vld [vmem:[%s15291_s13 + $0xb88] sm:$0xf0] }
 0x255   : > { %18178 = vst [vmem:[#allocation73_spill] sm:$0xff] %v15811_v19  ;;  %5541 = vmatmul.bf16.gmra.mxu0 %v11858_v21  ;;  %6279 = vmatmul.bf16.vlgmr.msra.gmra.mxu3 %v12570_v4  ;;  %v12613_v21 = vld [vmem:[%s15291_s13 + $0x10e0] sm:$0xf]  ;;  %v14165_v4 = vld [vmem:[%s15291_s13 + $0x1108] sm:$0xf0] }
 0x256   : > { %5870 = vmatmul.bf16.gmra.mxu1 %v11862_v39  ;;  %v11909_v39 = vld [vmem:[%s15291_s13 + $0xb60] sm:$0xf]  ;;  %v12614_v49 = vor.u32 %v14165_v4, %v12613_v21  ;;  %v11945_v4 = vld [vmem:[%s15291_s13 + $0xbb0] sm:$0xf] }
 0x257   : > { %6199 = vmatmul.bf16.gmra.mxu2 %v11866_v62 }
 0x258   : > { %v15813_v55 = vpop.f32.mrf.mxu3 }
 0x25a   : > { %v6160_v50 = vpop.f32.mrf.mxu2  ;;  %v5504_v38 = vpop.f32.mrf.mxu0 }
 0x25b   : > { %v15815_v40 = vadd.f32 %v6160_v50, %v5832_v63  ;;  %v5833_v3 = vpop.f32.mrf.mxu1  ;;  %v11906_v50 = vor.u32 %v13983_v24, %v11903_v6  ;;  %v13999_v6 = vld [vmem:[%s15291_s13 + $0xbd8] sm:$0xf0] }
 0x25c   : > { %v5834_v48 = vadd.f32 %v5833_v3, %v5504_v38  ;;  %v11910_v38 = vor.u32 %v13989_v46, %v11909_v39  ;;  %v13994_v39 = vld [vmem:[%s15291_s13 + $0xbb4] sm:$0xf]  ;;  %v12657_v46 = vld [vmem:[%s15291_s13 + $0x1138] sm:$0xf] }
 0x25d   : > { %18179 = vst [vmem:[#allocation74_spill] sm:$0xff] %v15815_v40 }
 0x260   : > { %v15825_v62 = vpop.f32.mrf.mxu3 }
 0x262   : > { %v6162_v19 = vpop.f32.mrf.mxu2  ;;  %v5507_v63 = vpop.f32.mrf.mxu0 }
 0x263   : > { %v15827_v58 = vadd.f32 %v6162_v19, %v5834_v48  ;;  %v5836_v3 = vpop.f32.mrf.mxu1 }
 0x264   : > { %v5837_v40 = vadd.f32 %v5836_v3, %v5507_v63  ;;  %v14176_v63 = vld [vmem:[%s15291_s13 + $0x1160] sm:$0xf0]  ;;  %v11947_v3 = vld [vmem:[%s15291_s13 + $0xbdc] sm:$0xf0] }
 0x265   : > { %18180 = vst [vmem:[#allocation75_spill] sm:$0xff] %v15827_v58  ;;  %5546 = vmatmul.bf16.gmra.mxu0 %v11902_v33  ;;  %6284 = vmatmul.bf16.gmra.mxu3 %v12614_v49  ;;  %v11953_v33 = vld [vmem:[%s15291_s13 + $0xbb8] sm:$0xf]  ;;  %v14000_v58 = vld [vmem:[%s15291_s13 + $0xbe0] sm:$0xf0]  ;;  %v12658_v36 = vor.u32 %v14176_v63, %v12657_v46  ;;  %v14365_v46 = vld [vmem:[#allocation6 + $0x148] sm:$0xff] }
 0x266   : > { %5875 = vmatmul.bf16.gmra.mxu1 %v11906_v50  ;;  %v11989_v63 = vld [vmem:[%s15291_s13 + $0xc08] sm:$0xf] }
 0x267   : > { %6204 = vmatmul.bf16.gmra.mxu2 %v11910_v38  ;;  %v11946_v38 = vor.u32 %v13999_v6, %v11945_v4  ;;  %7024 = vmatpush.bf16.msrb.mxu1 %v14365_v46 }
 0x268   : > { %v15829_v25 = vpop.f32.mrf.mxu3 }
 0x26a   : > { %v6165_v19 = vpop.f32.mrf.mxu2  ;;  %v5509_v31 = vpop.f32.mrf.mxu0 }
 0x26b   : > { %v15831_v48 = vadd.f32 %v6165_v19, %v5837_v40  ;;  %v5838_v24 = vpop.f32.mrf.mxu1  ;;  %v11950_v19 = vor.u32 %v13994_v39, %v11947_v3  ;;  %v14373_v39 = vld [vmem:[#allocation6 + $0x188] sm:$0xff]  ;;  %v14010_v3 = vld [vmem:[%s15291_s13 + $0xc30] sm:$0xf0] }
 0x26c   : > { %v5839_v21 = vadd.f32 %v5838_v24, %v5509_v31  ;;  %v14353_v24 = vld [vmem:[#allocation6 + $0xe8] sm:$0xff]  ;;  %7353 = vmatpush.bf16.msrb.mxu2 %v14373_v39 }
 0x26d   : > { %18181 = vst [vmem:[#allocation76_spill] sm:$0xff] %v15831_v48  ;;  %v11954_v48 = vor.u32 %v14000_v58, %v11953_v33  ;;  %6362 = vmatpush.bf16.msrb.mxu3 %v14353_v24  ;;  %v12701_v33 = vld [vmem:[%s15291_s13 + $0x1190] sm:$0xf] }
 0x270   : > { %v15841_v49 = vpop.f32.mrf.mxu3 }
 0x272   : > { %v6167_v50 = vpop.f32.mrf.mxu2  ;;  %v5512_v40 = vpop.f32.mrf.mxu0 }
 0x273   : > { %v15843_v20 = vadd.f32 %v6167_v50, %v5839_v21  ;;  %v5841_v45 = vpop.f32.mrf.mxu1  ;;  %v14187_v50 = vld [vmem:[%s15291_s13 + $0x11b8] sm:$0xf0] }
 0x274   : > { %v5842_v31 = vadd.f32 %v5841_v45, %v5512_v40  ;;  %v11997_v40 = vld [vmem:[%s15291_s13 + $0xc10] sm:$0xf] }
 0x275   : > { %18182 = vst [vmem:[#allocation77_spill] sm:$0xff] %v15843_v20  ;;  %5551 = vmatmul.bf16.gmra.mxu0 %v11946_v38  ;;  %6289 = vmatmul.bf16.gmra.mxu3 %v12658_v36  ;;  %v14357_v36 = vld [vmem:[#allocation6 + $0x108] sm:$0xff]  ;;  %v11991_v38 = vld [vmem:[%s15291_s13 + $0xc34] sm:$0xf0] }
 0x276   : > { %5880 = vmatmul.bf16.gmra.mxu1 %v11950_v19  ;;  %6695 = vmatpush.bf16.msrb.mxu0 %v14357_v36  ;;  %v14011_v19 = vld [vmem:[%s15291_s13 + $0xc38] sm:$0xf0] }
 0x277   : > { %6209 = vmatmul.bf16.gmra.mxu2 %v11954_v48  ;;  %v14005_v48 = vld [vmem:[%s15291_s13 + $0xc0c] sm:$0xf]  ;;  %v11998_v35 = vor.u32 %v14011_v19, %v11997_v40  ;;  %v14016_v40 = vld [vmem:[%s15291_s13 + $0xc64] sm:$0xf]  ;;  %v12745_v19 = vld [vmem:[%s15291_s13 + $0x11e8] sm:$0xf] }
 0x278   : > { %v15845_v10 = vpop.f32.mrf.mxu3  ;;  %v11994_v20 = vor.u32 %v14005_v48, %v11991_v38  ;;  %v14021_v38 = vld [vmem:[%s15291_s13 + $0xc88] sm:$0xf0] }
 0x27a   : > { %v6170_v21 = vpop.f32.mrf.mxu2  ;;  %v5514_v45 = vpop.f32.mrf.mxu0 }
 0x27b   : > { %v15847_v4 = vadd.f32 %v6170_v21, %v5842_v31  ;;  %v5843_v58 = vpop.f32.mrf.mxu1  ;;  %v11990_v21 = vor.u32 %v14010_v3, %v11989_v63 }
 0x27c   : > { %v5844_v6 = vadd.f32 %v5843_v58, %v5514_v45 }
 0x27d   : > { %18183 = vst [vmem:[#allocation78_spill] sm:$0xff] %v15847_v4  ;;  %v12702_v4 = vor.u32 %v14187_v50, %v12701_v33  ;;  %v12033_v50 = vld [vmem:[%s15291_s13 + $0xc60] sm:$0xf] }
 0x280   : > { %v15857_v31 = vpop.f32.mrf.mxu3 }
 0x282   : > { %v6172_v24 = vpop.f32.mrf.mxu2  ;;  %v5517_v58 = vpop.f32.mrf.mxu0 }
 0x283   : > { %v15859_v45 = vadd.f32 %v6172_v24, %v5844_v6  ;;  %v5846_v39 = vpop.f32.mrf.mxu1  ;;  %v14198_v24 = vld [vmem:[%s15291_s13 + $0x1210] sm:$0xf0] }
 0x284   : > { %v5847_v36 = vadd.f32 %v5846_v39, %v5517_v58  ;;  %v12035_v58 = vld [vmem:[%s15291_s13 + $0xc8c] sm:$0xf0]  ;;  %v14022_v39 = vld [vmem:[%s15291_s13 + $0xc90] sm:$0xf0] }
 0x285   : > { %18184 = vst [vmem:[#allocation79_spill] sm:$0xff] %v15859_v45  ;;  %5556 = vmatmul.bf16.gmra.mxu0 %v11990_v21  ;;  %6294 = vmatmul.bf16.gmra.mxu3 %v12702_v4  ;;  %v12041_v21 = vld [vmem:[%s15291_s13 + $0xc68] sm:$0xf]  ;;  %v12746_v45 = vor.u32 %v14198_v24, %v12745_v19 }
 0x286   : > { %5885 = vmatmul.bf16.gmra.mxu1 %v11994_v20 }
 0x287   : > { %6214 = vmatmul.bf16.gmra.mxu2 %v11998_v35  ;;  %v12034_v35 = vor.u32 %v14021_v38, %v12033_v50  ;;  %v14352_v50 = vld [vmem:[#allocation6 + $0xe0] sm:$0xff] }
 0x288   : > { %v15861_v46 = vpop.f32.mrf.mxu3  ;;  %6363 = vmatpush.bf16.msrb.mxu3 %v14352_v50 }
 0x289   : > { %18185 = vst [vmem:[#allocation80_spill] sm:$0xff] %v15861_v46 }
 0x28a   : > { %v6175_v6 = vpop.f32.mrf.mxu2  ;;  %v5519_v3 = vpop.f32.mrf.mxu0 }
 0x28b   : > { %v15863_v63 = vadd.f32 %v6175_v6, %v5847_v36  ;;  %v5848_v48 = vpop.f32.mrf.mxu1  ;;  %v12038_v6 = vor.u32 %v14016_v40, %v12035_v58 }
 0x28c   : > { %v5849_v33 = vadd.f32 %v5848_v48, %v5519_v3 }
 0x28d   : > { %18186 = vst [vmem:[#allocation81_spill] sm:$0xff] %v15863_v63  ;;  %v12042_v63 = vor.u32 %v14022_v39, %v12041_v21  ;;  %v12077_v21 = vld [vmem:[%s15291_s13 + $0xcb8] sm:$0xf]  ;;  %v14032_v39 = vld [vmem:[%s15291_s13 + $0xce0] sm:$0xf0] }
 0x290   : > { %v15873_v4 = vpop.f32.mrf.mxu3 }
 0x291   : > { %18187 = vst [vmem:[#allocation82_spill] sm:$0xff] %v15873_v4  ;;  %v12078_v4 = vor.u32 %v14032_v39, %v12077_v21 }
 0x292   : > { %v6177_v20 = vpop.f32.mrf.mxu2  ;;  %v5522_v36 = vpop.f32.mrf.mxu0 }
 0x293   : > { %v15875_v46 = vadd.f32 %v6177_v20, %v5849_v33  ;;  %v5851_v3 = vpop.f32.mrf.mxu1  ;;  %v14027_v20 = vld [vmem:[%s15291_s13 + $0xcbc] sm:$0xf] }
 0x294   : > { %v5852_v48 = vadd.f32 %v5851_v3, %v5522_v36  ;;  %v12079_v36 = vld [vmem:[%s15291_s13 + $0xce4] sm:$0xf0]  ;;  %v14033_v3 = vld [vmem:[%s15291_s13 + $0xce8] sm:$0xf0] }
 0x295   : > { %18188 = vst [vmem:[#allocation83_spill] sm:$0xff] %v15875_v46  ;;  %5561 = vmatmul.bf16.gmra.mxu0 %v12034_v35  ;;  %6299 = vmatmul.bf16.gmra.mxu3 %v12746_v45  ;;  %v12789_v35 = vld [vmem:[%s15291_s13 + $0x1240] sm:$0xf]  ;;  %v14209_v45 = vld [vmem:[%s15291_s13 + $0x1268] sm:$0xf0] }
 0x296   : > { %5890 = vmatmul.bf16.gmra.mxu1 %v12038_v6  ;;  %v12085_v6 = vld [vmem:[%s15291_s13 + $0xcc0] sm:$0xf] }
 0x297   : > { %6219 = vmatmul.bf16.gmra.mxu2 %v12042_v63 }
 0x298   : > { %v15877_v33 = vpop.f32.mrf.mxu3 }
 0x299   : > { %18189 = vst [vmem:[#allocation84_spill] sm:$0xff] %v15877_v33  ;;  %v12790_v33 = vor.u32 %v14209_v45, %v12789_v35  ;;  %v12121_v45 = vld [vmem:[%s15291_s13 + $0xd10] sm:$0xf] }
 0x29a   : > { %v6180_v38 = vpop.f32.mrf.mxu2  ;;  %v5524_v19 = vpop.f32.mrf.mxu0 }
 0x29b   : > { %v15879_v40 = vadd.f32 %v6180_v38, %v5852_v48  ;;  %v5853_v24 = vpop.f32.mrf.mxu1  ;;  %v12082_v38 = vor.u32 %v14027_v20, %v12079_v36  ;;  %v14043_v36 = vld [vmem:[%s15291_s13 + $0xd38] sm:$0xf0] }
 0x29c   : > { %v5854_v58 = vadd.f32 %v5853_v24, %v5524_v19  ;;  %v12086_v19 = vor.u32 %v14033_v3, %v12085_v6  ;;  %v14038_v6 = vld [vmem:[%s15291_s13 + $0xd14] sm:$0xf]  ;;  %v12833_v3 = vld [vmem:[%s15291_s13 + $0x1298] sm:$0xf] }
 0x29d   : > { %18190 = vst [vmem:[#allocation85_spill] sm:$0xff] %v15879_v40 }
 0x2a0   : > { %v15889_v63 = vpop.f32.mrf.mxu3 }
 0x2a1   : > { %18191 = vst [vmem:[#allocation86_spill] sm:$0xff] %v15889_v63 }
 0x2a2   : > { %v6182_v46 = vpop.f32.mrf.mxu2  ;;  %v5527_v48 = vpop.f32.mrf.mxu0 }
 0x2a3   : > { %v15891_v50 = vadd.f32 %v6182_v46, %v5854_v58  ;;  %v5856_v24 = vpop.f32.mrf.mxu1 }
 0x2a4   : > { %v5857_v40 = vadd.f32 %v5856_v24, %v5527_v48  ;;  %v14220_v48 = vld [vmem:[%s15291_s13 + $0x12c0] sm:$0xf0]  ;;  %v12123_v24 = vld [vmem:[%s15291_s13 + $0xd3c] sm:$0xf0] }
 0x2a5   : > { %18192 = vst [vmem:[#allocation87_spill] sm:$0xff] %v15891_v50  ;;  %5566 = vmatmul.bf16.gmra.mxu0 %v12078_v4  ;;  %6304 = vmatmul.bf16.gmra.mxu3 %v12790_v33  ;;  %v12129_v4 = vld [vmem:[%s15291_s13 + $0xd18] sm:$0xf]  ;;  %v14044_v50 = vld [vmem:[%s15291_s13 + $0xd40] sm:$0xf0]  ;;  %v12834_v63 = vor.u32 %v14220_v48, %v12833_v3 }
 0x2a6   : > { %5895 = vmatmul.bf16.gmra.mxu1 %v12082_v38 }
 0x2a7   : > { %6224 = vmatmul.bf16.gmra.mxu2 %v12086_v19  ;;  %v12122_v19 = vor.u32 %v14043_v36, %v12121_v45  ;;  %v14351_v45 = vld [vmem:[#allocation6 + $0xd8] sm:$0xff] }
 0x2a8   : > { %v15893_v21 = vpop.f32.mrf.mxu3  ;;  %6364 = vmatpush.bf16.msrb.mxu3 %v14351_v45 }
 0x2a9   : > { %18193 = vst [vmem:[#allocation88_spill] sm:$0xff] %v15893_v21 }
 0x2aa   : > { %v6185_v46 = vpop.f32.mrf.mxu2  ;;  %v5529_v39 = vpop.f32.mrf.mxu0 }
 0x2ab   : > { %v15895_v58 = vadd.f32 %v6185_v46, %v5857_v40  ;;  %v5858_v20 = vpop.f32.mrf.mxu1  ;;  %v12126_v46 = vor.u32 %v14038_v6, %v12123_v24  ;;  %v12165_v24 = vld [vmem:[%s15291_s13 + $0xd68] sm:$0xf] }
 0x2ac   : > { %v5859_v35 = vadd.f32 %v5858_v20, %v5529_v39 }
 0x2ad   : > { %18194 = vst [vmem:[#allocation89_spill] sm:$0xff] %v15895_v58  ;;  %v12130_v58 = vor.u32 %v14044_v50, %v12129_v4  ;;  %v14054_v4 = vld [vmem:[%s15291_s13 + $0xd90] sm:$0xf0] }
 0x2b0   : > { %v15905_v33 = vpop.f32.mrf.mxu3 }
 0x2b1   : > { %18195 = vst [vmem:[#allocation90_spill] sm:$0xff] %v15905_v33  ;;  %v12166_v33 = vor.u32 %v14054_v4, %v12165_v24 }
 0x2b2   : > { %v6187_v38 = vpop.f32.mrf.mxu2  ;;  %v5532_v40 = vpop.f32.mrf.mxu0 }
 0x2b3   : > { %v15907_v21 = vadd.f32 %v6187_v38, %v5859_v35  ;;  %v5861_v39 = vpop.f32.mrf.mxu1  ;;  %v14049_v38 = vld [vmem:[%s15291_s13 + $0xd6c] sm:$0xf] }
 0x2b4   : > { %v5862_v20 = vadd.f32 %v5861_v39, %v5532_v40  ;;  %v12167_v40 = vld [vmem:[%s15291_s13 + $0xd94] sm:$0xf0]  ;;  %v14055_v39 = vld [vmem:[%s15291_s13 + $0xd98] sm:$0xf0] }
 0x2b5   : > { %18196 = vst [vmem:[#allocation91_spill] sm:$0xff] %v15907_v21  ;;  %5571 = vmatmul.bf16.gmra.mxu0 %v12122_v19  ;;  %6309 = vmatmul.bf16.gmra.mxu3 %v12834_v63  ;;  %v12877_v19 = vld [vmem:[%s15291_s13 + $0x12f0] sm:$0xf]  ;;  %v14231_v63 = vld [vmem:[%s15291_s13 + $0x1318] sm:$0xf0] }
 0x2b6   : > { %5900 = vmatmul.bf16.gmra.mxu1 %v12126_v46  ;;  %v12173_v46 = vld [vmem:[%s15291_s13 + $0xd70] sm:$0xf] }
 0x2b7   : > { %6229 = vmatmul.bf16.gmra.mxu2 %v12130_v58 }
 0x2b8   : > { %v15909_v35 = vpop.f32.mrf.mxu3 }
 0x2b9   : > { %18197 = vst [vmem:[#allocation92_spill] sm:$0xff] %v15909_v35  ;;  %v12878_v35 = vor.u32 %v14231_v63, %v12877_v19  ;;  %v12209_v63 = vld [vmem:[%s15291_s13 + $0xdc0] sm:$0xf] }
 0x2ba   : > { %v6190_v36 = vpop.f32.mrf.mxu2  ;;  %v5534_v50 = vpop.f32.mrf.mxu0 }
 0x2bb   : > { %v15911_v6 = vadd.f32 %v6190_v36, %v5862_v20  ;;  %v5863_v3 = vpop.f32.mrf.mxu1  ;;  %v12170_v36 = vor.u32 %v14049_v38, %v12167_v40  ;;  %v14065_v40 = vld [vmem:[%s15291_s13 + $0xde8] sm:$0xf0] }
 0x2bc   : > { %v5864_v48 = vadd.f32 %v5863_v3, %v5534_v50  ;;  %v12174_v50 = vor.u32 %v14055_v39, %v12173_v46  ;;  %v14060_v46 = vld [vmem:[%s15291_s13 + $0xdc4] sm:$0xf]  ;;  %v12921_v39 = vld [vmem:[%s15291_s13 + $0x1348] sm:$0xf] }
 0x2bd   : > { %18198 = vst [vmem:[#allocation93_spill] sm:$0xff] %v15911_v6 }
 0x2c0   : > { %v15921_v58 = vpop.f32.mrf.mxu3 }
 0x2c1   : > { %18199 = vst [vmem:[#allocation94_spill] sm:$0xff] %v15921_v58 }
 0x2c2   : > { %v6192_v21 = vpop.f32.mrf.mxu2  ;;  %v5537_v20 = vpop.f32.mrf.mxu0 }
 0x2c3   : > { %v15923_v45 = vadd.f32 %v6192_v21, %v5864_v48  ;;  %v5866_v3 = vpop.f32.mrf.mxu1 }
 0x2c4   : > { %v5867_v6 = vadd.f32 %v5866_v3, %v5537_v20  ;;  %v14242_v20 = vld [vmem:[%s15291_s13 + $0x1370] sm:$0xf0]  ;;  %v12211_v3 = vld [vmem:[%s15291_s13 + $0xdec] sm:$0xf0] }
 0x2c5   : > { %18200 = vst [vmem:[#allocation95_spill] sm:$0xff] %v15923_v45  ;;  %5576 = vmatmul.bf16.gmra.mxu0 %v12166_v33  ;;  %6314 = vmatmul.bf16.gmra.mxu3 %v12878_v35  ;;  %v12217_v33 = vld [vmem:[%s15291_s13 + $0xdc8] sm:$0xf]  ;;  %v14066_v45 = vld [vmem:[%s15291_s13 + $0xdf0] sm:$0xf0]  ;;  %v12922_v58 = vor.u32 %v14242_v20, %v12921_v39  ;;  %v14372_v39 = vld [vmem:[#allocation6 + $0x180] sm:$0xff] }
 0x2c6   : > { %5905 = vmatmul.bf16.gmra.mxu1 %v12170_v36  ;;  %v14356_v20 = vld [vmem:[#allocation6 + $0x100] sm:$0xff]  ;;  %7354 = vmatpush.bf16.msrb.mxu2 %v14372_v39 }
 0x2c7   : > { %6234 = vmatmul.bf16.gmra.mxu2 %v12174_v50  ;;  %v12210_v50 = vor.u32 %v14065_v40, %v12209_v63  ;;  %v5952_v63 = vadd.f32 %v15685_v15, %v15429_v13  ;;  %v14071_v13 = vld [vmem:[%s15291_s13 + $0xe1c] sm:$0xf]  ;;  %v12965_v15 = vld [vmem:[%s15291_s13 + $0x13a0] sm:$0xf]  ;;  %6696 = vmatpush.bf16.msrb.mxu0 %v14356_v20 }
 0x2c8   : > { %v15925_v24 = vpop.f32.mrf.mxu3 }
 0x2c9   : > { %18201 = vst [vmem:[#allocation96_spill] sm:$0xff] %v15925_v24 }
 0x2ca   : > { %v6195_v21 = vpop.f32.mrf.mxu2  ;;  %v5539_v4 = vpop.f32.mrf.mxu0 }
 0x2cb   : > { %v15927_v48 = vadd.f32 %v6195_v21, %v5867_v6  ;;  %v5868_v38 = vpop.f32.mrf.mxu1  ;;  %v12214_v21 = vor.u32 %v14060_v46, %v12211_v3  ;;  %v14364_v3 = vld [vmem:[#allocation6 + $0x140] sm:$0xff] }
 0x2cc   : > { %v5869_v19 = vadd.f32 %v5868_v38, %v5539_v4  ;;  %v14350_v38 = vld [vmem:[#allocation6 + $0xd0] sm:$0xff]  ;;  %7025 = vmatpush.bf16.msrb.mxu1 %v14364_v3 }
 0x2cd   : > { %18202 = vst [vmem:[#allocation97_spill] sm:$0xff] %v15927_v48  ;;  %v12218_v48 = vor.u32 %v14066_v45, %v12217_v33  ;;  %6365 = vmatpush.bf16.msrb.mxu3 %v14350_v38  ;;  %v12253_v33 = vld [vmem:[%s15291_s13 + $0xe18] sm:$0xf]  ;;  %v14077_v38 = vld [vmem:[%s15291_s13 + $0xe48] sm:$0xf0] }
 0x2d0   : > { %v15937_v35 = vpop.f32.mrf.mxu3 }
 0x2d2   : > { %v6197_v36 = vpop.f32.mrf.mxu2  ;;  %v5542_v6 = vpop.f32.mrf.mxu0 }
 0x2d3   : > { %v15939_v24 = vadd.f32 %v6197_v36, %v5869_v19  ;;  %v5871_v54 = vpop.f32.mrf.mxu1  ;;  %v14076_v36 = vld [vmem:[%s15291_s13 + $0xe40] sm:$0xf0] }
 0x2d4   : > { %v5872_v4 = vadd.f32 %v5871_v54, %v5542_v6  ;;  %v5954_v6 = vadd.f32 %v15697_v59, %v15441_v27  ;;  %v5957_v59 = vadd.f32 %v15701_v2, %v15445_v37  ;;  %v12305_v37 = vld [vmem:[%s15291_s13 + $0xe78] sm:$0xf]  ;;  %v14088_v2 = vld [vmem:[%s15291_s13 + $0xea0] sm:$0xf0] }
 0x2d5   : > { %18203 = vst [vmem:[#allocation98_spill] sm:$0xff] %v15939_v24  ;;  %5581 = vmatmul.bf16.gmra.mxu0 %v12210_v50  ;;  %6319 = vmatmul.bf16.gmra.mxu3 %v12922_v58  ;;  %v14253_v50 = vld [vmem:[%s15291_s13 + $0x13c8] sm:$0xf0] }
 0x2d6   : > { %5910 = vmatmul.bf16.gmra.mxu1 %v12214_v21  ;;  %v12255_v21 = vld [vmem:[%s15291_s13 + $0xe44] sm:$0xf0] }
 0x2d7   : > { %6239 = vmatmul.bf16.gmra.mxu2 %v12218_v48  ;;  %v12258_v24 = vor.u32 %v14071_v13, %v12255_v21  ;;  %v14082_v21 = vld [vmem:[%s15291_s13 + $0xe74] sm:$0xf] }
 0x2d8   : > { %v6280_v19 = vpop.f32.mrf.mxu3 }
 0x2d9   : > { %v15943_v46 = vadd.f32 %v6280_v19, %v5952_v63 }
 0x2da   : > { %v6200_v40 = vpop.f32.mrf.mxu2  ;;  %v5544_v58 = vpop.f32.mrf.mxu0 }
 0x2db   : > { %18204 = vst [vmem:[#allocation99_spill] sm:$0xff] %v15943_v46  ;;  %v15945_v54 = vadd.f32 %v6200_v40, %v5872_v4  ;;  %v5873_v45 = vpop.f32.mrf.mxu1  ;;  %v12261_v4 = vld [vmem:[%s15291_s13 + $0xe20] sm:$0xf] }
 0x2dc   : > { %v5874_v48 = vadd.f32 %v5873_v45, %v5544_v58  ;;  %v12254_v58 = vor.u32 %v14076_v36, %v12253_v33  ;;  %v12966_v45 = vor.u32 %v14253_v50, %v12965_v15  ;;  %v12262_v39 = vor.u32 %v14077_v38, %v12261_v4  ;;  %v12297_v50 = vld [vmem:[%s15291_s13 + $0xe70] sm:$0xf]  ;;  %v14264_v4 = vld [vmem:[%s15291_s13 + $0x1420] sm:$0xf0] }
 0x2dd   : > { %18205 = vst [vmem:[#allocation100_spill] sm:$0xff] %v15945_v54  ;;  %v5959_v38 = vadd.f32 %v15713_v14, %v15457_v51  ;;  %v14349_v51 = vld [vmem:[#allocation6 + $0xc8] sm:$0xff]  ;;  %v5962_v14 = vadd.f32 %v15717_v34, %v15461_v61  ;;  %v5964_v61 = vadd.f32 %v15729_v47, %v15473_v18  ;;  %v12343_v34 = vld [vmem:[%s15291_s13 + $0xef4] sm:$0xf0]  ;;  %v5967_v18 = vadd.f32 %v15733_v60, %v15477_v23  ;;  %v14110_v60 = vld [vmem:[%s15291_s13 + $0xf50] sm:$0xf0] }
 0x2de   : > { %6366 = vmatpush.bf16.msrb.mxu3 %v14349_v51  ;;  %v12393_v23 = vld [vmem:[%s15291_s13 + $0xf28] sm:$0xf] }
 0x2e0   : > { %v6282_v63 = vpop.f32.mrf.mxu3 }
 0x2e1   : > { %v15957_v40 = vadd.f32 %v6282_v63, %v5954_v6  ;;  %v14087_v6 = vld [vmem:[%s15291_s13 + $0xe98] sm:$0xf0]  ;;  %v12299_v63 = vld [vmem:[%s15291_s13 + $0xe9c] sm:$0xf0] }
 0x2e2   : > { %v6202_v19 = vpop.f32.mrf.mxu2  ;;  %v5547_v54 = vpop.f32.mrf.mxu0 }
 0x2e3   : > { %v15959_v46 = vadd.f32 %v6202_v19, %v5874_v48  ;;  %v5876_v20 = vpop.f32.mrf.mxu1 }
 0x2e4   : > { %v5877_v27 = vadd.f32 %v5876_v20, %v5547_v54 }
 0x2e5   : > { %5586 = vmatmul.bf16.gmra.mxu0 %v12254_v58  ;;  %6324 = vmatmul.bf16.gmra.mxu3 %v12966_v45 }
 0x2e6   : > { %5915 = vmatmul.bf16.gmra.mxu1 %v12258_v24  ;;  %v13009_v24 = vld [vmem:[%s15291_s13 + $0x13f8] sm:$0xf] }
 0x2e7   : > { %6244 = vmatmul.bf16.gmra.mxu2 %v12262_v39  ;;  %v12298_v39 = vor.u32 %v14087_v6, %v12297_v50  ;;  %v13010_v20 = vor.u32 %v14264_v4, %v13009_v24 }
 0x2e8   : > { %v6285_v48 = vpop.f32.mrf.mxu3 }
 0x2e9   : > { %v15963_v33 = vadd.f32 %v6285_v48, %v5957_v59  ;;  %v12302_v48 = vor.u32 %v14082_v21, %v12299_v63  ;;  %v12341_v63 = vld [vmem:[%s15291_s13 + $0xec8] sm:$0xf] }
 0x2ea   : > { %v6205_v3 = vpop.f32.mrf.mxu2  ;;  %v5549_v13 = vpop.f32.mrf.mxu0 }
 0x2eb   : > { %v15965_v36 = vadd.f32 %v6205_v3, %v5877_v27  ;;  %v5878_v54 = vpop.f32.mrf.mxu1  ;;  %v12306_v3 = vor.u32 %v14088_v2, %v12305_v37  ;;  %v14098_v37 = vld [vmem:[%s15291_s13 + $0xef0] sm:$0xf0]  ;;  %v14093_v2 = vld [vmem:[%s15291_s13 + $0xecc] sm:$0xf] }
 0x2ec   : > { %v5879_v15 = vadd.f32 %v5878_v54, %v5549_v13 }
 0x2f0   : > { %v6287_v19 = vpop.f32.mrf.mxu3 }
 0x2f1   : > { %v15977_v45 = vadd.f32 %v6287_v19, %v5959_v38  ;;  %v13053_v19 = vld [vmem:[%s15291_s13 + $0x1450] sm:$0xf] }
 0x2f2   : > { %v6207_v58 = vpop.f32.mrf.mxu2  ;;  %v5552_v59 = vpop.f32.mrf.mxu0 }
 0x2f3   : > { %v15979_v27 = vadd.f32 %v6207_v58, %v5879_v15  ;;  %v5881_v13 = vpop.f32.mrf.mxu1  ;;  %v14275_v58 = vld [vmem:[%s15291_s13 + $0x1478] sm:$0xf0] }
 0x2f4   : > { %v5882_v54 = vadd.f32 %v5881_v13, %v5552_v59  ;;  %v12342_v13 = vor.u32 %v14098_v37, %v12341_v63 }
 0x2f5   : > { %5591 = vmatmul.bf16.gmra.mxu0 %v12298_v39  ;;  %6329 = vmatmul.bf16.gmra.mxu3 %v13010_v20  ;;  %v12349_v39 = vld [vmem:[%s15291_s13 + $0xed0] sm:$0xf]  ;;  %v14099_v20 = vld [vmem:[%s15291_s13 + $0xef8] sm:$0xf0] }
 0x2f6   : > { %5920 = vmatmul.bf16.gmra.mxu1 %v12302_v48 }
 0x2f7   : > { %6249 = vmatmul.bf16.gmra.mxu2 %v12306_v3 }
 0x2f8   : > { %v6290_v15 = vpop.f32.mrf.mxu3 }
 0x2f9   : > { %v15983_v6 = vadd.f32 %v6290_v15, %v5962_v14  ;;  %v12346_v15 = vor.u32 %v14093_v2, %v12343_v34  ;;  %v14109_v34 = vld [vmem:[%s15291_s13 + $0xf48] sm:$0xf0] }
 0x2fa   : > { %v6210_v50 = vpop.f32.mrf.mxu2  ;;  %v5554_v24 = vpop.f32.mrf.mxu0 }
 0x2fb   : > { %v15985_v21 = vadd.f32 %v6210_v50, %v5882_v54  ;;  %v5883_v4 = vpop.f32.mrf.mxu1  ;;  %v13054_v54 = vor.u32 %v14275_v58, %v13053_v19  ;;  %v12350_v50 = vor.u32 %v14099_v20, %v12349_v39  ;;  %v14104_v39 = vld [vmem:[%s15291_s13 + $0xf24] sm:$0xf]  ;;  %v13097_v20 = vld [vmem:[%s15291_s13 + $0x14a8] sm:$0xf] }
 0x2fc   : > { %v5884_v38 = vadd.f32 %v5883_v4, %v5554_v24 }
 0x300   : > { %v6292_v59 = vpop.f32.mrf.mxu3 }
 0x301   : > { %v15997_v3 = vadd.f32 %v6292_v59, %v5964_v61  ;;  %v12385_v61 = vld [vmem:[%s15291_s13 + $0xf20] sm:$0xf]  ;;  %v14286_v59 = vld [vmem:[%s15291_s13 + $0x14d0] sm:$0xf0] }
 0x302   : > { %v6212_v48 = vpop.f32.mrf.mxu2  ;;  %v5557_v14 = vpop.f32.mrf.mxu0 }
 0x303   : > { %v15999_v51 = vadd.f32 %v6212_v48, %v5884_v38  ;;  %v5886_v24 = vpop.f32.mrf.mxu1  ;;  %v5969_v48 = vadd.f32 %v15745_v11, %v15489_v44  ;;  %v14348_v44 = vld [vmem:[#allocation6 + $0xc0] sm:$0xff]  ;;  %v5972_v11 = vadd.f32 %v15749_v22, %v15493_v56  ;;  %v5974_v22 = vadd.f32 %v15761_v9, %v15505_v5  ;;  %v12431_v56 = vld [vmem:[%s15291_s13 + $0xfa4] sm:$0xf0] }
 0x304   : > { %v5887_v4 = vadd.f32 %v5886_v24, %v5557_v14  ;;  %v13098_v24 = vor.u32 %v14286_v59, %v13097_v20  ;;  %6367 = vmatpush.bf16.msrb.mxu3 %v14348_v44  ;;  %v5977_v5 = vadd.f32 %v15765_v0, %v15509_v17  ;;  %v12481_v17 = vld [vmem:[%s15291_s13 + $0xfd8] sm:$0xf]  ;;  %v14132_v0 = vld [vmem:[%s15291_s13 + $0x1000] sm:$0xf0] }
 0x305   : > { %5596 = vmatmul.bf16.gmra.mxu0 %v12342_v13  ;;  %6334 = vmatmul.bf16.gmra.mxu3 %v13054_v54  ;;  %v12387_v13 = vld [vmem:[%s15291_s13 + $0xf4c] sm:$0xf0] }
 0x306   : > { %5925 = vmatmul.bf16.gmra.mxu1 %v12346_v15 }
 0x307   : > { %6254 = vmatmul.bf16.gmra.mxu2 %v12350_v50  ;;  %v12386_v50 = vor.u32 %v14109_v34, %v12385_v61 }
 0x308   : > { %v6295_v47 = vpop.f32.mrf.mxu3 }
 0x309   : > { %v16003_v63 = vadd.f32 %v6295_v47, %v5967_v18  ;;  %v12390_v47 = vor.u32 %v14104_v39, %v12387_v13  ;;  %v12429_v13 = vld [vmem:[%s15291_s13 + $0xf78] sm:$0xf] }
 0x30a   : > { %v6215_v38 = vpop.f32.mrf.mxu2  ;;  %v5559_v2 = vpop.f32.mrf.mxu0 }
 0x30b   : > { %v16005_v37 = vadd.f32 %v6215_v38, %v5887_v4  ;;  %v5888_v19 = vpop.f32.mrf.mxu1  ;;  %v12394_v38 = vor.u32 %v14110_v60, %v12393_v23  ;;  %v14120_v23 = vld [vmem:[%s15291_s13 + $0xfa0] sm:$0xf0]  ;;  %v14115_v60 = vld [vmem:[%s15291_s13 + $0xf7c] sm:$0xf] }
 0x30c   : > { %v5889_v58 = vadd.f32 %v5888_v19, %v5559_v2 }
 0x310   : > { %v6297_v54 = vpop.f32.mrf.mxu3 }
 0x311   : > { %v16017_v15 = vadd.f32 %v6297_v54, %v5969_v48  ;;  %v13141_v54 = vld [vmem:[%s15291_s13 + $0x1500] sm:$0xf] }
 0x312   : > { %v6217_v14 = vpop.f32.mrf.mxu2  ;;  %v5562_v18 = vpop.f32.mrf.mxu0 }
 0x313   : > { %v16019_v4 = vadd.f32 %v6217_v14, %v5889_v58  ;;  %v5891_v2 = vpop.f32.mrf.mxu1  ;;  %v14297_v14 = vld [vmem:[%s15291_s13 + $0x1528] sm:$0xf0] }
 0x314   : > { %v5892_v19 = vadd.f32 %v5891_v2, %v5562_v18  ;;  %v12430_v2 = vor.u32 %v14120_v23, %v12429_v13 }
 0x315   : > { %5601 = vmatmul.bf16.gmra.mxu0 %v12386_v50  ;;  %6339 = vmatmul.bf16.gmra.mxu3 %v13098_v24  ;;  %v12437_v50 = vld [vmem:[%s15291_s13 + $0xf80] sm:$0xf]  ;;  %v14121_v24 = vld [vmem:[%s15291_s13 + $0xfa8] sm:$0xf0] }
 0x316   : > { %5930 = vmatmul.bf16.gmra.mxu1 %v12390_v47 }
 0x317   : > { %6259 = vmatmul.bf16.gmra.mxu2 %v12394_v38 }
 0x318   : > { %v6300_v58 = vpop.f32.mrf.mxu3 }
 0x319   : > { %v16023_v34 = vadd.f32 %v6300_v58, %v5972_v11  ;;  %v12434_v58 = vor.u32 %v14115_v60, %v12431_v56  ;;  %v14131_v56 = vld [vmem:[%s15291_s13 + $0xff8] sm:$0xf0] }
 0x31a   : > { %v6220_v61 = vpop.f32.mrf.mxu2  ;;  %v5564_v20 = vpop.f32.mrf.mxu0 }
 0x31b   : > { %18206 = vst [vmem:[#allocation101_spill] sm:$0xff] %v16023_v34  ;;  %v16025_v39 = vadd.f32 %v6220_v61, %v5892_v19  ;;  %v5893_v59 = vpop.f32.mrf.mxu1  ;;  %v13142_v19 = vor.u32 %v14297_v14, %v13141_v54  ;;  %v12438_v61 = vor.u32 %v14121_v24, %v12437_v50  ;;  %v14126_v50 = vld [vmem:[%s15291_s13 + $0xfd4] sm:$0xf]  ;;  %v13185_v24 = vld [vmem:[%s15291_s13 + $0x1558] sm:$0xf] }
 0x31c   : > { %v5894_v48 = vadd.f32 %v5893_v59, %v5564_v20 }
 0x320   : > { %v6302_v18 = vpop.f32.mrf.mxu3 }
 0x321   : > { %v16037_v38 = vadd.f32 %v6302_v18, %v5974_v22  ;;  %v12473_v22 = vld [vmem:[%s15291_s13 + $0xfd0] sm:$0xf]  ;;  %v14308_v18 = vld [vmem:[%s15291_s13 + $0x1580] sm:$0xf0] }
 0x322   : > { %v6222_v47 = vpop.f32.mrf.mxu2  ;;  %v5567_v11 = vpop.f32.mrf.mxu0 }
 0x323   : > { %18207 = vst [vmem:[#allocation102_spill] sm:$0xff] %v16037_v38  ;;  %v16039_v44 = vadd.f32 %v6222_v47, %v5894_v48  ;;  %v5896_v20 = vpop.f32.mrf.mxu1  ;;  %v5979_v47 = vadd.f32 %v15777_v29, %v15521_v42  ;;  %v14387_v42 = vld [vmem:[#allocation6 + $0x1f8] sm:$0xff]  ;;  %v5982_v29 = vadd.f32 %v15781_v43, %v15525_v57  ;;  %v14137_v57 = vld [vmem:[%s15291_s13 + $0x102c] sm:$0xf]  ;;  %v13229_v43 = vld [vmem:[%s15291_s13 + $0x15b0] sm:$0xf] }
 0x324   : > { %v5897_v59 = vadd.f32 %v5896_v20, %v5567_v11  ;;  %v13186_v20 = vor.u32 %v14308_v18, %v13185_v24  ;;  %7676 = vmatpush.bf16.msra.mxu3 %v14387_v42 }
 0x325   : > { %5606 = vmatmul.bf16.gmra.mxu0 %v12430_v2  ;;  %6344 = vmatmul.bf16.gmra.mxu3 %v13142_v19  ;;  %v12475_v2 = vld [vmem:[%s15291_s13 + $0xffc] sm:$0xf0] }
 0x326   : > { %5935 = vmatmul.bf16.gmra.mxu1 %v12434_v58 }
 0x327   : > { %6264 = vmatmul.bf16.gmra.mxu2 %v12438_v61  ;;  %v12474_v61 = vor.u32 %v14131_v56, %v12473_v22 }
 0x328   : > { %v6305_v9 = vpop.f32.mrf.mxu3 }
 0x329   : > { %v16043_v13 = vadd.f32 %v6305_v9, %v5977_v5  ;;  %v12478_v9 = vor.u32 %v14126_v50, %v12475_v2  ;;  %v14411_v2 = vld [vmem:[#allocation6 + $0x2b8] sm:$0xff] }
 0x32a   : > { %v6225_v48 = vpop.f32.mrf.mxu2  ;;  %v5569_v60 = vpop.f32.mrf.mxu0  ;;  %8663 = vmatpush.bf16.msra.mxu2 %v14411_v2 }
 0x32b   : > { %18208 = vst [vmem:[#allocation103_spill] sm:$0xff] %v16043_v13  ;;  %v16045_v23 = vadd.f32 %v6225_v48, %v5897_v59  ;;  %v5898_v54 = vpop.f32.mrf.mxu1  ;;  %v12482_v48 = vor.u32 %v14132_v0, %v12481_v17  ;;  %v14395_v17 = vld [vmem:[#allocation6 + $0x238] sm:$0xff] }
 0x32c   : > { %v5899_v14 = vadd.f32 %v5898_v54, %v5569_v60  ;;  %v14403_v0 = vld [vmem:[#allocation6 + $0x278] sm:$0xff]  ;;  %8005 = vmatpush.bf16.msra.mxu0 %v14395_v17 }
 0x32d   : > { %8334 = vmatpush.bf16.msra.mxu1 %v14403_v0 }
 0x330   : > { %v6307_v19 = vpop.f32.mrf.mxu3 }
 0x331   : > { %v16057_v58 = vadd.f32 %v6307_v19, %v5979_v47  ;;  %v12517_v19 = vld [vmem:[%s15291_s13 + $0x1028] sm:$0xf] }
 0x332   : > { %v6227_v11 = vpop.f32.mrf.mxu2  ;;  %v5572_v5 = vpop.f32.mrf.mxu0 }
 0x333   : > { %18209 = vst [vmem:[#allocation104_spill] sm:$0xff] %v16057_v58  ;;  %v16059_v59 = vadd.f32 %v6227_v11, %v5899_v14  ;;  %v5901_v60 = vpop.f32.mrf.mxu1  ;;  %v14142_v11 = vld [vmem:[%s15291_s13 + $0x1050] sm:$0xf0] }
 0x334   : > { %v5902_v54 = vadd.f32 %v5901_v60, %v5572_v5  ;;  %v12519_v5 = vld [vmem:[%s15291_s13 + $0x1054] sm:$0xf0] }
 0x335   : > { %5611 = vmatmul.bf16.gmra.mxu0 %v12474_v61  ;;  %6349 = vmatmul.bf16.gmra.mxu3 %v13186_v20  ;;  %v14319_v61 = vld [vmem:[%s15291_s13 + $0x15d8] sm:$0xf0]  ;;  %v5984_v20 = vadd.f32 %v15793_v8, %v15537_v12  ;;  %v5987_v8 = vadd.f32 %v15797_v28, %v15541_v32  ;;  %v13622_v32 = vld [vmem:[%s15291_s13 + $0x14] sm:$0xf]  ;;  %v10467_v28 = vld [vmem:[%s15291_s13 + $0x3c] sm:$0xf0] }
 0x336   : > { %5940 = vmatmul.bf16.gmra.mxu1 %v12478_v9  ;;  %v12525_v9 = vld [vmem:[%s15291_s13 + $0x1030] sm:$0xf] }
 0x337   : > { %6269 = vmatmul.bf16.gmra.mxu2 %v12482_v48  ;;  %v14143_v48 = vld [vmem:[%s15291_s13 + $0x1058] sm:$0xf0] }
 0x338   : > { %v6310_v14 = vpop.f32.mrf.mxu3  ;;  %v12526_v2 = vor.u32 %v14143_v48, %v12525_v9  ;;  %v10465_v9 = vld [vmem:[%s15291_s13 + $0x10] sm:$0xf]  ;;  %v13627_v48 = vld [vmem:[%s15291_s13 + $0x38] sm:$0xf0] }
 0x339   : > { %v16063_v56 = vadd.f32 %v6310_v14, %v5982_v29  ;;  %v12518_v29 = vor.u32 %v14142_v11, %v12517_v19  ;;  %v13230_v14 = vor.u32 %v14319_v61, %v13229_v43 }
 0x33a   : > { %v6230_v22 = vpop.f32.mrf.mxu2  ;;  %v5574_v24 = vpop.f32.mrf.mxu0 }
 0x33b   : > { %18210 = vst [vmem:[#allocation105_spill] sm:$0xff] %v16063_v56  ;;  %v16065_v50 = vadd.f32 %v6230_v22, %v5902_v54  ;;  %v5903_v18 = vpop.f32.mrf.mxu1 }
 0x33c   : > { %v5904_v47 = vadd.f32 %v5903_v18, %v5574_v24  ;;  %v12522_v18 = vor.u32 %v14137_v57, %v12519_v5  ;;  %v10459_v5 = vld [vmem:[%s15291_s13 + $0x34] sm:$0xf0] }
 0x340   : > { %v6312_v60 = vpop.f32.mrf.mxu3 }
 0x341   : > { %v16077_v42 = vadd.f32 %v6312_v60, %v5984_v20  ;;  %v13621_v20 = vld [vmem:[%s15291_s13 + $0xc] sm:$0xf]  ;;  %v10473_v60 = vld [vmem:[%s15291_s13 + $0x18] sm:$0xf] }
 0x342   : > { %v6232_v54 = vpop.f32.mrf.mxu2  ;;  %v5577_v24 = vpop.f32.mrf.mxu0 }
 0x343   : > { %18211 = vst [vmem:[#allocation106_spill] sm:$0xff] %v16077_v42  ;;  %v16079_v22 = vadd.f32 %v6232_v54, %v5904_v47  ;;  %v5906_v17 = vpop.f32.mrf.mxu1  ;;  %v5989_v54 = vadd.f32 %v15809_v16, %v15553_v53  ;;  %v5992_v53 = vadd.f32 %v15813_v55, %v15557_v7  ;;  %v13633_v7 = vld [vmem:[%s15291_s13 + $0x6c] sm:$0xf]  ;;  %v10511_v55 = vld [vmem:[%s15291_s13 + $0x94] sm:$0xf0] }
 0x344   : > { %v5907_v12 = vadd.f32 %v5906_v17, %v5577_v24  ;;  %v10466_v17 = vor.u32 %v13627_v48, %v10465_v9 }
 0x345   : > { %5616 = vmatmul.bf16.gmra.mxu0 %v12518_v29  ;;  %6354 = vmatmul.bf16.gmra.mxu3 %v13230_v14  ;;  %v13628_v29 = vld [vmem:[%s15291_s13 + $0x40] sm:$0xf0] }
 0x346   : > { %5945 = vmatmul.bf16.gmra.mxu1 %v12522_v18 }
 0x347   : > { %6274 = vmatmul.bf16.gmra.mxu2 %v12526_v2  ;;  %v10462_v2 = vor.u32 %v13621_v20, %v10459_v5 }
 0x348   : > { %v6315_v47 = vpop.f32.mrf.mxu3 }
 0x349   : > { %v16083_v19 = vadd.f32 %v6315_v47, %v5987_v8  ;;  %v10474_v47 = vor.u32 %v13628_v29, %v10473_v60  ;;  %v10503_v29 = vld [vmem:[%s15291_s13 + $0x8c] sm:$0xf0] }
 0x34a   : > { %v6235_v0 = vpop.f32.mrf.mxu2  ;;  %v5579_v57 = vpop.f32.mrf.mxu0 }
 0x34b   : > { %18212 = vst [vmem:[#allocation107_spill] sm:$0xff] %v16083_v19  ;;  %v16085_v11 = vadd.f32 %v6235_v0, %v5907_v12  ;;  %v5908_v43 = vpop.f32.mrf.mxu1  ;;  %v10470_v0 = vor.u32 %v13622_v32, %v10467_v28  ;;  %v10509_v32 = vld [vmem:[%s15291_s13 + $0x68] sm:$0xf]  ;;  %v13638_v28 = vld [vmem:[%s15291_s13 + $0x90] sm:$0xf0] }
 0x34c   : > { %v5909_v61 = vadd.f32 %v5908_v43, %v5579_v57 }
 0x350   : > { %v6317_v14 = vpop.f32.mrf.mxu3 }
 0x351   : > { %v16097_v18 = vadd.f32 %v6317_v14, %v5989_v54  ;;  %v13632_v54 = vld [vmem:[%s15291_s13 + $0x64] sm:$0xf]  ;;  %v10517_v14 = vld [vmem:[%s15291_s13 + $0x70] sm:$0xf] }
 0x352   : > { %v6237_v24 = vpop.f32.mrf.mxu2  ;;  %v5582_v8 = vpop.f32.mrf.mxu0 }
 0x353   : > { %18213 = vst [vmem:[#allocation108_spill] sm:$0xff] %v16097_v18  ;;  %v16099_v12 = vadd.f32 %v6237_v24, %v5909_v61  ;;  %v5911_v57 = vpop.f32.mrf.mxu1  ;;  %v5994_v24 = vadd.f32 %v15825_v62, %v15569_v41  ;;  %v5997_v41 = vadd.f32 %v15829_v25, %v15573_v1  ;;  %v13644_v1 = vld [vmem:[%s15291_s13 + $0xc4] sm:$0xf]  ;;  %v10555_v25 = vld [vmem:[%s15291_s13 + $0xec] sm:$0xf0] }
 0x354   : > { %v5912_v43 = vadd.f32 %v5911_v57, %v5582_v8  ;;  %v10510_v57 = vor.u32 %v13638_v28, %v10509_v32 }
 0x355   : > { %6368 = vmatmul.bf16.vlgmr.msrb.gmra.mxu3 %v10462_v2  ;;  %6697 = vmatmul.bf16.vlgmr.msrb.gmra.mxu0 %v10466_v17  ;;  %v13639_v2 = vld [vmem:[%s15291_s13 + $0x98] sm:$0xf0] }
 0x356   : > { %7026 = vmatmul.bf16.vlgmr.msrb.gmra.mxu1 %v10470_v0  ;;  %v10506_v0 = vor.u32 %v13632_v54, %v10503_v29 }
 0x357   : > { %7355 = vmatmul.bf16.vlgmr.msrb.gmra.mxu2 %v10474_v47 }
 0x358   : > { %v6320_v16 = vpop.f32.mrf.mxu3 }
 0x359   : > { %v16103_v20 = vadd.f32 %v6320_v16, %v5992_v53  ;;  %v10518_v16 = vor.u32 %v13639_v2, %v10517_v14  ;;  %v10547_v2 = vld [vmem:[%s15291_s13 + $0xe4] sm:$0xf0] }
 0x35a   : > { %v6240_v61 = vpop.f32.mrf.mxu2  ;;  %v5584_v9 = vpop.f32.mrf.mxu0 }
 0x35b   : > { %18214 = vst [vmem:[#allocation109_spill] sm:$0xff] %v16103_v20  ;;  %v16105_v5 = vadd.f32 %v6240_v61, %v5912_v43  ;;  %v5913_v48 = vpop.f32.mrf.mxu1  ;;  %v10514_v61 = vor.u32 %v13633_v7, %v10511_v55  ;;  %v10553_v7 = vld [vmem:[%s15291_s13 + $0xc0] sm:$0xf]  ;;  %v13649_v55 = vld [vmem:[%s15291_s13 + $0xe8] sm:$0xf0] }
 0x35c   : > { %v5914_v60 = vadd.f32 %v5913_v48, %v5584_v9 }
 0x360   : > { %v6322_v17 = vpop.f32.mrf.mxu3 }
 0x361   : > { %v16117_v47 = vadd.f32 %v6322_v17, %v5994_v24  ;;  %v13643_v24 = vld [vmem:[%s15291_s13 + $0xbc] sm:$0xf]  ;;  %v10561_v17 = vld [vmem:[%s15291_s13 + $0xc8] sm:$0xf] }
 0x362   : > { %v6242_v8 = vpop.f32.mrf.mxu2  ;;  %v5587_v53 = vpop.f32.mrf.mxu0 }
 0x363   : > { %18215 = vst [vmem:[#allocation110_spill] sm:$0xff] %v16117_v47  ;;  %v16119_v43 = vadd.f32 %v6242_v8, %v5914_v60  ;;  %v5916_v9 = vpop.f32.mrf.mxu1  ;;  %v5999_v8 = vadd.f32 %v15841_v49, %v15585_v30  ;;  %v6002_v30 = vadd.f32 %v15845_v10, %v15589_v52  ;;  %v13655_v52 = vld [vmem:[%s15291_s13 + $0x11c] sm:$0xf]  ;;  %v10599_v10 = vld [vmem:[%s15291_s13 + $0x144] sm:$0xf0] }
 0x364   : > { %v5917_v48 = vadd.f32 %v5916_v9, %v5587_v53  ;;  %v10554_v9 = vor.u32 %v13649_v55, %v10553_v7 }
 0x365   : > { %6373 = vmatmul.bf16.gmra.mxu3 %v10506_v0  ;;  %6702 = vmatmul.bf16.gmra.mxu0 %v10510_v57  ;;  %v13650_v0 = vld [vmem:[%s15291_s13 + $0xf0] sm:$0xf0] }
 0x366   : > { %7031 = vmatmul.bf16.gmra.mxu1 %v10514_v61  ;;  %v10550_v61 = vor.u32 %v13643_v24, %v10547_v2 }
 0x367   : > { %7360 = vmatmul.bf16.gmra.mxu2 %v10518_v16 }
 0x368   : > { %v6325_v62 = vpop.f32.mrf.mxu3 }
 0x369   : > { %v16123_v54 = vadd.f32 %v6325_v62, %v5997_v41  ;;  %v10562_v62 = vor.u32 %v13650_v0, %v10561_v17  ;;  %v10591_v0 = vld [vmem:[%s15291_s13 + $0x13c] sm:$0xf0] }
 0x36a   : > { %v6245_v60 = vpop.f32.mrf.mxu2  ;;  %v5589_v32 = vpop.f32.mrf.mxu0 }
 0x36b   : > { %18216 = vst [vmem:[#allocation111_spill] sm:$0xff] %v16123_v54  ;;  %v16125_v29 = vadd.f32 %v6245_v60, %v5917_v48  ;;  %v5918_v28 = vpop.f32.mrf.mxu1  ;;  %v10558_v60 = vor.u32 %v13644_v1, %v10555_v25  ;;  %v10597_v1 = vld [vmem:[%s15291_s13 + $0x118] sm:$0xf]  ;;  %v13660_v25 = vld [vmem:[%s15291_s13 + $0x140] sm:$0xf0] }
 0x36c   : > { %v5919_v14 = vadd.f32 %v5918_v28, %v5589_v32 }
 0x370   : > { %v6327_v57 = vpop.f32.mrf.mxu3 }
 0x371   : > { %v16137_v16 = vadd.f32 %v6327_v57, %v5999_v8  ;;  %v13654_v8 = vld [vmem:[%s15291_s13 + $0x114] sm:$0xf]  ;;  %v10605_v57 = vld [vmem:[%s15291_s13 + $0x120] sm:$0xf] }
 0x372   : > { %v6247_v53 = vpop.f32.mrf.mxu2  ;;  %v5592_v41 = vpop.f32.mrf.mxu0 }
 0x373   : > { %18217 = vst [vmem:[#allocation112_spill] sm:$0xff] %v16137_v16  ;;  %v16139_v48 = vadd.f32 %v6247_v53, %v5919_v14  ;;  %v5921_v32 = vpop.f32.mrf.mxu1  ;;  %v6004_v53 = vadd.f32 %v15857_v31, %v15601_v26  ;;  %v18220_v26 = vld [vmem:[#allocation38_spill] sm:$0xff]  ;;  %v18221_v31 = vld [vmem:[#allocation80_spill] sm:$0xff] }
 0x374   : > { %v5922_v28 = vadd.f32 %v5921_v32, %v5592_v41  ;;  %v10598_v32 = vor.u32 %v13660_v25, %v10597_v1 }
 0x375   : > { %6378 = vmatmul.bf16.gmra.mxu3 %v10550_v61  ;;  %6707 = vmatmul.bf16.gmra.mxu0 %v10554_v9  ;;  %v13661_v61 = vld [vmem:[%s15291_s13 + $0x148] sm:$0xf0] }
 0x376   : > { %7036 = vmatmul.bf16.gmra.mxu1 %v10558_v60  ;;  %v10594_v60 = vor.u32 %v13654_v8, %v10591_v0 }
 0x377   : > { %7365 = vmatmul.bf16.gmra.mxu2 %v10562_v62 }
 0x378   : > { %v6330_v49 = vpop.f32.mrf.mxu3 }
 0x379   : > { %v16143_v24 = vadd.f32 %v6330_v49, %v6002_v30  ;;  %v10606_v49 = vor.u32 %v13661_v61, %v10605_v57 }
 0x37a   : > { %v6250_v14 = vpop.f32.mrf.mxu2  ;;  %v5594_v7 = vpop.f32.mrf.mxu0 }
 0x37b   : > { %18218 = vst [vmem:[#allocation113_spill] sm:$0xff] %v16143_v24  ;;  %v16145_v2 = vadd.f32 %v6250_v14, %v5922_v28  ;;  %v5923_v55 = vpop.f32.mrf.mxu1  ;;  %v10602_v14 = vor.u32 %v13655_v52, %v10599_v10  ;;  %v13665_v52 = vld [vmem:[%s15291_s13 + $0x16c] sm:$0xf]  ;;  %v10635_v10 = vld [vmem:[%s15291_s13 + $0x194] sm:$0xf0] }
 0x37c   : > { %v5924_v17 = vadd.f32 %v5923_v55, %v5594_v7 }
 0x380   : > { %v6332_v9 = vpop.f32.mrf.mxu3 }
 0x381   : > { %v16157_v62 = vadd.f32 %v6332_v9, %v6004_v53  ;;  %v10641_v9 = vld [vmem:[%s15291_s13 + $0x170] sm:$0xf] }
 0x382   : > { %v6252_v41 = vpop.f32.mrf.mxu2  ;;  %v5597_v30 = vpop.f32.mrf.mxu0 }
 0x383   : > { %18219 = vst [vmem:[#allocation114_spill] sm:$0xff] %v16157_v62  ;;  %v16159_v28 = vadd.f32 %v6252_v41, %v5924_v17  ;;  %v5926_v7 = vpop.f32.mrf.mxu1  ;;  %v6007_v17 = vadd.f32 %v18221_v31, %v18220_v26  ;;  %v13671_v41 = vld [vmem:[%s15291_s13 + $0x198] sm:$0xf0]  ;;  %v10643_v26 = vld [vmem:[%s15291_s13 + $0x19c] sm:$0xf0] }
 0x384   : > { %v5927_v55 = vadd.f32 %v5926_v7, %v5597_v30  ;;  %v18224_v30 = vld [vmem:[#allocation82_spill] sm:$0xff] }
 0x385   : > { %6383 = vmatmul.bf16.gmra.mxu3 %v10594_v60  ;;  %6712 = vmatmul.bf16.gmra.mxu0 %v10598_v32  ;;  %v10649_v60 = vld [vmem:[%s15291_s13 + $0x178] sm:$0xf]  ;;  %v18223_v32 = vld [vmem:[#allocation40_spill] sm:$0xff]  ;;  %v13666_v7 = vld [vmem:[%s15291_s13 + $0x174] sm:$0xf] }
 0x386   : > { %7041 = vmatmul.bf16.gmra.mxu1 %v10602_v14  ;;  %v13672_v14 = vld [vmem:[%s15291_s13 + $0x1a0] sm:$0xf0] }
 0x387   : > { %7370 = vmatmul.bf16.gmra.mxu2 %v10606_v49  ;;  %v6009_v49 = vadd.f32 %v18224_v30, %v18223_v32  ;;  %v18226_v32 = vld [vmem:[#allocation42_spill] sm:$0xff] }
 0x388   : > { %v6335_v8 = vpop.f32.mrf.mxu3 }
 0x389   : > { %v16163_v1 = vadd.f32 %v6335_v8, %v6007_v17  ;;  %v10642_v8 = vor.u32 %v13671_v41, %v10641_v9 }
 0x38a   : > { %v6255_v0 = vpop.f32.mrf.mxu2  ;;  %v5599_v57 = vpop.f32.mrf.mxu0 }
 0x38b   : > { %18222 = vst [vmem:[#allocation38_spill] sm:$0xff] %v16163_v1  ;;  %v16165_v25 = vadd.f32 %v6255_v0, %v5927_v55  ;;  %v5928_v53 = vpop.f32.mrf.mxu1  ;;  %v10638_v55 = vor.u32 %v13665_v52, %v10635_v10  ;;  %v10646_v1 = vor.u32 %v13666_v7, %v10643_v26  ;;  %v18227_v52 = vld [vmem:[#allocation84_spill] sm:$0xff]  ;;  %v13682_v26 = vld [vmem:[%s15291_s13 + $0x1f0] sm:$0xf0] }
 0x38c   : > { %v5929_v61 = vadd.f32 %v5928_v53, %v5599_v57  ;;  %v10650_v53 = vor.u32 %v13672_v14, %v10649_v60  ;;  %v10679_v14 = vld [vmem:[%s15291_s13 + $0x1ec] sm:$0xf0]  ;;  %v10685_v7 = vld [vmem:[%s15291_s13 + $0x1c8] sm:$0xf] }
 0x390   : > { %v6337_v31 = vpop.f32.mrf.mxu3 }
 0x391   : > { %v16177_v17 = vadd.f32 %v6337_v31, %v6009_v49  ;;  %v13676_v49 = vld [vmem:[%s15291_s13 + $0x1c4] sm:$0xf]  ;;  %v10693_v31 = vld [vmem:[%s15291_s13 + $0x1d0] sm:$0xf] }
 0x392   : > { %v6257_v62 = vpop.f32.mrf.mxu2  ;;  %v5602_v57 = vpop.f32.mrf.mxu0 }
 0x393   : > { %18225 = vst [vmem:[#allocation80_spill] sm:$0xff] %v16177_v17  ;;  %v16179_v0 = vadd.f32 %v6257_v62, %v5929_v61  ;;  %v5931_v24 = vpop.f32.mrf.mxu1  ;;  %v6012_v62 = vadd.f32 %v18227_v52, %v18226_v32  ;;  %v10687_v32 = vld [vmem:[%s15291_s13 + $0x1f4] sm:$0xf0] }
 0x394   : > { %v5932_v16 = vadd.f32 %v5931_v24, %v5602_v57  ;;  %v13683_v57 = vld [vmem:[%s15291_s13 + $0x1f8] sm:$0xf0] }
 0x395   : > { %6388 = vmatmul.bf16.gmra.mxu3 %v10638_v55  ;;  %6717 = vmatmul.bf16.gmra.mxu0 %v10642_v8  ;;  %v18230_v55 = vld [vmem:[#allocation86_spill] sm:$0xff] }
 0x396   : > { %7046 = vmatmul.bf16.gmra.mxu1 %v10646_v1  ;;  %v18229_v1 = vld [vmem:[#allocation44_spill] sm:$0xff] }
 0x397   : > { %7375 = vmatmul.bf16.gmra.mxu2 %v10650_v53  ;;  %v6014_v8 = vadd.f32 %v18230_v55, %v18229_v1  ;;  %v13677_v53 = vld [vmem:[%s15291_s13 + $0x1cc] sm:$0xf]  ;;  %v18232_v1 = vld [vmem:[#allocation46_spill] sm:$0xff] }
 0x398   : > { %v6340_v61 = vpop.f32.mrf.mxu3 }
 0x399   : > { %v16183_v9 = vadd.f32 %v6340_v61, %v6012_v62  ;;  %v10686_v61 = vor.u32 %v13682_v26, %v10685_v7 }
 0x39a   : > { %v6260_v10 = vpop.f32.mrf.mxu2  ;;  %v5604_v60 = vpop.f32.mrf.mxu0 }
 0x39b   : > { %18228 = vst [vmem:[#allocation40_spill] sm:$0xff] %v16183_v9  ;;  %v16185_v41 = vadd.f32 %v6260_v10, %v5932_v16  ;;  %v5933_v24 = vpop.f32.mrf.mxu1  ;;  %v10682_v16 = vor.u32 %v13676_v49, %v10679_v14  ;;  %v10690_v9 = vor.u32 %v13677_v53, %v10687_v32  ;;  %v18233_v49 = vld [vmem:[#allocation88_spill] sm:$0xff]  ;;  %v10729_v53 = vld [vmem:[%s15291_s13 + $0x220] sm:$0xf]  ;;  %v13693_v32 = vld [vmem:[%s15291_s13 + $0x248] sm:$0xf0] }
 0x39c   : > { %v5934_v30 = vadd.f32 %v5933_v24, %v5604_v60  ;;  %v10694_v24 = vor.u32 %v13683_v57, %v10693_v31  ;;  %v10723_v57 = vld [vmem:[%s15291_s13 + $0x244] sm:$0xf0] }
 0x3a0   : > { %v6342_v52 = vpop.f32.mrf.mxu3 }
 0x3a1   : > { %v16197_v62 = vadd.f32 %v6342_v52, %v6014_v8  ;;  %v13687_v8 = vld [vmem:[%s15291_s13 + $0x21c] sm:$0xf]  ;;  %v10737_v52 = vld [vmem:[%s15291_s13 + $0x228] sm:$0xf] }
 0x3a2   : > { %v6262_v17 = vpop.f32.mrf.mxu2  ;;  %v5607_v60 = vpop.f32.mrf.mxu0 }
 0x3a3   : > { %18231 = vst [vmem:[#allocation82_spill] sm:$0xff] %v16197_v62  ;;  %v16199_v10 = vadd.f32 %v6262_v17, %v5934_v30  ;;  %v5936_v54 = vpop.f32.mrf.mxu1  ;;  %v6017_v17 = vadd.f32 %v18233_v49, %v18232_v1  ;;  %v10731_v1 = vld [vmem:[%s15291_s13 + $0x24c] sm:$0xf0] }
 0x3a4   : > { %v5937_v47 = vadd.f32 %v5936_v54, %v5607_v60  ;;  %v13694_v60 = vld [vmem:[%s15291_s13 + $0x250] sm:$0xf0] }
 0x3a5   : > { %6393 = vmatmul.bf16.gmra.mxu3 %v10682_v16  ;;  %6722 = vmatmul.bf16.gmra.mxu0 %v10686_v61  ;;  %v18236_v16 = vld [vmem:[#allocation90_spill] sm:$0xff] }
 0x3a6   : > { %7051 = vmatmul.bf16.gmra.mxu1 %v10690_v9  ;;  %v18235_v9 = vld [vmem:[#allocation48_spill] sm:$0xff] }
 0x3a7   : > { %7380 = vmatmul.bf16.gmra.mxu2 %v10694_v24  ;;  %v6019_v61 = vadd.f32 %v18236_v16, %v18235_v9  ;;  %v13688_v24 = vld [vmem:[%s15291_s13 + $0x224] sm:$0xf]  ;;  %v14386_v9 = vld [vmem:[#allocation6 + $0x1f0] sm:$0xff] }
 0x3a8   : > { %v6345_v30 = vpop.f32.mrf.mxu3  ;;  %7677 = vmatpush.bf16.msra.mxu3 %v14386_v9  ;;  %v14410_v9 = vld [vmem:[#allocation6 + $0x2b0] sm:$0xff] }
 0x3a9   : > { %v16203_v7 = vadd.f32 %v6345_v30, %v6017_v17  ;;  %v10730_v30 = vor.u32 %v13693_v32, %v10729_v53  ;;  %8664 = vmatpush.bf16.msra.mxu2 %v14410_v9  ;;  %v10825_v9 = vld [vmem:[%s15291_s13 + $0x2d8] sm:$0xf] }
 0x3aa   : > { %v6265_v14 = vpop.f32.mrf.mxu2  ;;  %v5609_v31 = vpop.f32.mrf.mxu0 }
 0x3ab   : > { %18234 = vst [vmem:[#allocation42_spill] sm:$0xff] %v16203_v7  ;;  %v16205_v26 = vadd.f32 %v6265_v14, %v5937_v47  ;;  %v5938_v54 = vpop.f32.mrf.mxu1  ;;  %v10726_v47 = vor.u32 %v13687_v8, %v10723_v57  ;;  %v10734_v7 = vor.u32 %v13688_v24, %v10731_v1  ;;  %v18238_v8 = vld [vmem:[#allocation50_spill] sm:$0xff]  ;;  %v18239_v57 = vld [vmem:[#allocation92_spill] sm:$0xff]  ;;  %v10767_v24 = vld [vmem:[%s15291_s13 + $0x29c] sm:$0xf0] }
 0x3ac   : > { %v5939_v55 = vadd.f32 %v5938_v54, %v5609_v31  ;;  %v10738_v54 = vor.u32 %v13694_v60, %v10737_v52  ;;  %v13698_v60 = vld [vmem:[%s15291_s13 + $0x274] sm:$0xf]  ;;  %v13704_v1 = vld [vmem:[%s15291_s13 + $0x2a0] sm:$0xf0] }
 0x3b0   : > { %v6347_v49 = vpop.f32.mrf.mxu3 }
 0x3b1   : > { %v16217_v17 = vadd.f32 %v6347_v49, %v6019_v61  ;;  %v10781_v49 = vld [vmem:[%s15291_s13 + $0x280] sm:$0xf] }
 0x3b2   : > { %v6267_v62 = vpop.f32.mrf.mxu2  ;;  %v5612_v31 = vpop.f32.mrf.mxu0 }
 0x3b3   : > { %18237 = vst [vmem:[#allocation84_spill] sm:$0xff] %v16217_v17  ;;  %v16219_v14 = vadd.f32 %v6267_v62, %v5939_v55  ;;  %v5941_v20 = vpop.f32.mrf.mxu1  ;;  %v6022_v62 = vadd.f32 %v18239_v57, %v18238_v8  ;;  %v18242_v8 = vld [vmem:[#allocation94_spill] sm:$0xff] }
 0x3b4   : > { %v5942_v18 = vadd.f32 %v5941_v20, %v5612_v31  ;;  %v10775_v31 = vld [vmem:[%s15291_s13 + $0x2a4] sm:$0xf0]  ;;  %v14394_v17 = vld [vmem:[#allocation6 + $0x230] sm:$0xff] }
 0x3b5   : > { %6398 = vmatmul.bf16.gmra.mxu3 %v10726_v47  ;;  %6727 = vmatmul.bf16.gmra.mxu0 %v10730_v30  ;;  %v13705_v47 = vld [vmem:[%s15291_s13 + $0x2a8] sm:$0xf0]  ;;  %v13699_v30 = vld [vmem:[%s15291_s13 + $0x27c] sm:$0xf] }
 0x3b6   : > { %7056 = vmatmul.bf16.gmra.mxu1 %v10734_v7  ;;  %v10773_v7 = vld [vmem:[%s15291_s13 + $0x278] sm:$0xf]  ;;  %8006 = vmatpush.bf16.msra.mxu0 %v14394_v17  ;;  %v10782_v42 = vor.u32 %v13705_v47, %v10781_v49  ;;  %v10778_v56 = vor.u32 %v13699_v30, %v10775_v31  ;;  %v18245_v17 = vld [vmem:[#allocation96_spill] sm:$0xff] }
 0x3b7   : > { %7385 = vmatmul.bf16.gmra.mxu2 %v10738_v54  ;;  %v18241_v54 = vld [vmem:[#allocation52_spill] sm:$0xff]  ;;  %v10811_v31 = vld [vmem:[%s15291_s13 + $0x2f4] sm:$0xf0] }
 0x3b8   : > { %v6350_v55 = vpop.f32.mrf.mxu3  ;;  %v6024_v57 = vadd.f32 %v18242_v8, %v18241_v54 }
 0x3b9   : > { %v16223_v32 = vadd.f32 %v6350_v55, %v6022_v62  ;;  %v14402_v62 = vld [vmem:[#allocation6 + $0x270] sm:$0xff] }
 0x3ba   : > { %v6270_v53 = vpop.f32.mrf.mxu2  ;;  %v5614_v52 = vpop.f32.mrf.mxu0  ;;  %8335 = vmatpush.bf16.msra.mxu1 %v14402_v62 }
 0x3bb   : > { %18240 = vst [vmem:[#allocation44_spill] sm:$0xff] %v16223_v32  ;;  %v16225_v20 = vadd.f32 %v6270_v53, %v5942_v18  ;;  %v5943_v16 = vpop.f32.mrf.mxu1  ;;  %v10770_v32 = vor.u32 %v13698_v60, %v10767_v24  ;;  %v18244_v60 = vld [vmem:[#allocation54_spill] sm:$0xff] }
 0x3bc   : > { %v5944_v61 = vadd.f32 %v5943_v16, %v5614_v52  ;;  %v10774_v52 = vor.u32 %v13704_v1, %v10773_v7 }
 0x3c0   : > { %v6352_v55 = vpop.f32.mrf.mxu3 }
 0x3c1   : > { %v16237_v53 = vadd.f32 %v6352_v55, %v6024_v57  ;;  %v10817_v57 = vld [vmem:[%s15291_s13 + $0x2d0] sm:$0xf]  ;;  %v13716_v55 = vld [vmem:[%s15291_s13 + $0x300] sm:$0xf0] }
 0x3c2   : > { %v6272_v18 = vpop.f32.mrf.mxu2  ;;  %v5617_v19 = vpop.f32.mrf.mxu0 }
 0x3c3   : > { %18243 = vst [vmem:[#allocation86_spill] sm:$0xff] %v16237_v53  ;;  %v16239_v16 = vadd.f32 %v6272_v18, %v5944_v61  ;;  %v5946_v54 = vpop.f32.mrf.mxu1  ;;  %v6027_v61 = vadd.f32 %v18245_v17, %v18244_v60  ;;  %v13710_v18 = vld [vmem:[%s15291_s13 + $0x2d4] sm:$0xf] }
 0x3c4   : > { %v5947_v8 = vadd.f32 %v5946_v54, %v5617_v19 }
 0x3c5   : > { %6403 = vmatmul.bf16.gmra.mxu3 %v10770_v32  ;;  %6732 = vmatmul.bf16.gmra.mxu0 %v10774_v52  ;;  %v13709_v32 = vld [vmem:[%s15291_s13 + $0x2cc] sm:$0xf]  ;;  %v10819_v52 = vld [vmem:[%s15291_s13 + $0x2fc] sm:$0xf0] }
 0x3c6   : > { %7061 = vmatmul.bf16.gmra.mxu1 %v10778_v56  ;;  %v18247_v56 = vld [vmem:[#allocation56_spill] sm:$0xff] }
 0x3c7   : > { %7390 = vmatmul.bf16.gmra.mxu2 %v10782_v42  ;;  %v13715_v42 = vld [vmem:[%s15291_s13 + $0x2f8] sm:$0xf0]  ;;  %v6029_v62 = vadd.f32 %v15937_v35, %v18247_v56 }
 0x3c8   : > { %v6355_v24 = vpop.f32.mrf.mxu3 }
 0x3c9   : > { %v16243_v1 = vadd.f32 %v6355_v24, %v6027_v61  ;;  %v10818_v61 = vor.u32 %v13715_v42, %v10817_v57 }
 0x3ca   : > { %v6275_v7 = vpop.f32.mrf.mxu2  ;;  %v5619_v47 = vpop.f32.mrf.mxu0 }
 0x3cb   : > { %18246 = vst [vmem:[#allocation46_spill] sm:$0xff] %v16243_v1  ;;  %v16245_v49 = vadd.f32 %v6275_v7, %v5947_v8  ;;  %v5948_v19 = vpop.f32.mrf.mxu1  ;;  %v10814_v8 = vor.u32 %v13709_v32, %v10811_v31  ;;  %v18249_v32 = vld [vmem:[#allocation16_spill] sm:$0xff] }
 0x3cc   : > { %v5949_v30 = vadd.f32 %v5948_v19, %v5619_v47  ;;  %v10826_v47 = vor.u32 %v13716_v55, %v10825_v9  ;;  %v10822_v19 = vor.u32 %v13710_v18, %v10819_v52  ;;  %v10855_v55 = vld [vmem:[%s15291_s13 + $0x34c] sm:$0xf0]  ;;  %v10861_v18 = vld [vmem:[%s15291_s13 + $0x328] sm:$0xf]  ;;  %v13726_v52 = vld [vmem:[%s15291_s13 + $0x350] sm:$0xf0] }
 0x3d0   : > { %v6357_v54 = vpop.f32.mrf.mxu3 }
 0x3d1   : > { %v16257_v17 = vadd.f32 %v6357_v54, %v6029_v62  ;;  %v13720_v62 = vld [vmem:[%s15291_s13 + $0x324] sm:$0xf]  ;;  %v10869_v54 = vld [vmem:[%s15291_s13 + $0x330] sm:$0xf] }
 0x3d2   : > { %v6277_v60 = vpop.f32.mrf.mxu2  ;;  %v6698_v7 = vpop.f32.mrf.mxu0 }
 0x3d3   : > { %18248 = vst [vmem:[#allocation88_spill] sm:$0xff] %v16257_v17  ;;  %v16259_v24 = vadd.f32 %v6277_v60, %v5949_v30  ;;  %v7027_v1 = vpop.f32.mrf.mxu1  ;;  %v18251_v17 = vld [vmem:[#allocation17_spill] sm:$0xff] }
 0x3d5   : > { %6408 = vmatmul.bf16.gmra.mxu3 %v10814_v8  ;;  %6737 = vmatmul.bf16.gmra.mxu0 %v10818_v61  ;;  %v13727_v8 = vld [vmem:[%s15291_s13 + $0x358] sm:$0xf0]  ;;  %v13721_v61 = vld [vmem:[%s15291_s13 + $0x32c] sm:$0xf] }
 0x3d6   : > { %7066 = vmatmul.bf16.gmra.mxu1 %v10822_v19 }
 0x3d7   : > { %7395 = vmatmul.bf16.gmra.mxu2 %v10826_v47  ;;  %v10863_v47 = vld [vmem:[%s15291_s13 + $0x354] sm:$0xf0] }
 0x3d8   : > { %v6369_v35 = vpop.f32.mrf.mxu3 }
 0x3d9   : > { %v6370_v30 = vadd.f32 %v6369_v35, %v18249_v32  ;;  %v10858_v35 = vor.u32 %v13720_v62, %v10855_v55  ;;  %v10862_v32 = vor.u32 %v13726_v52, %v10861_v18 }
 0x3da   : > { %v7356_v31 = vpop.f32.mrf.mxu2  ;;  %v6700_v57 = vpop.f32.mrf.mxu0 }
 0x3db   : > { %v6699_v42 = vadd.f32 %v6698_v7, %v6370_v30  ;;  %v7029_v56 = vpop.f32.mrf.mxu1  ;;  %v10870_v7 = vor.u32 %v13727_v8, %v10869_v54  ;;  %v10866_v30 = vor.u32 %v13721_v61, %v10863_v47  ;;  %v10899_v54 = vld [vmem:[%s15291_s13 + $0x3a4] sm:$0xf0]  ;;  %v10905_v8 = vld [vmem:[%s15291_s13 + $0x380] sm:$0xf]  ;;  %v13737_v61 = vld [vmem:[%s15291_s13 + $0x3a8] sm:$0xf0] }
 0x3dc   : > { %v10913_v47 = vld [vmem:[%s15291_s13 + $0x388] sm:$0xf] }
 0x3dd   : > { %v7028_v9 = vadd.f32 %v7027_v1, %v6699_v42 }
 0x3df   : > { %v16267_v60 = vadd.f32 %v7356_v31, %v7028_v9  ;;  %v18253_v9 = vld [vmem:[#allocation18_spill] sm:$0xff] }
 0x3e0   : > { %v6371_v19 = vpop.f32.mrf.mxu3 }
 0x3e1   : > { %18250 = vst [vmem:[#allocation48_spill] sm:$0xff] %v16267_v60  ;;  %v6372_v53 = vadd.f32 %v6371_v19, %v18251_v17 }
 0x3e2   : > { %v7358_v58 = vpop.f32.mrf.mxu2  ;;  %v6703_v13 = vpop.f32.mrf.mxu0 }
 0x3e3   : > { %v6701_v1 = vadd.f32 %v6700_v57, %v6372_v53  ;;  %v7032_v42 = vpop.f32.mrf.mxu1 }
 0x3e5   : > { %v7030_v38 = vadd.f32 %v7029_v56, %v6701_v1  ;;  %6413 = vmatmul.bf16.gmra.mxu3 %v10858_v35  ;;  %6742 = vmatmul.bf16.gmra.mxu0 %v10862_v32  ;;  %v13731_v56 = vld [vmem:[%s15291_s13 + $0x37c] sm:$0xf]  ;;  %v13738_v35 = vld [vmem:[%s15291_s13 + $0x3b0] sm:$0xf0]  ;;  %v13732_v32 = vld [vmem:[%s15291_s13 + $0x384] sm:$0xf] }
 0x3e6   : > { %7071 = vmatmul.bf16.gmra.mxu1 %v10866_v30 }
 0x3e7   : > { %7400 = vmatmul.bf16.gmra.mxu2 %v10870_v7  ;;  %v16273_v17 = vadd.f32 %v7358_v58, %v7030_v38  ;;  %v10907_v38 = vld [vmem:[%s15291_s13 + $0x3ac] sm:$0xf0]  ;;  %v18255_v7 = vld [vmem:[#allocation19_spill] sm:$0xff] }
 0x3e8   : > { %v6374_v31 = vpop.f32.mrf.mxu3 }
 0x3e9   : > { %18252 = vst [vmem:[#allocation90_spill] sm:$0xff] %v16273_v17  ;;  %v6375_v62 = vadd.f32 %v6374_v31, %v18253_v9  ;;  %v10902_v31 = vor.u32 %v13731_v56, %v10899_v54  ;;  %v10906_v9 = vor.u32 %v13737_v61, %v10905_v8  ;;  %v18257_v56 = vld [vmem:[#allocation20_spill] sm:$0xff] }
 0x3ea   : > { %v7361_v55 = vpop.f32.mrf.mxu2  ;;  %v6705_v53 = vpop.f32.mrf.mxu0 }
 0x3eb   : > { %v6704_v57 = vadd.f32 %v6703_v13, %v6375_v62  ;;  %v7034_v18 = vpop.f32.mrf.mxu1  ;;  %v10914_v13 = vor.u32 %v13738_v35, %v10913_v47  ;;  %v10910_v62 = vor.u32 %v13732_v32, %v10907_v38  ;;  %v10943_v32 = vld [vmem:[%s15291_s13 + $0x3fc] sm:$0xf0]  ;;  %v10949_v38 = vld [vmem:[%s15291_s13 + $0x3d8] sm:$0xf] }
 0x3ed   : > { %v7033_v52 = vadd.f32 %v7032_v42, %v6704_v57 }
 0x3ef   : > { %v16281_v19 = vadd.f32 %v7361_v55, %v7033_v52 }
 0x3f0   : > { %v6376_v58 = vpop.f32.mrf.mxu3 }
 0x3f1   : > { %18254 = vst [vmem:[#allocation50_spill] sm:$0xff] %v16281_v19  ;;  %v6377_v30 = vadd.f32 %v6376_v58, %v18255_v7  ;;  %v13748_v58 = vld [vmem:[%s15291_s13 + $0x400] sm:$0xf0]  ;;  %v10957_v7 = vld [vmem:[%s15291_s13 + $0x3e0] sm:$0xf] }
 0x3f2   : > { %v7363_v1 = vpop.f32.mrf.mxu2  ;;  %v6708_v17 = vpop.f32.mrf.mxu0 }
 0x3f3   : > { %v6706_v42 = vadd.f32 %v6705_v53, %v6377_v30  ;;  %v7037_v57 = vpop.f32.mrf.mxu1 }
 0x3f5   : > { %v7035_v60 = vadd.f32 %v7034_v18, %v6706_v42  ;;  %6418 = vmatmul.bf16.gmra.mxu3 %v10902_v31  ;;  %6747 = vmatmul.bf16.gmra.mxu0 %v10906_v9  ;;  %v13742_v18 = vld [vmem:[%s15291_s13 + $0x3d4] sm:$0xf]  ;;  %v13749_v31 = vld [vmem:[%s15291_s13 + $0x408] sm:$0xf0]  ;;  %v13743_v9 = vld [vmem:[%s15291_s13 + $0x3dc] sm:$0xf] }
 0x3f6   : > { %7076 = vmatmul.bf16.gmra.mxu1 %v10910_v62 }
 0x3f7   : > { %7405 = vmatmul.bf16.gmra.mxu2 %v10914_v13  ;;  %v16287_v55 = vadd.f32 %v7363_v1, %v7035_v60  ;;  %v10951_v60 = vld [vmem:[%s15291_s13 + $0x404] sm:$0xf0]  ;;  %v18259_v13 = vld [vmem:[#allocation21_spill] sm:$0xff] }
 0x3f8   : > { %v6379_v52 = vpop.f32.mrf.mxu3 }
 0x3f9   : > { %18256 = vst [vmem:[#allocation92_spill] sm:$0xff] %v16287_v55  ;;  %v6380_v54 = vadd.f32 %v6379_v52, %v18257_v56  ;;  %v10946_v52 = vor.u32 %v13742_v18, %v10943_v32  ;;  %v10950_v56 = vor.u32 %v13748_v58, %v10949_v38  ;;  %v18261_v18 = vld [vmem:[#allocation22_spill] sm:$0xff] }
 0x3fa   : > { %v7366_v8 = vpop.f32.mrf.mxu2  ;;  %v6710_v53 = vpop.f32.mrf.mxu0 }
 0x3fb   : > { %v6709_v61 = vadd.f32 %v6708_v17, %v6380_v54  ;;  %v7039_v47 = vpop.f32.mrf.mxu1  ;;  %v10958_v17 = vor.u32 %v13749_v31, %v10957_v7  ;;  %v10954_v54 = vor.u32 %v13743_v9, %v10951_v60  ;;  %v10987_v9 = vld [vmem:[%s15291_s13 + $0x454] sm:$0xf0]  ;;  %v10993_v60 = vld [vmem:[%s15291_s13 + $0x430] sm:$0xf] }
 0x3fd   : > { %v7038_v35 = vadd.f32 %v7037_v57, %v6709_v61 }
 0x3ff   : > { %v16295_v30 = vadd.f32 %v7366_v8, %v7038_v35 }
 0x400   : > { %v6381_v1 = vpop.f32.mrf.mxu3 }
 0x401   : > { %18258 = vst [vmem:[#allocation52_spill] sm:$0xff] %v16295_v30  ;;  %v6382_v62 = vadd.f32 %v6381_v1, %v18259_v13  ;;  %v13759_v1 = vld [vmem:[%s15291_s13 + $0x458] sm:$0xf0]  ;;  %v11001_v13 = vld [vmem:[%s15291_s13 + $0x438] sm:$0xf] }
 0x402   : > { %v7368_v42 = vpop.f32.mrf.mxu2  ;;  %v6713_v55 = vpop.f32.mrf.mxu0 }
 0x403   : > { %v6711_v57 = vadd.f32 %v6710_v53, %v6382_v62  ;;  %v7042_v61 = vpop.f32.mrf.mxu1 }
 0x405   : > { %v7040_v19 = vadd.f32 %v7039_v47, %v6711_v57  ;;  %6423 = vmatmul.bf16.gmra.mxu3 %v10946_v52  ;;  %6752 = vmatmul.bf16.gmra.mxu0 %v10950_v56  ;;  %v13753_v47 = vld [vmem:[%s15291_s13 + $0x42c] sm:$0xf]  ;;  %v13760_v52 = vld [vmem:[%s15291_s13 + $0x460] sm:$0xf0]  ;;  %v13754_v56 = vld [vmem:[%s15291_s13 + $0x434] sm:$0xf] }
 0x406   : > { %7081 = vmatmul.bf16.gmra.mxu1 %v10954_v54 }
 0x407   : > { %7410 = vmatmul.bf16.gmra.mxu2 %v10958_v17  ;;  %v16301_v8 = vadd.f32 %v7368_v42, %v7040_v19  ;;  %v10995_v19 = vld [vmem:[%s15291_s13 + $0x45c] sm:$0xf0] }
 0x408   : > { %v6384_v35 = vpop.f32.mrf.mxu3  ;;  %v18263_v17 = vld [vmem:[#allocation23_spill] sm:$0xff] }
 0x409   : > { %18260 = vst [vmem:[#allocation94_spill] sm:$0xff] %v16301_v8  ;;  %v6385_v32 = vadd.f32 %v6384_v35, %v18261_v18  ;;  %v10990_v35 = vor.u32 %v13753_v47, %v10987_v9  ;;  %v10994_v18 = vor.u32 %v13759_v1, %v10993_v60  ;;  %v18265_v47 = vld [vmem:[#allocation24_spill] sm:$0xff] }
 0x40a   : > { %v7371_v38 = vpop.f32.mrf.mxu2  ;;  %v6715_v53 = vpop.f32.mrf.mxu0 }
 0x40b   : > { %v6714_v58 = vadd.f32 %v6713_v55, %v6385_v32  ;;  %v7044_v7 = vpop.f32.mrf.mxu1  ;;  %v11002_v55 = vor.u32 %v13760_v52, %v11001_v13  ;;  %v10998_v32 = vor.u32 %v13754_v56, %v10995_v19  ;;  %v11031_v56 = vld [vmem:[%s15291_s13 + $0x4ac] sm:$0xf0]  ;;  %v11037_v19 = vld [vmem:[%s15291_s13 + $0x488] sm:$0xf] }
 0x40d   : > { %v7043_v31 = vadd.f32 %v7042_v61, %v6714_v58 }
 0x40f   : > { %v16309_v62 = vadd.f32 %v7371_v38, %v7043_v31 }
 0x410   : > { %v6386_v42 = vpop.f32.mrf.mxu3 }
 0x411   : > { %18262 = vst [vmem:[#allocation54_spill] sm:$0xff] %v16309_v62  ;;  %v6387_v54 = vadd.f32 %v6386_v42, %v18263_v17  ;;  %v13770_v42 = vld [vmem:[%s15291_s13 + $0x4b0] sm:$0xf0]  ;;  %v11045_v17 = vld [vmem:[%s15291_s13 + $0x490] sm:$0xf] }
 0x412   : > { %v7373_v57 = vpop.f32.mrf.mxu2  ;;  %v6718_v8 = vpop.f32.mrf.mxu0 }
 0x413   : > { %v6716_v61 = vadd.f32 %v6715_v53, %v6387_v54  ;;  %v7047_v58 = vpop.f32.mrf.mxu1 }
 0x415   : > { %v7045_v30 = vadd.f32 %v7044_v7, %v6716_v61  ;;  %6428 = vmatmul.bf16.gmra.mxu3 %v10990_v35  ;;  %6757 = vmatmul.bf16.gmra.mxu0 %v10994_v18  ;;  %v13764_v7 = vld [vmem:[%s15291_s13 + $0x484] sm:$0xf]  ;;  %v13771_v35 = vld [vmem:[%s15291_s13 + $0x4b8] sm:$0xf0]  ;;  %v13765_v18 = vld [vmem:[%s15291_s13 + $0x48c] sm:$0xf] }
 0x416   : > { %7086 = vmatmul.bf16.gmra.mxu1 %v10998_v32 }
 0x417   : > { %7415 = vmatmul.bf16.gmra.mxu2 %v11002_v55  ;;  %v16315_v38 = vadd.f32 %v7373_v57, %v7045_v30  ;;  %v11039_v30 = vld [vmem:[%s15291_s13 + $0x4b4] sm:$0xf0]  ;;  %v18267_v55 = vld [vmem:[#allocation25_spill] sm:$0xff] }
 0x418   : > { %v6389_v31 = vpop.f32.mrf.mxu3 }
 0x419   : > { %18264 = vst [vmem:[#allocation96_spill] sm:$0xff] %v16315_v38  ;;  %v6390_v9 = vadd.f32 %v6389_v31, %v18265_v47  ;;  %v11034_v31 = vor.u32 %v13764_v7, %v11031_v56  ;;  %v11038_v47 = vor.u32 %v13770_v42, %v11037_v19  ;;  %v18269_v7 = vld [vmem:[#allocation26_spill] sm:$0xff] }
 0x41a   : > { %v7376_v60 = vpop.f32.mrf.mxu2  ;;  %v6720_v53 = vpop.f32.mrf.mxu0 }
 0x41b   : > { %v6719_v1 = vadd.f32 %v6718_v8, %v6390_v9  ;;  %v7049_v13 = vpop.f32.mrf.mxu1  ;;  %v11046_v8 = vor.u32 %v13771_v35, %v11045_v17  ;;  %v11042_v9 = vor.u32 %v13765_v18, %v11039_v30  ;;  %v11075_v18 = vld [vmem:[%s15291_s13 + $0x504] sm:$0xf0]  ;;  %v11081_v30 = vld [vmem:[%s15291_s13 + $0x4e0] sm:$0xf] }
 0x41d   : > { %v7048_v52 = vadd.f32 %v7047_v58, %v6719_v1 }
 0x41f   : > { %v16323_v54 = vadd.f32 %v7376_v60, %v7048_v52 }
 0x420   : > { %v6391_v57 = vpop.f32.mrf.mxu3 }
 0x421   : > { %18266 = vst [vmem:[#allocation56_spill] sm:$0xff] %v16323_v54  ;;  %v6392_v32 = vadd.f32 %v6391_v57, %v18267_v55  ;;  %v13781_v57 = vld [vmem:[%s15291_s13 + $0x508] sm:$0xf0]  ;;  %v11089_v55 = vld [vmem:[%s15291_s13 + $0x4e8] sm:$0xf] }
 0x422   : > { %v7378_v61 = vpop.f32.mrf.mxu2  ;;  %v6723_v38 = vpop.f32.mrf.mxu0 }
 0x423   : > { %v6721_v58 = vadd.f32 %v6720_v53, %v6392_v32  ;;  %v7052_v1 = vpop.f32.mrf.mxu1 }
 0x425   : > { %v7050_v62 = vadd.f32 %v7049_v13, %v6721_v58  ;;  %6433 = vmatmul.bf16.gmra.mxu3 %v11034_v31  ;;  %6762 = vmatmul.bf16.gmra.mxu0 %v11038_v47  ;;  %v13775_v13 = vld [vmem:[%s15291_s13 + $0x4dc] sm:$0xf]  ;;  %v13782_v31 = vld [vmem:[%s15291_s13 + $0x510] sm:$0xf0]  ;;  %v13776_v47 = vld [vmem:[%s15291_s13 + $0x4e4] sm:$0xf] }
 0x426   : > { %7091 = vmatmul.bf16.gmra.mxu1 %v11042_v9 }
 0x427   : > { %7420 = vmatmul.bf16.gmra.mxu2 %v11046_v8  ;;  %v16329_v60 = vadd.f32 %v7378_v61, %v7050_v62  ;;  %v11083_v62 = vld [vmem:[%s15291_s13 + $0x50c] sm:$0xf0]  ;;  %v18271_v8 = vld [vmem:[#allocation27_spill] sm:$0xff] }
 0x428   : > { %v6394_v52 = vpop.f32.mrf.mxu3 }
 0x429   : > { %18268 = vst [vmem:[#allocation16_spill] sm:$0xff] %v16329_v60  ;;  %v6395_v56 = vadd.f32 %v6394_v52, %v18269_v7  ;;  %v11078_v52 = vor.u32 %v13775_v13, %v11075_v18  ;;  %v11082_v7 = vor.u32 %v13781_v57, %v11081_v30  ;;  %v18273_v18 = vld [vmem:[#allocation28_spill] sm:$0xff] }
 0x42a   : > { %v7381_v19 = vpop.f32.mrf.mxu2  ;;  %v6725_v53 = vpop.f32.mrf.mxu0 }
 0x42b   : > { %v6724_v42 = vadd.f32 %v6723_v38, %v6395_v56  ;;  %v7054_v17 = vpop.f32.mrf.mxu1  ;;  %v11090_v38 = vor.u32 %v13782_v31, %v11089_v55  ;;  %v11086_v56 = vor.u32 %v13776_v47, %v11083_v62  ;;  %v13786_v31 = vld [vmem:[%s15291_s13 + $0x534] sm:$0xf]  ;;  %v11119_v47 = vld [vmem:[%s15291_s13 + $0x55c] sm:$0xf0] }
 0x42d   : > { %v7053_v35 = vadd.f32 %v7052_v1, %v6724_v42 }
 0x42f   : > { %v16337_v32 = vadd.f32 %v7381_v19, %v7053_v35  ;;  %v14385_v35 = vld [vmem:[#allocation6 + $0x1e8] sm:$0xff] }
 0x430   : > { %v6396_v61 = vpop.f32.mrf.mxu3  ;;  %7678 = vmatpush.bf16.msra.mxu3 %v14385_v35 }
 0x431   : > { %18270 = vst [vmem:[#allocation17_spill] sm:$0xff] %v16337_v32  ;;  %v6397_v9 = vadd.f32 %v6396_v61, %v18271_v8  ;;  %v11125_v61 = vld [vmem:[%s15291_s13 + $0x538] sm:$0xf]  ;;  %v13792_v8 = vld [vmem:[%s15291_s13 + $0x560] sm:$0xf0] }
 0x432   : > { %v7383_v58 = vpop.f32.mrf.mxu2  ;;  %v6728_v60 = vpop.f32.mrf.mxu0 }
 0x433   : > { %v6726_v1 = vadd.f32 %v6725_v53, %v6397_v9  ;;  %v7057_v42 = vpop.f32.mrf.mxu1  ;;  %v11133_v9 = vld [vmem:[%s15291_s13 + $0x540] sm:$0xf] }
 0x435   : > { %v7055_v54 = vadd.f32 %v7054_v17, %v6726_v1  ;;  %6438 = vmatmul.bf16.gmra.mxu3 %v11078_v52  ;;  %6767 = vmatmul.bf16.gmra.mxu0 %v11082_v7  ;;  %v13793_v52 = vld [vmem:[%s15291_s13 + $0x568] sm:$0xf0] }
 0x436   : > { %7096 = vmatmul.bf16.gmra.mxu1 %v11086_v56  ;;  %v14393_v56 = vld [vmem:[#allocation6 + $0x228] sm:$0xff] }
 0x437   : > { %7425 = vmatmul.bf16.gmra.mxu2 %v11090_v38  ;;  %v16343_v19 = vadd.f32 %v7383_v58, %v7055_v54  ;;  %v13787_v54 = vld [vmem:[%s15291_s13 + $0x53c] sm:$0xf]  ;;  %v11127_v58 = vld [vmem:[%s15291_s13 + $0x564] sm:$0xf0]  ;;  %8007 = vmatpush.bf16.msra.mxu0 %v14393_v56 }
 0x438   : > { %v6399_v13 = vpop.f32.mrf.mxu3  ;;  %v14409_v38 = vld [vmem:[#allocation6 + $0x2a8] sm:$0xff]  ;;  %v11130_v32 = vor.u32 %v13787_v54, %v11127_v58  ;;  %v13803_v56 = vld [vmem:[%s15291_s13 + $0x5b8] sm:$0xf0] }
 0x439   : > { %18272 = vst [vmem:[#allocation18_spill] sm:$0xff] %v16343_v19  ;;  %v6400_v53 = vadd.f32 %v6399_v13, %v18273_v18  ;;  %v14401_v1 = vld [vmem:[#allocation6 + $0x268] sm:$0xff]  ;;  %8665 = vmatpush.bf16.msra.mxu2 %v14409_v38  ;;  %v11169_v38 = vld [vmem:[%s15291_s13 + $0x590] sm:$0xf] }
 0x43a   : > { %v7386_v30 = vpop.f32.mrf.mxu2  ;;  %v6730_v57 = vpop.f32.mrf.mxu0  ;;  %v18275_v18 = vld [vmem:[#allocation29_spill] sm:$0xff]  ;;  %8336 = vmatpush.bf16.msra.mxu1 %v14401_v1  ;;  %v11177_v1 = vld [vmem:[%s15291_s13 + $0x598] sm:$0xf] }
 0x43b   : > { %v6729_v17 = vadd.f32 %v6728_v60, %v6400_v53  ;;  %v7059_v55 = vpop.f32.mrf.mxu1  ;;  %v11122_v60 = vor.u32 %v13786_v31, %v11119_v47  ;;  %v11126_v53 = vor.u32 %v13792_v8, %v11125_v61  ;;  %v18277_v61 = vld [vmem:[#allocation30_spill] sm:$0xff] }
 0x43d   : > { %v7058_v62 = vadd.f32 %v7057_v42, %v6729_v17  ;;  %v11134_v17 = vor.u32 %v13793_v52, %v11133_v9 }
 0x43f   : > { %v16354_v7 = vadd.f32 %v7386_v30, %v7058_v62 }
 0x440   : > { %v6401_v13 = vpop.f32.mrf.mxu3 }
 0x441   : > { %18274 = vst [vmem:[#allocation19_spill] sm:$0xff] %v16354_v7  ;;  %v6402_v35 = vadd.f32 %v6401_v13, %v18275_v18  ;;  %v13798_v18 = vld [vmem:[%s15291_s13 + $0x594] sm:$0xf] }
 0x442   : > { %v7388_v19 = vpop.f32.mrf.mxu2  ;;  %v6733_v42 = vpop.f32.mrf.mxu0 }
 0x443   : > { %v6731_v34 = vadd.f32 %v6730_v57, %v6402_v35  ;;  %v7062_v30 = vpop.f32.mrf.mxu1 }
 0x445   : > { %v7060_v62 = vadd.f32 %v7059_v55, %v6731_v34  ;;  %6443 = vmatmul.bf16.gmra.mxu3 %v11122_v60  ;;  %6772 = vmatmul.bf16.gmra.mxu0 %v11126_v53  ;;  %v13797_v34 = vld [vmem:[%s15291_s13 + $0x58c] sm:$0xf]  ;;  %v11163_v55 = vld [vmem:[%s15291_s13 + $0x5b4] sm:$0xf0]  ;;  %v18279_v60 = vld [vmem:[#allocation31_spill] sm:$0xff] }
 0x446   : > { %7101 = vmatmul.bf16.gmra.mxu1 %v11130_v32  ;;  %v13804_v32 = vld [vmem:[%s15291_s13 + $0x5c0] sm:$0xf0] }
 0x447   : > { %7430 = vmatmul.bf16.gmra.mxu2 %v11134_v17  ;;  %v16357_v31 = vadd.f32 %v7388_v19, %v7060_v62  ;;  %v11171_v19 = vld [vmem:[%s15291_s13 + $0x5bc] sm:$0xf0]  ;;  %v11166_v62 = vor.u32 %v13797_v34, %v11163_v55  ;;  %v18281_v34 = vld [vmem:[#allocation32_spill] sm:$0xff] }
 0x448   : > { %v6404_v47 = vpop.f32.mrf.mxu3 }
 0x449   : > { %18276 = vst [vmem:[#allocation20_spill] sm:$0xff] %v16357_v31  ;;  %v6405_v8 = vadd.f32 %v6404_v47, %v18277_v61  ;;  %v11170_v47 = vor.u32 %v13803_v56, %v11169_v38 }
 0x44a   : > { %v7391_v9 = vpop.f32.mrf.mxu2  ;;  %v6735_v57 = vpop.f32.mrf.mxu0 }
 0x44b   : > { %v6734_v52 = vadd.f32 %v6733_v42, %v6405_v8  ;;  %v7064_v54 = vpop.f32.mrf.mxu1  ;;  %v11178_v42 = vor.u32 %v13804_v32, %v11177_v1  ;;  %v11174_v8 = vor.u32 %v13798_v18, %v11171_v19  ;;  %v11207_v18 = vld [vmem:[%s15291_s13 + $0x60c] sm:$0xf0]  ;;  %v11213_v19 = vld [vmem:[%s15291_s13 + $0x5e8] sm:$0xf] }
 0x44d   : > { %v7063_v58 = vadd.f32 %v7062_v30, %v6734_v52 }
 0x44f   : > { %v16365_v13 = vadd.f32 %v7391_v9, %v7063_v58 }
 0x450   : > { %v6406_v35 = vpop.f32.mrf.mxu3 }
 0x451   : > { %18278 = vst [vmem:[#allocation21_spill] sm:$0xff] %v16365_v13  ;;  %v6407_v53 = vadd.f32 %v6406_v35, %v18279_v60  ;;  %v13814_v35 = vld [vmem:[%s15291_s13 + $0x610] sm:$0xf0]  ;;  %v11221_v60 = vld [vmem:[%s15291_s13 + $0x5f0] sm:$0xf] }
 0x452   : > { %v7393_v17 = vpop.f32.mrf.mxu2  ;;  %v6738_v61 = vpop.f32.mrf.mxu0 }
 0x453   : > { %v6736_v30 = vadd.f32 %v6735_v57, %v6407_v53  ;;  %v7067_v52 = vpop.f32.mrf.mxu1 }
 0x455   : > { %v7065_v31 = vadd.f32 %v7064_v54, %v6736_v30  ;;  %6448 = vmatmul.bf16.gmra.mxu3 %v11166_v62  ;;  %6777 = vmatmul.bf16.gmra.mxu0 %v11170_v47  ;;  %v13808_v54 = vld [vmem:[%s15291_s13 + $0x5e4] sm:$0xf]  ;;  %v13815_v62 = vld [vmem:[%s15291_s13 + $0x618] sm:$0xf0]  ;;  %v13809_v47 = vld [vmem:[%s15291_s13 + $0x5ec] sm:$0xf] }
 0x456   : > { %7106 = vmatmul.bf16.gmra.mxu1 %v11174_v8 }
 0x457   : > { %7435 = vmatmul.bf16.gmra.mxu2 %v11178_v42  ;;  %v16371_v9 = vadd.f32 %v7393_v17, %v7065_v31  ;;  %v11215_v31 = vld [vmem:[%s15291_s13 + $0x614] sm:$0xf0]  ;;  %v18283_v42 = vld [vmem:[#allocation33_spill] sm:$0xff] }
 0x458   : > { %v6409_v58 = vpop.f32.mrf.mxu3 }
 0x459   : > { %18280 = vst [vmem:[#allocation22_spill] sm:$0xff] %v16371_v9  ;;  %v6410_v55 = vadd.f32 %v6409_v58, %v18281_v34  ;;  %v11210_v58 = vor.u32 %v13808_v54, %v11207_v18  ;;  %v11214_v34 = vor.u32 %v13814_v35, %v11213_v19  ;;  %v18285_v54 = vld [vmem:[#allocation34_spill] sm:$0xff] }
 0x45a   : > { %v7396_v38 = vpop.f32.mrf.mxu2  ;;  %v6740_v57 = vpop.f32.mrf.mxu0 }
 0x45b   : > { %v6739_v56 = vadd.f32 %v6738_v61, %v6410_v55  ;;  %v7069_v1 = vpop.f32.mrf.mxu1  ;;  %v11222_v61 = vor.u32 %v13815_v62, %v11221_v60  ;;  %v11218_v55 = vor.u32 %v13809_v47, %v11215_v31  ;;  %v11251_v47 = vld [vmem:[%s15291_s13 + $0x664] sm:$0xf0]  ;;  %v11257_v31 = vld [vmem:[%s15291_s13 + $0x640] sm:$0xf] }
 0x45d   : > { %v7068_v32 = vadd.f32 %v7067_v52, %v6739_v56 }
 0x45f   : > { %v16379_v53 = vadd.f32 %v7396_v38, %v7068_v32 }
 0x460   : > { %v6411_v17 = vpop.f32.mrf.mxu3 }
 0x461   : > { %18282 = vst [vmem:[#allocation23_spill] sm:$0xff] %v16379_v53  ;;  %v6412_v8 = vadd.f32 %v6411_v17, %v18283_v42  ;;  %v13825_v17 = vld [vmem:[%s15291_s13 + $0x668] sm:$0xf0]  ;;  %v11265_v42 = vld [vmem:[%s15291_s13 + $0x648] sm:$0xf] }
 0x462   : > { %v7398_v30 = vpop.f32.mrf.mxu2  ;;  %v6743_v9 = vpop.f32.mrf.mxu0 }
 0x463   : > { %v6741_v52 = vadd.f32 %v6740_v57, %v6412_v8  ;;  %v7072_v56 = vpop.f32.mrf.mxu1 }
 0x465   : > { %v7070_v13 = vadd.f32 %v7069_v1, %v6741_v52  ;;  %6453 = vmatmul.bf16.gmra.mxu3 %v11210_v58  ;;  %6782 = vmatmul.bf16.gmra.mxu0 %v11214_v34  ;;  %v13819_v1 = vld [vmem:[%s15291_s13 + $0x63c] sm:$0xf]  ;;  %v13826_v58 = vld [vmem:[%s15291_s13 + $0x670] sm:$0xf0]  ;;  %v13820_v34 = vld [vmem:[%s15291_s13 + $0x644] sm:$0xf] }
 0x466   : > { %7111 = vmatmul.bf16.gmra.mxu1 %v11218_v55 }
 0x467   : > { %7440 = vmatmul.bf16.gmra.mxu2 %v11222_v61  ;;  %v16385_v38 = vadd.f32 %v7398_v30, %v7070_v13  ;;  %v11259_v13 = vld [vmem:[%s15291_s13 + $0x66c] sm:$0xf0]  ;;  %v18287_v61 = vld [vmem:[#allocation35_spill] sm:$0xff] }
 0x468   : > { %v6414_v32 = vpop.f32.mrf.mxu3 }
 0x469   : > { %18284 = vst [vmem:[#allocation24_spill] sm:$0xff] %v16385_v38  ;;  %v6415_v18 = vadd.f32 %v6414_v32, %v18285_v54  ;;  %v11254_v32 = vor.u32 %v13819_v1, %v11251_v47  ;;  %v11258_v54 = vor.u32 %v13825_v17, %v11257_v31  ;;  %v18289_v1 = vld [vmem:[#allocation36_spill] sm:$0xff] }
 0x46a   : > { %v7401_v19 = vpop.f32.mrf.mxu2  ;;  %v6745_v57 = vpop.f32.mrf.mxu0 }
 0x46b   : > { %v6744_v35 = vadd.f32 %v6743_v9, %v6415_v18  ;;  %v7074_v60 = vpop.f32.mrf.mxu1  ;;  %v11266_v9 = vor.u32 %v13826_v58, %v11265_v42  ;;  %v11262_v18 = vor.u32 %v13820_v34, %v11259_v13  ;;  %v11295_v34 = vld [vmem:[%s15291_s13 + $0x6bc] sm:$0xf0]  ;;  %v11301_v13 = vld [vmem:[%s15291_s13 + $0x698] sm:$0xf] }
 0x46d   : > { %v7073_v62 = vadd.f32 %v7072_v56, %v6744_v35 }
 0x46f   : > { %v16393_v8 = vadd.f32 %v7401_v19, %v7073_v62 }
 0x470   : > { %v6416_v30 = vpop.f32.mrf.mxu3 }
 0x471   : > { %18286 = vst [vmem:[#allocation25_spill] sm:$0xff] %v16393_v8  ;;  %v6417_v55 = vadd.f32 %v6416_v30, %v18287_v61  ;;  %v13836_v30 = vld [vmem:[%s15291_s13 + $0x6c0] sm:$0xf0]  ;;  %v11309_v61 = vld [vmem:[%s15291_s13 + $0x6a0] sm:$0xf] }
 0x472   : > { %v7403_v52 = vpop.f32.mrf.mxu2  ;;  %v6748_v38 = vpop.f32.mrf.mxu0 }
 0x473   : > { %v6746_v56 = vadd.f32 %v6745_v57, %v6417_v55  ;;  %v7077_v35 = vpop.f32.mrf.mxu1 }
 0x475   : > { %v7075_v53 = vadd.f32 %v7074_v60, %v6746_v56  ;;  %6458 = vmatmul.bf16.gmra.mxu3 %v11254_v32  ;;  %6787 = vmatmul.bf16.gmra.mxu0 %v11258_v54  ;;  %v13830_v60 = vld [vmem:[%s15291_s13 + $0x694] sm:$0xf]  ;;  %v13837_v32 = vld [vmem:[%s15291_s13 + $0x6c8] sm:$0xf0]  ;;  %v13831_v54 = vld [vmem:[%s15291_s13 + $0x69c] sm:$0xf] }
 0x476   : > { %7116 = vmatmul.bf16.gmra.mxu1 %v11262_v18 }
 0x477   : > { %7445 = vmatmul.bf16.gmra.mxu2 %v11266_v9  ;;  %v16399_v19 = vadd.f32 %v7403_v52, %v7075_v53  ;;  %v11303_v53 = vld [vmem:[%s15291_s13 + $0x6c4] sm:$0xf0]  ;;  %v18291_v9 = vld [vmem:[#allocation37_spill] sm:$0xff] }
 0x478   : > { %v6419_v62 = vpop.f32.mrf.mxu3 }
 0x479   : > { %18288 = vst [vmem:[#allocation26_spill] sm:$0xff] %v16399_v19  ;;  %v6420_v47 = vadd.f32 %v6419_v62, %v18289_v1  ;;  %v11298_v62 = vor.u32 %v13830_v60, %v11295_v34  ;;  %v11302_v1 = vor.u32 %v13836_v30, %v11301_v13  ;;  %v18293_v60 = vld [vmem:[#allocation39_spill] sm:$0xff] }
 0x47a   : > { %v7406_v31 = vpop.f32.mrf.mxu2  ;;  %v6750_v57 = vpop.f32.mrf.mxu0 }
 0x47b   : > { %v6749_v17 = vadd.f32 %v6748_v38, %v6420_v47  ;;  %v7079_v42 = vpop.f32.mrf.mxu1  ;;  %v11310_v38 = vor.u32 %v13837_v32, %v11309_v61  ;;  %v11306_v47 = vor.u32 %v13831_v54, %v11303_v53  ;;  %v11339_v54 = vld [vmem:[%s15291_s13 + $0x714] sm:$0xf0]  ;;  %v11345_v53 = vld [vmem:[%s15291_s13 + $0x6f0] sm:$0xf] }
 0x47d   : > { %v7078_v58 = vadd.f32 %v7077_v35, %v6749_v17 }
 0x47f   : > { %v16407_v55 = vadd.f32 %v7406_v31, %v7078_v58 }
 0x480   : > { %v6421_v52 = vpop.f32.mrf.mxu3 }
 0x481   : > { %18290 = vst [vmem:[#allocation27_spill] sm:$0xff] %v16407_v55  ;;  %v6422_v18 = vadd.f32 %v6421_v52, %v18291_v9  ;;  %v13847_v52 = vld [vmem:[%s15291_s13 + $0x718] sm:$0xf0]  ;;  %v11353_v9 = vld [vmem:[%s15291_s13 + $0x6f8] sm:$0xf] }
 0x482   : > { %v7408_v56 = vpop.f32.mrf.mxu2  ;;  %v6753_v19 = vpop.f32.mrf.mxu0 }
 0x483   : > { %v6751_v35 = vadd.f32 %v6750_v57, %v6422_v18  ;;  %v7082_v17 = vpop.f32.mrf.mxu1 }
 0x485   : > { %v7080_v8 = vadd.f32 %v7079_v42, %v6751_v35  ;;  %6463 = vmatmul.bf16.gmra.mxu3 %v11298_v62  ;;  %6792 = vmatmul.bf16.gmra.mxu0 %v11302_v1  ;;  %v13841_v42 = vld [vmem:[%s15291_s13 + $0x6ec] sm:$0xf]  ;;  %v13848_v62 = vld [vmem:[%s15291_s13 + $0x720] sm:$0xf0]  ;;  %v13842_v1 = vld [vmem:[%s15291_s13 + $0x6f4] sm:$0xf] }
 0x486   : > { %7121 = vmatmul.bf16.gmra.mxu1 %v11306_v47 }
 0x487   : > { %7450 = vmatmul.bf16.gmra.mxu2 %v11310_v38  ;;  %v16413_v31 = vadd.f32 %v7408_v56, %v7080_v8  ;;  %v11347_v8 = vld [vmem:[%s15291_s13 + $0x71c] sm:$0xf0]  ;;  %v18295_v38 = vld [vmem:[#allocation41_spill] sm:$0xff] }
 0x488   : > { %v6424_v58 = vpop.f32.mrf.mxu3 }
 0x489   : > { %18292 = vst [vmem:[#allocation28_spill] sm:$0xff] %v16413_v31  ;;  %v6425_v34 = vadd.f32 %v6424_v58, %v18293_v60  ;;  %v11342_v58 = vor.u32 %v13841_v42, %v11339_v54  ;;  %v11346_v60 = vor.u32 %v13847_v52, %v11345_v53  ;;  %v18297_v42 = vld [vmem:[#allocation43_spill] sm:$0xff] }
 0x48a   : > { %v7411_v13 = vpop.f32.mrf.mxu2  ;;  %v6755_v57 = vpop.f32.mrf.mxu0 }
 0x48b   : > { %v6754_v30 = vadd.f32 %v6753_v19, %v6425_v34  ;;  %v7084_v61 = vpop.f32.mrf.mxu1  ;;  %v11354_v19 = vor.u32 %v13848_v62, %v11353_v9  ;;  %v11350_v34 = vor.u32 %v13842_v1, %v11347_v8  ;;  %v11383_v1 = vld [vmem:[%s15291_s13 + $0x76c] sm:$0xf0]  ;;  %v11389_v8 = vld [vmem:[%s15291_s13 + $0x748] sm:$0xf] }
 0x48d   : > { %v7083_v32 = vadd.f32 %v7082_v17, %v6754_v30 }
 0x48f   : > { %v16421_v18 = vadd.f32 %v7411_v13, %v7083_v32 }
 0x490   : > { %v6426_v56 = vpop.f32.mrf.mxu3 }
 0x491   : > { %18294 = vst [vmem:[#allocation29_spill] sm:$0xff] %v16421_v18  ;;  %v6427_v47 = vadd.f32 %v6426_v56, %v18295_v38  ;;  %v13858_v56 = vld [vmem:[%s15291_s13 + $0x770] sm:$0xf0]  ;;  %v11397_v38 = vld [vmem:[%s15291_s13 + $0x750] sm:$0xf] }
 0x492   : > { %v7413_v35 = vpop.f32.mrf.mxu2  ;;  %v6758_v31 = vpop.f32.mrf.mxu0 }
 0x493   : > { %v6756_v17 = vadd.f32 %v6755_v57, %v6427_v47  ;;  %v7087_v30 = vpop.f32.mrf.mxu1 }
 0x495   : > { %v7085_v55 = vadd.f32 %v7084_v61, %v6756_v17  ;;  %6468 = vmatmul.bf16.gmra.mxu3 %v11342_v58  ;;  %6797 = vmatmul.bf16.gmra.mxu0 %v11346_v60  ;;  %v13852_v61 = vld [vmem:[%s15291_s13 + $0x744] sm:$0xf]  ;;  %v13859_v58 = vld [vmem:[%s15291_s13 + $0x778] sm:$0xf0]  ;;  %v13853_v60 = vld [vmem:[%s15291_s13 + $0x74c] sm:$0xf] }
 0x496   : > { %7126 = vmatmul.bf16.gmra.mxu1 %v11350_v34 }
 0x497   : > { %7455 = vmatmul.bf16.gmra.mxu2 %v11354_v19  ;;  %v16427_v13 = vadd.f32 %v7413_v35, %v7085_v55  ;;  %v11391_v55 = vld [vmem:[%s15291_s13 + $0x774] sm:$0xf0]  ;;  %v18299_v19 = vld [vmem:[#allocation45_spill] sm:$0xff] }
 0x498   : > { %v6429_v32 = vpop.f32.mrf.mxu3 }
 0x499   : > { %18296 = vst [vmem:[#allocation30_spill] sm:$0xff] %v16427_v13  ;;  %v6430_v54 = vadd.f32 %v6429_v32, %v18297_v42  ;;  %v11386_v32 = vor.u32 %v13852_v61, %v11383_v1  ;;  %v11390_v42 = vor.u32 %v13858_v56, %v11389_v8  ;;  %v18301_v61 = vld [vmem:[#allocation47_spill] sm:$0xff] }
 0x49a   : > { %v7416_v53 = vpop.f32.mrf.mxu2  ;;  %v6760_v57 = vpop.f32.mrf.mxu0 }
 0x49b   : > { %v6759_v52 = vadd.f32 %v6758_v31, %v6430_v54  ;;  %v7089_v9 = vpop.f32.mrf.mxu1  ;;  %v11398_v31 = vor.u32 %v13859_v58, %v11397_v38  ;;  %v11394_v54 = vor.u32 %v13853_v60, %v11391_v55  ;;  %v11427_v60 = vld [vmem:[%s15291_s13 + $0x7c4] sm:$0xf0]  ;;  %v11433_v55 = vld [vmem:[%s15291_s13 + $0x7a0] sm:$0xf] }
 0x49d   : > { %v7088_v62 = vadd.f32 %v7087_v30, %v6759_v52 }
 0x49f   : > { %v16435_v47 = vadd.f32 %v7416_v53, %v7088_v62 }
 0x4a0   : > { %v6431_v35 = vpop.f32.mrf.mxu3 }
 0x4a1   : > { %18298 = vst [vmem:[#allocation31_spill] sm:$0xff] %v16435_v47  ;;  %v6432_v34 = vadd.f32 %v6431_v35, %v18299_v19  ;;  %v13869_v35 = vld [vmem:[%s15291_s13 + $0x7c8] sm:$0xf0]  ;;  %v11441_v19 = vld [vmem:[%s15291_s13 + $0x7a8] sm:$0xf] }
 0x4a2   : > { %v7418_v17 = vpop.f32.mrf.mxu2  ;;  %v6763_v13 = vpop.f32.mrf.mxu0 }
 0x4a3   : > { %v6761_v30 = vadd.f32 %v6760_v57, %v6432_v34  ;;  %v7092_v52 = vpop.f32.mrf.mxu1 }
 0x4a5   : > { %v7090_v18 = vadd.f32 %v7089_v9, %v6761_v30  ;;  %6473 = vmatmul.bf16.gmra.mxu3 %v11386_v32  ;;  %6802 = vmatmul.bf16.gmra.mxu0 %v11390_v42  ;;  %v13863_v9 = vld [vmem:[%s15291_s13 + $0x79c] sm:$0xf]  ;;  %v13870_v32 = vld [vmem:[%s15291_s13 + $0x7d0] sm:$0xf0]  ;;  %v13864_v42 = vld [vmem:[%s15291_s13 + $0x7a4] sm:$0xf] }
 0x4a6   : > { %7131 = vmatmul.bf16.gmra.mxu1 %v11394_v54 }
 0x4a7   : > { %7460 = vmatmul.bf16.gmra.mxu2 %v11398_v31  ;;  %v16441_v53 = vadd.f32 %v7418_v17, %v7090_v18  ;;  %v11435_v18 = vld [vmem:[%s15291_s13 + $0x7cc] sm:$0xf0] }
 0x4a8   : > { %v6434_v62 = vpop.f32.mrf.mxu3  ;;  %v18303_v31 = vld [vmem:[#allocation49_spill] sm:$0xff] }
 0x4a9   : > { %18300 = vst [vmem:[#allocation32_spill] sm:$0xff] %v16441_v53  ;;  %v6435_v1 = vadd.f32 %v6434_v62, %v18301_v61  ;;  %v11430_v62 = vor.u32 %v13863_v9, %v11427_v60  ;;  %v11434_v61 = vor.u32 %v13869_v35, %v11433_v55  ;;  %v18305_v60 = vld [vmem:[#allocation51_spill] sm:$0xff] }
 0x4aa   : > { %v7421_v8 = vpop.f32.mrf.mxu2  ;;  %v6765_v57 = vpop.f32.mrf.mxu0 }
 0x4ab   : > { %v6764_v56 = vadd.f32 %v6763_v13, %v6435_v1  ;;  %v7094_v38 = vpop.f32.mrf.mxu1  ;;  %v11442_v13 = vor.u32 %v13870_v32, %v11441_v19  ;;  %v11438_v1 = vor.u32 %v13864_v42, %v11435_v18  ;;  %v13874_v32 = vld [vmem:[%s15291_s13 + $0x7f4] sm:$0xf]  ;;  %v11471_v42 = vld [vmem:[%s15291_s13 + $0x81c] sm:$0xf0] }
 0x4ad   : > { %v7093_v58 = vadd.f32 %v7092_v52, %v6764_v56 }
 0x4af   : > { %v16449_v34 = vadd.f32 %v7421_v8, %v7093_v58  ;;  %v14384_v58 = vld [vmem:[#allocation6 + $0x1e0] sm:$0xff] }
 0x4b0   : > { %v6436_v17 = vpop.f32.mrf.mxu3  ;;  %7679 = vmatpush.bf16.msra.mxu3 %v14384_v58 }
 0x4b1   : > { %18302 = vst [vmem:[#allocation33_spill] sm:$0xff] %v16449_v34  ;;  %v6437_v54 = vadd.f32 %v6436_v17, %v18303_v31  ;;  %v11477_v17 = vld [vmem:[%s15291_s13 + $0x7f8] sm:$0xf]  ;;  %v13880_v31 = vld [vmem:[%s15291_s13 + $0x820] sm:$0xf0] }
 0x4b2   : > { %v7423_v30 = vpop.f32.mrf.mxu2  ;;  %v6768_v53 = vpop.f32.mrf.mxu0 }
 0x4b3   : > { %v6766_v52 = vadd.f32 %v6765_v57, %v6437_v54  ;;  %v7097_v56 = vpop.f32.mrf.mxu1  ;;  %v11485_v54 = vld [vmem:[%s15291_s13 + $0x800] sm:$0xf] }
 0x4b5   : > { %v7095_v47 = vadd.f32 %v7094_v38, %v6766_v52  ;;  %6478 = vmatmul.bf16.gmra.mxu3 %v11430_v62  ;;  %6807 = vmatmul.bf16.gmra.mxu0 %v11434_v61  ;;  %v13881_v62 = vld [vmem:[%s15291_s13 + $0x828] sm:$0xf0]  ;;  %v14400_v52 = vld [vmem:[#allocation6 + $0x260] sm:$0xff] }
 0x4b6   : > { %7136 = vmatmul.bf16.gmra.mxu1 %v11438_v1  ;;  %v14392_v1 = vld [vmem:[#allocation6 + $0x220] sm:$0xff] }
 0x4b7   : > { %7465 = vmatmul.bf16.gmra.mxu2 %v11442_v13  ;;  %v16455_v8 = vadd.f32 %v7423_v30, %v7095_v47  ;;  %v13875_v47 = vld [vmem:[%s15291_s13 + $0x7fc] sm:$0xf]  ;;  %v11479_v30 = vld [vmem:[%s15291_s13 + $0x824] sm:$0xf0]  ;;  %v14408_v13 = vld [vmem:[#allocation6 + $0x2a0] sm:$0xff]  ;;  %8008 = vmatpush.bf16.msra.mxu0 %v14392_v1 }
 0x4b8   : > { %v6439_v9 = vpop.f32.mrf.mxu3  ;;  %8666 = vmatpush.bf16.msra.mxu2 %v14408_v13  ;;  %v11482_v34 = vor.u32 %v13875_v47, %v11479_v30  ;;  %8337 = vmatpush.bf16.msra.mxu1 %v14400_v52  ;;  %v11521_v13 = vld [vmem:[%s15291_s13 + $0x850] sm:$0xf]  ;;  %v13891_v1 = vld [vmem:[%s15291_s13 + $0x878] sm:$0xf0]  ;;  %v11529_v52 = vld [vmem:[%s15291_s13 + $0x858] sm:$0xf] }
 0x4b9   : > { %18304 = vst [vmem:[#allocation34_spill] sm:$0xff] %v16455_v8  ;;  %v6440_v57 = vadd.f32 %v6439_v9, %v18305_v60  ;;  %v18307_v60 = vld [vmem:[#allocation53_spill] sm:$0xff] }
 0x4ba   : > { %v7426_v55 = vpop.f32.mrf.mxu2  ;;  %v6770_v35 = vpop.f32.mrf.mxu0 }
 0x4bb   : > { %v6769_v38 = vadd.f32 %v6768_v53, %v6440_v57  ;;  %v7099_v19 = vpop.f32.mrf.mxu1  ;;  %v11474_v53 = vor.u32 %v13874_v32, %v11471_v42  ;;  %v11478_v57 = vor.u32 %v13880_v31, %v11477_v17  ;;  %v18309_v17 = vld [vmem:[#allocation55_spill] sm:$0xff] }
 0x4bd   : > { %v7098_v18 = vadd.f32 %v7097_v56, %v6769_v38  ;;  %v11486_v38 = vor.u32 %v13881_v62, %v11485_v54 }
 0x4bf   : > { %v16466_v61 = vadd.f32 %v7426_v55, %v7098_v18 }
 0x4c0   : > { %v6441_v9 = vpop.f32.mrf.mxu3 }
 0x4c1   : > { %18306 = vst [vmem:[#allocation35_spill] sm:$0xff] %v16466_v61  ;;  %v6442_v58 = vadd.f32 %v6441_v9, %v18307_v60  ;;  %v13886_v60 = vld [vmem:[%s15291_s13 + $0x854] sm:$0xf] }
 0x4c2   : > { %v7428_v8 = vpop.f32.mrf.mxu2  ;;  %v6773_v56 = vpop.f32.mrf.mxu0 }
 0x4c3   : > { %v6771_v7 = vadd.f32 %v6770_v35, %v6442_v58  ;;  %v7102_v55 = vpop.f32.mrf.mxu1 }
 0x4c5   : > { %v7100_v18 = vadd.f32 %v7099_v19, %v6771_v7  ;;  %6483 = vmatmul.bf16.gmra.mxu3 %v11474_v53  ;;  %6812 = vmatmul.bf16.gmra.mxu0 %v11478_v57  ;;  %v13885_v7 = vld [vmem:[%s15291_s13 + $0x84c] sm:$0xf]  ;;  %v11515_v19 = vld [vmem:[%s15291_s13 + $0x874] sm:$0xf0] }
 0x4c6   : > { %7141 = vmatmul.bf16.gmra.mxu1 %v11482_v34  ;;  %v13892_v34 = vld [vmem:[%s15291_s13 + $0x880] sm:$0xf0]  ;;  %v18311_v53 = vld [vmem:[#allocation57_spill] sm:$0xff] }
 0x4c7   : > { %7470 = vmatmul.bf16.gmra.mxu2 %v11486_v38  ;;  %v16469_v32 = vadd.f32 %v7428_v8, %v7100_v18  ;;  %v11523_v8 = vld [vmem:[%s15291_s13 + $0x87c] sm:$0xf0]  ;;  %v11518_v18 = vor.u32 %v13885_v7, %v11515_v19  ;;  %v18313_v7 = vld [vmem:[#allocation58_spill] sm:$0xff] }
 0x4c8   : > { %v6444_v42 = vpop.f32.mrf.mxu3 }
 0x4c9   : > { %18308 = vst [vmem:[#allocation36_spill] sm:$0xff] %v16469_v32  ;;  %v6445_v31 = vadd.f32 %v6444_v42, %v18309_v17  ;;  %v11522_v42 = vor.u32 %v13891_v1, %v11521_v13 }
 0x4ca   : > { %v7431_v54 = vpop.f32.mrf.mxu2  ;;  %v6775_v35 = vpop.f32.mrf.mxu0 }
 0x4cb   : > { %v6774_v62 = vadd.f32 %v6773_v56, %v6445_v31  ;;  %v7104_v47 = vpop.f32.mrf.mxu1  ;;  %v11530_v56 = vor.u32 %v13892_v34, %v11529_v52  ;;  %v11526_v31 = vor.u32 %v13886_v60, %v11523_v8  ;;  %v11559_v60 = vld [vmem:[%s15291_s13 + $0x8cc] sm:$0xf0]  ;;  %v11565_v8 = vld [vmem:[%s15291_s13 + $0x8a8] sm:$0xf] }
 0x4cd   : > { %v7103_v30 = vadd.f32 %v7102_v55, %v6774_v62 }
 0x4cf   : > { %v16477_v9 = vadd.f32 %v7431_v54, %v7103_v30 }
 0x4d0   : > { %v6446_v58 = vpop.f32.mrf.mxu3 }
 0x4d1   : > { %18310 = vst [vmem:[#allocation37_spill] sm:$0xff] %v16477_v9  ;;  %v6447_v57 = vadd.f32 %v6446_v58, %v18311_v53  ;;  %v13902_v58 = vld [vmem:[%s15291_s13 + $0x8d0] sm:$0xf0]  ;;  %v11573_v53 = vld [vmem:[%s15291_s13 + $0x8b0] sm:$0xf] }
 0x4d2   : > { %v7433_v38 = vpop.f32.mrf.mxu2  ;;  %v6778_v17 = vpop.f32.mrf.mxu0 }
 0x4d3   : > { %v6776_v55 = vadd.f32 %v6775_v35, %v6447_v57  ;;  %v7107_v62 = vpop.f32.mrf.mxu1 }
 0x4d5   : > { %v7105_v32 = vadd.f32 %v7104_v47, %v6776_v55  ;;  %6488 = vmatmul.bf16.gmra.mxu3 %v11518_v18  ;;  %6817 = vmatmul.bf16.gmra.mxu0 %v11522_v42  ;;  %v13896_v47 = vld [vmem:[%s15291_s13 + $0x8a4] sm:$0xf]  ;;  %v13903_v18 = vld [vmem:[%s15291_s13 + $0x8d8] sm:$0xf0]  ;;  %v13897_v42 = vld [vmem:[%s15291_s13 + $0x8ac] sm:$0xf] }
 0x4d6   : > { %7146 = vmatmul.bf16.gmra.mxu1 %v11526_v31 }
 0x4d7   : > { %7475 = vmatmul.bf16.gmra.mxu2 %v11530_v56  ;;  %v16483_v54 = vadd.f32 %v7433_v38, %v7105_v32  ;;  %v11567_v32 = vld [vmem:[%s15291_s13 + $0x8d4] sm:$0xf0]  ;;  %v18315_v56 = vld [vmem:[#allocation59_spill] sm:$0xff] }
 0x4d8   : > { %v6449_v30 = vpop.f32.mrf.mxu3 }
 0x4d9   : > { %18312 = vst [vmem:[#allocation39_spill] sm:$0xff] %v16483_v54  ;;  %v6450_v19 = vadd.f32 %v6449_v30, %v18313_v7  ;;  %v11562_v30 = vor.u32 %v13896_v47, %v11559_v60  ;;  %v11566_v7 = vor.u32 %v13902_v58, %v11565_v8  ;;  %v18317_v47 = vld [vmem:[#allocation60_spill] sm:$0xff] }
 0x4da   : > { %v7436_v13 = vpop.f32.mrf.mxu2  ;;  %v6780_v35 = vpop.f32.mrf.mxu0 }
 0x4db   : > { %v6779_v1 = vadd.f32 %v6778_v17, %v6450_v19  ;;  %v7109_v52 = vpop.f32.mrf.mxu1  ;;  %v11574_v17 = vor.u32 %v13903_v18, %v11573_v53  ;;  %v11570_v19 = vor.u32 %v13897_v42, %v11567_v32  ;;  %v11603_v42 = vld [vmem:[%s15291_s13 + $0x924] sm:$0xf0]  ;;  %v11609_v32 = vld [vmem:[%s15291_s13 + $0x900] sm:$0xf] }
 0x4dd   : > { %v7108_v34 = vadd.f32 %v7107_v62, %v6779_v1 }
 0x4df   : > { %v16491_v57 = vadd.f32 %v7436_v13, %v7108_v34 }
 0x4e0   : > { %v6451_v38 = vpop.f32.mrf.mxu3 }
 0x4e1   : > { %18314 = vst [vmem:[#allocation41_spill] sm:$0xff] %v16491_v57  ;;  %v6452_v31 = vadd.f32 %v6451_v38, %v18315_v56  ;;  %v13913_v38 = vld [vmem:[%s15291_s13 + $0x928] sm:$0xf0]  ;;  %v11617_v56 = vld [vmem:[%s15291_s13 + $0x908] sm:$0xf] }
 0x4e2   : > { %v7438_v55 = vpop.f32.mrf.mxu2  ;;  %v6783_v54 = vpop.f32.mrf.mxu0 }
 0x4e3   : > { %v6781_v62 = vadd.f32 %v6780_v35, %v6452_v31  ;;  %v7112_v1 = vpop.f32.mrf.mxu1 }
 0x4e5   : > { %v7110_v9 = vadd.f32 %v7109_v52, %v6781_v62  ;;  %6493 = vmatmul.bf16.gmra.mxu3 %v11562_v30  ;;  %6822 = vmatmul.bf16.gmra.mxu0 %v11566_v7  ;;  %v13907_v52 = vld [vmem:[%s15291_s13 + $0x8fc] sm:$0xf]  ;;  %v13914_v30 = vld [vmem:[%s15291_s13 + $0x930] sm:$0xf0]  ;;  %v13908_v7 = vld [vmem:[%s15291_s13 + $0x904] sm:$0xf] }
 0x4e6   : > { %7151 = vmatmul.bf16.gmra.mxu1 %v11570_v19 }
 0x4e7   : > { %7480 = vmatmul.bf16.gmra.mxu2 %v11574_v17  ;;  %v16497_v13 = vadd.f32 %v7438_v55, %v7110_v9  ;;  %v11611_v9 = vld [vmem:[%s15291_s13 + $0x92c] sm:$0xf0] }
 0x4e8   : > { %v6454_v34 = vpop.f32.mrf.mxu3  ;;  %v18319_v17 = vld [vmem:[#allocation61_spill] sm:$0xff] }
 0x4e9   : > { %18316 = vst [vmem:[#allocation43_spill] sm:$0xff] %v16497_v13  ;;  %v6455_v60 = vadd.f32 %v6454_v34, %v18317_v47  ;;  %v11606_v34 = vor.u32 %v13907_v52, %v11603_v42  ;;  %v11610_v47 = vor.u32 %v13913_v38, %v11609_v32  ;;  %v18321_v52 = vld [vmem:[#allocation62_spill] sm:$0xff] }
 0x4ea   : > { %v7441_v8 = vpop.f32.mrf.mxu2  ;;  %v6785_v35 = vpop.f32.mrf.mxu0 }
 0x4eb   : > { %v6784_v58 = vadd.f32 %v6783_v54, %v6455_v60  ;;  %v7114_v53 = vpop.f32.mrf.mxu1  ;;  %v11618_v54 = vor.u32 %v13914_v30, %v11617_v56  ;;  %v11614_v60 = vor.u32 %v13908_v7, %v11611_v9  ;;  %v11647_v7 = vld [vmem:[%s15291_s13 + $0x97c] sm:$0xf0]  ;;  %v11653_v9 = vld [vmem:[%s15291_s13 + $0x958] sm:$0xf] }
 0x4ed   : > { %v7113_v18 = vadd.f32 %v7112_v1, %v6784_v58 }
 0x4ef   : > { %v16505_v31 = vadd.f32 %v7441_v8, %v7113_v18 }
 0x4f0   : > { %v6456_v55 = vpop.f32.mrf.mxu3 }
 0x4f1   : > { %18318 = vst [vmem:[#allocation45_spill] sm:$0xff] %v16505_v31  ;;  %v6457_v19 = vadd.f32 %v6456_v55, %v18319_v17  ;;  %v13924_v55 = vld [vmem:[%s15291_s13 + $0x980] sm:$0xf0]  ;;  %v11661_v17 = vld [vmem:[%s15291_s13 + $0x960] sm:$0xf] }
 0x4f2   : > { %v7443_v62 = vpop.f32.mrf.mxu2  ;;  %v6788_v13 = vpop.f32.mrf.mxu0 }
 0x4f3   : > { %v6786_v1 = vadd.f32 %v6785_v35, %v6457_v19  ;;  %v7117_v58 = vpop.f32.mrf.mxu1 }
 0x4f5   : > { %v7115_v57 = vadd.f32 %v7114_v53, %v6786_v1  ;;  %6498 = vmatmul.bf16.gmra.mxu3 %v11606_v34  ;;  %6827 = vmatmul.bf16.gmra.mxu0 %v11610_v47  ;;  %v13918_v53 = vld [vmem:[%s15291_s13 + $0x954] sm:$0xf]  ;;  %v13925_v34 = vld [vmem:[%s15291_s13 + $0x988] sm:$0xf0]  ;;  %v13919_v47 = vld [vmem:[%s15291_s13 + $0x95c] sm:$0xf] }
 0x4f6   : > { %7156 = vmatmul.bf16.gmra.mxu1 %v11614_v60 }
 0x4f7   : > { %7485 = vmatmul.bf16.gmra.mxu2 %v11618_v54  ;;  %v16511_v8 = vadd.f32 %v7443_v62, %v7115_v57  ;;  %v11655_v57 = vld [vmem:[%s15291_s13 + $0x984] sm:$0xf0]  ;;  %v18323_v54 = vld [vmem:[#allocation63_spill] sm:$0xff] }
 0x4f8   : > { %v6459_v18 = vpop.f32.mrf.mxu3 }
 0x4f9   : > { %18320 = vst [vmem:[#allocation47_spill] sm:$0xff] %v16511_v8  ;;  %v6460_v42 = vadd.f32 %v6459_v18, %v18321_v52  ;;  %v11650_v18 = vor.u32 %v13918_v53, %v11647_v7  ;;  %v11654_v52 = vor.u32 %v13924_v55, %v11653_v9  ;;  %v18325_v53 = vld [vmem:[#allocation64_spill] sm:$0xff] }
 0x4fa   : > { %v7446_v32 = vpop.f32.mrf.mxu2  ;;  %v6790_v35 = vpop.f32.mrf.mxu0 }
 0x4fb   : > { %v6789_v38 = vadd.f32 %v6788_v13, %v6460_v42  ;;  %v7119_v56 = vpop.f32.mrf.mxu1  ;;  %v11662_v13 = vor.u32 %v13925_v34, %v11661_v17  ;;  %v11658_v42 = vor.u32 %v13919_v47, %v11655_v57  ;;  %v11691_v47 = vld [vmem:[%s15291_s13 + $0x9d4] sm:$0xf0]  ;;  %v11697_v57 = vld [vmem:[%s15291_s13 + $0x9b0] sm:$0xf] }
 0x4fd   : > { %v7118_v30 = vadd.f32 %v7117_v58, %v6789_v38 }
 0x4ff   : > { %v16519_v19 = vadd.f32 %v7446_v32, %v7118_v30 }
 0x500   : > { %v6461_v62 = vpop.f32.mrf.mxu3 }
 0x501   : > { %18322 = vst [vmem:[#allocation49_spill] sm:$0xff] %v16519_v19  ;;  %v6462_v60 = vadd.f32 %v6461_v62, %v18323_v54  ;;  %v13935_v62 = vld [vmem:[%s15291_s13 + $0x9d8] sm:$0xf0]  ;;  %v11705_v54 = vld [vmem:[%s15291_s13 + $0x9b8] sm:$0xf] }
 0x502   : > { %v7448_v1 = vpop.f32.mrf.mxu2  ;;  %v6793_v8 = vpop.f32.mrf.mxu0 }
 0x503   : > { %v6791_v58 = vadd.f32 %v6790_v35, %v6462_v60  ;;  %v7122_v38 = vpop.f32.mrf.mxu1 }
 0x505   : > { %v7120_v31 = vadd.f32 %v7119_v56, %v6791_v58  ;;  %6503 = vmatmul.bf16.gmra.mxu3 %v11650_v18  ;;  %6832 = vmatmul.bf16.gmra.mxu0 %v11654_v52  ;;  %v13929_v56 = vld [vmem:[%s15291_s13 + $0x9ac] sm:$0xf]  ;;  %v13936_v18 = vld [vmem:[%s15291_s13 + $0x9e0] sm:$0xf0]  ;;  %v13930_v52 = vld [vmem:[%s15291_s13 + $0x9b4] sm:$0xf] }
 0x506   : > { %7161 = vmatmul.bf16.gmra.mxu1 %v11658_v42 }
 0x507   : > { %7490 = vmatmul.bf16.gmra.mxu2 %v11662_v13  ;;  %v16525_v32 = vadd.f32 %v7448_v1, %v7120_v31  ;;  %v11699_v31 = vld [vmem:[%s15291_s13 + $0x9dc] sm:$0xf0]  ;;  %v18327_v13 = vld [vmem:[#allocation65_spill] sm:$0xff] }
 0x508   : > { %v6464_v30 = vpop.f32.mrf.mxu3 }
 0x509   : > { %18324 = vst [vmem:[#allocation51_spill] sm:$0xff] %v16525_v32  ;;  %v6465_v7 = vadd.f32 %v6464_v30, %v18325_v53  ;;  %v11694_v30 = vor.u32 %v13929_v56, %v11691_v47  ;;  %v11698_v53 = vor.u32 %v13935_v62, %v11697_v57  ;;  %v18329_v56 = vld [vmem:[#allocation66_spill] sm:$0xff] }
 0x50a   : > { %v7451_v9 = vpop.f32.mrf.mxu2  ;;  %v6795_v35 = vpop.f32.mrf.mxu0 }
 0x50b   : > { %v6794_v55 = vadd.f32 %v6793_v8, %v6465_v7  ;;  %v7124_v17 = vpop.f32.mrf.mxu1  ;;  %v11706_v8 = vor.u32 %v13936_v18, %v11705_v54  ;;  %v11702_v7 = vor.u32 %v13930_v52, %v11699_v31  ;;  %v11735_v52 = vld [vmem:[%s15291_s13 + $0xa2c] sm:$0xf0]  ;;  %v11741_v31 = vld [vmem:[%s15291_s13 + $0xa08] sm:$0xf] }
 0x50d   : > { %v7123_v34 = vadd.f32 %v7122_v38, %v6794_v55 }
 0x50f   : > { %v16533_v60 = vadd.f32 %v7451_v9, %v7123_v34 }
 0x510   : > { %v6466_v1 = vpop.f32.mrf.mxu3 }
 0x511   : > { %18326 = vst [vmem:[#allocation53_spill] sm:$0xff] %v16533_v60  ;;  %v6467_v42 = vadd.f32 %v6466_v1, %v18327_v13  ;;  %v13946_v1 = vld [vmem:[%s15291_s13 + $0xa30] sm:$0xf0]  ;;  %v11749_v13 = vld [vmem:[%s15291_s13 + $0xa10] sm:$0xf] }
 0x512   : > { %v7453_v58 = vpop.f32.mrf.mxu2  ;;  %v6798_v32 = vpop.f32.mrf.mxu0 }
 0x513   : > { %v6796_v38 = vadd.f32 %v6795_v35, %v6467_v42  ;;  %v7127_v55 = vpop.f32.mrf.mxu1 }
 0x515   : > { %v7125_v19 = vadd.f32 %v7124_v17, %v6796_v38  ;;  %6508 = vmatmul.bf16.gmra.mxu3 %v11694_v30  ;;  %6837 = vmatmul.bf16.gmra.mxu0 %v11698_v53  ;;  %v13940_v17 = vld [vmem:[%s15291_s13 + $0xa04] sm:$0xf]  ;;  %v13947_v30 = vld [vmem:[%s15291_s13 + $0xa38] sm:$0xf0]  ;;  %v13941_v53 = vld [vmem:[%s15291_s13 + $0xa0c] sm:$0xf] }
 0x516   : > { %7166 = vmatmul.bf16.gmra.mxu1 %v11702_v7 }
 0x517   : > { %7495 = vmatmul.bf16.gmra.mxu2 %v11706_v8  ;;  %v16539_v9 = vadd.f32 %v7453_v58, %v7125_v19  ;;  %v11743_v19 = vld [vmem:[%s15291_s13 + $0xa34] sm:$0xf0]  ;;  %v18331_v8 = vld [vmem:[#allocation67_spill] sm:$0xff] }
 0x518   : > { %v6469_v34 = vpop.f32.mrf.mxu3 }
 0x519   : > { %18328 = vst [vmem:[#allocation55_spill] sm:$0xff] %v16539_v9  ;;  %v6470_v47 = vadd.f32 %v6469_v34, %v18329_v56  ;;  %v11738_v34 = vor.u32 %v13940_v17, %v11735_v52  ;;  %v11742_v56 = vor.u32 %v13946_v1, %v11741_v31  ;;  %v18333_v17 = vld [vmem:[#allocation68_spill] sm:$0xff] }
 0x51a   : > { %v7456_v57 = vpop.f32.mrf.mxu2  ;;  %v6800_v35 = vpop.f32.mrf.mxu0 }
 0x51b   : > { %v6799_v62 = vadd.f32 %v6798_v32, %v6470_v47  ;;  %v7129_v54 = vpop.f32.mrf.mxu1  ;;  %v11750_v32 = vor.u32 %v13947_v30, %v11749_v13  ;;  %v11746_v47 = vor.u32 %v13941_v53, %v11743_v19  ;;  %v11779_v53 = vld [vmem:[%s15291_s13 + $0xa84] sm:$0xf0]  ;;  %v11785_v19 = vld [vmem:[%s15291_s13 + $0xa60] sm:$0xf] }
 0x51d   : > { %v7128_v18 = vadd.f32 %v7127_v55, %v6799_v62 }
 0x51f   : > { %v16547_v42 = vadd.f32 %v7456_v57, %v7128_v18 }
 0x520   : > { %v6471_v58 = vpop.f32.mrf.mxu3 }
 0x521   : > { %18330 = vst [vmem:[#allocation57_spill] sm:$0xff] %v16547_v42  ;;  %v6472_v7 = vadd.f32 %v6471_v58, %v18331_v8  ;;  %v13957_v58 = vld [vmem:[%s15291_s13 + $0xa88] sm:$0xf0]  ;;  %v11793_v8 = vld [vmem:[%s15291_s13 + $0xa68] sm:$0xf] }
 0x522   : > { %v7458_v38 = vpop.f32.mrf.mxu2  ;;  %v6803_v9 = vpop.f32.mrf.mxu0 }
 0x523   : > { %v6801_v55 = vadd.f32 %v6800_v35, %v6472_v7  ;;  %v7132_v62 = vpop.f32.mrf.mxu1 }
 0x525   : > { %v7130_v60 = vadd.f32 %v7129_v54, %v6801_v55  ;;  %6513 = vmatmul.bf16.gmra.mxu3 %v11738_v34  ;;  %6842 = vmatmul.bf16.gmra.mxu0 %v11742_v56  ;;  %v13951_v54 = vld [vmem:[%s15291_s13 + $0xa5c] sm:$0xf]  ;;  %v13958_v34 = vld [vmem:[%s15291_s13 + $0xa90] sm:$0xf0]  ;;  %v13952_v56 = vld [vmem:[%s15291_s13 + $0xa64] sm:$0xf] }
 0x526   : > { %7171 = vmatmul.bf16.gmra.mxu1 %v11746_v47 }
 0x527   : > { %7500 = vmatmul.bf16.gmra.mxu2 %v11750_v32  ;;  %v16553_v57 = vadd.f32 %v7458_v38, %v7130_v60  ;;  %v11787_v60 = vld [vmem:[%s15291_s13 + $0xa8c] sm:$0xf0] }
 0x528   : > { %v6474_v18 = vpop.f32.mrf.mxu3  ;;  %v18335_v32 = vld [vmem:[#allocation69_spill] sm:$0xff] }
 0x529   : > { %18332 = vst [vmem:[#allocation58_spill] sm:$0xff] %v16553_v57  ;;  %v6475_v52 = vadd.f32 %v6474_v18, %v18333_v17  ;;  %v11782_v18 = vor.u32 %v13951_v54, %v11779_v53  ;;  %v11786_v17 = vor.u32 %v13957_v58, %v11785_v19  ;;  %v18337_v53 = vld [vmem:[#allocation70_spill] sm:$0xff] }
 0x52a   : > { %v7461_v31 = vpop.f32.mrf.mxu2  ;;  %v6805_v35 = vpop.f32.mrf.mxu0 }
 0x52b   : > { %v6804_v1 = vadd.f32 %v6803_v9, %v6475_v52  ;;  %v7134_v13 = vpop.f32.mrf.mxu1  ;;  %v11794_v9 = vor.u32 %v13958_v34, %v11793_v8  ;;  %v11790_v52 = vor.u32 %v13952_v56, %v11787_v60  ;;  %v13962_v34 = vld [vmem:[%s15291_s13 + $0xab4] sm:$0xf]  ;;  %v11823_v56 = vld [vmem:[%s15291_s13 + $0xadc] sm:$0xf0] }
 0x52d   : > { %v7133_v30 = vadd.f32 %v7132_v62, %v6804_v1 }
 0x52f   : > { %v16561_v7 = vadd.f32 %v7461_v31, %v7133_v30  ;;  %v14383_v30 = vld [vmem:[#allocation6 + $0x1d8] sm:$0xff] }
 0x530   : > { %v6476_v38 = vpop.f32.mrf.mxu3  ;;  %7680 = vmatpush.bf16.msra.mxu3 %v14383_v30 }
 0x531   : > { %18334 = vst [vmem:[#allocation59_spill] sm:$0xff] %v16561_v7  ;;  %v6477_v47 = vadd.f32 %v6476_v38, %v18335_v32  ;;  %v11829_v38 = vld [vmem:[%s15291_s13 + $0xab8] sm:$0xf]  ;;  %v13968_v32 = vld [vmem:[%s15291_s13 + $0xae0] sm:$0xf0] }
 0x532   : > { %v7463_v55 = vpop.f32.mrf.mxu2  ;;  %v6808_v57 = vpop.f32.mrf.mxu0 }
 0x533   : > { %v6806_v62 = vadd.f32 %v6805_v35, %v6477_v47  ;;  %v7137_v1 = vpop.f32.mrf.mxu1  ;;  %v11837_v47 = vld [vmem:[%s15291_s13 + $0xac0] sm:$0xf] }
 0x535   : > { %v7135_v42 = vadd.f32 %v7134_v13, %v6806_v62  ;;  %6518 = vmatmul.bf16.gmra.mxu3 %v11782_v18  ;;  %6847 = vmatmul.bf16.gmra.mxu0 %v11786_v17  ;;  %v13969_v18 = vld [vmem:[%s15291_s13 + $0xae8] sm:$0xf0]  ;;  %v14399_v62 = vld [vmem:[#allocation6 + $0x258] sm:$0xff] }
 0x536   : > { %7176 = vmatmul.bf16.gmra.mxu1 %v11790_v52  ;;  %v14391_v52 = vld [vmem:[#allocation6 + $0x218] sm:$0xff] }
 0x537   : > { %7505 = vmatmul.bf16.gmra.mxu2 %v11794_v9  ;;  %v16567_v31 = vadd.f32 %v7463_v55, %v7135_v42  ;;  %v13963_v42 = vld [vmem:[%s15291_s13 + $0xabc] sm:$0xf]  ;;  %v11831_v55 = vld [vmem:[%s15291_s13 + $0xae4] sm:$0xf0]  ;;  %8009 = vmatpush.bf16.msra.mxu0 %v14391_v52 }
 0x538   : > { %v6479_v54 = vpop.f32.mrf.mxu3  ;;  %v14407_v9 = vld [vmem:[#allocation6 + $0x298] sm:$0xff]  ;;  %v11834_v7 = vor.u32 %v13963_v42, %v11831_v55  ;;  %8338 = vmatpush.bf16.msra.mxu1 %v14399_v62 }
 0x539   : > { %18336 = vst [vmem:[#allocation60_spill] sm:$0xff] %v16567_v31  ;;  %v6480_v35 = vadd.f32 %v6479_v54, %v18337_v53  ;;  %v18339_v53 = vld [vmem:[#allocation71_spill] sm:$0xff]  ;;  %8667 = vmatpush.bf16.msra.mxu2 %v14407_v9  ;;  %v11873_v9 = vld [vmem:[%s15291_s13 + $0xb10] sm:$0xf]  ;;  %v11881_v62 = vld [vmem:[%s15291_s13 + $0xb18] sm:$0xf] }
 0x53a   : > { %v7466_v19 = vpop.f32.mrf.mxu2  ;;  %v6810_v58 = vpop.f32.mrf.mxu0  ;;  %v13979_v52 = vld [vmem:[%s15291_s13 + $0xb38] sm:$0xf0] }
 0x53b   : > { %v6809_v13 = vadd.f32 %v6808_v57, %v6480_v35  ;;  %v7139_v8 = vpop.f32.mrf.mxu1  ;;  %v11826_v57 = vor.u32 %v13962_v34, %v11823_v56  ;;  %v11830_v35 = vor.u32 %v13968_v32, %v11829_v38  ;;  %v18341_v38 = vld [vmem:[#allocation72_spill] sm:$0xff] }
 0x53d   : > { %v7138_v60 = vadd.f32 %v7137_v1, %v6809_v13  ;;  %v11838_v13 = vor.u32 %v13969_v18, %v11837_v47 }
 0x53f   : > { %v16578_v17 = vadd.f32 %v7466_v19, %v7138_v60 }
 0x540   : > { %v6481_v54 = vpop.f32.mrf.mxu3 }
 0x541   : > { %18338 = vst [vmem:[#allocation61_spill] sm:$0xff] %v16578_v17  ;;  %v6482_v30 = vadd.f32 %v6481_v54, %v18339_v53  ;;  %v13974_v53 = vld [vmem:[%s15291_s13 + $0xb14] sm:$0xf] }
 0x542   : > { %v7468_v31 = vpop.f32.mrf.mxu2  ;;  %v6813_v1 = vpop.f32.mrf.mxu0 }
 0x543   : > { %v6811_v61 = vadd.f32 %v6810_v58, %v6482_v30  ;;  %v7142_v19 = vpop.f32.mrf.mxu1 }
 0x545   : > { %v7140_v60 = vadd.f32 %v7139_v8, %v6811_v61  ;;  %6523 = vmatmul.bf16.gmra.mxu3 %v11826_v57  ;;  %6852 = vmatmul.bf16.gmra.mxu0 %v11830_v35  ;;  %v13973_v61 = vld [vmem:[%s15291_s13 + $0xb0c] sm:$0xf]  ;;  %v11867_v8 = vld [vmem:[%s15291_s13 + $0xb34] sm:$0xf0] }
 0x546   : > { %7181 = vmatmul.bf16.gmra.mxu1 %v11834_v7  ;;  %v13980_v7 = vld [vmem:[%s15291_s13 + $0xb40] sm:$0xf0]  ;;  %v18343_v57 = vld [vmem:[#allocation73_spill] sm:$0xff] }
 0x547   : > { %7510 = vmatmul.bf16.gmra.mxu2 %v11838_v13  ;;  %v16581_v34 = vadd.f32 %v7468_v31, %v7140_v60  ;;  %v11875_v31 = vld [vmem:[%s15291_s13 + $0xb3c] sm:$0xf0]  ;;  %v11870_v60 = vor.u32 %v13973_v61, %v11867_v8  ;;  %v18345_v61 = vld [vmem:[#allocation74_spill] sm:$0xff] }
 0x548   : > { %v6484_v56 = vpop.f32.mrf.mxu3 }
 0x549   : > { %18340 = vst [vmem:[#allocation62_spill] sm:$0xff] %v16581_v34  ;;  %v6485_v32 = vadd.f32 %v6484_v56, %v18341_v38  ;;  %v11874_v56 = vor.u32 %v13979_v52, %v11873_v9 }
 0x54a   : > { %v7471_v47 = vpop.f32.mrf.mxu2  ;;  %v6815_v58 = vpop.f32.mrf.mxu0 }
 0x54b   : > { %v6814_v18 = vadd.f32 %v6813_v1, %v6485_v32  ;;  %v7144_v42 = vpop.f32.mrf.mxu1  ;;  %v11882_v1 = vor.u32 %v13980_v7, %v11881_v62  ;;  %v11878_v32 = vor.u32 %v13974_v53, %v11875_v31  ;;  %v11911_v53 = vld [vmem:[%s15291_s13 + $0xb8c] sm:$0xf0]  ;;  %v11917_v31 = vld [vmem:[%s15291_s13 + $0xb68] sm:$0xf] }
 0x54d   : > { %v7143_v55 = vadd.f32 %v7142_v19, %v6814_v18 }
 0x54f   : > { %v16589_v54 = vadd.f32 %v7471_v47, %v7143_v55 }
 0x550   : > { %v6486_v30 = vpop.f32.mrf.mxu3 }
 0x551   : > { %18342 = vst [vmem:[#allocation63_spill] sm:$0xff] %v16589_v54  ;;  %v6487_v35 = vadd.f32 %v6486_v30, %v18343_v57  ;;  %v13990_v30 = vld [vmem:[%s15291_s13 + $0xb90] sm:$0xf0]  ;;  %v11925_v57 = vld [vmem:[%s15291_s13 + $0xb70] sm:$0xf] }
 0x552   : > { %v7473_v13 = vpop.f32.mrf.mxu2  ;;  %v6818_v38 = vpop.f32.mrf.mxu0 }
 0x553   : > { %v6816_v19 = vadd.f32 %v6815_v58, %v6487_v35  ;;  %v7147_v18 = vpop.f32.mrf.mxu1 }
 0x555   : > { %v7145_v34 = vadd.f32 %v7144_v42, %v6816_v19  ;;  %6528 = vmatmul.bf16.gmra.mxu3 %v11870_v60  ;;  %6857 = vmatmul.bf16.gmra.mxu0 %v11874_v56  ;;  %v13984_v42 = vld [vmem:[%s15291_s13 + $0xb64] sm:$0xf]  ;;  %v13991_v60 = vld [vmem:[%s15291_s13 + $0xb98] sm:$0xf0]  ;;  %v13985_v56 = vld [vmem:[%s15291_s13 + $0xb6c] sm:$0xf] }
 0x556   : > { %7186 = vmatmul.bf16.gmra.mxu1 %v11878_v32 }
 0x557   : > { %7515 = vmatmul.bf16.gmra.mxu2 %v11882_v1  ;;  %v16595_v47 = vadd.f32 %v7473_v13, %v7145_v34  ;;  %v11919_v34 = vld [vmem:[%s15291_s13 + $0xb94] sm:$0xf0]  ;;  %v18347_v1 = vld [vmem:[#allocation75_spill] sm:$0xff] }
 0x558   : > { %v6489_v55 = vpop.f32.mrf.mxu3 }
 0x559   : > { %18344 = vst [vmem:[#allocation64_spill] sm:$0xff] %v16595_v47  ;;  %v6490_v8 = vadd.f32 %v6489_v55, %v18345_v61  ;;  %v11914_v55 = vor.u32 %v13984_v42, %v11911_v53  ;;  %v11918_v61 = vor.u32 %v13990_v30, %v11917_v31  ;;  %v18349_v42 = vld [vmem:[#allocation76_spill] sm:$0xff] }
 0x55a   : > { %v7476_v9 = vpop.f32.mrf.mxu2  ;;  %v6820_v58 = vpop.f32.mrf.mxu0 }
 0x55b   : > { %v6819_v52 = vadd.f32 %v6818_v38, %v6490_v8  ;;  %v7149_v62 = vpop.f32.mrf.mxu1  ;;  %v11926_v38 = vor.u32 %v13991_v60, %v11925_v57  ;;  %v11922_v8 = vor.u32 %v13985_v56, %v11919_v34  ;;  %v11955_v56 = vld [vmem:[%s15291_s13 + $0xbe4] sm:$0xf0]  ;;  %v11961_v34 = vld [vmem:[%s15291_s13 + $0xbc0] sm:$0xf] }
 0x55d   : > { %v7148_v7 = vadd.f32 %v7147_v18, %v6819_v52 }
 0x55f   : > { %v16603_v35 = vadd.f32 %v7476_v9, %v7148_v7 }
 0x560   : > { %v6491_v13 = vpop.f32.mrf.mxu3 }
 0x561   : > { %18346 = vst [vmem:[#allocation65_spill] sm:$0xff] %v16603_v35  ;;  %v6492_v32 = vadd.f32 %v6491_v13, %v18347_v1  ;;  %v14001_v13 = vld [vmem:[%s15291_s13 + $0xbe8] sm:$0xf0]  ;;  %v11969_v1 = vld [vmem:[%s15291_s13 + $0xbc8] sm:$0xf] }
 0x562   : > { %v7478_v19 = vpop.f32.mrf.mxu2  ;;  %v6823_v47 = vpop.f32.mrf.mxu0 }
 0x563   : > { %v6821_v18 = vadd.f32 %v6820_v58, %v6492_v32  ;;  %v7152_v52 = vpop.f32.mrf.mxu1 }
 0x565   : > { %v7150_v54 = vadd.f32 %v7149_v62, %v6821_v18  ;;  %6533 = vmatmul.bf16.gmra.mxu3 %v11914_v55  ;;  %6862 = vmatmul.bf16.gmra.mxu0 %v11918_v61  ;;  %v13995_v62 = vld [vmem:[%s15291_s13 + $0xbbc] sm:$0xf]  ;;  %v14002_v55 = vld [vmem:[%s15291_s13 + $0xbf0] sm:$0xf0]  ;;  %v13996_v61 = vld [vmem:[%s15291_s13 + $0xbc4] sm:$0xf] }
 0x566   : > { %7191 = vmatmul.bf16.gmra.mxu1 %v11922_v8 }
 0x567   : > { %7520 = vmatmul.bf16.gmra.mxu2 %v11926_v38  ;;  %v16609_v9 = vadd.f32 %v7478_v19, %v7150_v54  ;;  %v11963_v54 = vld [vmem:[%s15291_s13 + $0xbec] sm:$0xf0] }
 0x568   : > { %v6494_v7 = vpop.f32.mrf.mxu3  ;;  %v18351_v38 = vld [vmem:[#allocation77_spill] sm:$0xff] }
 0x569   : > { %18348 = vst [vmem:[#allocation66_spill] sm:$0xff] %v16609_v9  ;;  %v6495_v53 = vadd.f32 %v6494_v7, %v18349_v42  ;;  %v11958_v7 = vor.u32 %v13995_v62, %v11955_v56  ;;  %v11962_v42 = vor.u32 %v14001_v13, %v11961_v34  ;;  %v18353_v62 = vld [vmem:[#allocation78_spill] sm:$0xff] }
 0x56a   : > { %v7481_v31 = vpop.f32.mrf.mxu2  ;;  %v6825_v58 = vpop.f32.mrf.mxu0 }
 0x56b   : > { %v6824_v30 = vadd.f32 %v6823_v47, %v6495_v53  ;;  %v7154_v57 = vpop.f32.mrf.mxu1  ;;  %v11970_v47 = vor.u32 %v14002_v55, %v11969_v1  ;;  %v11966_v53 = vor.u32 %v13996_v61, %v11963_v54  ;;  %v11999_v61 = vld [vmem:[%s15291_s13 + $0xc3c] sm:$0xf0]  ;;  %v12005_v54 = vld [vmem:[%s15291_s13 + $0xc18] sm:$0xf] }
 0x56d   : > { %v7153_v60 = vadd.f32 %v7152_v52, %v6824_v30 }
 0x56f   : > { %v16617_v32 = vadd.f32 %v7481_v31, %v7153_v60 }
 0x570   : > { %v6496_v19 = vpop.f32.mrf.mxu3 }
 0x571   : > { %18350 = vst [vmem:[#allocation67_spill] sm:$0xff] %v16617_v32  ;;  %v6497_v8 = vadd.f32 %v6496_v19, %v18351_v38  ;;  %v14012_v19 = vld [vmem:[%s15291_s13 + $0xc40] sm:$0xf0]  ;;  %v12013_v38 = vld [vmem:[%s15291_s13 + $0xc20] sm:$0xf] }
 0x572   : > { %v7483_v18 = vpop.f32.mrf.mxu2  ;;  %v6828_v9 = vpop.f32.mrf.mxu0 }
 0x573   : > { %v6826_v52 = vadd.f32 %v6825_v58, %v6497_v8  ;;  %v7157_v30 = vpop.f32.mrf.mxu1 }
 0x575   : > { %v7155_v35 = vadd.f32 %v7154_v57, %v6826_v52  ;;  %6538 = vmatmul.bf16.gmra.mxu3 %v11958_v7  ;;  %6867 = vmatmul.bf16.gmra.mxu0 %v11962_v42  ;;  %v14006_v57 = vld [vmem:[%s15291_s13 + $0xc14] sm:$0xf]  ;;  %v14013_v7 = vld [vmem:[%s15291_s13 + $0xc48] sm:$0xf0]  ;;  %v14007_v42 = vld [vmem:[%s15291_s13 + $0xc1c] sm:$0xf] }
 0x576   : > { %7196 = vmatmul.bf16.gmra.mxu1 %v11966_v53 }
 0x577   : > { %7525 = vmatmul.bf16.gmra.mxu2 %v11970_v47  ;;  %v16623_v31 = vadd.f32 %v7483_v18, %v7155_v35  ;;  %v12007_v35 = vld [vmem:[%s15291_s13 + $0xc44] sm:$0xf0]  ;;  %v18355_v47 = vld [vmem:[#allocation79_spill] sm:$0xff] }
 0x578   : > { %v6499_v60 = vpop.f32.mrf.mxu3 }
 0x579   : > { %18352 = vst [vmem:[#allocation68_spill] sm:$0xff] %v16623_v31  ;;  %v6500_v56 = vadd.f32 %v6499_v60, %v18353_v62  ;;  %v12002_v60 = vor.u32 %v14006_v57, %v11999_v61  ;;  %v12006_v62 = vor.u32 %v14012_v19, %v12005_v54  ;;  %v18357_v57 = vld [vmem:[#allocation81_spill] sm:$0xff] }
 0x57a   : > { %v7486_v34 = vpop.f32.mrf.mxu2  ;;  %v6830_v58 = vpop.f32.mrf.mxu0 }
 0x57b   : > { %v6829_v13 = vadd.f32 %v6828_v9, %v6500_v56  ;;  %v7159_v1 = vpop.f32.mrf.mxu1  ;;  %v12014_v9 = vor.u32 %v14013_v7, %v12013_v38  ;;  %v12010_v56 = vor.u32 %v14007_v42, %v12007_v35  ;;  %v12043_v42 = vld [vmem:[%s15291_s13 + $0xc94] sm:$0xf0]  ;;  %v12049_v35 = vld [vmem:[%s15291_s13 + $0xc70] sm:$0xf] }
 0x57d   : > { %v7158_v55 = vadd.f32 %v7157_v30, %v6829_v13 }
 0x57f   : > { %v16631_v8 = vadd.f32 %v7486_v34, %v7158_v55 }
 0x580   : > { %v6501_v18 = vpop.f32.mrf.mxu3 }
 0x581   : > { %18354 = vst [vmem:[#allocation69_spill] sm:$0xff] %v16631_v8  ;;  %v6502_v53 = vadd.f32 %v6501_v18, %v18355_v47  ;;  %v14023_v18 = vld [vmem:[%s15291_s13 + $0xc98] sm:$0xf0]  ;;  %v12057_v47 = vld [vmem:[%s15291_s13 + $0xc78] sm:$0xf] }
 0x582   : > { %v7488_v52 = vpop.f32.mrf.mxu2  ;;  %v6833_v31 = vpop.f32.mrf.mxu0 }
 0x583   : > { %v6831_v30 = vadd.f32 %v6830_v58, %v6502_v53  ;;  %v7162_v13 = vpop.f32.mrf.mxu1 }
 0x585   : > { %v7160_v32 = vadd.f32 %v7159_v1, %v6831_v30  ;;  %6543 = vmatmul.bf16.gmra.mxu3 %v12002_v60  ;;  %6872 = vmatmul.bf16.gmra.mxu0 %v12006_v62  ;;  %v14017_v1 = vld [vmem:[%s15291_s13 + $0xc6c] sm:$0xf]  ;;  %v14024_v60 = vld [vmem:[%s15291_s13 + $0xca0] sm:$0xf0]  ;;  %v14018_v62 = vld [vmem:[%s15291_s13 + $0xc74] sm:$0xf] }
 0x586   : > { %7201 = vmatmul.bf16.gmra.mxu1 %v12010_v56 }
 0x587   : > { %7530 = vmatmul.bf16.gmra.mxu2 %v12014_v9  ;;  %v16637_v34 = vadd.f32 %v7488_v52, %v7160_v32  ;;  %v12051_v32 = vld [vmem:[%s15291_s13 + $0xc9c] sm:$0xf0] }
 0x588   : > { %v6504_v55 = vpop.f32.mrf.mxu3  ;;  %v18359_v9 = vld [vmem:[#allocation83_spill] sm:$0xff] }
 0x589   : > { %18356 = vst [vmem:[#allocation70_spill] sm:$0xff] %v16637_v34  ;;  %v6505_v61 = vadd.f32 %v6504_v55, %v18357_v57  ;;  %v12046_v55 = vor.u32 %v14017_v1, %v12043_v42  ;;  %v12050_v57 = vor.u32 %v14023_v18, %v12049_v35  ;;  %v18361_v1 = vld [vmem:[#allocation85_spill] sm:$0xff] }
 0x58a   : > { %v7491_v54 = vpop.f32.mrf.mxu2  ;;  %v6835_v58 = vpop.f32.mrf.mxu0 }
 0x58b   : > { %v6834_v19 = vadd.f32 %v6833_v31, %v6505_v61  ;;  %v7164_v38 = vpop.f32.mrf.mxu1  ;;  %v12058_v31 = vor.u32 %v14024_v60, %v12057_v47  ;;  %v12054_v61 = vor.u32 %v14018_v62, %v12051_v32  ;;  %v12087_v62 = vld [vmem:[%s15291_s13 + $0xcec] sm:$0xf0]  ;;  %v12093_v32 = vld [vmem:[%s15291_s13 + $0xcc8] sm:$0xf] }
 0x58d   : > { %v7163_v7 = vadd.f32 %v7162_v13, %v6834_v19 }
 0x58f   : > { %v16645_v53 = vadd.f32 %v7491_v54, %v7163_v7 }
 0x590   : > { %v6506_v52 = vpop.f32.mrf.mxu3 }
 0x591   : > { %18358 = vst [vmem:[#allocation71_spill] sm:$0xff] %v16645_v53  ;;  %v6507_v56 = vadd.f32 %v6506_v52, %v18359_v9  ;;  %v14034_v52 = vld [vmem:[%s15291_s13 + $0xcf0] sm:$0xf0]  ;;  %v12101_v9 = vld [vmem:[%s15291_s13 + $0xcd0] sm:$0xf] }
 0x592   : > { %v7493_v30 = vpop.f32.mrf.mxu2  ;;  %v6838_v34 = vpop.f32.mrf.mxu0 }
 0x593   : > { %v6836_v13 = vadd.f32 %v6835_v58, %v6507_v56  ;;  %v7167_v19 = vpop.f32.mrf.mxu1 }
 0x595   : > { %v7165_v8 = vadd.f32 %v7164_v38, %v6836_v13  ;;  %6548 = vmatmul.bf16.gmra.mxu3 %v12046_v55  ;;  %6877 = vmatmul.bf16.gmra.mxu0 %v12050_v57  ;;  %v14028_v38 = vld [vmem:[%s15291_s13 + $0xcc4] sm:$0xf]  ;;  %v14035_v55 = vld [vmem:[%s15291_s13 + $0xcf8] sm:$0xf0]  ;;  %v14029_v57 = vld [vmem:[%s15291_s13 + $0xccc] sm:$0xf] }
 0x596   : > { %7206 = vmatmul.bf16.gmra.mxu1 %v12054_v61 }
 0x597   : > { %7535 = vmatmul.bf16.gmra.mxu2 %v12058_v31  ;;  %v16651_v54 = vadd.f32 %v7493_v30, %v7165_v8  ;;  %v12095_v8 = vld [vmem:[%s15291_s13 + $0xcf4] sm:$0xf0]  ;;  %v18363_v31 = vld [vmem:[#allocation87_spill] sm:$0xff] }
 0x598   : > { %v6509_v7 = vpop.f32.mrf.mxu3 }
 0x599   : > { %18360 = vst [vmem:[#allocation72_spill] sm:$0xff] %v16651_v54  ;;  %v6510_v42 = vadd.f32 %v6509_v7, %v18361_v1  ;;  %v12090_v7 = vor.u32 %v14028_v38, %v12087_v62  ;;  %v12094_v1 = vor.u32 %v14034_v52, %v12093_v32  ;;  %v18365_v38 = vld [vmem:[#allocation89_spill] sm:$0xff] }
 0x59a   : > { %v7496_v35 = vpop.f32.mrf.mxu2  ;;  %v6840_v58 = vpop.f32.mrf.mxu0 }
 0x59b   : > { %v6839_v18 = vadd.f32 %v6838_v34, %v6510_v42  ;;  %v7169_v47 = vpop.f32.mrf.mxu1  ;;  %v12102_v34 = vor.u32 %v14035_v55, %v12101_v9  ;;  %v12098_v42 = vor.u32 %v14029_v57, %v12095_v8  ;;  %v12131_v57 = vld [vmem:[%s15291_s13 + $0xd44] sm:$0xf0]  ;;  %v12137_v8 = vld [vmem:[%s15291_s13 + $0xd20] sm:$0xf] }
 0x59d   : > { %v7168_v60 = vadd.f32 %v7167_v19, %v6839_v18 }
 0x59f   : > { %v16659_v56 = vadd.f32 %v7496_v35, %v7168_v60 }
 0x5a0   : > { %v6511_v30 = vpop.f32.mrf.mxu3 }
 0x5a1   : > { %18362 = vst [vmem:[#allocation73_spill] sm:$0xff] %v16659_v56  ;;  %v6512_v61 = vadd.f32 %v6511_v30, %v18363_v31  ;;  %v14045_v30 = vld [vmem:[%s15291_s13 + $0xd48] sm:$0xf0]  ;;  %v12145_v31 = vld [vmem:[%s15291_s13 + $0xd28] sm:$0xf] }
 0x5a2   : > { %v7498_v13 = vpop.f32.mrf.mxu2  ;;  %v6843_v54 = vpop.f32.mrf.mxu0 }
 0x5a3   : > { %v6841_v19 = vadd.f32 %v6840_v58, %v6512_v61  ;;  %v7172_v18 = vpop.f32.mrf.mxu1 }
 0x5a5   : > { %v7170_v53 = vadd.f32 %v7169_v47, %v6841_v19  ;;  %6553 = vmatmul.bf16.gmra.mxu3 %v12090_v7  ;;  %6882 = vmatmul.bf16.gmra.mxu0 %v12094_v1  ;;  %v14039_v47 = vld [vmem:[%s15291_s13 + $0xd1c] sm:$0xf]  ;;  %v14046_v7 = vld [vmem:[%s15291_s13 + $0xd50] sm:$0xf0]  ;;  %v14040_v1 = vld [vmem:[%s15291_s13 + $0xd24] sm:$0xf] }
 0x5a6   : > { %7211 = vmatmul.bf16.gmra.mxu1 %v12098_v42 }
 0x5a7   : > { %7540 = vmatmul.bf16.gmra.mxu2 %v12102_v34  ;;  %v16665_v35 = vadd.f32 %v7498_v13, %v7170_v53  ;;  %v12139_v53 = vld [vmem:[%s15291_s13 + $0xd4c] sm:$0xf0]  ;;  %v18367_v34 = vld [vmem:[#allocation91_spill] sm:$0xff] }
 0x5a8   : > { %v6514_v60 = vpop.f32.mrf.mxu3 }
 0x5a9   : > { %18364 = vst [vmem:[#allocation74_spill] sm:$0xff] %v16665_v35  ;;  %v6515_v62 = vadd.f32 %v6514_v60, %v18365_v38  ;;  %v12134_v60 = vor.u32 %v14039_v47, %v12131_v57  ;;  %v12138_v38 = vor.u32 %v14045_v30, %v12137_v8  ;;  %v18369_v57 = vld [vmem:[#allocation93_spill] sm:$0xff] }
 0x5aa   : > { %v7501_v32 = vpop.f32.mrf.mxu2  ;;  %v6845_v58 = vpop.f32.mrf.mxu0 }
 0x5ab   : > { %v6844_v52 = vadd.f32 %v6843_v54, %v6515_v62  ;;  %v7174_v9 = vpop.f32.mrf.mxu1  ;;  %v12146_v54 = vor.u32 %v14046_v7, %v12145_v31  ;;  %v12142_v62 = vor.u32 %v14040_v1, %v12139_v53  ;;  %v14050_v7 = vld [vmem:[%s15291_s13 + $0xd74] sm:$0xf]  ;;  %v12175_v1 = vld [vmem:[%s15291_s13 + $0xd9c] sm:$0xf0] }
 0x5ad   : > { %v7173_v55 = vadd.f32 %v7172_v18, %v6844_v52 }
 0x5af   : > { %v16673_v61 = vadd.f32 %v7501_v32, %v7173_v55  ;;  %v14382_v55 = vld [vmem:[#allocation6 + $0x1d0] sm:$0xff] }
 0x5b0   : > { %v6516_v13 = vpop.f32.mrf.mxu3  ;;  %7681 = vmatpush.bf16.msra.mxu3 %v14382_v55 }
 0x5b1   : > { %18366 = vst [vmem:[#allocation75_spill] sm:$0xff] %v16673_v61  ;;  %v6517_v42 = vadd.f32 %v6516_v13, %v18367_v34  ;;  %v12181_v13 = vld [vmem:[%s15291_s13 + $0xd78] sm:$0xf]  ;;  %v14056_v34 = vld [vmem:[%s15291_s13 + $0xda0] sm:$0xf0] }
 0x5b2   : > { %v7503_v19 = vpop.f32.mrf.mxu2  ;;  %v6848_v35 = vpop.f32.mrf.mxu0 }
 0x5b3   : > { %v6846_v18 = vadd.f32 %v6845_v58, %v6517_v42  ;;  %v7177_v52 = vpop.f32.mrf.mxu1  ;;  %v12189_v42 = vld [vmem:[%s15291_s13 + $0xd80] sm:$0xf] }
 0x5b5   : > { %v7175_v56 = vadd.f32 %v7174_v9, %v6846_v18  ;;  %6558 = vmatmul.bf16.gmra.mxu3 %v12134_v60  ;;  %6887 = vmatmul.bf16.gmra.mxu0 %v12138_v38  ;;  %v14057_v60 = vld [vmem:[%s15291_s13 + $0xda8] sm:$0xf0]  ;;  %v14398_v18 = vld [vmem:[#allocation6 + $0x250] sm:$0xff] }
 0x5b6   : > { %7216 = vmatmul.bf16.gmra.mxu1 %v12142_v62  ;;  %v14390_v62 = vld [vmem:[#allocation6 + $0x210] sm:$0xff] }
 0x5b7   : > { %7545 = vmatmul.bf16.gmra.mxu2 %v12146_v54  ;;  %v16679_v32 = vadd.f32 %v7503_v19, %v7175_v56  ;;  %v14051_v56 = vld [vmem:[%s15291_s13 + $0xd7c] sm:$0xf]  ;;  %v12183_v19 = vld [vmem:[%s15291_s13 + $0xda4] sm:$0xf0]  ;;  %v14406_v54 = vld [vmem:[#allocation6 + $0x290] sm:$0xff]  ;;  %8010 = vmatpush.bf16.msra.mxu0 %v14390_v62 }
 0x5b8   : > { %v6519_v47 = vpop.f32.mrf.mxu3  ;;  %8668 = vmatpush.bf16.msra.mxu2 %v14406_v54  ;;  %v12186_v61 = vor.u32 %v14051_v56, %v12183_v19  ;;  %8339 = vmatpush.bf16.msra.mxu1 %v14398_v18  ;;  %v12225_v54 = vld [vmem:[%s15291_s13 + $0xdd0] sm:$0xf]  ;;  %v14067_v62 = vld [vmem:[%s15291_s13 + $0xdf8] sm:$0xf0]  ;;  %v12233_v18 = vld [vmem:[%s15291_s13 + $0xdd8] sm:$0xf] }
 0x5b9   : > { %18368 = vst [vmem:[#allocation76_spill] sm:$0xff] %v16679_v32  ;;  %v6520_v58 = vadd.f32 %v6519_v47, %v18369_v57  ;;  %v18370_v57 = vld [vmem:[#allocation95_spill] sm:$0xff] }
 0x5ba   : > { %v7506_v8 = vpop.f32.mrf.mxu2  ;;  %v6850_v30 = vpop.f32.mrf.mxu0 }
 0x5bb   : > { %v6849_v9 = vadd.f32 %v6848_v35, %v6520_v58  ;;  %v7179_v31 = vpop.f32.mrf.mxu1  ;;  %v12178_v35 = vor.u32 %v14050_v7, %v12175_v1  ;;  %v12182_v58 = vor.u32 %v14056_v34, %v12181_v13  ;;  %v18372_v13 = vld [vmem:[#allocation97_spill] sm:$0xff] }
 0x5bd   : > { %v7178_v53 = vadd.f32 %v7177_v52, %v6849_v9  ;;  %v12190_v9 = vor.u32 %v14057_v60, %v12189_v42 }
 0x5bf   : > { %v16690_v38 = vadd.f32 %v7506_v8, %v7178_v53 }
 0x5c0   : > { %v6521_v47 = vpop.f32.mrf.mxu3 }
 0x5c1   : > { %v6522_v55 = vadd.f32 %v6521_v47, %v18370_v57  ;;  %v14062_v57 = vld [vmem:[%s15291_s13 + $0xdd4] sm:$0xf] }
 0x5c2   : > { %v7508_v32 = vpop.f32.mrf.mxu2  ;;  %v6853_v52 = vpop.f32.mrf.mxu0 }
 0x5c3   : > { %v6851_v17 = vadd.f32 %v6850_v30, %v6522_v55  ;;  %v7182_v8 = vpop.f32.mrf.mxu1 }
 0x5c5   : > { %v7180_v53 = vadd.f32 %v7179_v31, %v6851_v17  ;;  %6563 = vmatmul.bf16.gmra.mxu3 %v12178_v35  ;;  %6892 = vmatmul.bf16.gmra.mxu0 %v12182_v58  ;;  %v14061_v17 = vld [vmem:[%s15291_s13 + $0xdcc] sm:$0xf]  ;;  %v12219_v31 = vld [vmem:[%s15291_s13 + $0xdf4] sm:$0xf0] }
 0x5c6   : > { %7221 = vmatmul.bf16.gmra.mxu1 %v12186_v61  ;;  %v14068_v61 = vld [vmem:[%s15291_s13 + $0xe00] sm:$0xf0]  ;;  %v18373_v35 = vld [vmem:[#allocation98_spill] sm:$0xff] }
 0x5c7   : > { %7550 = vmatmul.bf16.gmra.mxu2 %v12190_v9  ;;  %v16693_v7 = vadd.f32 %v7508_v32, %v7180_v53  ;;  %v12227_v32 = vld [vmem:[%s15291_s13 + $0xdfc] sm:$0xf0]  ;;  %v12222_v53 = vor.u32 %v14061_v17, %v12219_v31  ;;  %v18375_v17 = vld [vmem:[#allocation100_spill] sm:$0xff] }
 0x5c8   : > { %v6524_v1 = vpop.f32.mrf.mxu3 }
 0x5c9   : > { %18371 = vst [vmem:[#allocation77_spill] sm:$0xff] %v16693_v7  ;;  %v6525_v34 = vadd.f32 %v6524_v1, %v18372_v13  ;;  %v12226_v1 = vor.u32 %v14067_v62, %v12225_v54 }
 0x5ca   : > { %v7511_v42 = vpop.f32.mrf.mxu2  ;;  %v6855_v30 = vpop.f32.mrf.mxu0 }
 0x5cb   : > { %v6854_v60 = vadd.f32 %v6853_v52, %v6525_v34  ;;  %v7184_v56 = vpop.f32.mrf.mxu1  ;;  %v12234_v52 = vor.u32 %v14068_v61, %v12233_v18  ;;  %v12230_v34 = vor.u32 %v14062_v57, %v12227_v32  ;;  %v12263_v57 = vld [vmem:[%s15291_s13 + $0xe4c] sm:$0xf0]  ;;  %v12269_v32 = vld [vmem:[%s15291_s13 + $0xe28] sm:$0xf] }
 0x5cd   : > { %v7183_v19 = vadd.f32 %v7182_v8, %v6854_v60 }
 0x5cf   : > { %v16701_v47 = vadd.f32 %v7511_v42, %v7183_v19 }
 0x5d0   : > { %v6526_v55 = vpop.f32.mrf.mxu3 }
 0x5d1   : > { %v6527_v58 = vadd.f32 %v6526_v55, %v18373_v35  ;;  %v14078_v55 = vld [vmem:[%s15291_s13 + $0xe50] sm:$0xf0]  ;;  %v12277_v35 = vld [vmem:[%s15291_s13 + $0xe30] sm:$0xf] }
 0x5d2   : > { %v7513_v9 = vpop.f32.mrf.mxu2  ;;  %v6858_v13 = vpop.f32.mrf.mxu0 }
 0x5d3   : > { %v6856_v8 = vadd.f32 %v6855_v30, %v6527_v58  ;;  %v7187_v60 = vpop.f32.mrf.mxu1 }
 0x5d5   : > { %v7185_v7 = vadd.f32 %v7184_v56, %v6856_v8  ;;  %6568 = vmatmul.bf16.gmra.mxu3 %v12222_v53  ;;  %6897 = vmatmul.bf16.gmra.mxu0 %v12226_v1  ;;  %v14072_v56 = vld [vmem:[%s15291_s13 + $0xe24] sm:$0xf]  ;;  %v14079_v53 = vld [vmem:[%s15291_s13 + $0xe58] sm:$0xf0]  ;;  %v14073_v1 = vld [vmem:[%s15291_s13 + $0xe2c] sm:$0xf] }
 0x5d6   : > { %7226 = vmatmul.bf16.gmra.mxu1 %v12230_v34  ;;  %v12266_v8 = vor.u32 %v14072_v56, %v12263_v57 }
 0x5d7   : > { %7555 = vmatmul.bf16.gmra.mxu2 %v12234_v52  ;;  %v16707_v42 = vadd.f32 %v7513_v9, %v7185_v7  ;;  %v12271_v7 = vld [vmem:[%s15291_s13 + $0xe54] sm:$0xf0] }
 0x5d8   : > { %v6529_v19 = vpop.f32.mrf.mxu3 }
 0x5d9   : > { %18374 = vst [vmem:[#allocation78_spill] sm:$0xff] %v16707_v42  ;;  %v6530_v31 = vadd.f32 %v6529_v19, %v18375_v17  ;;  %v12270_v19 = vor.u32 %v14078_v55, %v12269_v32 }
 0x5da   : > { %v7516_v54 = vpop.f32.mrf.mxu2  ;;  %v6860_v30 = vpop.f32.mrf.mxu0 }
 0x5db   : > { %v6859_v62 = vadd.f32 %v6858_v13, %v6530_v31  ;;  %v7189_v18 = vpop.f32.mrf.mxu1  ;;  %v12278_v13 = vor.u32 %v14079_v53, %v12277_v35  ;;  %v12274_v31 = vor.u32 %v14073_v1, %v12271_v7  ;;  %v12307_v35 = vld [vmem:[%s15291_s13 + $0xea4] sm:$0xf0]  ;;  %v12313_v53 = vld [vmem:[%s15291_s13 + $0xe80] sm:$0xf]  ;;  %v14089_v1 = vld [vmem:[%s15291_s13 + $0xea8] sm:$0xf0] }
 0x5dc   : > { %v12321_v7 = vld [vmem:[%s15291_s13 + $0xe88] sm:$0xf] }
 0x5dd   : > { %v7188_v61 = vadd.f32 %v7187_v60, %v6859_v62 }
 0x5df   : > { %v16715_v58 = vadd.f32 %v7516_v54, %v7188_v61 }
 0x5e0   : > { %v6531_v9 = vpop.f32.mrf.mxu3 }
 0x5e1   : > { %v6532_v52 = vadd.f32 %v6531_v9, %v15959_v46 }
 0x5e2   : > { %v7518_v34 = vpop.f32.mrf.mxu2  ;;  %v6863_v17 = vpop.f32.mrf.mxu0 }
 0x5e3   : > { %v6861_v60 = vadd.f32 %v6860_v30, %v6532_v52  ;;  %v7192_v62 = vpop.f32.mrf.mxu1  ;;  %v14090_v52 = vld [vmem:[%s15291_s13 + $0xeb0] sm:$0xf0] }
 0x5e5   : > { %v7190_v42 = vadd.f32 %v7189_v18, %v6861_v60  ;;  %6573 = vmatmul.bf16.gmra.mxu3 %v12266_v8  ;;  %6902 = vmatmul.bf16.gmra.mxu0 %v12270_v19  ;;  %v14083_v18 = vld [vmem:[%s15291_s13 + $0xe7c] sm:$0xf]  ;;  %v14084_v8 = vld [vmem:[%s15291_s13 + $0xe84] sm:$0xf] }
 0x5e6   : > { %7231 = vmatmul.bf16.gmra.mxu1 %v12274_v31  ;;  %v12314_v31 = vor.u32 %v14089_v1, %v12313_v53 }
 0x5e7   : > { %7560 = vmatmul.bf16.gmra.mxu2 %v12278_v13  ;;  %v16721_v46 = vadd.f32 %v7518_v34, %v7190_v42  ;;  %v12315_v42 = vld [vmem:[%s15291_s13 + $0xeac] sm:$0xf0] }
 0x5e8   : > { %v6534_v54 = vpop.f32.mrf.mxu3 }
 0x5e9   : > { %v6535_v61 = vadd.f32 %v6534_v54, %v15965_v36  ;;  %v12310_v36 = vor.u32 %v14083_v18, %v12307_v35  ;;  %v12318_v54 = vor.u32 %v14084_v8, %v12315_v42  ;;  %v14100_v8 = vld [vmem:[%s15291_s13 + $0xf00] sm:$0xf0]  ;;  %v12365_v42 = vld [vmem:[%s15291_s13 + $0xee0] sm:$0xf] }
 0x5ea   : > { %v7521_v56 = vpop.f32.mrf.mxu2  ;;  %v6865_v30 = vpop.f32.mrf.mxu0 }
 0x5eb   : > { %v6864_v57 = vadd.f32 %v6863_v17, %v6535_v61  ;;  %v7194_v32 = vpop.f32.mrf.mxu1  ;;  %v12322_v17 = vor.u32 %v14090_v52, %v12321_v7  ;;  %v12351_v7 = vld [vmem:[%s15291_s13 + $0xefc] sm:$0xf0]  ;;  %v12357_v52 = vld [vmem:[%s15291_s13 + $0xed8] sm:$0xf] }
 0x5ed   : > { %v7193_v55 = vadd.f32 %v7192_v62, %v6864_v57 }
 0x5ef   : > { %v16729_v9 = vadd.f32 %v7521_v56, %v7193_v55 }
 0x5f0   : > { %v6536_v34 = vpop.f32.mrf.mxu3 }
 0x5f1   : > { %v6537_v19 = vadd.f32 %v6536_v34, %v15979_v27 }
 0x5f2   : > { %v7523_v13 = vpop.f32.mrf.mxu2  ;;  %v6868_v60 = vpop.f32.mrf.mxu0 }
 0x5f3   : > { %v6866_v62 = vadd.f32 %v6865_v30, %v6537_v19  ;;  %v7197_v61 = vpop.f32.mrf.mxu1  ;;  %v14101_v19 = vld [vmem:[%s15291_s13 + $0xf08] sm:$0xf0] }
 0x5f5   : > { %v7195_v57 = vadd.f32 %v7194_v32, %v6866_v62  ;;  %6578 = vmatmul.bf16.gmra.mxu3 %v12310_v36  ;;  %6907 = vmatmul.bf16.gmra.mxu0 %v12314_v31  ;;  %v14094_v32 = vld [vmem:[%s15291_s13 + $0xed4] sm:$0xf]  ;;  %v14095_v36 = vld [vmem:[%s15291_s13 + $0xedc] sm:$0xf]  ;;  %v12358_v62 = vor.u32 %v14100_v8, %v12357_v52 }
 0x5f6   : > { %7236 = vmatmul.bf16.gmra.mxu1 %v12318_v54 }
 0x5f7   : > { %7565 = vmatmul.bf16.gmra.mxu2 %v12322_v17  ;;  %v16735_v27 = vadd.f32 %v7523_v13, %v7195_v57  ;;  %v12359_v13 = vld [vmem:[%s15291_s13 + $0xf04] sm:$0xf0] }
 0x5f8   : > { %v6539_v56 = vpop.f32.mrf.mxu3 }
 0x5f9   : > { %v6540_v55 = vadd.f32 %v6539_v56, %v15985_v21  ;;  %v12354_v21 = vor.u32 %v14094_v32, %v12351_v7  ;;  %v12362_v56 = vor.u32 %v14095_v36, %v12359_v13  ;;  %v14111_v36 = vld [vmem:[%s15291_s13 + $0xf58] sm:$0xf0]  ;;  %v12409_v13 = vld [vmem:[%s15291_s13 + $0xf38] sm:$0xf] }
 0x5fa   : > { %v7526_v18 = vpop.f32.mrf.mxu2  ;;  %v6870_v30 = vpop.f32.mrf.mxu0 }
 0x5fb   : > { %v6869_v35 = vadd.f32 %v6868_v60, %v6540_v55  ;;  %v7199_v53 = vpop.f32.mrf.mxu1  ;;  %v12366_v60 = vor.u32 %v14101_v19, %v12365_v42  ;;  %v12395_v42 = vld [vmem:[%s15291_s13 + $0xf54] sm:$0xf0]  ;;  %v12401_v19 = vld [vmem:[%s15291_s13 + $0xf30] sm:$0xf] }
 0x5fd   : > { %v7198_v1 = vadd.f32 %v7197_v61, %v6869_v35 }
 0x5ff   : > { %v16743_v34 = vadd.f32 %v7526_v18, %v7198_v1 }
 0x600   : > { %v6541_v31 = vpop.f32.mrf.mxu3 }
 0x601   : > { %v6542_v17 = vadd.f32 %v6541_v31, %v15999_v51 }
 0x602   : > { %v7528_v54 = vpop.f32.mrf.mxu2  ;;  %v6873_v57 = vpop.f32.mrf.mxu0 }
 0x603   : > { %v6871_v61 = vadd.f32 %v6870_v30, %v6542_v17  ;;  %v7202_v55 = vpop.f32.mrf.mxu1  ;;  %v14112_v17 = vld [vmem:[%s15291_s13 + $0xf60] sm:$0xf0] }
 0x605   : > { %v7200_v35 = vadd.f32 %v7199_v53, %v6871_v61  ;;  %6583 = vmatmul.bf16.gmra.mxu3 %v12354_v21  ;;  %6912 = vmatmul.bf16.gmra.mxu0 %v12358_v62  ;;  %v14105_v53 = vld [vmem:[%s15291_s13 + $0xf2c] sm:$0xf]  ;;  %v14106_v21 = vld [vmem:[%s15291_s13 + $0xf34] sm:$0xf]  ;;  %v12402_v61 = vor.u32 %v14111_v36, %v12401_v19 }
 0x606   : > { %7241 = vmatmul.bf16.gmra.mxu1 %v12362_v56 }
 0x607   : > { %7570 = vmatmul.bf16.gmra.mxu2 %v12366_v60  ;;  %v16749_v51 = vadd.f32 %v7528_v54, %v7200_v35  ;;  %v12403_v54 = vld [vmem:[%s15291_s13 + $0xf5c] sm:$0xf0] }
 0x608   : > { %v6544_v18 = vpop.f32.mrf.mxu3 }
 0x609   : > { %v6545_v1 = vadd.f32 %v6544_v18, %v16005_v37  ;;  %v12398_v37 = vor.u32 %v14105_v53, %v12395_v42  ;;  %v12406_v18 = vor.u32 %v14106_v21, %v12403_v54  ;;  %v14122_v21 = vld [vmem:[%s15291_s13 + $0xfb0] sm:$0xf0]  ;;  %v12453_v54 = vld [vmem:[%s15291_s13 + $0xf90] sm:$0xf] }
 0x60a   : > { %v7531_v32 = vpop.f32.mrf.mxu2  ;;  %v6875_v30 = vpop.f32.mrf.mxu0 }
 0x60b   : > { %v6874_v7 = vadd.f32 %v6873_v57, %v6545_v1  ;;  %v7204_v52 = vpop.f32.mrf.mxu1  ;;  %v12410_v57 = vor.u32 %v14112_v17, %v12409_v13  ;;  %v12439_v13 = vld [vmem:[%s15291_s13 + $0xfac] sm:$0xf0]  ;;  %v12445_v17 = vld [vmem:[%s15291_s13 + $0xf88] sm:$0xf] }
 0x60d   : > { %v7203_v8 = vadd.f32 %v7202_v55, %v6874_v7 }
 0x60f   : > { %v16757_v31 = vadd.f32 %v7531_v32, %v7203_v8 }
 0x610   : > { %v6546_v62 = vpop.f32.mrf.mxu3 }
 0x611   : > { %v6547_v60 = vadd.f32 %v6546_v62, %v16019_v4 }
 0x612   : > { %v7533_v56 = vpop.f32.mrf.mxu2  ;;  %v6878_v35 = vpop.f32.mrf.mxu0 }
 0x613   : > { %v6876_v55 = vadd.f32 %v6875_v30, %v6547_v60  ;;  %v7207_v1 = vpop.f32.mrf.mxu1  ;;  %v14123_v60 = vld [vmem:[%s15291_s13 + $0xfb8] sm:$0xf0] }
 0x615   : > { %v7205_v7 = vadd.f32 %v7204_v52, %v6876_v55  ;;  %6588 = vmatmul.bf16.gmra.mxu3 %v12398_v37  ;;  %6917 = vmatmul.bf16.gmra.mxu0 %v12402_v61  ;;  %v14116_v52 = vld [vmem:[%s15291_s13 + $0xf84] sm:$0xf]  ;;  %v14117_v37 = vld [vmem:[%s15291_s13 + $0xf8c] sm:$0xf]  ;;  %v12446_v55 = vor.u32 %v14122_v21, %v12445_v17 }
 0x616   : > { %7246 = vmatmul.bf16.gmra.mxu1 %v12406_v18 }
 0x617   : > { %7575 = vmatmul.bf16.gmra.mxu2 %v12410_v57  ;;  %v16763_v4 = vadd.f32 %v7533_v56, %v7205_v7  ;;  %v12447_v56 = vld [vmem:[%s15291_s13 + $0xfb4] sm:$0xf0] }
 0x618   : > { %v6549_v32 = vpop.f32.mrf.mxu3 }
 0x619   : > { %v6550_v8 = vadd.f32 %v6549_v32, %v16025_v39  ;;  %v12442_v39 = vor.u32 %v14116_v52, %v12439_v13  ;;  %v12450_v32 = vor.u32 %v14117_v37, %v12447_v56  ;;  %v14133_v37 = vld [vmem:[%s15291_s13 + $0x1008] sm:$0xf0]  ;;  %v12497_v56 = vld [vmem:[%s15291_s13 + $0xfe8] sm:$0xf] }
 0x61a   : > { %v7536_v53 = vpop.f32.mrf.mxu2  ;;  %v6880_v30 = vpop.f32.mrf.mxu0 }
 0x61b   : > { %v6879_v42 = vadd.f32 %v6878_v35, %v6550_v8  ;;  %v7209_v19 = vpop.f32.mrf.mxu1  ;;  %v12454_v35 = vor.u32 %v14123_v60, %v12453_v54  ;;  %v12483_v54 = vld [vmem:[%s15291_s13 + $0x1004] sm:$0xf0]  ;;  %v12489_v60 = vld [vmem:[%s15291_s13 + $0xfe0] sm:$0xf] }
 0x61d   : > { %v7208_v36 = vadd.f32 %v7207_v1, %v6879_v42 }
 0x61f   : > { %v16771_v62 = vadd.f32 %v7536_v53, %v7208_v36 }
 0x620   : > { %v6551_v61 = vpop.f32.mrf.mxu3 }
 0x621   : > { %v6552_v57 = vadd.f32 %v6551_v61, %v16039_v44 }
 0x622   : > { %v7538_v18 = vpop.f32.mrf.mxu2  ;;  %v6883_v7 = vpop.f32.mrf.mxu0 }
 0x623   : > { %v6881_v1 = vadd.f32 %v6880_v30, %v6552_v57  ;;  %v7212_v8 = vpop.f32.mrf.mxu1  ;;  %v14134_v57 = vld [vmem:[%s15291_s13 + $0x1010] sm:$0xf0] }
 0x625   : > { %v7210_v42 = vadd.f32 %v7209_v19, %v6881_v1  ;;  %6593 = vmatmul.bf16.gmra.mxu3 %v12442_v39  ;;  %6922 = vmatmul.bf16.gmra.mxu0 %v12446_v55  ;;  %v14127_v19 = vld [vmem:[%s15291_s13 + $0xfdc] sm:$0xf]  ;;  %v14128_v39 = vld [vmem:[%s15291_s13 + $0xfe4] sm:$0xf]  ;;  %v12490_v1 = vor.u32 %v14133_v37, %v12489_v60  ;;  %v14138_v37 = vld [vmem:[%s15291_s13 + $0x1034] sm:$0xf] }
 0x626   : > { %7251 = vmatmul.bf16.gmra.mxu1 %v12450_v32 }
 0x627   : > { %7580 = vmatmul.bf16.gmra.mxu2 %v12454_v35  ;;  %v16777_v44 = vadd.f32 %v7538_v18, %v7210_v42  ;;  %v12491_v18 = vld [vmem:[%s15291_s13 + $0x100c] sm:$0xf0] }
 0x628   : > { %v6554_v53 = vpop.f32.mrf.mxu3 }
 0x629   : > { %v6555_v36 = vadd.f32 %v6554_v53, %v16045_v23  ;;  %v12486_v23 = vor.u32 %v14127_v19, %v12483_v54  ;;  %v12494_v53 = vor.u32 %v14128_v39, %v12491_v18  ;;  %v12533_v39 = vld [vmem:[%s15291_s13 + $0x1038] sm:$0xf]  ;;  %v14144_v18 = vld [vmem:[%s15291_s13 + $0x1060] sm:$0xf0] }
 0x62a   : > { %v7541_v52 = vpop.f32.mrf.mxu2  ;;  %v6885_v30 = vpop.f32.mrf.mxu0 }
 0x62b   : > { %v6884_v13 = vadd.f32 %v6883_v7, %v6555_v36  ;;  %v7214_v17 = vpop.f32.mrf.mxu1  ;;  %v12498_v7 = vor.u32 %v14134_v57, %v12497_v56  ;;  %v12527_v56 = vld [vmem:[%s15291_s13 + $0x105c] sm:$0xf0] }
 0x62d   : > { %v7213_v21 = vadd.f32 %v7212_v8, %v6884_v13 }
 0x62f   : > { %v16785_v61 = vadd.f32 %v7541_v52, %v7213_v21  ;;  %v14381_v52 = vld [vmem:[#allocation6 + $0x1c8] sm:$0xff] }
 0x630   : > { %v6556_v55 = vpop.f32.mrf.mxu3  ;;  %7682 = vmatpush.bf16.msra.mxu3 %v14381_v52 }
 0x631   : > { %v6557_v35 = vadd.f32 %v6556_v55, %v16059_v59  ;;  %v12541_v55 = vld [vmem:[%s15291_s13 + $0x1040] sm:$0xf] }
 0x632   : > { %v7543_v32 = vpop.f32.mrf.mxu2  ;;  %v6888_v42 = vpop.f32.mrf.mxu0 }
 0x633   : > { %v6886_v8 = vadd.f32 %v6885_v30, %v6557_v35  ;;  %v7217_v36 = vpop.f32.mrf.mxu1  ;;  %v14145_v35 = vld [vmem:[%s15291_s13 + $0x1068] sm:$0xf0] }
 0x635   : > { %v7215_v13 = vadd.f32 %v7214_v17, %v6886_v8  ;;  %6598 = vmatmul.bf16.gmra.mxu3 %v12486_v23  ;;  %6927 = vmatmul.bf16.gmra.mxu0 %v12490_v1  ;;  %v12535_v23 = vld [vmem:[%s15291_s13 + $0x1064] sm:$0xf0] }
 0x636   : > { %7256 = vmatmul.bf16.gmra.mxu1 %v12494_v53  ;;  %v14389_v53 = vld [vmem:[#allocation6 + $0x208] sm:$0xff] }
 0x637   : > { %7585 = vmatmul.bf16.gmra.mxu2 %v12498_v7  ;;  %v16791_v59 = vadd.f32 %v7543_v32, %v7215_v13  ;;  %v14139_v32 = vld [vmem:[%s15291_s13 + $0x103c] sm:$0xf]  ;;  %v14405_v7 = vld [vmem:[#allocation6 + $0x288] sm:$0xff]  ;;  %8011 = vmatpush.bf16.msra.mxu0 %v14389_v53 }
 0x638   : > { %v6559_v21 = vpop.f32.mrf.mxu3  ;;  %v14397_v8 = vld [vmem:[#allocation6 + $0x248] sm:$0xff]  ;;  %8669 = vmatpush.bf16.msra.mxu2 %v14405_v7  ;;  %v12585_v7 = vld [vmem:[%s15291_s13 + $0x1098] sm:$0xf] }
 0x639   : > { %18376 = vst [vmem:[#allocation79_spill] sm:$0xff] %v16791_v59  ;;  %v6560_v30 = vadd.f32 %v6559_v21, %v16065_v50  ;;  %v12534_v21 = vor.u32 %v14144_v18, %v12533_v39  ;;  %8340 = vmatpush.bf16.msra.mxu1 %v14397_v8  ;;  %v14156_v8 = vld [vmem:[%s15291_s13 + $0x10c0] sm:$0xf0] }
 0x63a   : > { %v7546_v19 = vpop.f32.mrf.mxu2  ;;  %v6890_v54 = vpop.f32.mrf.mxu0 }
 0x63b   : > { %v6889_v17 = vadd.f32 %v6888_v42, %v6560_v30  ;;  %v7219_v60 = vpop.f32.mrf.mxu1  ;;  %v12530_v42 = vor.u32 %v14138_v37, %v12527_v56  ;;  %v12542_v30 = vor.u32 %v14145_v35, %v12541_v55 }
 0x63d   : > { %v7218_v57 = vadd.f32 %v7217_v36, %v6889_v17  ;;  %v12538_v17 = vor.u32 %v14139_v32, %v12535_v23  ;;  %v12577_v32 = vld [vmem:[%s15291_s13 + $0x1090] sm:$0xf]  ;;  %v14155_v23 = vld [vmem:[%s15291_s13 + $0x10b8] sm:$0xf0] }
 0x63f   : > { %v16802_v1 = vadd.f32 %v7546_v19, %v7218_v57 }
 0x640   : > { %v6561_v50 = vpop.f32.mrf.mxu3 }
 0x641   : > { %v6562_v13 = vadd.f32 %v6561_v50, %v16079_v22  ;;  %v14150_v50 = vld [vmem:[%s15291_s13 + $0x1094] sm:$0xf] }
 0x642   : > { %v7548_v52 = vpop.f32.mrf.mxu2  ;;  %v6893_v36 = vpop.f32.mrf.mxu0 }
 0x643   : > { %v6891_v59 = vadd.f32 %v6890_v54, %v6562_v13  ;;  %v7222_v19 = vpop.f32.mrf.mxu1  ;;  %v12579_v13 = vld [vmem:[%s15291_s13 + $0x10bc] sm:$0xf0] }
 0x645   : > { %v7220_v57 = vadd.f32 %v7219_v60, %v6891_v59  ;;  %6603 = vmatmul.bf16.gmra.mxu3 %v12530_v42  ;;  %6932 = vmatmul.bf16.gmra.mxu0 %v12534_v21  ;;  %v14149_v59 = vld [vmem:[%s15291_s13 + $0x108c] sm:$0xf]  ;;  %v12571_v60 = vld [vmem:[%s15291_s13 + $0x10b4] sm:$0xf0] }
 0x646   : > { %7261 = vmatmul.bf16.gmra.mxu1 %v12538_v17 }
 0x647   : > { %7590 = vmatmul.bf16.gmra.mxu2 %v12542_v30  ;;  %v16805_v22 = vadd.f32 %v7548_v52, %v7220_v57  ;;  %v12578_v30 = vor.u32 %v14155_v23, %v12577_v32  ;;  %v12582_v57 = vor.u32 %v14150_v50, %v12579_v13  ;;  %v12615_v23 = vld [vmem:[%s15291_s13 + $0x110c] sm:$0xf0] }
 0x648   : > { %v6564_v37 = vpop.f32.mrf.mxu3  ;;  %v12629_v50 = vld [vmem:[%s15291_s13 + $0x10f0] sm:$0xf] }
 0x649   : > { %v6565_v56 = vadd.f32 %v6564_v37, %v16085_v11  ;;  %v12574_v11 = vor.u32 %v14149_v59, %v12571_v60 }
 0x64a   : > { %v7551_v39 = vpop.f32.mrf.mxu2  ;;  %v6895_v54 = vpop.f32.mrf.mxu0 }
 0x64b   : > { %v6894_v18 = vadd.f32 %v6893_v36, %v6565_v56  ;;  %v7224_v55 = vpop.f32.mrf.mxu1  ;;  %v12586_v36 = vor.u32 %v14156_v8, %v12585_v7  ;;  %v12621_v7 = vld [vmem:[%s15291_s13 + $0x10e8] sm:$0xf]  ;;  %v14166_v8 = vld [vmem:[%s15291_s13 + $0x1110] sm:$0xf0] }
 0x64d   : > { %v7223_v35 = vadd.f32 %v7222_v19, %v6894_v18 }
 0x64f   : > { %v16813_v53 = vadd.f32 %v7551_v39, %v7223_v35 }
 0x650   : > { %v6566_v52 = vpop.f32.mrf.mxu3 }
 0x651   : > { %v6567_v42 = vadd.f32 %v6566_v52, %v16099_v12  ;;  %v14167_v52 = vld [vmem:[%s15291_s13 + $0x1118] sm:$0xf0] }
 0x652   : > { %v7553_v21 = vpop.f32.mrf.mxu2  ;;  %v6898_v17 = vpop.f32.mrf.mxu0 }
 0x653   : > { %v6896_v19 = vadd.f32 %v6895_v54, %v6567_v42  ;;  %v7227_v37 = vpop.f32.mrf.mxu1  ;;  %v14161_v42 = vld [vmem:[%s15291_s13 + $0x10ec] sm:$0xf] }
 0x655   : > { %v7225_v56 = vadd.f32 %v7224_v55, %v6896_v19  ;;  %6608 = vmatmul.bf16.gmra.mxu3 %v12574_v11  ;;  %6937 = vmatmul.bf16.gmra.mxu0 %v12578_v30  ;;  %v14160_v55 = vld [vmem:[%s15291_s13 + $0x10e4] sm:$0xf] }
 0x656   : > { %7266 = vmatmul.bf16.gmra.mxu1 %v12582_v57  ;;  %v12622_v57 = vor.u32 %v14166_v8, %v12621_v7  ;;  %v12659_v8 = vld [vmem:[%s15291_s13 + $0x1164] sm:$0xf0] }
 0x657   : > { %7595 = vmatmul.bf16.gmra.mxu2 %v12586_v36  ;;  %v16819_v12 = vadd.f32 %v7553_v21, %v7225_v56  ;;  %v12623_v21 = vld [vmem:[%s15291_s13 + $0x1114] sm:$0xf0] }
 0x658   : > { %v6569_v39 = vpop.f32.mrf.mxu3  ;;  %v12626_v56 = vor.u32 %v14161_v42, %v12623_v21  ;;  %v12673_v42 = vld [vmem:[%s15291_s13 + $0x1148] sm:$0xf] }
 0x659   : > { %v6570_v18 = vadd.f32 %v6569_v39, %v16105_v5  ;;  %v12618_v5 = vor.u32 %v14160_v55, %v12615_v23 }
 0x65a   : > { %v7556_v35 = vpop.f32.mrf.mxu2  ;;  %v6900_v54 = vpop.f32.mrf.mxu0 }
 0x65b   : > { %v6899_v59 = vadd.f32 %v6898_v17, %v6570_v18  ;;  %v7229_v60 = vpop.f32.mrf.mxu1  ;;  %v12630_v17 = vor.u32 %v14167_v52, %v12629_v50  ;;  %v12665_v50 = vld [vmem:[%s15291_s13 + $0x1140] sm:$0xf]  ;;  %v14177_v52 = vld [vmem:[%s15291_s13 + $0x1168] sm:$0xf0] }
 0x65d   : > { %v7228_v32 = vadd.f32 %v7227_v37, %v6899_v59 }
 0x65f   : > { %v16827_v13 = vadd.f32 %v7556_v35, %v7228_v32 }
 0x660   : > { %v6571_v11 = vpop.f32.mrf.mxu3 }
 0x661   : > { %v6572_v30 = vadd.f32 %v6571_v11, %v16119_v43  ;;  %v14178_v11 = vld [vmem:[%s15291_s13 + $0x1170] sm:$0xf0] }
 0x662   : > { %v7558_v36 = vpop.f32.mrf.mxu2  ;;  %v6903_v19 = vpop.f32.mrf.mxu0 }
 0x663   : > { %v6901_v37 = vadd.f32 %v6900_v54, %v6572_v30  ;;  %v7232_v39 = vpop.f32.mrf.mxu1  ;;  %v14172_v30 = vld [vmem:[%s15291_s13 + $0x1144] sm:$0xf] }
 0x665   : > { %v7230_v18 = vadd.f32 %v7229_v60, %v6901_v37  ;;  %6613 = vmatmul.bf16.gmra.mxu3 %v12618_v5  ;;  %6942 = vmatmul.bf16.gmra.mxu0 %v12622_v57  ;;  %v14171_v60 = vld [vmem:[%s15291_s13 + $0x113c] sm:$0xf] }
 0x666   : > { %7271 = vmatmul.bf16.gmra.mxu1 %v12626_v56  ;;  %v12666_v56 = vor.u32 %v14177_v52, %v12665_v50  ;;  %v12703_v52 = vld [vmem:[%s15291_s13 + $0x11bc] sm:$0xf0] }
 0x667   : > { %7600 = vmatmul.bf16.gmra.mxu2 %v12630_v17  ;;  %v16833_v43 = vadd.f32 %v7558_v36, %v7230_v18  ;;  %v12667_v36 = vld [vmem:[%s15291_s13 + $0x116c] sm:$0xf0] }
 0x668   : > { %v6574_v35 = vpop.f32.mrf.mxu3  ;;  %v12670_v18 = vor.u32 %v14172_v30, %v12667_v36  ;;  %v12717_v30 = vld [vmem:[%s15291_s13 + $0x11a0] sm:$0xf] }
 0x669   : > { %v6575_v59 = vadd.f32 %v6574_v35, %v16125_v29  ;;  %v12662_v29 = vor.u32 %v14171_v60, %v12659_v8 }
 0x66a   : > { %v7561_v32 = vpop.f32.mrf.mxu2  ;;  %v6905_v54 = vpop.f32.mrf.mxu0 }
 0x66b   : > { %v6904_v55 = vadd.f32 %v6903_v19, %v6575_v59  ;;  %v7234_v23 = vpop.f32.mrf.mxu1  ;;  %v12674_v19 = vor.u32 %v14178_v11, %v12673_v42  ;;  %v12709_v42 = vld [vmem:[%s15291_s13 + $0x1198] sm:$0xf]  ;;  %v14188_v11 = vld [vmem:[%s15291_s13 + $0x11c0] sm:$0xf0] }
 0x66d   : > { %v7233_v7 = vadd.f32 %v7232_v39, %v6904_v55 }
 0x66f   : > { %v16841_v21 = vadd.f32 %v7561_v32, %v7233_v7 }
 0x670   : > { %v6576_v5 = vpop.f32.mrf.mxu3 }
 0x671   : > { %v6577_v57 = vadd.f32 %v6576_v5, %v16139_v48  ;;  %v14189_v5 = vld [vmem:[%s15291_s13 + $0x11c8] sm:$0xf0] }
 0x672   : > { %v7563_v17 = vpop.f32.mrf.mxu2  ;;  %v6908_v37 = vpop.f32.mrf.mxu0 }
 0x673   : > { %v6906_v39 = vadd.f32 %v6905_v54, %v6577_v57  ;;  %v7237_v35 = vpop.f32.mrf.mxu1  ;;  %v14183_v57 = vld [vmem:[%s15291_s13 + $0x119c] sm:$0xf] }
 0x675   : > { %v7235_v59 = vadd.f32 %v7234_v23, %v6906_v39  ;;  %6618 = vmatmul.bf16.gmra.mxu3 %v12662_v29  ;;  %6947 = vmatmul.bf16.gmra.mxu0 %v12666_v56  ;;  %v14182_v23 = vld [vmem:[%s15291_s13 + $0x1194] sm:$0xf] }
 0x676   : > { %7276 = vmatmul.bf16.gmra.mxu1 %v12670_v18  ;;  %v12710_v18 = vor.u32 %v14188_v11, %v12709_v42  ;;  %v12747_v11 = vld [vmem:[%s15291_s13 + $0x1214] sm:$0xf0] }
 0x677   : > { %7605 = vmatmul.bf16.gmra.mxu2 %v12674_v19  ;;  %v16847_v48 = vadd.f32 %v7563_v17, %v7235_v59  ;;  %v12711_v17 = vld [vmem:[%s15291_s13 + $0x11c4] sm:$0xf0] }
 0x678   : > { %v6579_v32 = vpop.f32.mrf.mxu3  ;;  %v12714_v59 = vor.u32 %v14183_v57, %v12711_v17  ;;  %v12761_v57 = vld [vmem:[%s15291_s13 + $0x11f8] sm:$0xf] }
 0x679   : > { %v6580_v55 = vadd.f32 %v6579_v32, %v16145_v2  ;;  %v12706_v2 = vor.u32 %v14182_v23, %v12703_v52 }
 0x67a   : > { %v7566_v7 = vpop.f32.mrf.mxu2  ;;  %v6910_v54 = vpop.f32.mrf.mxu0 }
 0x67b   : > { %v6909_v60 = vadd.f32 %v6908_v37, %v6580_v55  ;;  %v7239_v8 = vpop.f32.mrf.mxu1  ;;  %v12718_v37 = vor.u32 %v14189_v5, %v12717_v30  ;;  %v12753_v30 = vld [vmem:[%s15291_s13 + $0x11f0] sm:$0xf]  ;;  %v14199_v5 = vld [vmem:[%s15291_s13 + $0x1218] sm:$0xf0] }
 0x67d   : > { %v7238_v50 = vadd.f32 %v7237_v35, %v6909_v60 }
 0x67f   : > { %v16855_v36 = vadd.f32 %v7566_v7, %v7238_v50 }
 0x680   : > { %v6581_v29 = vpop.f32.mrf.mxu3 }
 0x681   : > { %v6582_v56 = vadd.f32 %v6581_v29, %v16159_v28  ;;  %v14200_v29 = vld [vmem:[%s15291_s13 + $0x1220] sm:$0xf0] }
 0x682   : > { %v7568_v19 = vpop.f32.mrf.mxu2  ;;  %v6913_v39 = vpop.f32.mrf.mxu0 }
 0x683   : > { %v6911_v35 = vadd.f32 %v6910_v54, %v6582_v56  ;;  %v7242_v32 = vpop.f32.mrf.mxu1  ;;  %v14194_v56 = vld [vmem:[%s15291_s13 + $0x11f4] sm:$0xf] }
 0x685   : > { %v7240_v55 = vadd.f32 %v7239_v8, %v6911_v35  ;;  %6623 = vmatmul.bf16.gmra.mxu3 %v12706_v2  ;;  %6952 = vmatmul.bf16.gmra.mxu0 %v12710_v18  ;;  %v14193_v8 = vld [vmem:[%s15291_s13 + $0x11ec] sm:$0xf] }
 0x686   : > { %7281 = vmatmul.bf16.gmra.mxu1 %v12714_v59  ;;  %v12754_v59 = vor.u32 %v14199_v5, %v12753_v30  ;;  %v12791_v5 = vld [vmem:[%s15291_s13 + $0x126c] sm:$0xf0] }
 0x687   : > { %7610 = vmatmul.bf16.gmra.mxu2 %v12718_v37  ;;  %v16861_v28 = vadd.f32 %v7568_v19, %v7240_v55  ;;  %v12755_v19 = vld [vmem:[%s15291_s13 + $0x121c] sm:$0xf0] }
 0x688   : > { %v6584_v7 = vpop.f32.mrf.mxu3  ;;  %v12758_v55 = vor.u32 %v14194_v56, %v12755_v19  ;;  %v12805_v56 = vld [vmem:[%s15291_s13 + $0x1250] sm:$0xf] }
 0x689   : > { %v6585_v60 = vadd.f32 %v6584_v7, %v16165_v25  ;;  %v12750_v25 = vor.u32 %v14193_v8, %v12747_v11 }
 0x68a   : > { %v7571_v50 = vpop.f32.mrf.mxu2  ;;  %v6915_v54 = vpop.f32.mrf.mxu0 }
 0x68b   : > { %v6914_v23 = vadd.f32 %v6913_v39, %v6585_v60  ;;  %v7244_v52 = vpop.f32.mrf.mxu1  ;;  %v12762_v39 = vor.u32 %v14200_v29, %v12761_v57  ;;  %v12797_v57 = vld [vmem:[%s15291_s13 + $0x1248] sm:$0xf]  ;;  %v14210_v29 = vld [vmem:[%s15291_s13 + $0x1270] sm:$0xf0] }
 0x68d   : > { %v7243_v42 = vadd.f32 %v7242_v32, %v6914_v23 }
 0x68f   : > { %v16869_v17 = vadd.f32 %v7571_v50, %v7243_v42 }
 0x690   : > { %v6586_v2 = vpop.f32.mrf.mxu3 }
 0x691   : > { %v6587_v18 = vadd.f32 %v6586_v2, %v16179_v0  ;;  %v14211_v2 = vld [vmem:[%s15291_s13 + $0x1278] sm:$0xf0] }
 0x692   : > { %v7573_v37 = vpop.f32.mrf.mxu2  ;;  %v6918_v35 = vpop.f32.mrf.mxu0 }
 0x693   : > { %v6916_v32 = vadd.f32 %v6915_v54, %v6587_v18  ;;  %v7247_v7 = vpop.f32.mrf.mxu1  ;;  %v14205_v18 = vld [vmem:[%s15291_s13 + $0x124c] sm:$0xf] }
 0x695   : > { %v7245_v60 = vadd.f32 %v7244_v52, %v6916_v32  ;;  %6628 = vmatmul.bf16.gmra.mxu3 %v12750_v25  ;;  %6957 = vmatmul.bf16.gmra.mxu0 %v12754_v59  ;;  %v14204_v52 = vld [vmem:[%s15291_s13 + $0x1244] sm:$0xf] }
 0x696   : > { %7286 = vmatmul.bf16.gmra.mxu1 %v12758_v55  ;;  %v12798_v55 = vor.u32 %v14210_v29, %v12797_v57  ;;  %v12835_v29 = vld [vmem:[%s15291_s13 + $0x12c4] sm:$0xf0] }
 0x697   : > { %7615 = vmatmul.bf16.gmra.mxu2 %v12762_v39  ;;  %v16875_v0 = vadd.f32 %v7573_v37, %v7245_v60  ;;  %v12799_v37 = vld [vmem:[%s15291_s13 + $0x1274] sm:$0xf0] }
 0x698   : > { %v6589_v50 = vpop.f32.mrf.mxu3  ;;  %v12802_v60 = vor.u32 %v14205_v18, %v12799_v37  ;;  %v12849_v18 = vld [vmem:[%s15291_s13 + $0x12a8] sm:$0xf] }
 0x699   : > { %v6590_v23 = vadd.f32 %v6589_v50, %v16185_v41  ;;  %v12794_v41 = vor.u32 %v14204_v52, %v12791_v5 }
 0x69a   : > { %v7576_v42 = vpop.f32.mrf.mxu2  ;;  %v6920_v54 = vpop.f32.mrf.mxu0 }
 0x69b   : > { %v6919_v8 = vadd.f32 %v6918_v35, %v6590_v23  ;;  %v7249_v11 = vpop.f32.mrf.mxu1  ;;  %v12806_v35 = vor.u32 %v14211_v2, %v12805_v56  ;;  %v12841_v56 = vld [vmem:[%s15291_s13 + $0x12a0] sm:$0xf]  ;;  %v14221_v2 = vld [vmem:[%s15291_s13 + $0x12c8] sm:$0xf0] }
 0x69d   : > { %v7248_v30 = vadd.f32 %v7247_v7, %v6919_v8 }
 0x69f   : > { %v16883_v19 = vadd.f32 %v7576_v42, %v7248_v30 }
 0x6a0   : > { %v6591_v25 = vpop.f32.mrf.mxu3 }
 0x6a1   : > { %v6592_v59 = vadd.f32 %v6591_v25, %v16199_v10  ;;  %v14222_v25 = vld [vmem:[%s15291_s13 + $0x12d0] sm:$0xf0] }
 0x6a2   : > { %v7578_v39 = vpop.f32.mrf.mxu2  ;;  %v6923_v32 = vpop.f32.mrf.mxu0 }
 0x6a3   : > { %v6921_v7 = vadd.f32 %v6920_v54, %v6592_v59  ;;  %v7252_v50 = vpop.f32.mrf.mxu1  ;;  %v14216_v59 = vld [vmem:[%s15291_s13 + $0x12a4] sm:$0xf] }
 0x6a5   : > { %v7250_v23 = vadd.f32 %v7249_v11, %v6921_v7  ;;  %6633 = vmatmul.bf16.gmra.mxu3 %v12794_v41  ;;  %6962 = vmatmul.bf16.gmra.mxu0 %v12798_v55  ;;  %v14215_v11 = vld [vmem:[%s15291_s13 + $0x129c] sm:$0xf] }
 0x6a6   : > { %7291 = vmatmul.bf16.gmra.mxu1 %v12802_v60  ;;  %v12842_v60 = vor.u32 %v14221_v2, %v12841_v56  ;;  %v14226_v56 = vld [vmem:[%s15291_s13 + $0x12f4] sm:$0xf]  ;;  %v12879_v2 = vld [vmem:[%s15291_s13 + $0x131c] sm:$0xf0] }
 0x6a7   : > { %7620 = vmatmul.bf16.gmra.mxu2 %v12806_v35  ;;  %v16889_v10 = vadd.f32 %v7578_v39, %v7250_v23  ;;  %v12843_v39 = vld [vmem:[%s15291_s13 + $0x12cc] sm:$0xf0] }
 0x6a8   : > { %v6594_v42 = vpop.f32.mrf.mxu3  ;;  %v12846_v23 = vor.u32 %v14216_v59, %v12843_v39  ;;  %v14232_v59 = vld [vmem:[%s15291_s13 + $0x1320] sm:$0xf0]  ;;  %v12893_v39 = vld [vmem:[%s15291_s13 + $0x1300] sm:$0xf] }
 0x6a9   : > { %v6595_v8 = vadd.f32 %v6594_v42, %v16205_v26  ;;  %v12838_v26 = vor.u32 %v14215_v11, %v12835_v29 }
 0x6aa   : > { %v7581_v30 = vpop.f32.mrf.mxu2  ;;  %v6925_v54 = vpop.f32.mrf.mxu0 }
 0x6ab   : > { %v6924_v52 = vadd.f32 %v6923_v32, %v6595_v8  ;;  %v7254_v5 = vpop.f32.mrf.mxu1  ;;  %v12850_v32 = vor.u32 %v14222_v25, %v12849_v18  ;;  %v12885_v25 = vld [vmem:[%s15291_s13 + $0x12f8] sm:$0xf] }
 0x6ad   : > { %v7253_v57 = vadd.f32 %v7252_v50, %v6924_v52 }
 0x6af   : > { %v16897_v37 = vadd.f32 %v7581_v30, %v7253_v57  ;;  %v14380_v30 = vld [vmem:[#allocation6 + $0x1c0] sm:$0xff] }
 0x6b0   : > { %v6596_v41 = vpop.f32.mrf.mxu3  ;;  %7683 = vmatpush.bf16.msra.mxu3 %v14380_v30  ;;  %v12886_v30 = vor.u32 %v14232_v59, %v12885_v25 }
 0x6b1   : > { %v6597_v55 = vadd.f32 %v6596_v41, %v16219_v14  ;;  %v14233_v41 = vld [vmem:[%s15291_s13 + $0x1328] sm:$0xf0] }
 0x6b2   : > { %v7583_v35 = vpop.f32.mrf.mxu2  ;;  %v6928_v7 = vpop.f32.mrf.mxu0 }
 0x6b3   : > { %v6926_v50 = vadd.f32 %v6925_v54, %v6597_v55  ;;  %v7257_v42 = vpop.f32.mrf.mxu1  ;;  %v14227_v55 = vld [vmem:[%s15291_s13 + $0x12fc] sm:$0xf] }
 0x6b5   : > { %v7255_v8 = vadd.f32 %v7254_v5, %v6926_v50  ;;  %6638 = vmatmul.bf16.gmra.mxu3 %v12838_v26  ;;  %6967 = vmatmul.bf16.gmra.mxu0 %v12842_v60  ;;  %v14404_v60 = vld [vmem:[#allocation6 + $0x280] sm:$0xff] }
 0x6b6   : > { %7296 = vmatmul.bf16.gmra.mxu1 %v12846_v23  ;;  %v14396_v23 = vld [vmem:[#allocation6 + $0x240] sm:$0xff]  ;;  %8670 = vmatpush.bf16.msra.mxu2 %v14404_v60  ;;  %v14243_v60 = vld [vmem:[%s15291_s13 + $0x1378] sm:$0xf0] }
 0x6b7   : > { %7625 = vmatmul.bf16.gmra.mxu2 %v12850_v32  ;;  %v16903_v14 = vadd.f32 %v7583_v35, %v7255_v8  ;;  %v12887_v35 = vld [vmem:[%s15291_s13 + $0x1324] sm:$0xf0]  ;;  %v14388_v32 = vld [vmem:[#allocation6 + $0x200] sm:$0xff]  ;;  %8341 = vmatpush.bf16.msra.mxu1 %v14396_v23 }
 0x6b8   : > { %v6599_v52 = vpop.f32.mrf.mxu3  ;;  %8012 = vmatpush.bf16.msra.mxu0 %v14388_v32  ;;  %v12937_v32 = vld [vmem:[%s15291_s13 + $0x1358] sm:$0xf] }
 0x6b9   : > { %v6600_v54 = vadd.f32 %v6599_v52, %v16225_v20  ;;  %v12894_v52 = vor.u32 %v14233_v41, %v12893_v39 }
 0x6ba   : > { %v7586_v57 = vpop.f32.mrf.mxu2  ;;  %v6930_v11 = vpop.f32.mrf.mxu0 }
 0x6bb   : > { %v6929_v5 = vadd.f32 %v6928_v7, %v6600_v54  ;;  %v7259_v29 = vpop.f32.mrf.mxu1  ;;  %v12882_v7 = vor.u32 %v14226_v56, %v12879_v2  ;;  %v12890_v54 = vor.u32 %v14227_v55, %v12887_v35  ;;  %v12923_v55 = vld [vmem:[%s15291_s13 + $0x1374] sm:$0xf0]  ;;  %v12929_v35 = vld [vmem:[%s15291_s13 + $0x1350] sm:$0xf] }
 0x6bd   : > { %v7258_v18 = vadd.f32 %v7257_v42, %v6929_v5 }
 0x6bf   : > { %v16914_v26 = vadd.f32 %v7586_v57, %v7258_v18 }
 0x6c0   : > { %v6601_v20 = vpop.f32.mrf.mxu3 }
 0x6c1   : > { %v6602_v50 = vadd.f32 %v6601_v20, %v16239_v16  ;;  %v14244_v20 = vld [vmem:[%s15291_s13 + $0x1380] sm:$0xf0] }
 0x6c2   : > { %v7588_v8 = vpop.f32.mrf.mxu2  ;;  %v6933_v42 = vpop.f32.mrf.mxu0 }
 0x6c3   : > { %v6931_v5 = vadd.f32 %v6930_v11, %v6602_v50  ;;  %v7262_v57 = vpop.f32.mrf.mxu1  ;;  %v14238_v50 = vld [vmem:[%s15291_s13 + $0x1354] sm:$0xf] }
 0x6c5   : > { %v7260_v18 = vadd.f32 %v7259_v29, %v6931_v5  ;;  %6643 = vmatmul.bf16.gmra.mxu3 %v12882_v7  ;;  %6972 = vmatmul.bf16.gmra.mxu0 %v12886_v30  ;;  %v14237_v29 = vld [vmem:[%s15291_s13 + $0x134c] sm:$0xf] }
 0x6c6   : > { %7301 = vmatmul.bf16.gmra.mxu1 %v12890_v54  ;;  %v12930_v54 = vor.u32 %v14243_v60, %v12929_v35 }
 0x6c7   : > { %7630 = vmatmul.bf16.gmra.mxu2 %v12894_v52  ;;  %v16917_v16 = vadd.f32 %v7588_v8, %v7260_v18  ;;  %v12931_v8 = vld [vmem:[%s15291_s13 + $0x137c] sm:$0xf0] }
 0x6c8   : > { %v6604_v56 = vpop.f32.mrf.mxu3  ;;  %v12934_v18 = vor.u32 %v14238_v50, %v12931_v8  ;;  %v14254_v50 = vld [vmem:[%s15291_s13 + $0x13d0] sm:$0xf0]  ;;  %v12981_v8 = vld [vmem:[%s15291_s13 + $0x13b0] sm:$0xf] }
 0x6c9   : > { %v6605_v2 = vadd.f32 %v6604_v56, %v16245_v49  ;;  %v12926_v49 = vor.u32 %v14237_v29, %v12923_v55 }
 0x6ca   : > { %v7591_v25 = vpop.f32.mrf.mxu2  ;;  %v6935_v11 = vpop.f32.mrf.mxu0 }
 0x6cb   : > { %v6934_v59 = vadd.f32 %v6933_v42, %v6605_v2  ;;  %v7264_v39 = vpop.f32.mrf.mxu1  ;;  %v12938_v42 = vor.u32 %v14244_v20, %v12937_v32  ;;  %v12967_v32 = vld [vmem:[%s15291_s13 + $0x13cc] sm:$0xf0]  ;;  %v12973_v20 = vld [vmem:[%s15291_s13 + $0x13a8] sm:$0xf] }
 0x6cd   : > { %v7263_v41 = vadd.f32 %v7262_v57, %v6934_v59  ;;  %v18377_v59 = vld [vmem:[#allocation99_spill] sm:$0xff] }
 0x6cf   : > { %v16925_v23 = vadd.f32 %v7591_v25, %v7263_v41 }
 0x6d0   : > { %v6606_v7 = vpop.f32.mrf.mxu3 }
 0x6d1   : > { %v6607_v30 = vadd.f32 %v6606_v7, %v16259_v24 }
 0x6d2   : > { %v7593_v52 = vpop.f32.mrf.mxu2  ;;  %v6938_v5 = vpop.f32.mrf.mxu0 }
 0x6d3   : > { %v6936_v57 = vadd.f32 %v6935_v11, %v6607_v30  ;;  %v7267_v56 = vpop.f32.mrf.mxu1  ;;  %v14255_v30 = vld [vmem:[%s15291_s13 + $0x13d8] sm:$0xf0] }
 0x6d5   : > { %v7265_v2 = vadd.f32 %v7264_v39, %v6936_v57  ;;  %6648 = vmatmul.bf16.gmra.mxu3 %v12926_v49  ;;  %6977 = vmatmul.bf16.gmra.mxu0 %v12930_v54  ;;  %v14248_v39 = vld [vmem:[%s15291_s13 + $0x13a4] sm:$0xf]  ;;  %v14249_v49 = vld [vmem:[%s15291_s13 + $0x13ac] sm:$0xf] }
 0x6d6   : > { %7306 = vmatmul.bf16.gmra.mxu1 %v12934_v18  ;;  %v12970_v57 = vor.u32 %v14248_v39, %v12967_v32 }
 0x6d7   : > { %7635 = vmatmul.bf16.gmra.mxu2 %v12938_v42  ;;  %v16931_v24 = vadd.f32 %v7593_v52, %v7265_v2  ;;  %v12975_v52 = vld [vmem:[%s15291_s13 + $0x13d4] sm:$0xf0]  ;;  %v12974_v2 = vor.u32 %v14254_v50, %v12973_v20 }
 0x6d8   : > { %v6609_v25 = vpop.f32.mrf.mxu3 }
 0x6d9   : > { %v6610_v41 = vadd.f32 %v6609_v25, %v18377_v59  ;;  %v12978_v59 = vor.u32 %v14249_v49, %v12975_v52  ;;  %v14265_v49 = vld [vmem:[%s15291_s13 + $0x1428] sm:$0xf0]  ;;  %v13025_v52 = vld [vmem:[%s15291_s13 + $0x1408] sm:$0xf] }
 0x6da   : > { %v7596_v29 = vpop.f32.mrf.mxu2  ;;  %v6940_v11 = vpop.f32.mrf.mxu0 }
 0x6db   : > { %v6939_v55 = vadd.f32 %v6938_v5, %v6610_v41  ;;  %v7269_v35 = vpop.f32.mrf.mxu1  ;;  %v12982_v5 = vor.u32 %v14255_v30, %v12981_v8  ;;  %v13011_v8 = vld [vmem:[%s15291_s13 + $0x1424] sm:$0xf0]  ;;  %v13017_v30 = vld [vmem:[%s15291_s13 + $0x1400] sm:$0xf] }
 0x6dd   : > { %v7268_v60 = vadd.f32 %v7267_v56, %v6939_v55 }
 0x6df   : > { %v16939_v7 = vadd.f32 %v7596_v29, %v7268_v60 }
 0x6e0   : > { %v6611_v54 = vpop.f32.mrf.mxu3 }
 0x6e1   : > { %18378 = vst [vmem:[#allocation81_spill] sm:$0xff] %v16939_v7  ;;  %v6612_v42 = vadd.f32 %v6611_v54, %v15957_v40 }
 0x6e2   : > { %v7598_v18 = vpop.f32.mrf.mxu2  ;;  %v6943_v25 = vpop.f32.mrf.mxu0 }
 0x6e3   : > { %v6941_v56 = vadd.f32 %v6940_v11, %v6612_v42  ;;  %v7272_v41 = vpop.f32.mrf.mxu1  ;;  %v14266_v42 = vld [vmem:[%s15291_s13 + $0x1430] sm:$0xf0] }
 0x6e5   : > { %v7270_v55 = vadd.f32 %v7269_v35, %v6941_v56  ;;  %6653 = vmatmul.bf16.gmra.mxu3 %v12970_v57  ;;  %6982 = vmatmul.bf16.gmra.mxu0 %v12974_v2  ;;  %v14259_v35 = vld [vmem:[%s15291_s13 + $0x13fc] sm:$0xf]  ;;  %v14260_v57 = vld [vmem:[%s15291_s13 + $0x1404] sm:$0xf]  ;;  %v13018_v56 = vor.u32 %v14265_v49, %v13017_v30 }
 0x6e6   : > { %7311 = vmatmul.bf16.gmra.mxu1 %v12978_v59 }
 0x6e7   : > { %7640 = vmatmul.bf16.gmra.mxu2 %v12982_v5  ;;  %v16945_v40 = vadd.f32 %v7598_v18, %v7270_v55  ;;  %v13019_v18 = vld [vmem:[%s15291_s13 + $0x142c] sm:$0xf0] }
 0x6e8   : > { %v6614_v29 = vpop.f32.mrf.mxu3 }
 0x6e9   : > { %18379 = vst [vmem:[#allocation83_spill] sm:$0xff] %v16945_v40  ;;  %v6615_v60 = vadd.f32 %v6614_v29, %v15963_v33  ;;  %v13014_v33 = vor.u32 %v14259_v35, %v13011_v8  ;;  %v13022_v29 = vor.u32 %v14260_v57, %v13019_v18  ;;  %v14276_v57 = vld [vmem:[%s15291_s13 + $0x1480] sm:$0xf0]  ;;  %v13069_v18 = vld [vmem:[%s15291_s13 + $0x1460] sm:$0xf] }
 0x6ea   : > { %v7601_v39 = vpop.f32.mrf.mxu2  ;;  %v6945_v11 = vpop.f32.mrf.mxu0 }
 0x6eb   : > { %v6944_v32 = vadd.f32 %v6943_v25, %v6615_v60  ;;  %v7274_v20 = vpop.f32.mrf.mxu1  ;;  %v13026_v25 = vor.u32 %v14266_v42, %v13025_v52  ;;  %v13055_v52 = vld [vmem:[%s15291_s13 + $0x147c] sm:$0xf0]  ;;  %v13061_v42 = vld [vmem:[%s15291_s13 + $0x1458] sm:$0xf] }
 0x6ed   : > { %v7273_v50 = vadd.f32 %v7272_v41, %v6944_v32 }
 0x6ef   : > { %v16953_v54 = vadd.f32 %v7601_v39, %v7273_v50 }
 0x6f0   : > { %v6616_v2 = vpop.f32.mrf.mxu3 }
 0x6f1   : > { %18380 = vst [vmem:[#allocation85_spill] sm:$0xff] %v16953_v54  ;;  %v6617_v5 = vadd.f32 %v6616_v2, %v15977_v45 }
 0x6f2   : > { %v7603_v59 = vpop.f32.mrf.mxu2  ;;  %v6948_v55 = vpop.f32.mrf.mxu0 }
 0x6f3   : > { %v6946_v41 = vadd.f32 %v6945_v11, %v6617_v5  ;;  %v7277_v60 = vpop.f32.mrf.mxu1  ;;  %v14277_v5 = vld [vmem:[%s15291_s13 + $0x1488] sm:$0xf0] }
 0x6f5   : > { %v7275_v32 = vadd.f32 %v7274_v20, %v6946_v41  ;;  %6658 = vmatmul.bf16.gmra.mxu3 %v13014_v33  ;;  %6987 = vmatmul.bf16.gmra.mxu0 %v13018_v56  ;;  %v14270_v20 = vld [vmem:[%s15291_s13 + $0x1454] sm:$0xf]  ;;  %v14271_v33 = vld [vmem:[%s15291_s13 + $0x145c] sm:$0xf]  ;;  %v13062_v41 = vor.u32 %v14276_v57, %v13061_v42 }
 0x6f6   : > { %7316 = vmatmul.bf16.gmra.mxu1 %v13022_v29 }
 0x6f7   : > { %7645 = vmatmul.bf16.gmra.mxu2 %v13026_v25  ;;  %v16959_v45 = vadd.f32 %v7603_v59, %v7275_v32  ;;  %v13063_v59 = vld [vmem:[%s15291_s13 + $0x1484] sm:$0xf0] }
 0x6f8   : > { %v6619_v39 = vpop.f32.mrf.mxu3 }
 0x6f9   : > { %18381 = vst [vmem:[#allocation87_spill] sm:$0xff] %v16959_v45  ;;  %v6620_v50 = vadd.f32 %v6619_v39, %v15983_v6  ;;  %v13058_v6 = vor.u32 %v14270_v20, %v13055_v52  ;;  %v13066_v39 = vor.u32 %v14271_v33, %v13063_v59  ;;  %v14287_v33 = vld [vmem:[%s15291_s13 + $0x14d8] sm:$0xf0]  ;;  %v13113_v59 = vld [vmem:[%s15291_s13 + $0x14b8] sm:$0xf] }
 0x6fa   : > { %v7606_v35 = vpop.f32.mrf.mxu2  ;;  %v6950_v11 = vpop.f32.mrf.mxu0 }
 0x6fb   : > { %v6949_v8 = vadd.f32 %v6948_v55, %v6620_v50  ;;  %v7279_v30 = vpop.f32.mrf.mxu1  ;;  %v13070_v55 = vor.u32 %v14277_v5, %v13069_v18  ;;  %v13099_v18 = vld [vmem:[%s15291_s13 + $0x14d4] sm:$0xf0]  ;;  %v13105_v5 = vld [vmem:[%s15291_s13 + $0x14b0] sm:$0xf] }
 0x6fd   : > { %v7278_v49 = vadd.f32 %v7277_v60, %v6949_v8 }
 0x6ff   : > { %v16967_v2 = vadd.f32 %v7606_v35, %v7278_v49 }
 0x700   : > { %v6621_v56 = vpop.f32.mrf.mxu3 }
 0x701   : > { %18382 = vst [vmem:[#allocation89_spill] sm:$0xff] %v16967_v2  ;;  %v6622_v25 = vadd.f32 %v6621_v56, %v15997_v3  ;;  %v17170_v2 = vld [vmem:[#allocation9] ss:$0 sm:$0xff] }
 0x702   : > { %v7608_v29 = vpop.f32.mrf.mxu2  ;;  %v6953_v32 = vpop.f32.mrf.mxu0 }
 0x703   : > { %v6951_v60 = vadd.f32 %v6950_v11, %v6622_v25  ;;  %v7282_v50 = vpop.f32.mrf.mxu1  ;;  %v14288_v25 = vld [vmem:[%s15291_s13 + $0x14e0] sm:$0xf0] }
 0x705   : > { %v7280_v8 = vadd.f32 %v7279_v30, %v6951_v60  ;;  %6663 = vmatmul.bf16.gmra.mxu3 %v13058_v6  ;;  %6992 = vmatmul.bf16.gmra.mxu0 %v13062_v41  ;;  %v14281_v30 = vld [vmem:[%s15291_s13 + $0x14ac] sm:$0xf]  ;;  %v14282_v6 = vld [vmem:[%s15291_s13 + $0x14b4] sm:$0xf]  ;;  %v13106_v60 = vor.u32 %v14287_v33, %v13105_v5 }
 0x706   : > { %7321 = vmatmul.bf16.gmra.mxu1 %v13066_v39 }
 0x707   : > { %7650 = vmatmul.bf16.gmra.mxu2 %v13070_v55  ;;  %v16973_v3 = vadd.f32 %v7608_v29, %v7280_v8  ;;  %v13107_v29 = vld [vmem:[%s15291_s13 + $0x14dc] sm:$0xf0] }
 0x708   : > { %v6624_v35 = vpop.f32.mrf.mxu3 }
 0x709   : > { %18383 = vst [vmem:[#allocation91_spill] sm:$0xff] %v16973_v3  ;;  %v6625_v49 = vadd.f32 %v6624_v35, %v16003_v63  ;;  %v13102_v63 = vor.u32 %v14281_v30, %v13099_v18  ;;  %v13110_v35 = vor.u32 %v14282_v6, %v13107_v29  ;;  %v13149_v6 = vld [vmem:[%s15291_s13 + $0x1508] sm:$0xf]  ;;  %v14298_v29 = vld [vmem:[%s15291_s13 + $0x1530] sm:$0xf0] }
 0x70a   : > { %v7611_v20 = vpop.f32.mrf.mxu2  ;;  %v6955_v11 = vpop.f32.mrf.mxu0 }
 0x70b   : > { %v6954_v52 = vadd.f32 %v6953_v32, %v6625_v49  ;;  %v7284_v42 = vpop.f32.mrf.mxu1  ;;  %v13114_v32 = vor.u32 %v14288_v25, %v13113_v59  ;;  %v13143_v25 = vld [vmem:[%s15291_s13 + $0x152c] sm:$0xf0] }
 0x70d   : > { %v7283_v57 = vadd.f32 %v7282_v50, %v6954_v52 }
 0x70f   : > { %v16981_v56 = vadd.f32 %v7611_v20, %v7283_v57  ;;  %v18386_v57 = vld [vmem:[#allocation101_spill] sm:$0xff] }
 0x710   : > { %v6626_v41 = vpop.f32.mrf.mxu3 }
 0x711   : > { %18384 = vst [vmem:[#allocation93_spill] sm:$0xff] %v16981_v56  ;;  %v6627_v55 = vadd.f32 %v6626_v41, %v16017_v15  ;;  %v13157_v41 = vld [vmem:[%s15291_s13 + $0x1510] sm:$0xf] }
 0x712   : > { %v7613_v39 = vpop.f32.mrf.mxu2  ;;  %v6958_v8 = vpop.f32.mrf.mxu0 }
 0x713   : > { %v6956_v50 = vadd.f32 %v6955_v11, %v6627_v55  ;;  %v7287_v49 = vpop.f32.mrf.mxu1 }
 0x715   : > { %v7285_v52 = vadd.f32 %v7284_v42, %v6956_v50  ;;  %6668 = vmatmul.bf16.gmra.mxu3 %v13102_v63  ;;  %6997 = vmatmul.bf16.gmra.mxu0 %v13106_v60  ;;  %v14292_v42 = vld [vmem:[%s15291_s13 + $0x1504] sm:$0xf]  ;;  %v14299_v63 = vld [vmem:[%s15291_s13 + $0x1538] sm:$0xf0]  ;;  %v14293_v60 = vld [vmem:[%s15291_s13 + $0x150c] sm:$0xf] }
 0x716   : > { %7326 = vmatmul.bf16.gmra.mxu1 %v13110_v35  ;;  %v18388_v35 = vld [vmem:[#allocation102_spill] sm:$0xff] }
 0x717   : > { %7655 = vmatmul.bf16.gmra.mxu2 %v13114_v32  ;;  %v16987_v15 = vadd.f32 %v7613_v39, %v7285_v52  ;;  %v13151_v39 = vld [vmem:[%s15291_s13 + $0x1534] sm:$0xf0] }
 0x718   : > { %v6629_v20 = vpop.f32.mrf.mxu3 }
 0x719   : > { %18385 = vst [vmem:[#allocation95_spill] sm:$0xff] %v16987_v15  ;;  %v6630_v30 = vadd.f32 %v6629_v20, %v18386_v57  ;;  %v13146_v20 = vor.u32 %v14292_v42, %v13143_v25  ;;  %v13150_v57 = vor.u32 %v14298_v29, %v13149_v6  ;;  %v18390_v42 = vld [vmem:[#allocation103_spill] sm:$0xff] }
 0x71a   : > { %v7616_v18 = vpop.f32.mrf.mxu2  ;;  %v6960_v11 = vpop.f32.mrf.mxu0 }
 0x71b   : > { %v6959_v5 = vadd.f32 %v6958_v8, %v6630_v30  ;;  %v7289_v33 = vpop.f32.mrf.mxu1  ;;  %v13158_v8 = vor.u32 %v14299_v63, %v13157_v41  ;;  %v13154_v30 = vor.u32 %v14293_v60, %v13151_v39  ;;  %v13187_v60 = vld [vmem:[%s15291_s13 + $0x1584] sm:$0xf0]  ;;  %v13193_v39 = vld [vmem:[%s15291_s13 + $0x1560] sm:$0xf] }
 0x71d   : > { %v7288_v59 = vadd.f32 %v7287_v49, %v6959_v5 }
 0x71f   : > { %v16995_v55 = vadd.f32 %v7616_v18, %v7288_v59 }
 0x720   : > { %v6631_v32 = vpop.f32.mrf.mxu3 }
 0x721   : > { %18387 = vst [vmem:[#allocation97_spill] sm:$0xff] %v16995_v55  ;;  %v6632_v50 = vadd.f32 %v6631_v32, %v18388_v35  ;;  %v14309_v32 = vld [vmem:[%s15291_s13 + $0x1588] sm:$0xf0]  ;;  %v13201_v35 = vld [vmem:[%s15291_s13 + $0x1568] sm:$0xf] }
 0x722   : > { %v7618_v52 = vpop.f32.mrf.mxu2  ;;  %v6963_v15 = vpop.f32.mrf.mxu0 }
 0x723   : > { %v6961_v49 = vadd.f32 %v6960_v11, %v6632_v50  ;;  %v7292_v5 = vpop.f32.mrf.mxu1 }
 0x725   : > { %v7290_v56 = vadd.f32 %v7289_v33, %v6961_v49  ;;  %6673 = vmatmul.bf16.gmra.mxu3 %v13146_v20  ;;  %7002 = vmatmul.bf16.gmra.mxu0 %v13150_v57  ;;  %v14303_v33 = vld [vmem:[%s15291_s13 + $0x155c] sm:$0xf]  ;;  %v14310_v20 = vld [vmem:[%s15291_s13 + $0x1590] sm:$0xf0]  ;;  %v14304_v57 = vld [vmem:[%s15291_s13 + $0x1564] sm:$0xf] }
 0x726   : > { %7331 = vmatmul.bf16.gmra.mxu1 %v13154_v30 }
 0x727   : > { %7660 = vmatmul.bf16.gmra.mxu2 %v13158_v8  ;;  %v17001_v18 = vadd.f32 %v7618_v52, %v7290_v56  ;;  %v13195_v56 = vld [vmem:[%s15291_s13 + $0x158c] sm:$0xf0]  ;;  %v18392_v8 = vld [vmem:[#allocation104_spill] sm:$0xff] }
 0x728   : > { %v6634_v59 = vpop.f32.mrf.mxu3 }
 0x729   : > { %18389 = vst [vmem:[#allocation98_spill] sm:$0xff] %v17001_v18  ;;  %v6635_v25 = vadd.f32 %v6634_v59, %v18390_v42  ;;  %v13190_v59 = vor.u32 %v14303_v33, %v13187_v60  ;;  %v13194_v42 = vor.u32 %v14309_v32, %v13193_v39  ;;  %v18394_v33 = vld [vmem:[#allocation105_spill] sm:$0xff] }
 0x72a   : > { %v7621_v6 = vpop.f32.mrf.mxu2  ;;  %v6965_v11 = vpop.f32.mrf.mxu0 }
 0x72b   : > { %v6964_v29 = vadd.f32 %v6963_v15, %v6635_v25  ;;  %v7294_v41 = vpop.f32.mrf.mxu1  ;;  %v13202_v15 = vor.u32 %v14310_v20, %v13201_v35  ;;  %v13198_v25 = vor.u32 %v14304_v57, %v13195_v56  ;;  %v13231_v57 = vld [vmem:[%s15291_s13 + $0x15dc] sm:$0xf0]  ;;  %v13237_v56 = vld [vmem:[%s15291_s13 + $0x15b8] sm:$0xf] }
 0x72d   : > { %v7293_v63 = vadd.f32 %v7292_v5, %v6964_v29 }
 0x72f   : > { %v17009_v50 = vadd.f32 %v7621_v6, %v7293_v63 }
 0x730   : > { %v6636_v52 = vpop.f32.mrf.mxu3 }
 0x731   : > { %18391 = vst [vmem:[#allocation100_spill] sm:$0xff] %v17009_v50  ;;  %v6637_v30 = vadd.f32 %v6636_v52, %v18392_v8  ;;  %v14320_v52 = vld [vmem:[%s15291_s13 + $0x15e0] sm:$0xf0]  ;;  %v13245_v8 = vld [vmem:[%s15291_s13 + $0x15c0] sm:$0xf] }
 0x732   : > { %v7623_v49 = vpop.f32.mrf.mxu2  ;;  %v6968_v18 = vpop.f32.mrf.mxu0 }
 0x733   : > { %v6966_v5 = vadd.f32 %v6965_v11, %v6637_v30  ;;  %v7297_v29 = vpop.f32.mrf.mxu1 }
 0x735   : > { %v7295_v55 = vadd.f32 %v7294_v41, %v6966_v5  ;;  %6678 = vmatmul.bf16.gmra.mxu3 %v13190_v59  ;;  %7007 = vmatmul.bf16.gmra.mxu0 %v13194_v42  ;;  %v14314_v41 = vld [vmem:[%s15291_s13 + $0x15b4] sm:$0xf]  ;;  %v14321_v59 = vld [vmem:[%s15291_s13 + $0x15e8] sm:$0xf0]  ;;  %v14315_v42 = vld [vmem:[%s15291_s13 + $0x15bc] sm:$0xf] }
 0x736   : > { %7336 = vmatmul.bf16.gmra.mxu1 %v13198_v25 }
 0x737   : > { %7665 = vmatmul.bf16.gmra.mxu2 %v13202_v15  ;;  %v17015_v6 = vadd.f32 %v7623_v49, %v7295_v55  ;;  %v13239_v55 = vld [vmem:[%s15291_s13 + $0x15e4] sm:$0xf0]  ;;  %v18396_v15 = vld [vmem:[#allocation106_spill] sm:$0xff] }
 0x738   : > { %v6639_v63 = vpop.f32.mrf.mxu3 }
 0x739   : > { %18393 = vst [vmem:[#allocation99_spill] sm:$0xff] %v17015_v6  ;;  %v6640_v60 = vadd.f32 %v6639_v63, %v18394_v33  ;;  %v13234_v63 = vor.u32 %v14314_v41, %v13231_v57  ;;  %v13238_v33 = vor.u32 %v14320_v52, %v13237_v56  ;;  %v18398_v41 = vld [vmem:[#allocation107_spill] sm:$0xff] }
 0x73a   : > { %v7626_v39 = vpop.f32.mrf.mxu2  ;;  %v6970_v11 = vpop.f32.mrf.mxu0 }
 0x73b   : > { %v6969_v32 = vadd.f32 %v6968_v18, %v6640_v60  ;;  %v7299_v35 = vpop.f32.mrf.mxu1  ;;  %v13246_v18 = vor.u32 %v14321_v59, %v13245_v8  ;;  %v13242_v60 = vor.u32 %v14315_v42, %v13239_v55  ;;  %v10475_v42 = vld [vmem:[%s15291_s13 + $0x44] sm:$0xf0]  ;;  %v10481_v55 = vld [vmem:[%s15291_s13 + $0x20] sm:$0xf] }
 0x73d   : > { %v7298_v20 = vadd.f32 %v7297_v29, %v6969_v32 }
 0x73f   : > { %v17023_v30 = vadd.f32 %v7626_v39, %v7298_v20 }
 0x740   : > { %v6641_v49 = vpop.f32.mrf.mxu3 }
 0x741   : > { %18395 = vst [vmem:[#allocation101_spill] sm:$0xff] %v17023_v30  ;;  %v6642_v25 = vadd.f32 %v6641_v49, %v18396_v15  ;;  %v13629_v49 = vld [vmem:[%s15291_s13 + $0x48] sm:$0xf0]  ;;  %v10489_v15 = vld [vmem:[%s15291_s13 + $0x28] sm:$0xf] }
 0x742   : > { %v7628_v5 = vpop.f32.mrf.mxu2  ;;  %v6973_v6 = vpop.f32.mrf.mxu0 }
 0x743   : > { %v6971_v29 = vadd.f32 %v6970_v11, %v6642_v25  ;;  %v7302_v32 = vpop.f32.mrf.mxu1 }
 0x745   : > { %v7300_v50 = vadd.f32 %v7299_v35, %v6971_v29  ;;  %6683 = vmatmul.bf16.gmra.mxu3 %v13234_v63  ;;  %7012 = vmatmul.bf16.gmra.mxu0 %v13238_v33  ;;  %v13623_v35 = vld [vmem:[%s15291_s13 + $0x1c] sm:$0xf]  ;;  %v13630_v63 = vld [vmem:[%s15291_s13 + $0x50] sm:$0xf0]  ;;  %v13624_v33 = vld [vmem:[%s15291_s13 + $0x24] sm:$0xf] }
 0x746   : > { %7341 = vmatmul.bf16.gmra.mxu1 %v13242_v60 }
 0x747   : > { %7670 = vmatmul.bf16.gmra.mxu2 %v13246_v18  ;;  %v17029_v39 = vadd.f32 %v7628_v5, %v7300_v50  ;;  %v10483_v50 = vld [vmem:[%s15291_s13 + $0x4c] sm:$0xf0]  ;;  %v18400_v18 = vld [vmem:[#allocation108_spill] sm:$0xff] }
 0x748   : > { %v6644_v20 = vpop.f32.mrf.mxu3 }
 0x749   : > { %18397 = vst [vmem:[#allocation102_spill] sm:$0xff] %v17029_v39  ;;  %v6645_v57 = vadd.f32 %v6644_v20, %v18398_v41  ;;  %v10478_v20 = vor.u32 %v13623_v35, %v10475_v42  ;;  %v10482_v41 = vor.u32 %v13629_v49, %v10481_v55  ;;  %v18402_v35 = vld [vmem:[#allocation109_spill] sm:$0xff] }
 0x74a   : > { %v7631_v56 = vpop.f32.mrf.mxu2  ;;  %v6975_v11 = vpop.f32.mrf.mxu0 }
 0x74b   : > { %v6974_v52 = vadd.f32 %v6973_v6, %v6645_v57  ;;  %v7304_v8 = vpop.f32.mrf.mxu1  ;;  %v10490_v6 = vor.u32 %v13630_v63, %v10489_v15  ;;  %v10486_v57 = vor.u32 %v13624_v33, %v10483_v50  ;;  %v10519_v33 = vld [vmem:[%s15291_s13 + $0x9c] sm:$0xf0]  ;;  %v10525_v50 = vld [vmem:[%s15291_s13 + $0x78] sm:$0xf] }
 0x74d   : > { %v7303_v59 = vadd.f32 %v7302_v32, %v6974_v52 }
 0x74f   : > { %v17037_v25 = vadd.f32 %v7631_v56, %v7303_v59 }
 0x750   : > { %v6646_v5 = vpop.f32.mrf.mxu3 }
 0x751   : > { %18399 = vst [vmem:[#allocation103_spill] sm:$0xff] %v17037_v25  ;;  %v6647_v60 = vadd.f32 %v6646_v5, %v18400_v18  ;;  %v13640_v5 = vld [vmem:[%s15291_s13 + $0xa0] sm:$0xf0]  ;;  %v10533_v18 = vld [vmem:[%s15291_s13 + $0x80] sm:$0xf] }
 0x752   : > { %v7633_v29 = vpop.f32.mrf.mxu2  ;;  %v6978_v39 = vpop.f32.mrf.mxu0 }
 0x753   : > { %v6976_v32 = vadd.f32 %v6975_v11, %v6647_v60  ;;  %v7307_v52 = vpop.f32.mrf.mxu1 }
 0x755   : > { %v7305_v30 = vadd.f32 %v7304_v8, %v6976_v32  ;;  %7684 = vmatmul.bf16.vlgmr.msra.gmra.mxu3 %v10478_v20  ;;  %8013 = vmatmul.bf16.vlgmr.msra.gmra.mxu0 %v10482_v41  ;;  %v13634_v8 = vld [vmem:[%s15291_s13 + $0x74] sm:$0xf]  ;;  %v13641_v20 = vld [vmem:[%s15291_s13 + $0xa8] sm:$0xf0]  ;;  %v13635_v41 = vld [vmem:[%s15291_s13 + $0x7c] sm:$0xf] }
 0x756   : > { %8342 = vmatmul.bf16.vlgmr.msra.gmra.mxu1 %v10486_v57 }
 0x757   : > { %8671 = vmatmul.bf16.vlgmr.msra.gmra.mxu2 %v10490_v6  ;;  %v17043_v56 = vadd.f32 %v7633_v29, %v7305_v30  ;;  %v10527_v30 = vld [vmem:[%s15291_s13 + $0xa4] sm:$0xf0]  ;;  %v18404_v6 = vld [vmem:[#allocation110_spill] sm:$0xff] }
 0x758   : > { %v6649_v59 = vpop.f32.mrf.mxu3 }
 0x759   : > { %18401 = vst [vmem:[#allocation104_spill] sm:$0xff] %v17043_v56  ;;  %v6650_v42 = vadd.f32 %v6649_v59, %v18402_v35  ;;  %v10522_v59 = vor.u32 %v13634_v8, %v10519_v33  ;;  %v10526_v35 = vor.u32 %v13640_v5, %v10525_v50  ;;  %v18406_v8 = vld [vmem:[#allocation111_spill] sm:$0xff] }
 0x75a   : > { %v7636_v55 = vpop.f32.mrf.mxu2  ;;  %v6980_v11 = vpop.f32.mrf.mxu0 }
 0x75b   : > { %v6979_v49 = vadd.f32 %v6978_v39, %v6650_v42  ;;  %v7309_v15 = vpop.f32.mrf.mxu1  ;;  %v10534_v39 = vor.u32 %v13641_v20, %v10533_v18  ;;  %v10530_v42 = vor.u32 %v13635_v41, %v10527_v30  ;;  %v10563_v41 = vld [vmem:[%s15291_s13 + $0xf4] sm:$0xf0]  ;;  %v10569_v30 = vld [vmem:[%s15291_s13 + $0xd0] sm:$0xf] }
 0x75d   : > { %v7308_v63 = vadd.f32 %v7307_v52, %v6979_v49 }
 0x75f   : > { %v17051_v60 = vadd.f32 %v7636_v55, %v7308_v63 }
 0x760   : > { %v6651_v29 = vpop.f32.mrf.mxu3 }
 0x761   : > { %18403 = vst [vmem:[#allocation105_spill] sm:$0xff] %v17051_v60  ;;  %v6652_v57 = vadd.f32 %v6651_v29, %v18404_v6  ;;  %v13651_v29 = vld [vmem:[%s15291_s13 + $0xf8] sm:$0xf0]  ;;  %v10577_v6 = vld [vmem:[%s15291_s13 + $0xd8] sm:$0xf] }
 0x762   : > { %v7638_v32 = vpop.f32.mrf.mxu2  ;;  %v6983_v56 = vpop.f32.mrf.mxu0 }
 0x763   : > { %v6981_v52 = vadd.f32 %v6980_v11, %v6652_v57  ;;  %v7312_v49 = vpop.f32.mrf.mxu1 }
 0x765   : > { %v7310_v25 = vadd.f32 %v7309_v15, %v6981_v52  ;;  %7689 = vmatmul.bf16.gmra.mxu3 %v10522_v59  ;;  %8018 = vmatmul.bf16.gmra.mxu0 %v10526_v35  ;;  %v13645_v15 = vld [vmem:[%s15291_s13 + $0xcc] sm:$0xf]  ;;  %v13652_v59 = vld [vmem:[%s15291_s13 + $0x100] sm:$0xf0]  ;;  %v13646_v35 = vld [vmem:[%s15291_s13 + $0xd4] sm:$0xf] }
 0x766   : > { %8347 = vmatmul.bf16.gmra.mxu1 %v10530_v42 }
 0x767   : > { %8676 = vmatmul.bf16.gmra.mxu2 %v10534_v39  ;;  %v17057_v55 = vadd.f32 %v7638_v32, %v7310_v25  ;;  %v10571_v25 = vld [vmem:[%s15291_s13 + $0xfc] sm:$0xf0]  ;;  %v18408_v39 = vld [vmem:[#allocation112_spill] sm:$0xff] }
 0x768   : > { %v6654_v63 = vpop.f32.mrf.mxu3 }
 0x769   : > { %18405 = vst [vmem:[#allocation106_spill] sm:$0xff] %v17057_v55  ;;  %v6655_v33 = vadd.f32 %v6654_v63, %v18406_v8  ;;  %v10566_v63 = vor.u32 %v13645_v15, %v10563_v41  ;;  %v10570_v8 = vor.u32 %v13651_v29, %v10569_v30  ;;  %v18410_v15 = vld [vmem:[#allocation113_spill] sm:$0xff] }
 0x76a   : > { %v7641_v50 = vpop.f32.mrf.mxu2  ;;  %v6985_v11 = vpop.f32.mrf.mxu0 }
 0x76b   : > { %v6984_v5 = vadd.f32 %v6983_v56, %v6655_v33  ;;  %v7314_v18 = vpop.f32.mrf.mxu1  ;;  %v10578_v56 = vor.u32 %v13652_v59, %v10577_v6  ;;  %v10574_v33 = vor.u32 %v13646_v35, %v10571_v25  ;;  %v10607_v35 = vld [vmem:[%s15291_s13 + $0x14c] sm:$0xf0]  ;;  %v10613_v25 = vld [vmem:[%s15291_s13 + $0x128] sm:$0xf] }
 0x76d   : > { %v7313_v20 = vadd.f32 %v7312_v49, %v6984_v5 }
 0x76f   : > { %v17065_v57 = vadd.f32 %v7641_v50, %v7313_v20 }
 0x770   : > { %v6656_v32 = vpop.f32.mrf.mxu3 }
 0x771   : > { %18407 = vst [vmem:[#allocation107_spill] sm:$0xff] %v17065_v57  ;;  %v6657_v42 = vadd.f32 %v6656_v32, %v18408_v39  ;;  %v13662_v32 = vld [vmem:[%s15291_s13 + $0x150] sm:$0xf0]  ;;  %v10621_v39 = vld [vmem:[%s15291_s13 + $0x130] sm:$0xf] }
 0x772   : > { %v7643_v52 = vpop.f32.mrf.mxu2  ;;  %v6988_v55 = vpop.f32.mrf.mxu0 }
 0x773   : > { %v6986_v49 = vadd.f32 %v6985_v11, %v6657_v42  ;;  %v7317_v5 = vpop.f32.mrf.mxu1 }
 0x775   : > { %v7315_v60 = vadd.f32 %v7314_v18, %v6986_v49  ;;  %7694 = vmatmul.bf16.gmra.mxu3 %v10566_v63  ;;  %8023 = vmatmul.bf16.gmra.mxu0 %v10570_v8  ;;  %v13656_v18 = vld [vmem:[%s15291_s13 + $0x124] sm:$0xf]  ;;  %v13663_v63 = vld [vmem:[%s15291_s13 + $0x158] sm:$0xf0]  ;;  %v13657_v8 = vld [vmem:[%s15291_s13 + $0x12c] sm:$0xf] }
 0x776   : > { %8352 = vmatmul.bf16.gmra.mxu1 %v10574_v33 }
 0x777   : > { %8681 = vmatmul.bf16.gmra.mxu2 %v10578_v56  ;;  %v17071_v50 = vadd.f32 %v7643_v52, %v7315_v60  ;;  %v10615_v60 = vld [vmem:[%s15291_s13 + $0x154] sm:$0xf0] }
 0x778   : > { %v6659_v20 = vpop.f32.mrf.mxu3  ;;  %v18412_v56 = vld [vmem:[#allocation114_spill] sm:$0xff] }
 0x779   : > { %18409 = vst [vmem:[#allocation108_spill] sm:$0xff] %v17071_v50  ;;  %v6660_v41 = vadd.f32 %v6659_v20, %v18410_v15  ;;  %v10610_v20 = vor.u32 %v13656_v18, %v10607_v35  ;;  %v10614_v15 = vor.u32 %v13662_v32, %v10613_v25  ;;  %v18414_v18 = vld [vmem:[#allocation38_spill] sm:$0xff] }
 0x77a   : > { %v7646_v30 = vpop.f32.mrf.mxu2  ;;  %v6990_v11 = vpop.f32.mrf.mxu0 }
 0x77b   : > { %v6989_v29 = vadd.f32 %v6988_v55, %v6660_v41  ;;  %v7319_v6 = vpop.f32.mrf.mxu1  ;;  %v10622_v55 = vor.u32 %v13663_v63, %v10621_v39  ;;  %v10618_v41 = vor.u32 %v13657_v8, %v10615_v60  ;;  %v10651_v8 = vld [vmem:[%s15291_s13 + $0x1a4] sm:$0xf0]  ;;  %v10657_v60 = vld [vmem:[%s15291_s13 + $0x180] sm:$0xf] }
 0x77d   : > { %v7318_v59 = vadd.f32 %v7317_v5, %v6989_v29 }
 0x77f   : > { %v17079_v42 = vadd.f32 %v7646_v30, %v7318_v59 }
 0x780   : > { %v6661_v52 = vpop.f32.mrf.mxu3 }
 0x781   : > { %18411 = vst [vmem:[#allocation109_spill] sm:$0xff] %v17079_v42  ;;  %v6662_v33 = vadd.f32 %v6661_v52, %v18412_v56  ;;  %v13673_v52 = vld [vmem:[%s15291_s13 + $0x1a8] sm:$0xf0]  ;;  %v10665_v56 = vld [vmem:[%s15291_s13 + $0x188] sm:$0xf] }
 0x782   : > { %v7648_v49 = vpop.f32.mrf.mxu2  ;;  %v6993_v50 = vpop.f32.mrf.mxu0 }
 0x783   : > { %v6991_v5 = vadd.f32 %v6990_v11, %v6662_v33  ;;  %v7322_v29 = vpop.f32.mrf.mxu1 }
 0x785   : > { %v7320_v57 = vadd.f32 %v7319_v6, %v6991_v5  ;;  %7699 = vmatmul.bf16.gmra.mxu3 %v10610_v20  ;;  %8028 = vmatmul.bf16.gmra.mxu0 %v10614_v15  ;;  %v13667_v6 = vld [vmem:[%s15291_s13 + $0x17c] sm:$0xf]  ;;  %v13674_v20 = vld [vmem:[%s15291_s13 + $0x1b0] sm:$0xf0]  ;;  %v13668_v15 = vld [vmem:[%s15291_s13 + $0x184] sm:$0xf] }
 0x786   : > { %8357 = vmatmul.bf16.gmra.mxu1 %v10618_v41 }
 0x787   : > { %8686 = vmatmul.bf16.gmra.mxu2 %v10622_v55  ;;  %v17085_v30 = vadd.f32 %v7648_v49, %v7320_v57  ;;  %v10659_v57 = vld [vmem:[%s15291_s13 + $0x1ac] sm:$0xf0]  ;;  %v18416_v55 = vld [vmem:[#allocation80_spill] sm:$0xff] }
 0x788   : > { %v6664_v59 = vpop.f32.mrf.mxu3 }
 0x789   : > { %18413 = vst [vmem:[#allocation110_spill] sm:$0xff] %v17085_v30  ;;  %v6665_v35 = vadd.f32 %v6664_v59, %v18414_v18  ;;  %v10654_v59 = vor.u32 %v13667_v6, %v10651_v8  ;;  %v10658_v18 = vor.u32 %v13673_v52, %v10657_v60  ;;  %v18418_v6 = vld [vmem:[#allocation40_spill] sm:$0xff] }
 0x78a   : > { %v7651_v25 = vpop.f32.mrf.mxu2  ;;  %v6995_v11 = vpop.f32.mrf.mxu0 }
 0x78b   : > { %v6994_v32 = vadd.f32 %v6993_v50, %v6665_v35  ;;  %v7324_v39 = vpop.f32.mrf.mxu1  ;;  %v10666_v50 = vor.u32 %v13674_v20, %v10665_v56  ;;  %v10662_v35 = vor.u32 %v13668_v15, %v10659_v57  ;;  %v10695_v15 = vld [vmem:[%s15291_s13 + $0x1fc] sm:$0xf0]  ;;  %v10701_v57 = vld [vmem:[%s15291_s13 + $0x1d8] sm:$0xf] }
 0x78d   : > { %v7323_v63 = vadd.f32 %v7322_v29, %v6994_v32 }
 0x78f   : > { %v17093_v33 = vadd.f32 %v7651_v25, %v7323_v63 }
 0x790   : > { %v6666_v49 = vpop.f32.mrf.mxu3 }
 0x791   : > { %18415 = vst [vmem:[#allocation111_spill] sm:$0xff] %v17093_v33  ;;  %v6667_v41 = vadd.f32 %v6666_v49, %v18416_v55  ;;  %v13684_v49 = vld [vmem:[%s15291_s13 + $0x200] sm:$0xf0]  ;;  %v10709_v55 = vld [vmem:[%s15291_s13 + $0x1e0] sm:$0xf] }
 0x792   : > { %v7653_v5 = vpop.f32.mrf.mxu2  ;;  %v6998_v30 = vpop.f32.mrf.mxu0 }
 0x793   : > { %v6996_v29 = vadd.f32 %v6995_v11, %v6667_v41  ;;  %v7327_v32 = vpop.f32.mrf.mxu1 }
 0x795   : > { %v7325_v42 = vadd.f32 %v7324_v39, %v6996_v29  ;;  %7704 = vmatmul.bf16.gmra.mxu3 %v10654_v59  ;;  %8033 = vmatmul.bf16.gmra.mxu0 %v10658_v18  ;;  %v13678_v39 = vld [vmem:[%s15291_s13 + $0x1d4] sm:$0xf]  ;;  %v13685_v59 = vld [vmem:[%s15291_s13 + $0x208] sm:$0xf0]  ;;  %v13679_v18 = vld [vmem:[%s15291_s13 + $0x1dc] sm:$0xf] }
 0x796   : > { %8362 = vmatmul.bf16.gmra.mxu1 %v10662_v35 }
 0x797   : > { %8691 = vmatmul.bf16.gmra.mxu2 %v10666_v50  ;;  %v17099_v25 = vadd.f32 %v7653_v5, %v7325_v42  ;;  %v10703_v42 = vld [vmem:[%s15291_s13 + $0x204] sm:$0xf0]  ;;  %v18420_v50 = vld [vmem:[#allocation82_spill] sm:$0xff] }
 0x798   : > { %v6669_v63 = vpop.f32.mrf.mxu3 }
 0x799   : > { %18417 = vst [vmem:[#allocation112_spill] sm:$0xff] %v17099_v25  ;;  %v6670_v8 = vadd.f32 %v6669_v63, %v18418_v6  ;;  %v10698_v63 = vor.u32 %v13678_v39, %v10695_v15  ;;  %v10702_v6 = vor.u32 %v13684_v49, %v10701_v57  ;;  %v18422_v39 = vld [vmem:[#allocation42_spill] sm:$0xff] }
 0x79a   : > { %v7656_v60 = vpop.f32.mrf.mxu2  ;;  %v7000_v11 = vpop.f32.mrf.mxu0 }
 0x79b   : > { %v6999_v52 = vadd.f32 %v6998_v30, %v6670_v8  ;;  %v7329_v56 = vpop.f32.mrf.mxu1  ;;  %v10710_v30 = vor.u32 %v13685_v59, %v10709_v55  ;;  %v10706_v8 = vor.u32 %v13679_v18, %v10703_v42  ;;  %v10739_v18 = vld [vmem:[%s15291_s13 + $0x254] sm:$0xf0]  ;;  %v10745_v42 = vld [vmem:[%s15291_s13 + $0x230] sm:$0xf] }
 0x79d   : > { %v7328_v20 = vadd.f32 %v7327_v32, %v6999_v52 }
 0x79f   : > { %v17107_v41 = vadd.f32 %v7656_v60, %v7328_v20 }
 0x7a0   : > { %v6671_v5 = vpop.f32.mrf.mxu3 }
 0x7a1   : > { %18419 = vst [vmem:[#allocation113_spill] sm:$0xff] %v17107_v41  ;;  %v6672_v35 = vadd.f32 %v6671_v5, %v18420_v50  ;;  %v13695_v5 = vld [vmem:[%s15291_s13 + $0x258] sm:$0xf0]  ;;  %v10753_v50 = vld [vmem:[%s15291_s13 + $0x238] sm:$0xf] }
 0x7a2   : > { %v7658_v29 = vpop.f32.mrf.mxu2  ;;  %v7003_v25 = vpop.f32.mrf.mxu0 }
 0x7a3   : > { %v7001_v32 = vadd.f32 %v7000_v11, %v6672_v35  ;;  %v7332_v52 = vpop.f32.mrf.mxu1 }
 0x7a5   : > { %v7330_v33 = vadd.f32 %v7329_v56, %v7001_v32  ;;  %7709 = vmatmul.bf16.gmra.mxu3 %v10698_v63  ;;  %8038 = vmatmul.bf16.gmra.mxu0 %v10702_v6  ;;  %v13689_v56 = vld [vmem:[%s15291_s13 + $0x22c] sm:$0xf]  ;;  %v13696_v63 = vld [vmem:[%s15291_s13 + $0x260] sm:$0xf0]  ;;  %v13690_v6 = vld [vmem:[%s15291_s13 + $0x234] sm:$0xf] }
 0x7a6   : > { %8367 = vmatmul.bf16.gmra.mxu1 %v10706_v8 }
 0x7a7   : > { %8696 = vmatmul.bf16.gmra.mxu2 %v10710_v30  ;;  %v17113_v60 = vadd.f32 %v7658_v29, %v7330_v33  ;;  %v10747_v33 = vld [vmem:[%s15291_s13 + $0x25c] sm:$0xf0]  ;;  %v18424_v30 = vld [vmem:[#allocation84_spill] sm:$0xff] }
 0x7a8   : > { %v6674_v20 = vpop.f32.mrf.mxu3 }
 0x7a9   : > { %18421 = vst [vmem:[#allocation114_spill] sm:$0xff] %v17113_v60  ;;  %v6675_v15 = vadd.f32 %v6674_v20, %v18422_v39  ;;  %v10742_v20 = vor.u32 %v13689_v56, %v10739_v18  ;;  %v10746_v39 = vor.u32 %v13695_v5, %v10745_v42  ;;  %v18426_v56 = vld [vmem:[#allocation44_spill] sm:$0xff] }
 0x7aa   : > { %v7661_v57 = vpop.f32.mrf.mxu2  ;;  %v7005_v11 = vpop.f32.mrf.mxu0 }
 0x7ab   : > { %v7004_v49 = vadd.f32 %v7003_v25, %v6675_v15  ;;  %v7334_v55 = vpop.f32.mrf.mxu1  ;;  %v10754_v25 = vor.u32 %v13696_v63, %v10753_v50  ;;  %v10750_v15 = vor.u32 %v13690_v6, %v10747_v33  ;;  %v10783_v6 = vld [vmem:[%s15291_s13 + $0x2ac] sm:$0xf0]  ;;  %v10789_v33 = vld [vmem:[%s15291_s13 + $0x288] sm:$0xf] }
 0x7ad   : > { %v7333_v59 = vadd.f32 %v7332_v52, %v7004_v49 }
 0x7af   : > { %v17121_v35 = vadd.f32 %v7661_v57, %v7333_v59 }
 0x7b0   : > { %v6676_v29 = vpop.f32.mrf.mxu3 }
 0x7b1   : > { %18423 = vst [vmem:[#allocation38_spill] sm:$0xff] %v17121_v35  ;;  %v6677_v8 = vadd.f32 %v6676_v29, %v18424_v30  ;;  %v13706_v29 = vld [vmem:[%s15291_s13 + $0x2b0] sm:$0xf0]  ;;  %v10797_v30 = vld [vmem:[%s15291_s13 + $0x290] sm:$0xf] }
 0x7b2   : > { %v7663_v32 = vpop.f32.mrf.mxu2  ;;  %v7008_v60 = vpop.f32.mrf.mxu0 }
 0x7b3   : > { %v7006_v52 = vadd.f32 %v7005_v11, %v6677_v8  ;;  %v7337_v49 = vpop.f32.mrf.mxu1 }
 0x7b5   : > { %v7335_v41 = vadd.f32 %v7334_v55, %v7006_v52  ;;  %7714 = vmatmul.bf16.gmra.mxu3 %v10742_v20  ;;  %8043 = vmatmul.bf16.gmra.mxu0 %v10746_v39  ;;  %v13700_v55 = vld [vmem:[%s15291_s13 + $0x284] sm:$0xf]  ;;  %v13707_v20 = vld [vmem:[%s15291_s13 + $0x2b8] sm:$0xf0]  ;;  %v13701_v39 = vld [vmem:[%s15291_s13 + $0x28c] sm:$0xf] }
 0x7b6   : > { %8372 = vmatmul.bf16.gmra.mxu1 %v10750_v15 }
 0x7b7   : > { %8701 = vmatmul.bf16.gmra.mxu2 %v10754_v25  ;;  %v17127_v57 = vadd.f32 %v7663_v32, %v7335_v41  ;;  %v10791_v41 = vld [vmem:[%s15291_s13 + $0x2b4] sm:$0xf0] }
 0x7b8   : > { %v6679_v59 = vpop.f32.mrf.mxu3  ;;  %v18428_v25 = vld [vmem:[#allocation86_spill] sm:$0xff] }
 0x7b9   : > { %18425 = vst [vmem:[#allocation80_spill] sm:$0xff] %v17127_v57  ;;  %v6680_v18 = vadd.f32 %v6679_v59, %v18426_v56  ;;  %v10786_v59 = vor.u32 %v13700_v55, %v10783_v6  ;;  %v10790_v56 = vor.u32 %v13706_v29, %v10789_v33  ;;  %v18430_v55 = vld [vmem:[#allocation46_spill] sm:$0xff] }
 0x7ba   : > { %v7666_v42 = vpop.f32.mrf.mxu2  ;;  %v7010_v11 = vpop.f32.mrf.mxu0 }
 0x7bb   : > { %v7009_v5 = vadd.f32 %v7008_v60, %v6680_v18  ;;  %v7339_v50 = vpop.f32.mrf.mxu1  ;;  %v10798_v60 = vor.u32 %v13707_v20, %v10797_v30  ;;  %v10794_v18 = vor.u32 %v13701_v39, %v10791_v41  ;;  %v10827_v39 = vld [vmem:[%s15291_s13 + $0x304] sm:$0xf0]  ;;  %v10833_v41 = vld [vmem:[%s15291_s13 + $0x2e0] sm:$0xf] }
 0x7bd   : > { %v7338_v63 = vadd.f32 %v7337_v49, %v7009_v5 }
 0x7bf   : > { %v17135_v8 = vadd.f32 %v7666_v42, %v7338_v63 }
 0x7c0   : > { %v6681_v32 = vpop.f32.mrf.mxu3 }
 0x7c1   : > { %18427 = vst [vmem:[#allocation40_spill] sm:$0xff] %v17135_v8  ;;  %v6682_v15 = vadd.f32 %v6681_v32, %v18428_v25  ;;  %v13717_v32 = vld [vmem:[%s15291_s13 + $0x308] sm:$0xf0]  ;;  %v10841_v25 = vld [vmem:[%s15291_s13 + $0x2e8] sm:$0xf] }
 0x7c2   : > { %v7668_v52 = vpop.f32.mrf.mxu2  ;;  %v7013_v57 = vpop.f32.mrf.mxu0 }
 0x7c3   : > { %v7011_v49 = vadd.f32 %v7010_v11, %v6682_v15  ;;  %v7342_v5 = vpop.f32.mrf.mxu1 }
 0x7c5   : > { %v7340_v35 = vadd.f32 %v7339_v50, %v7011_v49  ;;  %7719 = vmatmul.bf16.gmra.mxu3 %v10786_v59  ;;  %8048 = vmatmul.bf16.gmra.mxu0 %v10790_v56  ;;  %v13711_v50 = vld [vmem:[%s15291_s13 + $0x2dc] sm:$0xf]  ;;  %v13718_v59 = vld [vmem:[%s15291_s13 + $0x310] sm:$0xf0]  ;;  %v13712_v56 = vld [vmem:[%s15291_s13 + $0x2e4] sm:$0xf] }
 0x7c6   : > { %8377 = vmatmul.bf16.gmra.mxu1 %v10794_v18 }
 0x7c7   : > { %8706 = vmatmul.bf16.gmra.mxu2 %v10798_v60  ;;  %v17141_v42 = vadd.f32 %v7668_v52, %v7340_v35  ;;  %v10835_v35 = vld [vmem:[%s15291_s13 + $0x30c] sm:$0xf0]  ;;  %v18432_v60 = vld [vmem:[#allocation88_spill] sm:$0xff] }
 0x7c8   : > { %v6684_v63 = vpop.f32.mrf.mxu3 }
 0x7c9   : > { %18429 = vst [vmem:[#allocation82_spill] sm:$0xff] %v17141_v42  ;;  %v6685_v6 = vadd.f32 %v6684_v63, %v18430_v55  ;;  %v10830_v63 = vor.u32 %v13711_v50, %v10827_v39  ;;  %v10834_v55 = vor.u32 %v13717_v32, %v10833_v41  ;;  %v18434_v50 = vld [vmem:[#allocation48_spill] sm:$0xff] }
 0x7ca   : > { %v7671_v33 = vpop.f32.mrf.mxu2  ;;  %v7015_v11 = vpop.f32.mrf.mxu0 }
 0x7cb   : > { %v7014_v29 = vadd.f32 %v7013_v57, %v6685_v6  ;;  %v7344_v30 = vpop.f32.mrf.mxu1  ;;  %v10842_v57 = vor.u32 %v13718_v59, %v10841_v25  ;;  %v10838_v6 = vor.u32 %v13712_v56, %v10835_v35  ;;  %v10871_v56 = vld [vmem:[%s15291_s13 + $0x35c] sm:$0xf0]  ;;  %v10877_v35 = vld [vmem:[%s15291_s13 + $0x338] sm:$0xf] }
 0x7cd   : > { %v7343_v20 = vadd.f32 %v7342_v5, %v7014_v29 }
 0x7cf   : > { %v17149_v15 = vadd.f32 %v7671_v33, %v7343_v20 }
 0x7d0   : > { %v6686_v52 = vpop.f32.mrf.mxu3 }
 0x7d1   : > { %18431 = vst [vmem:[#allocation42_spill] sm:$0xff] %v17149_v15  ;;  %v6687_v18 = vadd.f32 %v6686_v52, %v18432_v60  ;;  %v13728_v52 = vld [vmem:[%s15291_s13 + $0x360] sm:$0xf0]  ;;  %v10885_v60 = vld [vmem:[%s15291_s13 + $0x340] sm:$0xf] }
 0x7d2   : > { %v7673_v49 = vpop.f32.mrf.mxu2  ;;  %v8014_v42 = vpop.f32.mrf.mxu0 }
 0x7d3   : > { %v7016_v5 = vadd.f32 %v7015_v11, %v6687_v18  ;;  %v8343_v29 = vpop.f32.mrf.mxu1  ;;  %v13729_v18 = vld [vmem:[%s15291_s13 + $0x368] sm:$0xf0] }
 0x7d5   : > { %v7345_v8 = vadd.f32 %v7344_v30, %v7016_v5  ;;  %7724 = vmatmul.bf16.gmra.mxu3 %v10830_v63  ;;  %8053 = vmatmul.bf16.gmra.mxu0 %v10834_v55  ;;  %v13722_v30 = vld [vmem:[%s15291_s13 + $0x334] sm:$0xf]  ;;  %v13723_v63 = vld [vmem:[%s15291_s13 + $0x33c] sm:$0xf]  ;;  %v10879_v55 = vld [vmem:[%s15291_s13 + $0x364] sm:$0xf0] }
 0x7d6   : > { %8382 = vmatmul.bf16.gmra.mxu1 %v10838_v6 }
 0x7d7   : > { %8711 = vmatmul.bf16.gmra.mxu2 %v10842_v57  ;;  %v17155_v33 = vadd.f32 %v7673_v49, %v7345_v8  ;;  %v17166_v8 = vld [vmem:[#allocation8] ss:$0 sm:$0xff]  ;;  %v18435_v49 = vld [vmem:[#allocation90_spill] sm:$0xff] }
 0x7d8   : > { %v7685_v20 = vpop.f32.mrf.mxu3 }
 0x7d9   : > { %18433 = vst [vmem:[#allocation84_spill] sm:$0xff] %v17155_v33  ;;  %v7686_v39 = vadd.f32 %v7685_v20, %v18434_v50  ;;  %v10874_v50 = vor.u32 %v13722_v30, %v10871_v56  ;;  %v10878_v33 = vor.u32 %v13728_v52, %v10877_v35  ;;  %v18436_v56 = vld [vmem:[#allocation50_spill] sm:$0xff] }
 0x7da   : > { %v8672_v41 = vpop.f32.mrf.mxu2  ;;  %v8016_v11 = vpop.f32.mrf.mxu0 }
 0x7db   : > { %v8015_v32 = vadd.f32 %v8014_v42, %v7686_v39  ;;  %v8345_v25 = vpop.f32.mrf.mxu1  ;;  %v10882_v39 = vor.u32 %v13723_v63, %v10879_v55 }
 0x7dd   : > { %v8344_v59 = vadd.f32 %v8343_v29, %v8015_v32  ;;  %v10886_v29 = vor.u32 %v13729_v18, %v10885_v60 }
 0x7df   : > { %v8673_v6 = vadd.f32 %v8672_v41, %v8344_v59 }
 0x7e0   : > { %v7687_v57 = vpop.f32.mrf.mxu3 }
 0x7e1   : > { %v7688_v5 = vadd.f32 %v7687_v57, %v18435_v49  ;;  %v9647_v3 = vmul.f32 %v17166_v8, %v8673_v6  ;;  %v13733_v57 = vld [vmem:[%s15291_s13 + $0x38c] sm:$0xf]  ;;  %v10921_v6 = vld [vmem:[%s15291_s13 + $0x390] sm:$0xf]  ;;  %v13739_v49 = vld [vmem:[%s15291_s13 + $0x3b8] sm:$0xf0] }
 0x7e2   : > { %v8674_v20 = vpop.f32.mrf.mxu2  ;;  %v8019_v42 = vpop.f32.mrf.mxu0 }
 0x7e3   : > { %v8017_v32 = vadd.f32 %v8016_v11, %v7688_v5  ;;  %v8348_v15 = vpop.f32.mrf.mxu1  ;;  %v9779_v30 = vadd.f32 %v17170_v2, %v9647_v3  ;;  %v10915_v3 = vld [vmem:[%s15291_s13 + $0x3b4] sm:$0xf0] }
 0x7e4   : > { %v10929_v5 = vld [vmem:[%s15291_s13 + $0x398] sm:$0xf] }
 0x7e5   : > { %v8346_v45 = vadd.f32 %v8345_v25, %v8017_v32  ;;  %7729 = vmatmul.bf16.gmra.mxu3 %v10874_v50  ;;  %8058 = vmatmul.bf16.gmra.mxu0 %v10878_v33  ;;  %v9907_v18 = vmax.f32 %v9779_v30, 0.0  ;;  %v13740_v50 = vld [vmem:[%s15291_s13 + $0x3c0] sm:$0xf0] }
 0x7e6   : > { %8387 = vmatmul.bf16.gmra.mxu1 %v10882_v39  ;;  %v10923_v39 = vld [vmem:[%s15291_s13 + $0x3bc] sm:$0xf0] }
 0x7e7   : > { %8716 = vmatmul.bf16.gmra.mxu2 %v10886_v29  ;;  %v8675_v41 = vadd.f32 %v8674_v20, %v8346_v45  ;;  %v13734_v29 = vld [vmem:[%s15291_s13 + $0x394] sm:$0xf] }
 0x7e8   : > { %v7690_v59 = vpop.f32.mrf.mxu3 }
 0x7e9   : > { %v9648_v11 = vmul.f32 %v17166_v8, %v8675_v41  ;;  %v7691_v35 = vadd.f32 %v7690_v59, %v18436_v56 }
 0x7ea   : > { %v8677_v25 = vpop.f32.mrf.mxu2  ;;  %v8021_v33 = vpop.f32.mrf.mxu0 }
 0x7eb   : > { %v9780_v52 = vadd.f32 %v17170_v2, %v9648_v11  ;;  %v8020_v60 = vadd.f32 %v8019_v42, %v7691_v35  ;;  %v8350_v45 = vpop.f32.mrf.mxu1  ;;  %v18437_v42 = vld [vmem:[#allocation92_spill] sm:$0xff]  ;;  %v10918_v11 = vor.u32 %v13733_v57, %v10915_v3  ;;  %v10930_v35 = vor.u32 %v13740_v50, %v10929_v5 }
 0x7ed   : > { %v9908_v63 = vmax.f32 %v9780_v52, 0.0  ;;  %v8349_v55 = vadd.f32 %v8348_v15, %v8020_v60  ;;  %v10922_v15 = vor.u32 %v13739_v49, %v10921_v6  ;;  %v10926_v52 = vor.u32 %v13734_v29, %v10923_v39 }
 0x7ef   : > { %v14416_v20 = vpack.c.bf16 %v9908_v63, %v9907_v18  ;;  %v8678_v41 = vadd.f32 %v8677_v25, %v8349_v55 }
 0x7f0   : > { %v7692_v32 = vpop.f32.mrf.mxu3 }
 0x7f1   : > { %14417 = vst [vmem:[%s17185_s23] sm:$0xff] %v14416_v20   ;;  %v7693_v59 = vadd.f32 %v7692_v32, %v18437_v42  ;;  %v9649_v18 = vmul.f32 %v17166_v8, %v8678_v41  ;;  %v13744_v41 = vld [vmem:[%s15291_s13 + $0x3e4] sm:$0xf]  ;;  %v10959_v42 = vld [vmem:[%s15291_s13 + $0x40c] sm:$0xf0] }
 0x7f2   : > { %v8679_v30 = vpop.f32.mrf.mxu2  ;;  %v8024_v56 = vpop.f32.mrf.mxu0 }
 0x7f3   : > { %v8022_v60 = vadd.f32 %v8021_v33, %v7693_v59  ;;  %v8353_v54 = vpop.f32.mrf.mxu1  ;;  %v9781_v57 = vadd.f32 %v17170_v2, %v9649_v18  ;;  %v18438_v33 = vld [vmem:[#allocation52_spill] sm:$0xff] }
 0x7f4   : > { %v10965_v59 = vld [vmem:[%s15291_s13 + $0x3e8] sm:$0xf] }
 0x7f5   : > { %v8351_v63 = vadd.f32 %v8350_v45, %v8022_v60  ;;  %7734 = vmatmul.bf16.gmra.mxu3 %v10918_v11  ;;  %8063 = vmatmul.bf16.gmra.mxu0 %v10922_v15  ;;  %v9909_v29 = vmax.f32 %v9781_v57, 0.0  ;;  %v10973_v11 = vld [vmem:[%s15291_s13 + $0x3f0] sm:$0xf]  ;;  %v10967_v60 = vld [vmem:[%s15291_s13 + $0x414] sm:$0xf0] }
 0x7f6   : > { %8392 = vmatmul.bf16.gmra.mxu1 %v10926_v52  ;;  %v13745_v52 = vld [vmem:[%s15291_s13 + $0x3ec] sm:$0xf] }
 0x7f7   : > { %8721 = vmatmul.bf16.gmra.mxu2 %v10930_v35  ;;  %v8680_v25 = vadd.f32 %v8679_v30, %v8351_v63  ;;  %v13750_v30 = vld [vmem:[%s15291_s13 + $0x410] sm:$0xf0]  ;;  %v13751_v35 = vld [vmem:[%s15291_s13 + $0x418] sm:$0xf0] }
 0x7f8   : > { %v7695_v55 = vpop.f32.mrf.mxu3 }
 0x7f9   : > { %v9650_v3 = vmul.f32 %v17166_v8, %v8680_v25  ;;  %v7696_v6 = vadd.f32 %v7695_v55, %v18438_v33  ;;  %v18439_v25 = vld [vmem:[#allocation94_spill] sm:$0xff]  ;;  %v10966_v33 = vor.u32 %v13750_v30, %v10965_v59 }
 0x7fa   : > { %v8682_v45 = vpop.f32.mrf.mxu2  ;;  %v8026_v49 = vpop.f32.mrf.mxu0 }
 0x7fb   : > { %v9782_v5 = vadd.f32 %v17170_v2, %v9650_v3  ;;  %v8025_v20 = vadd.f32 %v8024_v56, %v7696_v6  ;;  %v8355_v50 = vpop.f32.mrf.mxu1  ;;  %v10962_v56 = vor.u32 %v13744_v41, %v10959_v42  ;;  %v10974_v6 = vor.u32 %v13751_v35, %v10973_v11 }
 0x7fd   : > { %v9910_v39 = vmax.f32 %v9782_v5, 0.0  ;;  %v8354_v32 = vadd.f32 %v8353_v54, %v8025_v20  ;;  %v10970_v54 = vor.u32 %v13745_v52, %v10967_v60  ;;  %v13755_v52 = vld [vmem:[%s15291_s13 + $0x43c] sm:$0xf]  ;;  %v11003_v60 = vld [vmem:[%s15291_s13 + $0x464] sm:$0xf0] }
 0x7ff   : > { %v14421_v15 = vpack.c.bf16 %v9910_v39, %v9909_v29  ;;  %v8683_v63 = vadd.f32 %v8682_v45, %v8354_v32 }
 0x800   : > { %v7697_v18 = vpop.f32.mrf.mxu3 }
 0x801   : > { %14733 = vst [vmem:[%s17185_s23 + $0x8] sm:$0xff] %v14421_v15   ;;  %v7698_v55 = vadd.f32 %v7697_v18, %v18439_v25  ;;  %v9651_v40 = vmul.f32 %v17166_v8, %v8683_v63  ;;  %v13761_v18 = vld [vmem:[%s15291_s13 + $0x468] sm:$0xf0]  ;;  %v11017_v63 = vld [vmem:[%s15291_s13 + $0x448] sm:$0xf] }
 0x802   : > { %v8684_v3 = vpop.f32.mrf.mxu2  ;;  %v8029_v57 = vpop.f32.mrf.mxu0 }
 0x803   : > { %v8027_v5 = vadd.f32 %v8026_v49, %v7698_v55  ;;  %v8358_v20 = vpop.f32.mrf.mxu1  ;;  %v9783_v39 = vadd.f32 %v17170_v2, %v9651_v40  ;;  %v18440_v49 = vld [vmem:[#allocation54_spill] sm:$0xff]  ;;  %v11009_v40 = vld [vmem:[%s15291_s13 + $0x440] sm:$0xf] }
 0x804   : > { %v13762_v55 = vld [vmem:[%s15291_s13 + $0x470] sm:$0xf0] }
 0x805   : > { %v8356_v7 = vadd.f32 %v8355_v50, %v8027_v5  ;;  %7739 = vmatmul.bf16.gmra.mxu3 %v10962_v56  ;;  %8068 = vmatmul.bf16.gmra.mxu0 %v10966_v33  ;;  %v11011_v56 = vld [vmem:[%s15291_s13 + $0x46c] sm:$0xf0] }
 0x806   : > { %8397 = vmatmul.bf16.gmra.mxu1 %v10970_v54  ;;  %v18441_v54 = vld [vmem:[#allocation96_spill] sm:$0xff] }
 0x807   : > { %8726 = vmatmul.bf16.gmra.mxu2 %v10974_v6  ;;  %v8685_v45 = vadd.f32 %v8684_v3, %v8356_v7  ;;  %v9911_v7 = vmax.f32 %v9783_v39, 0.0  ;;  %v13756_v3 = vld [vmem:[%s15291_s13 + $0x444] sm:$0xf] }
 0x808   : > { %v7700_v29 = vpop.f32.mrf.mxu3 }
 0x809   : > { %v9652_v32 = vmul.f32 %v17166_v8, %v8685_v45  ;;  %v7701_v41 = vadd.f32 %v7700_v29, %v18440_v49  ;;  %v11010_v29 = vor.u32 %v13761_v18, %v11009_v40 }
 0x80a   : > { %v8687_v50 = vpop.f32.mrf.mxu2  ;;  %v8031_v42 = vpop.f32.mrf.mxu0 }
 0x80b   : > { %v9784_v59 = vadd.f32 %v17170_v2, %v9652_v32  ;;  %v8030_v30 = vadd.f32 %v8029_v57, %v7701_v41  ;;  %v8360_v11 = vpop.f32.mrf.mxu1  ;;  %v11006_v57 = vor.u32 %v13755_v52, %v11003_v60  ;;  %v11018_v32 = vor.u32 %v13762_v55, %v11017_v63 }
 0x80d   : > { %v9912_v15 = vmax.f32 %v9784_v59, 0.0  ;;  %v8359_v35 = vadd.f32 %v8358_v20, %v8030_v30  ;;  %v11014_v20 = vor.u32 %v13756_v3, %v11011_v56  ;;  %v13766_v56 = vld [vmem:[%s15291_s13 + $0x494] sm:$0xf] }
 0x80f   : > { %v14426_v25 = vpack.c.bf16 %v9912_v15, %v9911_v7  ;;  %v8688_v6 = vadd.f32 %v8687_v50, %v8359_v35 }
 0x810   : > { %v7702_v33 = vpop.f32.mrf.mxu3 }
 0x811   : > { %14734 = vst [vmem:[%s17185_s23 + $0x10] sm:$0xff] %v14426_v25   ;;  %v7703_v5 = vadd.f32 %v7702_v33, %v18441_v54  ;;  %v9653_v59 = vmul.f32 %v17166_v8, %v8688_v6  ;;  %v11047_v33 = vld [vmem:[%s15291_s13 + $0x4bc] sm:$0xf0]  ;;  %v11053_v6 = vld [vmem:[%s15291_s13 + $0x498] sm:$0xf] }
 0x812   : > { %v8689_v45 = vpop.f32.mrf.mxu2  ;;  %v8034_v39 = vpop.f32.mrf.mxu0  ;;  %v13772_v54 = vld [vmem:[%s15291_s13 + $0x4c0] sm:$0xf0] }
 0x813   : > { %v8032_v49 = vadd.f32 %v8031_v42, %v7703_v5  ;;  %v8363_v41 = vpop.f32.mrf.mxu1  ;;  %v9785_v15 = vadd.f32 %v17170_v2, %v9653_v59  ;;  %v18442_v42 = vld [vmem:[#allocation56_spill] sm:$0xff]  ;;  %v11061_v5 = vld [vmem:[%s15291_s13 + $0x4a0] sm:$0xf] }
 0x814   : > { %v18443_v59 = vld [vmem:[#allocation16_spill] sm:$0xff] }
 0x815   : > { %v8361_v30 = vadd.f32 %v8360_v11, %v8032_v49  ;;  %7744 = vmatmul.bf16.gmra.mxu3 %v11006_v57  ;;  %8073 = vmatmul.bf16.gmra.mxu0 %v11010_v29  ;;  %v9913_v25 = vmax.f32 %v9785_v15, 0.0  ;;  %v13773_v57 = vld [vmem:[%s15291_s13 + $0x4c8] sm:$0xf0]  ;;  %v13767_v29 = vld [vmem:[%s15291_s13 + $0x49c] sm:$0xf] }
 0x816   : > { %8402 = vmatmul.bf16.gmra.mxu1 %v11014_v20 }
 0x817   : > { %8731 = vmatmul.bf16.gmra.mxu2 %v11018_v32  ;;  %v8690_v50 = vadd.f32 %v8689_v45, %v8361_v30  ;;  %v11055_v32 = vld [vmem:[%s15291_s13 + $0x4c4] sm:$0xf0] }
 0x818   : > { %v7705_v7 = vpop.f32.mrf.mxu3 }
 0x819   : > { %v9654_v35 = vmul.f32 %v17166_v8, %v8690_v50  ;;  %v7706_v52 = vadd.f32 %v7705_v7, %v18442_v42  ;;  %v11054_v7 = vor.u32 %v13772_v54, %v11053_v6 }
 0x81a   : > { %v8692_v11 = vpop.f32.mrf.mxu2  ;;  %v8036_v60 = vpop.f32.mrf.mxu0 }
 0x81b   : > { %v9786_v40 = vadd.f32 %v17170_v2, %v9654_v35  ;;  %v8035_v18 = vadd.f32 %v8034_v39, %v7706_v52  ;;  %v8365_v63 = vpop.f32.mrf.mxu1  ;;  %v11050_v39 = vor.u32 %v13766_v56, %v11047_v33  ;;  %v11062_v35 = vor.u32 %v13773_v57, %v11061_v5 }
 0x81d   : > { %v9914_v55 = vmax.f32 %v9786_v40, 0.0  ;;  %v8364_v3 = vadd.f32 %v8363_v41, %v8035_v18  ;;  %v11058_v41 = vor.u32 %v13767_v29, %v11055_v32  ;;  %v13777_v32 = vld [vmem:[%s15291_s13 + $0x4ec] sm:$0xf] }
 0x81f   : > { %v14431_v45 = vpack.c.bf16 %v9914_v55, %v9913_v25  ;;  %v8693_v49 = vadd.f32 %v8692_v11, %v8364_v3 }
 0x820   : > { %v7707_v20 = vpop.f32.mrf.mxu3 }
 0x821   : > { %14735 = vst [vmem:[%s17185_s23 + $0x18] sm:$0xff] %v14431_v45   ;;  %v7708_v30 = vadd.f32 %v7707_v20, %v18443_v59  ;;  %v9655_v40 = vmul.f32 %v17166_v8, %v8693_v49  ;;  %v11091_v20 = vld [vmem:[%s15291_s13 + $0x514] sm:$0xf0]  ;;  %v11097_v49 = vld [vmem:[%s15291_s13 + $0x4f0] sm:$0xf] }
 0x822   : > { %v8694_v50 = vpop.f32.mrf.mxu2  ;;  %v8039_v15 = vpop.f32.mrf.mxu0  ;;  %v13783_v59 = vld [vmem:[%s15291_s13 + $0x518] sm:$0xf0] }
 0x823   : > { %v8037_v42 = vadd.f32 %v8036_v60, %v7708_v30  ;;  %v8368_v52 = vpop.f32.mrf.mxu1  ;;  %v9787_v55 = vadd.f32 %v17170_v2, %v9655_v40  ;;  %v18444_v60 = vld [vmem:[#allocation17_spill] sm:$0xff]  ;;  %v11105_v30 = vld [vmem:[%s15291_s13 + $0x4f8] sm:$0xf] }
 0x824   : > { %v18445_v40 = vld [vmem:[#allocation18_spill] sm:$0xff] }
 0x825   : > { %v8366_v18 = vadd.f32 %v8365_v63, %v8037_v42  ;;  %7749 = vmatmul.bf16.gmra.mxu3 %v11050_v39  ;;  %8078 = vmatmul.bf16.gmra.mxu0 %v11054_v7  ;;  %v9915_v45 = vmax.f32 %v9787_v55, 0.0  ;;  %v13784_v39 = vld [vmem:[%s15291_s13 + $0x520] sm:$0xf0]  ;;  %v13778_v7 = vld [vmem:[%s15291_s13 + $0x4f4] sm:$0xf] }
 0x826   : > { %8407 = vmatmul.bf16.gmra.mxu1 %v11058_v41 }
 0x827   : > { %8736 = vmatmul.bf16.gmra.mxu2 %v11062_v35  ;;  %v8695_v11 = vadd.f32 %v8694_v50, %v8366_v18  ;;  %v11099_v35 = vld [vmem:[%s15291_s13 + $0x51c] sm:$0xf0] }
 0x828   : > { %v7710_v25 = vpop.f32.mrf.mxu3 }
 0x829   : > { %v9656_v3 = vmul.f32 %v17166_v8, %v8695_v11  ;;  %v7711_v56 = vadd.f32 %v7710_v25, %v18444_v60  ;;  %v11098_v25 = vor.u32 %v13783_v59, %v11097_v49 }
 0x82a   : > { %v8697_v63 = vpop.f32.mrf.mxu2  ;;  %v8041_v33 = vpop.f32.mrf.mxu0 }
 0x82b   : > { %v9788_v6 = vadd.f32 %v17170_v2, %v9656_v3  ;;  %v8040_v54 = vadd.f32 %v8039_v15, %v7711_v56  ;;  %v8370_v5 = vpop.f32.mrf.mxu1  ;;  %v11094_v15 = vor.u32 %v13777_v32, %v11091_v20  ;;  %v11106_v3 = vor.u32 %v13784_v39, %v11105_v30 }
 0x82d   : > { %v9916_v57 = vmax.f32 %v9788_v6, 0.0  ;;  %v8369_v29 = vadd.f32 %v8368_v52, %v8040_v54  ;;  %v11102_v52 = vor.u32 %v13778_v7, %v11099_v35  ;;  %v13788_v35 = vld [vmem:[%s15291_s13 + $0x544] sm:$0xf] }
 0x82f   : > { %v14436_v50 = vpack.c.bf16 %v9916_v57, %v9915_v45  ;;  %v8698_v42 = vadd.f32 %v8697_v63, %v8369_v29 }
 0x830   : > { %v7712_v41 = vpop.f32.mrf.mxu3 }
 0x831   : > { %14736 = vst [vmem:[%s17185_s23 + $0x20] sm:$0xff] %v14436_v50   ;;  %v7713_v18 = vadd.f32 %v7712_v41, %v18445_v40  ;;  %v9657_v6 = vmul.f32 %v17166_v8, %v8698_v42  ;;  %v11135_v41 = vld [vmem:[%s15291_s13 + $0x56c] sm:$0xf0]  ;;  %v11141_v42 = vld [vmem:[%s15291_s13 + $0x548] sm:$0xf] }
 0x832   : > { %v8699_v11 = vpop.f32.mrf.mxu2  ;;  %v8044_v55 = vpop.f32.mrf.mxu0  ;;  %v13794_v40 = vld [vmem:[%s15291_s13 + $0x570] sm:$0xf0] }
 0x833   : > { %v8042_v60 = vadd.f32 %v8041_v33, %v7713_v18  ;;  %v8373_v56 = vpop.f32.mrf.mxu1  ;;  %v9789_v57 = vadd.f32 %v17170_v2, %v9657_v6  ;;  %v18446_v33 = vld [vmem:[#allocation19_spill] sm:$0xff]  ;;  %v11149_v18 = vld [vmem:[%s15291_s13 + $0x550] sm:$0xf]  ;;  %v18447_v6 = vld [vmem:[#allocation20_spill] sm:$0xff] }
 0x835   : > { %v8371_v54 = vadd.f32 %v8370_v5, %v8042_v60  ;;  %7754 = vmatmul.bf16.gmra.mxu3 %v11094_v15  ;;  %8083 = vmatmul.bf16.gmra.mxu0 %v11098_v25  ;;  %v9917_v50 = vmax.f32 %v9789_v57, 0.0  ;;  %v13795_v15 = vld [vmem:[%s15291_s13 + $0x578] sm:$0xf0]  ;;  %v13789_v25 = vld [vmem:[%s15291_s13 + $0x54c] sm:$0xf] }
 0x836   : > { %8412 = vmatmul.bf16.gmra.mxu1 %v11102_v52 }
 0x837   : > { %8741 = vmatmul.bf16.gmra.mxu2 %v11106_v3  ;;  %v8700_v63 = vadd.f32 %v8699_v11, %v8371_v54  ;;  %v11143_v3 = vld [vmem:[%s15291_s13 + $0x574] sm:$0xf0] }
 0x838   : > { %v7715_v45 = vpop.f32.mrf.mxu3 }
 0x839   : > { %v9658_v29 = vmul.f32 %v17166_v8, %v8700_v63  ;;  %v7716_v32 = vadd.f32 %v7715_v45, %v18446_v33  ;;  %v11142_v45 = vor.u32 %v13794_v40, %v11141_v42 }
 0x83a   : > { %v8702_v5 = vpop.f32.mrf.mxu2  ;;  %v8046_v20 = vpop.f32.mrf.mxu0 }
 0x83b   : > { %v9790_v49 = vadd.f32 %v17170_v2, %v9658_v29  ;;  %v8045_v59 = vadd.f32 %v8044_v55, %v7716_v32  ;;  %v8375_v30 = vpop.f32.mrf.mxu1  ;;  %v11138_v55 = vor.u32 %v13788_v35, %v11135_v41  ;;  %v11150_v29 = vor.u32 %v13795_v15, %v11149_v18 }
 0x83d   : > { %v9918_v39 = vmax.f32 %v9790_v49, 0.0  ;;  %v8374_v7 = vadd.f32 %v8373_v56, %v8045_v59  ;;  %v11146_v56 = vor.u32 %v13789_v25, %v11143_v3  ;;  %v13799_v3 = vld [vmem:[%s15291_s13 + $0x59c] sm:$0xf] }
 0x83f   : > { %v14441_v11 = vpack.c.bf16 %v9918_v39, %v9917_v50  ;;  %v8703_v60 = vadd.f32 %v8702_v5, %v8374_v7 }
 0x840   : > { %v7717_v52 = vpop.f32.mrf.mxu3 }
 0x841   : > { %14737 = vst [vmem:[%s17185_s23 + $0x28] sm:$0xff] %v14441_v11   ;;  %v7718_v54 = vadd.f32 %v7717_v52, %v18447_v6  ;;  %v9659_v49 = vmul.f32 %v17166_v8, %v8703_v60  ;;  %v11179_v52 = vld [vmem:[%s15291_s13 + $0x5c4] sm:$0xf0]  ;;  %v11185_v60 = vld [vmem:[%s15291_s13 + $0x5a0] sm:$0xf] }
 0x842   : > { %v8704_v63 = vpop.f32.mrf.mxu2  ;;  %v8049_v57 = vpop.f32.mrf.mxu0  ;;  %v13805_v6 = vld [vmem:[%s15291_s13 + $0x5c8] sm:$0xf0] }
 0x843   : > { %v8047_v33 = vadd.f32 %v8046_v20, %v7718_v54  ;;  %v8378_v32 = vpop.f32.mrf.mxu1  ;;  %v9791_v39 = vadd.f32 %v17170_v2, %v9659_v49  ;;  %v18448_v20 = vld [vmem:[#allocation21_spill] sm:$0xff]  ;;  %v11193_v54 = vld [vmem:[%s15291_s13 + $0x5a8] sm:$0xf]  ;;  %v18449_v49 = vld [vmem:[#allocation22_spill] sm:$0xff] }
 0x845   : > { %v8376_v59 = vadd.f32 %v8375_v30, %v8047_v33  ;;  %7759 = vmatmul.bf16.gmra.mxu3 %v11138_v55  ;;  %8088 = vmatmul.bf16.gmra.mxu0 %v11142_v45  ;;  %v9919_v11 = vmax.f32 %v9791_v39, 0.0  ;;  %v13806_v55 = vld [vmem:[%s15291_s13 + $0x5d0] sm:$0xf0]  ;;  %v13800_v45 = vld [vmem:[%s15291_s13 + $0x5a4] sm:$0xf] }
 0x846   : > { %8417 = vmatmul.bf16.gmra.mxu1 %v11146_v56 }
 0x847   : > { %8746 = vmatmul.bf16.gmra.mxu2 %v11150_v29  ;;  %v8705_v5 = vadd.f32 %v8704_v63, %v8376_v59  ;;  %v11187_v29 = vld [vmem:[%s15291_s13 + $0x5cc] sm:$0xf0] }
 0x848   : > { %v7720_v50 = vpop.f32.mrf.mxu3 }
 0x849   : > { %v9660_v7 = vmul.f32 %v17166_v8, %v8705_v5  ;;  %v7721_v35 = vadd.f32 %v7720_v50, %v18448_v20  ;;  %v11186_v50 = vor.u32 %v13805_v6, %v11185_v60 }
 0x84a   : > { %v8707_v30 = vpop.f32.mrf.mxu2  ;;  %v8051_v41 = vpop.f32.mrf.mxu0 }
 0x84b   : > { %v9792_v42 = vadd.f32 %v17170_v2, %v9660_v7  ;;  %v8050_v40 = vadd.f32 %v8049_v57, %v7721_v35  ;;  %v8380_v18 = vpop.f32.mrf.mxu1  ;;  %v11182_v57 = vor.u32 %v13799_v3, %v11179_v52  ;;  %v11194_v7 = vor.u32 %v13806_v55, %v11193_v54 }
 0x84d   : > { %v9920_v15 = vmax.f32 %v9792_v42, 0.0  ;;  %v8379_v25 = vadd.f32 %v8378_v32, %v8050_v40  ;;  %v11190_v32 = vor.u32 %v13800_v45, %v11187_v29  ;;  %v13810_v29 = vld [vmem:[%s15291_s13 + $0x5f4] sm:$0xf] }
 0x84f   : > { %v14446_v63 = vpack.c.bf16 %v9920_v15, %v9919_v11  ;;  %v8708_v33 = vadd.f32 %v8707_v30, %v8379_v25 }
 0x850   : > { %v7722_v56 = vpop.f32.mrf.mxu3 }
 0x851   : > { %14738 = vst [vmem:[%s17185_s23 + $0x30] sm:$0xff] %v14446_v63   ;;  %v7723_v59 = vadd.f32 %v7722_v56, %v18449_v49  ;;  %v9661_v42 = vmul.f32 %v17166_v8, %v8708_v33  ;;  %v11223_v56 = vld [vmem:[%s15291_s13 + $0x61c] sm:$0xf0]  ;;  %v11229_v33 = vld [vmem:[%s15291_s13 + $0x5f8] sm:$0xf] }
 0x852   : > { %v8709_v5 = vpop.f32.mrf.mxu2  ;;  %v8054_v39 = vpop.f32.mrf.mxu0  ;;  %v13816_v49 = vld [vmem:[%s15291_s13 + $0x620] sm:$0xf0] }
 0x853   : > { %v8052_v20 = vadd.f32 %v8051_v41, %v7723_v59  ;;  %v8383_v35 = vpop.f32.mrf.mxu1  ;;  %v9793_v15 = vadd.f32 %v17170_v2, %v9661_v42  ;;  %v18450_v41 = vld [vmem:[#allocation23_spill] sm:$0xff]  ;;  %v18451_v42 = vld [vmem:[#allocation24_spill] sm:$0xff] }
 0x854   : > { %v11237_v59 = vld [vmem:[%s15291_s13 + $0x600] sm:$0xf] }
 0x855   : > { %v8381_v40 = vadd.f32 %v8380_v18, %v8052_v20  ;;  %7764 = vmatmul.bf16.gmra.mxu3 %v11182_v57  ;;  %8093 = vmatmul.bf16.gmra.mxu0 %v11186_v50  ;;  %v9921_v63 = vmax.f32 %v9793_v15, 0.0  ;;  %v13817_v57 = vld [vmem:[%s15291_s13 + $0x628] sm:$0xf0]  ;;  %v13811_v50 = vld [vmem:[%s15291_s13 + $0x5fc] sm:$0xf] }
 0x856   : > { %8422 = vmatmul.bf16.gmra.mxu1 %v11190_v32 }
 0x857   : > { %8751 = vmatmul.bf16.gmra.mxu2 %v11194_v7  ;;  %v8710_v30 = vadd.f32 %v8709_v5, %v8381_v40  ;;  %v11231_v7 = vld [vmem:[%s15291_s13 + $0x624] sm:$0xf0] }
 0x858   : > { %v7725_v11 = vpop.f32.mrf.mxu3 }
 0x859   : > { %v9662_v25 = vmul.f32 %v17166_v8, %v8710_v30  ;;  %v7726_v3 = vadd.f32 %v7725_v11, %v18450_v41  ;;  %v11230_v11 = vor.u32 %v13816_v49, %v11229_v33 }
 0x85a   : > { %v8712_v18 = vpop.f32.mrf.mxu2  ;;  %v8056_v52 = vpop.f32.mrf.mxu0 }
 0x85b   : > { %v9794_v60 = vadd.f32 %v17170_v2, %v9662_v25  ;;  %v8055_v6 = vadd.f32 %v8054_v39, %v7726_v3  ;;  %v8385_v54 = vpop.f32.mrf.mxu1  ;;  %v11226_v39 = vor.u32 %v13810_v29, %v11223_v56  ;;  %v11238_v25 = vor.u32 %v13817_v57, %v11237_v59 }
 0x85d   : > { %v9922_v55 = vmax.f32 %v9794_v60, 0.0  ;;  %v8384_v45 = vadd.f32 %v8383_v35, %v8055_v6  ;;  %v11234_v35 = vor.u32 %v13811_v50, %v11231_v7  ;;  %v13821_v7 = vld [vmem:[%s15291_s13 + $0x64c] sm:$0xf] }
 0x85f   : > { %v14451_v5 = vpack.c.bf16 %v9922_v55, %v9921_v63  ;;  %v8713_v20 = vadd.f32 %v8712_v18, %v8384_v45 }
 0x860   : > { %v7727_v32 = vpop.f32.mrf.mxu3 }
 0x861   : > { %14739 = vst [vmem:[%s17185_s23 + $0x38] sm:$0xff] %v14451_v5   ;;  %v7728_v40 = vadd.f32 %v7727_v32, %v18451_v42  ;;  %v9663_v60 = vmul.f32 %v17166_v8, %v8713_v20  ;;  %v11267_v32 = vld [vmem:[%s15291_s13 + $0x674] sm:$0xf0]  ;;  %v11273_v20 = vld [vmem:[%s15291_s13 + $0x650] sm:$0xf] }
 0x862   : > { %v8714_v30 = vpop.f32.mrf.mxu2  ;;  %v8059_v15 = vpop.f32.mrf.mxu0  ;;  %v13827_v42 = vld [vmem:[%s15291_s13 + $0x678] sm:$0xf0] }
 0x863   : > { %v8057_v41 = vadd.f32 %v8056_v52, %v7728_v40  ;;  %v8388_v3 = vpop.f32.mrf.mxu1  ;;  %v9795_v55 = vadd.f32 %v17170_v2, %v9663_v60  ;;  %v18452_v52 = vld [vmem:[#allocation25_spill] sm:$0xff]  ;;  %v11281_v40 = vld [vmem:[%s15291_s13 + $0x658] sm:$0xf] }
 0x864   : > { %v18453_v60 = vld [vmem:[#allocation26_spill] sm:$0xff] }
 0x865   : > { %v8386_v6 = vadd.f32 %v8385_v54, %v8057_v41  ;;  %7769 = vmatmul.bf16.gmra.mxu3 %v11226_v39  ;;  %8098 = vmatmul.bf16.gmra.mxu0 %v11230_v11  ;;  %v9923_v5 = vmax.f32 %v9795_v55, 0.0  ;;  %v13828_v39 = vld [vmem:[%s15291_s13 + $0x680] sm:$0xf0]  ;;  %v13822_v11 = vld [vmem:[%s15291_s13 + $0x654] sm:$0xf] }
 0x866   : > { %8427 = vmatmul.bf16.gmra.mxu1 %v11234_v35 }
 0x867   : > { %8756 = vmatmul.bf16.gmra.mxu2 %v11238_v25  ;;  %v8715_v18 = vadd.f32 %v8714_v30, %v8386_v6  ;;  %v11275_v25 = vld [vmem:[%s15291_s13 + $0x67c] sm:$0xf0] }
 0x868   : > { %v7730_v63 = vpop.f32.mrf.mxu3 }
 0x869   : > { %v9664_v45 = vmul.f32 %v17166_v8, %v8715_v18  ;;  %v7731_v29 = vadd.f32 %v7730_v63, %v18452_v52  ;;  %v11274_v63 = vor.u32 %v13827_v42, %v11273_v20 }
 0x86a   : > { %v8717_v54 = vpop.f32.mrf.mxu2  ;;  %v8061_v56 = vpop.f32.mrf.mxu0 }
 0x86b   : > { %v9796_v33 = vadd.f32 %v17170_v2, %v9664_v45  ;;  %v8060_v49 = vadd.f32 %v8059_v15, %v7731_v29  ;;  %v8390_v59 = vpop.f32.mrf.mxu1  ;;  %v11270_v15 = vor.u32 %v13821_v7, %v11267_v32  ;;  %v11282_v45 = vor.u32 %v13828_v39, %v11281_v40 }
 0x86d   : > { %v9924_v57 = vmax.f32 %v9796_v33, 0.0  ;;  %v8389_v50 = vadd.f32 %v8388_v3, %v8060_v49  ;;  %v11278_v3 = vor.u32 %v13822_v11, %v11275_v25  ;;  %v13832_v25 = vld [vmem:[%s15291_s13 + $0x6a4] sm:$0xf] }
 0x86f   : > { %v14456_v30 = vpack.c.bf16 %v9924_v57, %v9923_v5  ;;  %v8718_v41 = vadd.f32 %v8717_v54, %v8389_v50 }
 0x870   : > { %v7732_v35 = vpop.f32.mrf.mxu3 }
 0x871   : > { %14740 = vst [vmem:[%s17185_s23 + $0x40] sm:$0xff] %v14456_v30   ;;  %v7733_v6 = vadd.f32 %v7732_v35, %v18453_v60  ;;  %v9665_v33 = vmul.f32 %v17166_v8, %v8718_v41  ;;  %v11311_v35 = vld [vmem:[%s15291_s13 + $0x6cc] sm:$0xf0]  ;;  %v11317_v41 = vld [vmem:[%s15291_s13 + $0x6a8] sm:$0xf] }
 0x872   : > { %v8719_v18 = vpop.f32.mrf.mxu2  ;;  %v8064_v55 = vpop.f32.mrf.mxu0  ;;  %v13838_v60 = vld [vmem:[%s15291_s13 + $0x6d0] sm:$0xf0] }
 0x873   : > { %v8062_v52 = vadd.f32 %v8061_v56, %v7733_v6  ;;  %v8393_v29 = vpop.f32.mrf.mxu1  ;;  %v9797_v57 = vadd.f32 %v17170_v2, %v9665_v33  ;;  %v18454_v56 = vld [vmem:[#allocation27_spill] sm:$0xff]  ;;  %v11325_v6 = vld [vmem:[%s15291_s13 + $0x6b0] sm:$0xf]  ;;  %v18455_v33 = vld [vmem:[#allocation28_spill] sm:$0xff] }
 0x875   : > { %v8391_v49 = vadd.f32 %v8390_v59, %v8062_v52  ;;  %7774 = vmatmul.bf16.gmra.mxu3 %v11270_v15  ;;  %8103 = vmatmul.bf16.gmra.mxu0 %v11274_v63  ;;  %v9925_v30 = vmax.f32 %v9797_v57, 0.0  ;;  %v13839_v15 = vld [vmem:[%s15291_s13 + $0x6d8] sm:$0xf0]  ;;  %v13833_v63 = vld [vmem:[%s15291_s13 + $0x6ac] sm:$0xf] }
 0x876   : > { %8432 = vmatmul.bf16.gmra.mxu1 %v11278_v3 }
 0x877   : > { %8761 = vmatmul.bf16.gmra.mxu2 %v11282_v45  ;;  %v8720_v54 = vadd.f32 %v8719_v18, %v8391_v49  ;;  %v11319_v45 = vld [vmem:[%s15291_s13 + $0x6d4] sm:$0xf0] }
 0x878   : > { %v7735_v5 = vpop.f32.mrf.mxu3 }
 0x879   : > { %v9666_v50 = vmul.f32 %v17166_v8, %v8720_v54  ;;  %v7736_v7 = vadd.f32 %v7735_v5, %v18454_v56  ;;  %v11318_v5 = vor.u32 %v13838_v60, %v11317_v41 }
 0x87a   : > { %v8722_v59 = vpop.f32.mrf.mxu2  ;;  %v8066_v32 = vpop.f32.mrf.mxu0 }
 0x87b   : > { %v9798_v20 = vadd.f32 %v17170_v2, %v9666_v50  ;;  %v8065_v42 = vadd.f32 %v8064_v55, %v7736_v7  ;;  %v8395_v40 = vpop.f32.mrf.mxu1  ;;  %v11314_v55 = vor.u32 %v13832_v25, %v11311_v35  ;;  %v11326_v50 = vor.u32 %v13839_v15, %v11325_v6 }
 0x87d   : > { %v9926_v39 = vmax.f32 %v9798_v20, 0.0  ;;  %v8394_v11 = vadd.f32 %v8393_v29, %v8065_v42  ;;  %v11322_v29 = vor.u32 %v13833_v63, %v11319_v45  ;;  %v13843_v45 = vld [vmem:[%s15291_s13 + $0x6fc] sm:$0xf] }
 0x87f   : > { %v14461_v18 = vpack.c.bf16 %v9926_v39, %v9925_v30  ;;  %v8723_v52 = vadd.f32 %v8722_v59, %v8394_v11 }
 0x880   : > { %v7737_v3 = vpop.f32.mrf.mxu3 }
 0x881   : > { %14741 = vst [vmem:[%s17185_s23 + $0x48] sm:$0xff] %v14461_v18   ;;  %v7738_v49 = vadd.f32 %v7737_v3, %v18455_v33  ;;  %v9667_v20 = vmul.f32 %v17166_v8, %v8723_v52  ;;  %v11355_v3 = vld [vmem:[%s15291_s13 + $0x724] sm:$0xf0]  ;;  %v11361_v52 = vld [vmem:[%s15291_s13 + $0x700] sm:$0xf] }
 0x882   : > { %v8724_v54 = vpop.f32.mrf.mxu2  ;;  %v8069_v57 = vpop.f32.mrf.mxu0  ;;  %v13849_v33 = vld [vmem:[%s15291_s13 + $0x728] sm:$0xf0] }
 0x883   : > { %v8067_v56 = vadd.f32 %v8066_v32, %v7738_v49  ;;  %v8398_v7 = vpop.f32.mrf.mxu1  ;;  %v9799_v39 = vadd.f32 %v17170_v2, %v9667_v20  ;;  %v18456_v32 = vld [vmem:[#allocation29_spill] sm:$0xff]  ;;  %v11369_v49 = vld [vmem:[%s15291_s13 + $0x708] sm:$0xf]  ;;  %v18457_v20 = vld [vmem:[#allocation30_spill] sm:$0xff] }
 0x885   : > { %v8396_v42 = vadd.f32 %v8395_v40, %v8067_v56  ;;  %7779 = vmatmul.bf16.gmra.mxu3 %v11314_v55  ;;  %8108 = vmatmul.bf16.gmra.mxu0 %v11318_v5  ;;  %v9927_v18 = vmax.f32 %v9799_v39, 0.0  ;;  %v13850_v55 = vld [vmem:[%s15291_s13 + $0x730] sm:$0xf0]  ;;  %v13844_v5 = vld [vmem:[%s15291_s13 + $0x704] sm:$0xf] }
 0x886   : > { %8437 = vmatmul.bf16.gmra.mxu1 %v11322_v29 }
 0x887   : > { %8766 = vmatmul.bf16.gmra.mxu2 %v11326_v50  ;;  %v8725_v59 = vadd.f32 %v8724_v54, %v8396_v42  ;;  %v11363_v50 = vld [vmem:[%s15291_s13 + $0x72c] sm:$0xf0] }
 0x888   : > { %v7740_v30 = vpop.f32.mrf.mxu3 }
 0x889   : > { %v9668_v11 = vmul.f32 %v17166_v8, %v8725_v59  ;;  %v7741_v25 = vadd.f32 %v7740_v30, %v18456_v32  ;;  %v11362_v30 = vor.u32 %v13849_v33, %v11361_v52 }
 0x88a   : > { %v8727_v40 = vpop.f32.mrf.mxu2  ;;  %v8071_v35 = vpop.f32.mrf.mxu0 }
 0x88b   : > { %v9800_v41 = vadd.f32 %v17170_v2, %v9668_v11  ;;  %v8070_v60 = vadd.f32 %v8069_v57, %v7741_v25  ;;  %v8400_v6 = vpop.f32.mrf.mxu1  ;;  %v11358_v57 = vor.u32 %v13843_v45, %v11355_v3  ;;  %v11370_v11 = vor.u32 %v13850_v55, %v11369_v49 }
 0x88d   : > { %v9928_v15 = vmax.f32 %v9800_v41, 0.0  ;;  %v8399_v63 = vadd.f32 %v8398_v7, %v8070_v60  ;;  %v11366_v7 = vor.u32 %v13844_v5, %v11363_v50  ;;  %v13854_v50 = vld [vmem:[%s15291_s13 + $0x754] sm:$0xf] }
 0x88f   : > { %v14466_v54 = vpack.c.bf16 %v9928_v15, %v9927_v18  ;;  %v8728_v56 = vadd.f32 %v8727_v40, %v8399_v63 }
 0x890   : > { %v7742_v29 = vpop.f32.mrf.mxu3 }
 0x891   : > { %14742 = vst [vmem:[%s17185_s23 + $0x50] sm:$0xff] %v14466_v54   ;;  %v7743_v42 = vadd.f32 %v7742_v29, %v18457_v20  ;;  %v9669_v41 = vmul.f32 %v17166_v8, %v8728_v56  ;;  %v11399_v29 = vld [vmem:[%s15291_s13 + $0x77c] sm:$0xf0]  ;;  %v11405_v56 = vld [vmem:[%s15291_s13 + $0x758] sm:$0xf] }
 0x892   : > { %v8729_v59 = vpop.f32.mrf.mxu2  ;;  %v8074_v39 = vpop.f32.mrf.mxu0  ;;  %v13860_v20 = vld [vmem:[%s15291_s13 + $0x780] sm:$0xf0] }
 0x893   : > { %v8072_v32 = vadd.f32 %v8071_v35, %v7743_v42  ;;  %v8403_v25 = vpop.f32.mrf.mxu1  ;;  %v9801_v15 = vadd.f32 %v17170_v2, %v9669_v41  ;;  %v18458_v35 = vld [vmem:[#allocation31_spill] sm:$0xff]  ;;  %v18459_v41 = vld [vmem:[#allocation32_spill] sm:$0xff] }
 0x894   : > { %v11413_v42 = vld [vmem:[%s15291_s13 + $0x760] sm:$0xf] }
 0x895   : > { %v8401_v60 = vadd.f32 %v8400_v6, %v8072_v32  ;;  %7784 = vmatmul.bf16.gmra.mxu3 %v11358_v57  ;;  %8113 = vmatmul.bf16.gmra.mxu0 %v11362_v30  ;;  %v9929_v54 = vmax.f32 %v9801_v15, 0.0  ;;  %v13861_v57 = vld [vmem:[%s15291_s13 + $0x788] sm:$0xf0]  ;;  %v13855_v30 = vld [vmem:[%s15291_s13 + $0x75c] sm:$0xf] }
 0x896   : > { %8442 = vmatmul.bf16.gmra.mxu1 %v11366_v7 }
 0x897   : > { %8771 = vmatmul.bf16.gmra.mxu2 %v11370_v11  ;;  %v8730_v40 = vadd.f32 %v8729_v59, %v8401_v60  ;;  %v11407_v11 = vld [vmem:[%s15291_s13 + $0x784] sm:$0xf0] }
 0x898   : > { %v7745_v18 = vpop.f32.mrf.mxu3 }
 0x899   : > { %v9670_v63 = vmul.f32 %v17166_v8, %v8730_v40  ;;  %v7746_v45 = vadd.f32 %v7745_v18, %v18458_v35  ;;  %v11406_v18 = vor.u32 %v13860_v20, %v11405_v56 }
 0x89a   : > { %v8732_v6 = vpop.f32.mrf.mxu2  ;;  %v8076_v3 = vpop.f32.mrf.mxu0 }
 0x89b   : > { %v9802_v52 = vadd.f32 %v17170_v2, %v9670_v63  ;;  %v8075_v33 = vadd.f32 %v8074_v39, %v7746_v45  ;;  %v8405_v49 = vpop.f32.mrf.mxu1  ;;  %v11402_v39 = vor.u32 %v13854_v50, %v11399_v29  ;;  %v11414_v63 = vor.u32 %v13861_v57, %v11413_v42 }
 0x89d   : > { %v9930_v55 = vmax.f32 %v9802_v52, 0.0  ;;  %v8404_v5 = vadd.f32 %v8403_v25, %v8075_v33  ;;  %v11410_v25 = vor.u32 %v13855_v30, %v11407_v11  ;;  %v13865_v11 = vld [vmem:[%s15291_s13 + $0x7ac] sm:$0xf] }
 0x89f   : > { %v14471_v59 = vpack.c.bf16 %v9930_v55, %v9929_v54  ;;  %v8733_v32 = vadd.f32 %v8732_v6, %v8404_v5 }
 0x8a0   : > { %v7747_v7 = vpop.f32.mrf.mxu3 }
 0x8a1   : > { %14743 = vst [vmem:[%s17185_s23 + $0x58] sm:$0xff] %v14471_v59   ;;  %v7748_v60 = vadd.f32 %v7747_v7, %v18459_v41  ;;  %v9671_v52 = vmul.f32 %v17166_v8, %v8733_v32  ;;  %v11443_v7 = vld [vmem:[%s15291_s13 + $0x7d4] sm:$0xf0]  ;;  %v11449_v32 = vld [vmem:[%s15291_s13 + $0x7b0] sm:$0xf] }
 0x8a2   : > { %v8734_v40 = vpop.f32.mrf.mxu2  ;;  %v8079_v15 = vpop.f32.mrf.mxu0  ;;  %v13871_v41 = vld [vmem:[%s15291_s13 + $0x7d8] sm:$0xf0] }
 0x8a3   : > { %v8077_v35 = vadd.f32 %v8076_v3, %v7748_v60  ;;  %v8408_v45 = vpop.f32.mrf.mxu1  ;;  %v9803_v55 = vadd.f32 %v17170_v2, %v9671_v52  ;;  %v18460_v3 = vld [vmem:[#allocation33_spill] sm:$0xff] }
 0x8a5   : > { %v8406_v33 = vadd.f32 %v8405_v49, %v8077_v35  ;;  %7789 = vmatmul.bf16.gmra.mxu3 %v11402_v39  ;;  %8118 = vmatmul.bf16.gmra.mxu0 %v11406_v18  ;;  %v9931_v59 = vmax.f32 %v9803_v55, 0.0  ;;  %v13866_v39 = vld [vmem:[%s15291_s13 + $0x7b4] sm:$0xf]  ;;  %v11451_v18 = vld [vmem:[%s15291_s13 + $0x7dc] sm:$0xf0] }
 0x8a6   : > { %8447 = vmatmul.bf16.gmra.mxu1 %v11410_v25  ;;  %v18461_v35 = vld [vmem:[#allocation34_spill] sm:$0xff] }
 0x8a7   : > { %8776 = vmatmul.bf16.gmra.mxu2 %v11414_v63  ;;  %v8735_v6 = vadd.f32 %v8734_v40, %v8406_v33  ;;  %v13872_v40 = vld [vmem:[%s15291_s13 + $0x7e0] sm:$0xf0]  ;;  %v11450_v33 = vor.u32 %v13871_v41, %v11449_v32 }
 0x8a8   : > { %v7750_v54 = vpop.f32.mrf.mxu3 }
 0x8a9   : > { %v9672_v5 = vmul.f32 %v17166_v8, %v8735_v6  ;;  %v7751_v50 = vadd.f32 %v7750_v54, %v18460_v3  ;;  %v11457_v8 = vld [vmem:[%s15291_s13 + $0x7b8] sm:$0xf]  ;;  %v17369_v3 = vld [vmem:[#allocation8] ss:$0 sm:$0xff] }
 0x8aa   : > { %v8737_v49 = vpop.f32.mrf.mxu2  ;;  %v8081_v29 = vpop.f32.mrf.mxu0  ;;  %v11458_v54 = vor.u32 %v13872_v40, %v11457_v8 }
 0x8ab   : > { %v9804_v56 = vadd.f32 %v17170_v2, %v9672_v5  ;;  %v8080_v20 = vadd.f32 %v8079_v15, %v7751_v50  ;;  %v8410_v42 = vpop.f32.mrf.mxu1  ;;  %v11446_v15 = vor.u32 %v13865_v11, %v11443_v7 }
 0x8ad   : > { %v9932_v57 = vmax.f32 %v9804_v56, 0.0  ;;  %v8409_v30 = vadd.f32 %v8408_v45, %v8080_v20  ;;  %v11454_v45 = vor.u32 %v13866_v39, %v11451_v18  ;;  %v13876_v18 = vld [vmem:[%s15291_s13 + $0x804] sm:$0xf] }
 0x8af   : > { %v14476_v60 = vpack.c.bf16 %v9932_v57, %v9931_v59  ;;  %v8738_v25 = vadd.f32 %v8737_v49, %v8409_v30  ;;  %v17372_v59 = vld [vmem:[#allocation9] ss:$0 sm:$0xff] }
 0x8b0   : > { %v7752_v63 = vpop.f32.mrf.mxu3  ;;  %v18462_v30 = vld [vmem:[#allocation35_spill] sm:$0xff] }
 0x8b1   : > { %14744 = vst [vmem:[%s17185_s23 + $0x60] sm:$0xff] %v14476_v60   ;;  %v7753_v2 = vadd.f32 %v7752_v63, %v18461_v35  ;;  %v9673_v50 = vmul.f32 %v17369_v3, %v8738_v25  ;;  %v11487_v63 = vld [vmem:[%s15291_s13 + $0x82c] sm:$0xf0]  ;;  %v11493_v25 = vld [vmem:[%s15291_s13 + $0x808] sm:$0xf] }
 0x8b2   : > { %v8739_v52 = vpop.f32.mrf.mxu2  ;;  %v8084_v6 = vpop.f32.mrf.mxu0  ;;  %v13882_v35 = vld [vmem:[%s15291_s13 + $0x830] sm:$0xf0] }
 0x8b3   : > { %v8082_v55 = vadd.f32 %v8081_v29, %v7753_v2  ;;  %v8413_v5 = vpop.f32.mrf.mxu1  ;;  %v9805_v29 = vadd.f32 %v17372_v59, %v9673_v50  ;;  %v11501_v2 = vld [vmem:[%s15291_s13 + $0x810] sm:$0xf]  ;;  %v18463_v50 = vld [vmem:[#allocation36_spill] sm:$0xff] }
 0x8b5   : > { %v8411_v56 = vadd.f32 %v8410_v42, %v8082_v55  ;;  %7794 = vmatmul.bf16.gmra.mxu3 %v11446_v15  ;;  %8123 = vmatmul.bf16.gmra.mxu0 %v11450_v33  ;;  %v9933_v60 = vmax.f32 %v9805_v29, 0.0  ;;  %v13883_v15 = vld [vmem:[%s15291_s13 + $0x838] sm:$0xf0]  ;;  %v13877_v33 = vld [vmem:[%s15291_s13 + $0x80c] sm:$0xf] }
 0x8b6   : > { %8452 = vmatmul.bf16.gmra.mxu1 %v11454_v45 }
 0x8b7   : > { %8781 = vmatmul.bf16.gmra.mxu2 %v11458_v54  ;;  %v8740_v49 = vadd.f32 %v8739_v52, %v8411_v56  ;;  %v11495_v54 = vld [vmem:[%s15291_s13 + $0x834] sm:$0xf0] }
 0x8b8   : > { %v7755_v20 = vpop.f32.mrf.mxu3 }
 0x8b9   : > { %v9674_v57 = vmul.f32 %v17369_v3, %v8740_v49  ;;  %v7756_v42 = vadd.f32 %v7755_v20, %v18462_v30  ;;  %v11494_v20 = vor.u32 %v13882_v35, %v11493_v25 }
 0x8ba   : > { %v8742_v11 = vpop.f32.mrf.mxu2  ;;  %v8086_v7 = vpop.f32.mrf.mxu0 }
 0x8bb   : > { %v9806_v32 = vadd.f32 %v17372_v59, %v9674_v57  ;;  %v8085_v41 = vadd.f32 %v8084_v6, %v7756_v42  ;;  %v8415_v8 = vpop.f32.mrf.mxu1  ;;  %v11490_v6 = vor.u32 %v13876_v18, %v11487_v63  ;;  %v11502_v57 = vor.u32 %v13883_v15, %v11501_v2 }
 0x8bd   : > { %v9934_v40 = vmax.f32 %v9806_v32, 0.0  ;;  %v8414_v39 = vadd.f32 %v8413_v5, %v8085_v41  ;;  %v11498_v5 = vor.u32 %v13877_v33, %v11495_v54  ;;  %v13887_v54 = vld [vmem:[%s15291_s13 + $0x85c] sm:$0xf] }
 0x8bf   : > { %v14481_v52 = vpack.c.bf16 %v9934_v40, %v9933_v60  ;;  %v8743_v55 = vadd.f32 %v8742_v11, %v8414_v39 }
 0x8c0   : > { %v7757_v45 = vpop.f32.mrf.mxu3 }
 0x8c1   : > { %14745 = vst [vmem:[%s17185_s23 + $0x68] sm:$0xff] %v14481_v52   ;;  %v7758_v56 = vadd.f32 %v7757_v45, %v18463_v50  ;;  %v9675_v32 = vmul.f32 %v17369_v3, %v8743_v55  ;;  %v11531_v45 = vld [vmem:[%s15291_s13 + $0x884] sm:$0xf0]  ;;  %v11537_v55 = vld [vmem:[%s15291_s13 + $0x860] sm:$0xf] }
 0x8c2   : > { %v8744_v49 = vpop.f32.mrf.mxu2  ;;  %v8089_v29 = vpop.f32.mrf.mxu0  ;;  %v13893_v50 = vld [vmem:[%s15291_s13 + $0x888] sm:$0xf0] }
 0x8c3   : > { %v8087_v30 = vadd.f32 %v8086_v7, %v7758_v56  ;;  %v8418_v42 = vpop.f32.mrf.mxu1  ;;  %v9807_v40 = vadd.f32 %v17372_v59, %v9675_v32  ;;  %v18464_v7 = vld [vmem:[#allocation37_spill] sm:$0xff]  ;;  %v11545_v56 = vld [vmem:[%s15291_s13 + $0x868] sm:$0xf]  ;;  %v18465_v32 = vld [vmem:[#allocation39_spill] sm:$0xff] }
 0x8c5   : > { %v8416_v41 = vadd.f32 %v8415_v8, %v8087_v30  ;;  %7799 = vmatmul.bf16.gmra.mxu3 %v11490_v6  ;;  %8128 = vmatmul.bf16.gmra.mxu0 %v11494_v20  ;;  %v9935_v52 = vmax.f32 %v9807_v40, 0.0  ;;  %v13894_v6 = vld [vmem:[%s15291_s13 + $0x890] sm:$0xf0]  ;;  %v13888_v20 = vld [vmem:[%s15291_s13 + $0x864] sm:$0xf] }
 0x8c6   : > { %8457 = vmatmul.bf16.gmra.mxu1 %v11498_v5 }
 0x8c7   : > { %8786 = vmatmul.bf16.gmra.mxu2 %v11502_v57  ;;  %v8745_v11 = vadd.f32 %v8744_v49, %v8416_v41  ;;  %v11539_v57 = vld [vmem:[%s15291_s13 + $0x88c] sm:$0xf0] }
 0x8c8   : > { %v7760_v60 = vpop.f32.mrf.mxu3 }
 0x8c9   : > { %v9676_v39 = vmul.f32 %v17369_v3, %v8745_v11  ;;  %v7761_v18 = vadd.f32 %v7760_v60, %v18464_v7  ;;  %v11538_v60 = vor.u32 %v13893_v50, %v11537_v55 }
 0x8ca   : > { %v8747_v8 = vpop.f32.mrf.mxu2  ;;  %v8091_v63 = vpop.f32.mrf.mxu0 }
 0x8cb   : > { %v9808_v25 = vadd.f32 %v17372_v59, %v9676_v39  ;;  %v8090_v35 = vadd.f32 %v8089_v29, %v7761_v18  ;;  %v8420_v2 = vpop.f32.mrf.mxu1  ;;  %v11534_v29 = vor.u32 %v13887_v54, %v11531_v45  ;;  %v11546_v39 = vor.u32 %v13894_v6, %v11545_v56 }
 0x8cd   : > { %v9936_v15 = vmax.f32 %v9808_v25, 0.0  ;;  %v8419_v33 = vadd.f32 %v8418_v42, %v8090_v35  ;;  %v11542_v42 = vor.u32 %v13888_v20, %v11539_v57  ;;  %v13898_v57 = vld [vmem:[%s15291_s13 + $0x8b4] sm:$0xf] }
 0x8cf   : > { %v14486_v49 = vpack.c.bf16 %v9936_v15, %v9935_v52  ;;  %v8748_v30 = vadd.f32 %v8747_v8, %v8419_v33 }
 0x8d0   : > { %v7762_v5 = vpop.f32.mrf.mxu3 }
 0x8d1   : > { %14746 = vst [vmem:[%s17185_s23 + $0x70] sm:$0xff] %v14486_v49   ;;  %v7763_v41 = vadd.f32 %v7762_v5, %v18465_v32  ;;  %v9677_v25 = vmul.f32 %v17369_v3, %v8748_v30  ;;  %v11575_v5 = vld [vmem:[%s15291_s13 + $0x8dc] sm:$0xf0]  ;;  %v11581_v30 = vld [vmem:[%s15291_s13 + $0x8b8] sm:$0xf] }
 0x8d2   : > { %v8749_v11 = vpop.f32.mrf.mxu2  ;;  %v8094_v40 = vpop.f32.mrf.mxu0  ;;  %v13904_v32 = vld [vmem:[%s15291_s13 + $0x8e0] sm:$0xf0] }
 0x8d3   : > { %v8092_v7 = vadd.f32 %v8091_v63, %v7763_v41  ;;  %v8423_v18 = vpop.f32.mrf.mxu1  ;;  %v9809_v15 = vadd.f32 %v17372_v59, %v9677_v25  ;;  %v18466_v63 = vld [vmem:[#allocation41_spill] sm:$0xff]  ;;  %v11589_v41 = vld [vmem:[%s15291_s13 + $0x8c0] sm:$0xf] }
 0x8d4   : > { %v18467_v25 = vld [vmem:[#allocation43_spill] sm:$0xff] }
 0x8d5   : > { %v8421_v35 = vadd.f32 %v8420_v2, %v8092_v7  ;;  %7804 = vmatmul.bf16.gmra.mxu3 %v11534_v29  ;;  %8133 = vmatmul.bf16.gmra.mxu0 %v11538_v60  ;;  %v9937_v49 = vmax.f32 %v9809_v15, 0.0  ;;  %v13905_v29 = vld [vmem:[%s15291_s13 + $0x8e8] sm:$0xf0]  ;;  %v13899_v60 = vld [vmem:[%s15291_s13 + $0x8bc] sm:$0xf] }
 0x8d6   : > { %8462 = vmatmul.bf16.gmra.mxu1 %v11542_v42 }
 0x8d7   : > { %8791 = vmatmul.bf16.gmra.mxu2 %v11546_v39  ;;  %v8750_v8 = vadd.f32 %v8749_v11, %v8421_v35  ;;  %v11583_v39 = vld [vmem:[%s15291_s13 + $0x8e4] sm:$0xf0] }
 0x8d8   : > { %v7765_v52 = vpop.f32.mrf.mxu3 }
 0x8d9   : > { %v9678_v33 = vmul.f32 %v17369_v3, %v8750_v8  ;;  %v7766_v54 = vadd.f32 %v7765_v52, %v18466_v63  ;;  %v11582_v52 = vor.u32 %v13904_v32, %v11581_v30 }
 0x8da   : > { %v8752_v2 = vpop.f32.mrf.mxu2  ;;  %v8096_v45 = vpop.f32.mrf.mxu0 }
 0x8db   : > { %v9810_v55 = vadd.f32 %v17372_v59, %v9678_v33  ;;  %v8095_v50 = vadd.f32 %v8094_v40, %v7766_v54  ;;  %v8425_v56 = vpop.f32.mrf.mxu1  ;;  %v11578_v40 = vor.u32 %v13898_v57, %v11575_v5  ;;  %v11590_v33 = vor.u32 %v13905_v29, %v11589_v41 }
 0x8dd   : > { %v9938_v6 = vmax.f32 %v9810_v55, 0.0  ;;  %v8424_v20 = vadd.f32 %v8423_v18, %v8095_v50  ;;  %v11586_v18 = vor.u32 %v13899_v60, %v11583_v39  ;;  %v13909_v39 = vld [vmem:[%s15291_s13 + $0x90c] sm:$0xf] }
 0x8df   : > { %v14491_v11 = vpack.c.bf16 %v9938_v6, %v9937_v49  ;;  %v8753_v7 = vadd.f32 %v8752_v2, %v8424_v20 }
 0x8e0   : > { %v7767_v42 = vpop.f32.mrf.mxu3 }
 0x8e1   : > { %14747 = vst [vmem:[%s17185_s23 + $0x78] sm:$0xff] %v14491_v11   ;;  %v7768_v35 = vadd.f32 %v7767_v42, %v18467_v25  ;;  %v9679_v55 = vmul.f32 %v17369_v3, %v8753_v7  ;;  %v11619_v42 = vld [vmem:[%s15291_s13 + $0x934] sm:$0xf0]  ;;  %v11625_v7 = vld [vmem:[%s15291_s13 + $0x910] sm:$0xf] }
 0x8e2   : > { %v8754_v8 = vpop.f32.mrf.mxu2  ;;  %v8099_v15 = vpop.f32.mrf.mxu0  ;;  %v13915_v25 = vld [vmem:[%s15291_s13 + $0x938] sm:$0xf0] }
 0x8e3   : > { %v8097_v63 = vadd.f32 %v8096_v45, %v7768_v35  ;;  %v8428_v54 = vpop.f32.mrf.mxu1  ;;  %v9811_v6 = vadd.f32 %v17372_v59, %v9679_v55  ;;  %v18468_v45 = vld [vmem:[#allocation45_spill] sm:$0xff]  ;;  %v11633_v35 = vld [vmem:[%s15291_s13 + $0x918] sm:$0xf]  ;;  %v18469_v55 = vld [vmem:[#allocation47_spill] sm:$0xff] }
 0x8e5   : > { %v8426_v50 = vadd.f32 %v8425_v56, %v8097_v63  ;;  %7809 = vmatmul.bf16.gmra.mxu3 %v11578_v40  ;;  %8138 = vmatmul.bf16.gmra.mxu0 %v11582_v52  ;;  %v9939_v11 = vmax.f32 %v9811_v6, 0.0  ;;  %v13916_v40 = vld [vmem:[%s15291_s13 + $0x940] sm:$0xf0]  ;;  %v13910_v52 = vld [vmem:[%s15291_s13 + $0x914] sm:$0xf] }
 0x8e6   : > { %8467 = vmatmul.bf16.gmra.mxu1 %v11586_v18 }
 0x8e7   : > { %8796 = vmatmul.bf16.gmra.mxu2 %v11590_v33  ;;  %v8755_v2 = vadd.f32 %v8754_v8, %v8426_v50  ;;  %v11627_v33 = vld [vmem:[%s15291_s13 + $0x93c] sm:$0xf0] }
 0x8e8   : > { %v7770_v49 = vpop.f32.mrf.mxu3 }
 0x8e9   : > { %v9680_v20 = vmul.f32 %v17369_v3, %v8755_v2  ;;  %v7771_v57 = vadd.f32 %v7770_v49, %v18468_v45  ;;  %v11626_v49 = vor.u32 %v13915_v25, %v11625_v7 }
 0x8ea   : > { %v8757_v56 = vpop.f32.mrf.mxu2  ;;  %v8101_v5 = vpop.f32.mrf.mxu0 }
 0x8eb   : > { %v9812_v30 = vadd.f32 %v17372_v59, %v9680_v20  ;;  %v8100_v32 = vadd.f32 %v8099_v15, %v7771_v57  ;;  %v8430_v41 = vpop.f32.mrf.mxu1  ;;  %v11622_v15 = vor.u32 %v13909_v39, %v11619_v42  ;;  %v11634_v20 = vor.u32 %v13916_v40, %v11633_v35 }
 0x8ed   : > { %v9940_v29 = vmax.f32 %v9812_v30, 0.0  ;;  %v8429_v60 = vadd.f32 %v8428_v54, %v8100_v32  ;;  %v11630_v54 = vor.u32 %v13910_v52, %v11627_v33  ;;  %v13920_v33 = vld [vmem:[%s15291_s13 + $0x964] sm:$0xf] }
 0x8ef   : > { %v14496_v8 = vpack.c.bf16 %v9940_v29, %v9939_v11  ;;  %v8758_v63 = vadd.f32 %v8757_v56, %v8429_v60 }
 0x8f0   : > { %v7772_v18 = vpop.f32.mrf.mxu3 }
 0x8f1   : > { %14748 = vst [vmem:[%s17185_s23 + $0x80] sm:$0xff] %v14496_v8   ;;  %v7773_v50 = vadd.f32 %v7772_v18, %v18469_v55  ;;  %v9681_v30 = vmul.f32 %v17369_v3, %v8758_v63  ;;  %v11663_v18 = vld [vmem:[%s15291_s13 + $0x98c] sm:$0xf0]  ;;  %v11669_v63 = vld [vmem:[%s15291_s13 + $0x968] sm:$0xf] }
 0x8f2   : > { %v8759_v2 = vpop.f32.mrf.mxu2  ;;  %v8104_v6 = vpop.f32.mrf.mxu0  ;;  %v13926_v55 = vld [vmem:[%s15291_s13 + $0x990] sm:$0xf0] }
 0x8f3   : > { %v8102_v45 = vadd.f32 %v8101_v5, %v7773_v50  ;;  %v8433_v57 = vpop.f32.mrf.mxu1  ;;  %v9813_v29 = vadd.f32 %v17372_v59, %v9681_v30  ;;  %v18470_v5 = vld [vmem:[#allocation49_spill] sm:$0xff]  ;;  %v18471_v30 = vld [vmem:[#allocation51_spill] sm:$0xff] }
 0x8f4   : > { %v11677_v50 = vld [vmem:[%s15291_s13 + $0x970] sm:$0xf] }
 0x8f5   : > { %v8431_v32 = vadd.f32 %v8430_v41, %v8102_v45  ;;  %7814 = vmatmul.bf16.gmra.mxu3 %v11622_v15  ;;  %8143 = vmatmul.bf16.gmra.mxu0 %v11626_v49  ;;  %v9941_v8 = vmax.f32 %v9813_v29, 0.0  ;;  %v13927_v15 = vld [vmem:[%s15291_s13 + $0x998] sm:$0xf0]  ;;  %v13921_v49 = vld [vmem:[%s15291_s13 + $0x96c] sm:$0xf] }
 0x8f6   : > { %8472 = vmatmul.bf16.gmra.mxu1 %v11630_v54 }
 0x8f7   : > { %8801 = vmatmul.bf16.gmra.mxu2 %v11634_v20  ;;  %v8760_v56 = vadd.f32 %v8759_v2, %v8431_v32  ;;  %v11671_v20 = vld [vmem:[%s15291_s13 + $0x994] sm:$0xf0] }
 0x8f8   : > { %v7775_v11 = vpop.f32.mrf.mxu3 }
 0x8f9   : > { %v9682_v60 = vmul.f32 %v17369_v3, %v8760_v56  ;;  %v7776_v39 = vadd.f32 %v7775_v11, %v18470_v5  ;;  %v11670_v11 = vor.u32 %v13926_v55, %v11669_v63 }
 0x8fa   : > { %v8762_v41 = vpop.f32.mrf.mxu2  ;;  %v8106_v42 = vpop.f32.mrf.mxu0 }
 0x8fb   : > { %v9814_v7 = vadd.f32 %v17372_v59, %v9682_v60  ;;  %v8105_v25 = vadd.f32 %v8104_v6, %v7776_v39  ;;  %v8435_v35 = vpop.f32.mrf.mxu1  ;;  %v11666_v6 = vor.u32 %v13920_v33, %v11663_v18  ;;  %v11678_v60 = vor.u32 %v13927_v15, %v11677_v50 }
 0x8fd   : > { %v9942_v40 = vmax.f32 %v9814_v7, 0.0  ;;  %v8434_v52 = vadd.f32 %v8433_v57, %v8105_v25  ;;  %v11674_v57 = vor.u32 %v13921_v49, %v11671_v20  ;;  %v13931_v20 = vld [vmem:[%s15291_s13 + $0x9bc] sm:$0xf] }
 0x8ff   : > { %v14501_v2 = vpack.c.bf16 %v9942_v40, %v9941_v8  ;;  %v8763_v45 = vadd.f32 %v8762_v41, %v8434_v52 }
 0x900   : > { %v7777_v54 = vpop.f32.mrf.mxu3 }
 0x901   : > { %14749 = vst [vmem:[%s17185_s23 + $0x88] sm:$0xff] %v14501_v2   ;;  %v7778_v32 = vadd.f32 %v7777_v54, %v18471_v30  ;;  %v9683_v7 = vmul.f32 %v17369_v3, %v8763_v45  ;;  %v11707_v54 = vld [vmem:[%s15291_s13 + $0x9e4] sm:$0xf0]  ;;  %v11713_v45 = vld [vmem:[%s15291_s13 + $0x9c0] sm:$0xf] }
 0x902   : > { %v8764_v56 = vpop.f32.mrf.mxu2  ;;  %v8109_v29 = vpop.f32.mrf.mxu0  ;;  %v13937_v30 = vld [vmem:[%s15291_s13 + $0x9e8] sm:$0xf0] }
 0x903   : > { %v8107_v5 = vadd.f32 %v8106_v42, %v7778_v32  ;;  %v8438_v39 = vpop.f32.mrf.mxu1  ;;  %v9815_v40 = vadd.f32 %v17372_v59, %v9683_v7  ;;  %v18472_v42 = vld [vmem:[#allocation53_spill] sm:$0xff]  ;;  %v11721_v32 = vld [vmem:[%s15291_s13 + $0x9c8] sm:$0xf]  ;;  %v18473_v7 = vld [vmem:[#allocation55_spill] sm:$0xff] }
 0x905   : > { %v8436_v25 = vadd.f32 %v8435_v35, %v8107_v5  ;;  %7819 = vmatmul.bf16.gmra.mxu3 %v11666_v6  ;;  %8148 = vmatmul.bf16.gmra.mxu0 %v11670_v11  ;;  %v9943_v2 = vmax.f32 %v9815_v40, 0.0  ;;  %v13938_v6 = vld [vmem:[%s15291_s13 + $0x9f0] sm:$0xf0]  ;;  %v13932_v11 = vld [vmem:[%s15291_s13 + $0x9c4] sm:$0xf] }
 0x906   : > { %8477 = vmatmul.bf16.gmra.mxu1 %v11674_v57 }
 0x907   : > { %8806 = vmatmul.bf16.gmra.mxu2 %v11678_v60  ;;  %v8765_v41 = vadd.f32 %v8764_v56, %v8436_v25  ;;  %v11715_v60 = vld [vmem:[%s15291_s13 + $0x9ec] sm:$0xf0] }
 0x908   : > { %v7780_v8 = vpop.f32.mrf.mxu3 }
 0x909   : > { %v9684_v52 = vmul.f32 %v17369_v3, %v8765_v41  ;;  %v7781_v33 = vadd.f32 %v7780_v8, %v18472_v42  ;;  %v11714_v8 = vor.u32 %v13937_v30, %v11713_v45 }
 0x90a   : > { %v8767_v35 = vpop.f32.mrf.mxu2  ;;  %v8111_v18 = vpop.f32.mrf.mxu0 }
 0x90b   : > { %v9816_v63 = vadd.f32 %v17372_v59, %v9684_v52  ;;  %v8110_v55 = vadd.f32 %v8109_v29, %v7781_v33  ;;  %v8440_v50 = vpop.f32.mrf.mxu1  ;;  %v11710_v29 = vor.u32 %v13931_v20, %v11707_v54  ;;  %v11722_v52 = vor.u32 %v13938_v6, %v11721_v32 }
 0x90d   : > { %v9944_v15 = vmax.f32 %v9816_v63, 0.0  ;;  %v8439_v49 = vadd.f32 %v8438_v39, %v8110_v55  ;;  %v11718_v39 = vor.u32 %v13932_v11, %v11715_v60  ;;  %v13942_v60 = vld [vmem:[%s15291_s13 + $0xa14] sm:$0xf] }
 0x90f   : > { %v14506_v56 = vpack.c.bf16 %v9944_v15, %v9943_v2  ;;  %v8768_v5 = vadd.f32 %v8767_v35, %v8439_v49 }
 0x910   : > { %v7782_v57 = vpop.f32.mrf.mxu3 }
 0x911   : > { %14750 = vst [vmem:[%s17185_s23 + $0x90] sm:$0xff] %v14506_v56   ;;  %v7783_v25 = vadd.f32 %v7782_v57, %v18473_v7  ;;  %v9685_v63 = vmul.f32 %v17369_v3, %v8768_v5  ;;  %v11751_v57 = vld [vmem:[%s15291_s13 + $0xa3c] sm:$0xf0]  ;;  %v11757_v5 = vld [vmem:[%s15291_s13 + $0xa18] sm:$0xf] }
 0x912   : > { %v8769_v41 = vpop.f32.mrf.mxu2  ;;  %v8114_v40 = vpop.f32.mrf.mxu0  ;;  %v13948_v7 = vld [vmem:[%s15291_s13 + $0xa40] sm:$0xf0] }
 0x913   : > { %v8112_v42 = vadd.f32 %v8111_v18, %v7783_v25  ;;  %v8443_v33 = vpop.f32.mrf.mxu1  ;;  %v9817_v15 = vadd.f32 %v17372_v59, %v9685_v63  ;;  %v18474_v18 = vld [vmem:[#allocation57_spill] sm:$0xff]  ;;  %v11765_v25 = vld [vmem:[%s15291_s13 + $0xa20] sm:$0xf]  ;;  %v18475_v63 = vld [vmem:[#allocation58_spill] sm:$0xff] }
 0x915   : > { %v8441_v55 = vadd.f32 %v8440_v50, %v8112_v42  ;;  %7824 = vmatmul.bf16.gmra.mxu3 %v11710_v29  ;;  %8153 = vmatmul.bf16.gmra.mxu0 %v11714_v8  ;;  %v9945_v56 = vmax.f32 %v9817_v15, 0.0  ;;  %v13949_v29 = vld [vmem:[%s15291_s13 + $0xa48] sm:$0xf0]  ;;  %v13943_v8 = vld [vmem:[%s15291_s13 + $0xa1c] sm:$0xf] }
 0x916   : > { %8482 = vmatmul.bf16.gmra.mxu1 %v11718_v39 }
 0x917   : > { %8811 = vmatmul.bf16.gmra.mxu2 %v11722_v52  ;;  %v8770_v35 = vadd.f32 %v8769_v41, %v8441_v55  ;;  %v11759_v52 = vld [vmem:[%s15291_s13 + $0xa44] sm:$0xf0] }
 0x918   : > { %v7785_v2 = vpop.f32.mrf.mxu3 }
 0x919   : > { %v9686_v49 = vmul.f32 %v17369_v3, %v8770_v35  ;;  %v7786_v20 = vadd.f32 %v7785_v2, %v18474_v18  ;;  %v11758_v2 = vor.u32 %v13948_v7, %v11757_v5 }
 0x91a   : > { %v8772_v50 = vpop.f32.mrf.mxu2  ;;  %v8116_v54 = vpop.f32.mrf.mxu0 }
 0x91b   : > { %v9818_v45 = vadd.f32 %v17372_v59, %v9686_v49  ;;  %v8115_v30 = vadd.f32 %v8114_v40, %v7786_v20  ;;  %v8445_v32 = vpop.f32.mrf.mxu1  ;;  %v11754_v40 = vor.u32 %v13942_v60, %v11751_v57  ;;  %v11766_v49 = vor.u32 %v13949_v29, %v11765_v25 }
 0x91d   : > { %v9946_v6 = vmax.f32 %v9818_v45, 0.0  ;;  %v8444_v11 = vadd.f32 %v8443_v33, %v8115_v30  ;;  %v11762_v33 = vor.u32 %v13943_v8, %v11759_v52  ;;  %v13953_v52 = vld [vmem:[%s15291_s13 + $0xa6c] sm:$0xf] }
 0x91f   : > { %v14511_v41 = vpack.c.bf16 %v9946_v6, %v9945_v56  ;;  %v8773_v42 = vadd.f32 %v8772_v50, %v8444_v11 }
 0x920   : > { %v7787_v39 = vpop.f32.mrf.mxu3 }
 0x921   : > { %14751 = vst [vmem:[%s17185_s23 + $0x98] sm:$0xff] %v14511_v41   ;;  %v7788_v55 = vadd.f32 %v7787_v39, %v18475_v63  ;;  %v9687_v45 = vmul.f32 %v17369_v3, %v8773_v42  ;;  %v11795_v39 = vld [vmem:[%s15291_s13 + $0xa94] sm:$0xf0]  ;;  %v11801_v42 = vld [vmem:[%s15291_s13 + $0xa70] sm:$0xf] }
 0x922   : > { %v8774_v35 = vpop.f32.mrf.mxu2  ;;  %v8119_v15 = vpop.f32.mrf.mxu0  ;;  %v13959_v63 = vld [vmem:[%s15291_s13 + $0xa98] sm:$0xf0] }
 0x923   : > { %v8117_v18 = vadd.f32 %v8116_v54, %v7788_v55  ;;  %v8448_v20 = vpop.f32.mrf.mxu1  ;;  %v9819_v6 = vadd.f32 %v17372_v59, %v9687_v45  ;;  %v18476_v54 = vld [vmem:[#allocation59_spill] sm:$0xff]  ;;  %v11809_v55 = vld [vmem:[%s15291_s13 + $0xa78] sm:$0xf]  ;;  %v18477_v45 = vld [vmem:[#allocation60_spill] sm:$0xff] }
 0x925   : > { %v8446_v30 = vadd.f32 %v8445_v32, %v8117_v18  ;;  %7829 = vmatmul.bf16.gmra.mxu3 %v11754_v40  ;;  %8158 = vmatmul.bf16.gmra.mxu0 %v11758_v2  ;;  %v9947_v41 = vmax.f32 %v9819_v6, 0.0  ;;  %v13960_v40 = vld [vmem:[%s15291_s13 + $0xaa0] sm:$0xf0]  ;;  %v13954_v2 = vld [vmem:[%s15291_s13 + $0xa74] sm:$0xf] }
 0x926   : > { %8487 = vmatmul.bf16.gmra.mxu1 %v11762_v33 }
 0x927   : > { %8816 = vmatmul.bf16.gmra.mxu2 %v11766_v49  ;;  %v8775_v50 = vadd.f32 %v8774_v35, %v8446_v30  ;;  %v11803_v49 = vld [vmem:[%s15291_s13 + $0xa9c] sm:$0xf0] }
 0x928   : > { %v7790_v56 = vpop.f32.mrf.mxu3 }
 0x929   : > { %v9688_v11 = vmul.f32 %v17369_v3, %v8775_v50  ;;  %v7791_v60 = vadd.f32 %v7790_v56, %v18476_v54  ;;  %v11802_v56 = vor.u32 %v13959_v63, %v11801_v42 }
 0x92a   : > { %v8777_v32 = vpop.f32.mrf.mxu2  ;;  %v8121_v57 = vpop.f32.mrf.mxu0 }
 0x92b   : > { %v9820_v5 = vadd.f32 %v17372_v59, %v9688_v11  ;;  %v8120_v7 = vadd.f32 %v8119_v15, %v7791_v60  ;;  %v8450_v25 = vpop.f32.mrf.mxu1  ;;  %v11798_v15 = vor.u32 %v13953_v52, %v11795_v39  ;;  %v11810_v11 = vor.u32 %v13960_v40, %v11809_v55 }
 0x92d   : > { %v9948_v29 = vmax.f32 %v9820_v5, 0.0  ;;  %v8449_v8 = vadd.f32 %v8448_v20, %v8120_v7  ;;  %v11806_v20 = vor.u32 %v13954_v2, %v11803_v49  ;;  %v13964_v49 = vld [vmem:[%s15291_s13 + $0xac4] sm:$0xf] }
 0x92f   : > { %v14516_v35 = vpack.c.bf16 %v9948_v29, %v9947_v41  ;;  %v8778_v18 = vadd.f32 %v8777_v32, %v8449_v8 }
 0x930   : > { %v7792_v33 = vpop.f32.mrf.mxu3 }
 0x931   : > { %14752 = vst [vmem:[%s17185_s23 + $0xa0] sm:$0xff] %v14516_v35   ;;  %v7793_v30 = vadd.f32 %v7792_v33, %v18477_v45  ;;  %v9689_v5 = vmul.f32 %v17369_v3, %v8778_v18  ;;  %v11839_v33 = vld [vmem:[%s15291_s13 + $0xaec] sm:$0xf0]  ;;  %v11845_v18 = vld [vmem:[%s15291_s13 + $0xac8] sm:$0xf] }
 0x932   : > { %v8779_v50 = vpop.f32.mrf.mxu2  ;;  %v8124_v6 = vpop.f32.mrf.mxu0  ;;  %v13970_v45 = vld [vmem:[%s15291_s13 + $0xaf0] sm:$0xf0] }
 0x933   : > { %v8122_v54 = vadd.f32 %v8121_v57, %v7793_v30  ;;  %v8453_v60 = vpop.f32.mrf.mxu1  ;;  %v9821_v29 = vadd.f32 %v17372_v59, %v9689_v5  ;;  %v18478_v57 = vld [vmem:[#allocation61_spill] sm:$0xff]  ;;  %v18479_v5 = vld [vmem:[#allocation62_spill] sm:$0xff] }
 0x934   : > { %v11853_v30 = vld [vmem:[%s15291_s13 + $0xad0] sm:$0xf] }
 0x935   : > { %v8451_v7 = vadd.f32 %v8450_v25, %v8122_v54  ;;  %7834 = vmatmul.bf16.gmra.mxu3 %v11798_v15  ;;  %8163 = vmatmul.bf16.gmra.mxu0 %v11802_v56  ;;  %v9949_v35 = vmax.f32 %v9821_v29, 0.0  ;;  %v13971_v15 = vld [vmem:[%s15291_s13 + $0xaf8] sm:$0xf0]  ;;  %v13965_v56 = vld [vmem:[%s15291_s13 + $0xacc] sm:$0xf] }
 0x936   : > { %8492 = vmatmul.bf16.gmra.mxu1 %v11806_v20 }
 0x937   : > { %8821 = vmatmul.bf16.gmra.mxu2 %v11810_v11  ;;  %v8780_v32 = vadd.f32 %v8779_v50, %v8451_v7  ;;  %v11847_v11 = vld [vmem:[%s15291_s13 + $0xaf4] sm:$0xf0] }
 0x938   : > { %v7795_v41 = vpop.f32.mrf.mxu3 }
 0x939   : > { %v9690_v8 = vmul.f32 %v17369_v3, %v8780_v32  ;;  %v7796_v52 = vadd.f32 %v7795_v41, %v18478_v57  ;;  %v11846_v41 = vor.u32 %v13970_v45, %v11845_v18 }
 0x93a   : > { %v8782_v25 = vpop.f32.mrf.mxu2  ;;  %v8126_v39 = vpop.f32.mrf.mxu0 }
 0x93b   : > { %v9822_v42 = vadd.f32 %v17372_v59, %v9690_v8  ;;  %v8125_v63 = vadd.f32 %v8124_v6, %v7796_v52  ;;  %v8455_v55 = vpop.f32.mrf.mxu1  ;;  %v11842_v6 = vor.u32 %v13964_v49, %v11839_v33  ;;  %v11854_v8 = vor.u32 %v13971_v15, %v11853_v30 }
 0x93d   : > { %v9950_v40 = vmax.f32 %v9822_v42, 0.0  ;;  %v8454_v2 = vadd.f32 %v8453_v60, %v8125_v63  ;;  %v11850_v60 = vor.u32 %v13965_v56, %v11847_v11  ;;  %v13975_v11 = vld [vmem:[%s15291_s13 + $0xb1c] sm:$0xf] }
 0x93f   : > { %v14521_v50 = vpack.c.bf16 %v9950_v40, %v9949_v35  ;;  %v8783_v54 = vadd.f32 %v8782_v25, %v8454_v2 }
 0x940   : > { %v7797_v20 = vpop.f32.mrf.mxu3 }
 0x941   : > { %14753 = vst [vmem:[%s17185_s23 + $0xa8] sm:$0xff] %v14521_v50   ;;  %v7798_v7 = vadd.f32 %v7797_v20, %v18479_v5  ;;  %v9691_v42 = vmul.f32 %v17369_v3, %v8783_v54  ;;  %v11883_v20 = vld [vmem:[%s15291_s13 + $0xb44] sm:$0xf0]  ;;  %v11889_v54 = vld [vmem:[%s15291_s13 + $0xb20] sm:$0xf] }
 0x942   : > { %v8784_v32 = vpop.f32.mrf.mxu2  ;;  %v8129_v29 = vpop.f32.mrf.mxu0  ;;  %v13981_v5 = vld [vmem:[%s15291_s13 + $0xb48] sm:$0xf0] }
 0x943   : > { %v8127_v57 = vadd.f32 %v8126_v39, %v7798_v7  ;;  %v8458_v52 = vpop.f32.mrf.mxu1  ;;  %v9823_v40 = vadd.f32 %v17372_v59, %v9691_v42  ;;  %v18480_v39 = vld [vmem:[#allocation63_spill] sm:$0xff]  ;;  %v11897_v7 = vld [vmem:[%s15291_s13 + $0xb28] sm:$0xf] }
 0x944   : > { %v18481_v42 = vld [vmem:[#allocation64_spill] sm:$0xff] }
 0x945   : > { %v8456_v63 = vadd.f32 %v8455_v55, %v8127_v57  ;;  %7839 = vmatmul.bf16.gmra.mxu3 %v11842_v6  ;;  %8168 = vmatmul.bf16.gmra.mxu0 %v11846_v41  ;;  %v9951_v50 = vmax.f32 %v9823_v40, 0.0  ;;  %v13982_v6 = vld [vmem:[%s15291_s13 + $0xb50] sm:$0xf0]  ;;  %v13976_v41 = vld [vmem:[%s15291_s13 + $0xb24] sm:$0xf] }
 0x946   : > { %8497 = vmatmul.bf16.gmra.mxu1 %v11850_v60 }
 0x947   : > { %8826 = vmatmul.bf16.gmra.mxu2 %v11854_v8  ;;  %v8785_v25 = vadd.f32 %v8784_v32, %v8456_v63  ;;  %v11891_v8 = vld [vmem:[%s15291_s13 + $0xb4c] sm:$0xf0] }
 0x948   : > { %v7800_v35 = vpop.f32.mrf.mxu3 }
 0x949   : > { %v9692_v2 = vmul.f32 %v17369_v3, %v8785_v25  ;;  %v7801_v49 = vadd.f32 %v7800_v35, %v18480_v39  ;;  %v11890_v35 = vor.u32 %v13981_v5, %v11889_v54 }
 0x94a   : > { %v8787_v55 = vpop.f32.mrf.mxu2  ;;  %v8131_v33 = vpop.f32.mrf.mxu0 }
 0x94b   : > { %v9824_v18 = vadd.f32 %v17372_v59, %v9692_v2  ;;  %v8130_v45 = vadd.f32 %v8129_v29, %v7801_v49  ;;  %v8460_v30 = vpop.f32.mrf.mxu1  ;;  %v11886_v29 = vor.u32 %v13975_v11, %v11883_v20  ;;  %v11898_v2 = vor.u32 %v13982_v6, %v11897_v7 }
 0x94d   : > { %v9952_v15 = vmax.f32 %v9824_v18, 0.0  ;;  %v8459_v56 = vadd.f32 %v8458_v52, %v8130_v45  ;;  %v11894_v52 = vor.u32 %v13976_v41, %v11891_v8  ;;  %v13986_v8 = vld [vmem:[%s15291_s13 + $0xb74] sm:$0xf] }
 0x94f   : > { %v14526_v32 = vpack.c.bf16 %v9952_v15, %v9951_v50  ;;  %v8788_v57 = vadd.f32 %v8787_v55, %v8459_v56 }
 0x950   : > { %v7802_v60 = vpop.f32.mrf.mxu3 }
 0x951   : > { %14754 = vst [vmem:[%s17185_s23 + $0xb0] sm:$0xff] %v14526_v32   ;;  %v7803_v63 = vadd.f32 %v7802_v60, %v18481_v42  ;;  %v9693_v18 = vmul.f32 %v17369_v3, %v8788_v57  ;;  %v11927_v60 = vld [vmem:[%s15291_s13 + $0xb9c] sm:$0xf0]  ;;  %v11933_v57 = vld [vmem:[%s15291_s13 + $0xb78] sm:$0xf] }
 0x952   : > { %v8789_v25 = vpop.f32.mrf.mxu2  ;;  %v8134_v40 = vpop.f32.mrf.mxu0  ;;  %v13992_v42 = vld [vmem:[%s15291_s13 + $0xba0] sm:$0xf0] }
 0x953   : > { %v8132_v39 = vadd.f32 %v8131_v33, %v7803_v63  ;;  %v8463_v49 = vpop.f32.mrf.mxu1  ;;  %v9825_v15 = vadd.f32 %v17372_v59, %v9693_v18  ;;  %v18482_v33 = vld [vmem:[#allocation65_spill] sm:$0xff]  ;;  %v11941_v63 = vld [vmem:[%s15291_s13 + $0xb80] sm:$0xf]  ;;  %v18483_v18 = vld [vmem:[#allocation66_spill] sm:$0xff] }
 0x955   : > { %v8461_v45 = vadd.f32 %v8460_v30, %v8132_v39  ;;  %7844 = vmatmul.bf16.gmra.mxu3 %v11886_v29  ;;  %8173 = vmatmul.bf16.gmra.mxu0 %v11890_v35  ;;  %v9953_v32 = vmax.f32 %v9825_v15, 0.0  ;;  %v13993_v29 = vld [vmem:[%s15291_s13 + $0xba8] sm:$0xf0]  ;;  %v13987_v35 = vld [vmem:[%s15291_s13 + $0xb7c] sm:$0xf] }
 0x956   : > { %8502 = vmatmul.bf16.gmra.mxu1 %v11894_v52 }
 0x957   : > { %8831 = vmatmul.bf16.gmra.mxu2 %v11898_v2  ;;  %v8790_v55 = vadd.f32 %v8789_v25, %v8461_v45  ;;  %v11935_v2 = vld [vmem:[%s15291_s13 + $0xba4] sm:$0xf0] }
 0x958   : > { %v7805_v50 = vpop.f32.mrf.mxu3 }
 0x959   : > { %v9694_v56 = vmul.f32 %v17369_v3, %v8790_v55  ;;  %v7806_v11 = vadd.f32 %v7805_v50, %v18482_v33  ;;  %v11934_v50 = vor.u32 %v13992_v42, %v11933_v57 }
 0x95a   : > { %v8792_v30 = vpop.f32.mrf.mxu2  ;;  %v8136_v20 = vpop.f32.mrf.mxu0 }
 0x95b   : > { %v9826_v54 = vadd.f32 %v17372_v59, %v9694_v56  ;;  %v8135_v5 = vadd.f32 %v8134_v40, %v7806_v11  ;;  %v8465_v7 = vpop.f32.mrf.mxu1  ;;  %v11930_v40 = vor.u32 %v13986_v8, %v11927_v60  ;;  %v11942_v56 = vor.u32 %v13993_v29, %v11941_v63 }
 0x95d   : > { %v9954_v6 = vmax.f32 %v9826_v54, 0.0  ;;  %v8464_v41 = vadd.f32 %v8463_v49, %v8135_v5  ;;  %v11938_v49 = vor.u32 %v13987_v35, %v11935_v2  ;;  %v13997_v2 = vld [vmem:[%s15291_s13 + $0xbcc] sm:$0xf] }
 0x95f   : > { %v14531_v25 = vpack.c.bf16 %v9954_v6, %v9953_v32  ;;  %v8793_v39 = vadd.f32 %v8792_v30, %v8464_v41 }
 0x960   : > { %v7807_v52 = vpop.f32.mrf.mxu3 }
 0x961   : > { %14755 = vst [vmem:[%s17185_s23 + $0xb8] sm:$0xff] %v14531_v25   ;;  %v7808_v45 = vadd.f32 %v7807_v52, %v18483_v18  ;;  %v9695_v54 = vmul.f32 %v17369_v3, %v8793_v39  ;;  %v11971_v52 = vld [vmem:[%s15291_s13 + $0xbf4] sm:$0xf0]  ;;  %v11977_v39 = vld [vmem:[%s15291_s13 + $0xbd0] sm:$0xf] }
 0x962   : > { %v8794_v55 = vpop.f32.mrf.mxu2  ;;  %v8139_v15 = vpop.f32.mrf.mxu0  ;;  %v14003_v18 = vld [vmem:[%s15291_s13 + $0xbf8] sm:$0xf0] }
 0x963   : > { %v8137_v33 = vadd.f32 %v8136_v20, %v7808_v45  ;;  %v8468_v11 = vpop.f32.mrf.mxu1  ;;  %v9827_v6 = vadd.f32 %v17372_v59, %v9695_v54  ;;  %v18484_v20 = vld [vmem:[#allocation67_spill] sm:$0xff]  ;;  %v11985_v45 = vld [vmem:[%s15291_s13 + $0xbd8] sm:$0xf]  ;;  %v18485_v54 = vld [vmem:[#allocation68_spill] sm:$0xff] }
 0x965   : > { %v8466_v5 = vadd.f32 %v8465_v7, %v8137_v33  ;;  %7849 = vmatmul.bf16.gmra.mxu3 %v11930_v40  ;;  %8178 = vmatmul.bf16.gmra.mxu0 %v11934_v50  ;;  %v9955_v25 = vmax.f32 %v9827_v6, 0.0  ;;  %v14004_v40 = vld [vmem:[%s15291_s13 + $0xc00] sm:$0xf0]  ;;  %v13998_v50 = vld [vmem:[%s15291_s13 + $0xbd4] sm:$0xf] }
 0x966   : > { %8507 = vmatmul.bf16.gmra.mxu1 %v11938_v49 }
 0x967   : > { %8836 = vmatmul.bf16.gmra.mxu2 %v11942_v56  ;;  %v8795_v30 = vadd.f32 %v8794_v55, %v8466_v5  ;;  %v11979_v56 = vld [vmem:[%s15291_s13 + $0xbfc] sm:$0xf0] }
 0x968   : > { %v7810_v32 = vpop.f32.mrf.mxu3 }
 0x969   : > { %v9696_v41 = vmul.f32 %v17369_v3, %v8795_v30  ;;  %v7811_v8 = vadd.f32 %v7810_v32, %v18484_v20  ;;  %v11978_v32 = vor.u32 %v14003_v18, %v11977_v39 }
 0x96a   : > { %v8797_v7 = vpop.f32.mrf.mxu2  ;;  %v8141_v60 = vpop.f32.mrf.mxu0 }
 0x96b   : > { %v9828_v57 = vadd.f32 %v17372_v59, %v9696_v41  ;;  %v8140_v42 = vadd.f32 %v8139_v15, %v7811_v8  ;;  %v8470_v63 = vpop.f32.mrf.mxu1  ;;  %v11974_v15 = vor.u32 %v13997_v2, %v11971_v52  ;;  %v11986_v41 = vor.u32 %v14004_v40, %v11985_v45 }
 0x96d   : > { %v9956_v29 = vmax.f32 %v9828_v57, 0.0  ;;  %v8469_v35 = vadd.f32 %v8468_v11, %v8140_v42  ;;  %v11982_v11 = vor.u32 %v13998_v50, %v11979_v56  ;;  %v14008_v56 = vld [vmem:[%s15291_s13 + $0xc24] sm:$0xf] }
 0x96f   : > { %v14536_v55 = vpack.c.bf16 %v9956_v29, %v9955_v25  ;;  %v8798_v33 = vadd.f32 %v8797_v7, %v8469_v35 }
 0x970   : > { %v7812_v49 = vpop.f32.mrf.mxu3 }
 0x971   : > { %14756 = vst [vmem:[%s17185_s23 + $0xc0] sm:$0xff] %v14536_v55   ;;  %v7813_v5 = vadd.f32 %v7812_v49, %v18485_v54  ;;  %v9697_v57 = vmul.f32 %v17369_v3, %v8798_v33  ;;  %v12015_v49 = vld [vmem:[%s15291_s13 + $0xc4c] sm:$0xf0]  ;;  %v12021_v33 = vld [vmem:[%s15291_s13 + $0xc28] sm:$0xf] }
 0x972   : > { %v8799_v30 = vpop.f32.mrf.mxu2  ;;  %v8144_v6 = vpop.f32.mrf.mxu0  ;;  %v14014_v54 = vld [vmem:[%s15291_s13 + $0xc50] sm:$0xf0] }
 0x973   : > { %v8142_v20 = vadd.f32 %v8141_v60, %v7813_v5  ;;  %v8473_v8 = vpop.f32.mrf.mxu1  ;;  %v9829_v29 = vadd.f32 %v17372_v59, %v9697_v57  ;;  %v18486_v60 = vld [vmem:[#allocation69_spill] sm:$0xff] }
 0x975   : > { %v8471_v42 = vadd.f32 %v8470_v63, %v8142_v20  ;;  %7854 = vmatmul.bf16.gmra.mxu3 %v11974_v15  ;;  %8183 = vmatmul.bf16.gmra.mxu0 %v11978_v32  ;;  %v9957_v55 = vmax.f32 %v9829_v29, 0.0  ;;  %v14009_v15 = vld [vmem:[%s15291_s13 + $0xc2c] sm:$0xf]  ;;  %v12023_v32 = vld [vmem:[%s15291_s13 + $0xc54] sm:$0xf0] }
 0x976   : > { %8512 = vmatmul.bf16.gmra.mxu1 %v11982_v11  ;;  %v18487_v20 = vld [vmem:[#allocation70_spill] sm:$0xff] }
 0x977   : > { %8841 = vmatmul.bf16.gmra.mxu2 %v11986_v41  ;;  %v8800_v7 = vadd.f32 %v8799_v30, %v8471_v42  ;;  %v14015_v30 = vld [vmem:[%s15291_s13 + $0xc58] sm:$0xf0]  ;;  %v12022_v42 = vor.u32 %v14014_v54, %v12021_v33 }
 0x978   : > { %v7815_v25 = vpop.f32.mrf.mxu3 }
 0x979   : > { %v9698_v35 = vmul.f32 %v17369_v3, %v8800_v7  ;;  %v7816_v2 = vadd.f32 %v7815_v25, %v18486_v60  ;;  %v12029_v3 = vld [vmem:[%s15291_s13 + $0xc30] sm:$0xf]  ;;  %v17568_v60 = vld [vmem:[#allocation8] ss:$0 sm:$0xff] }
 0x97a   : > { %v8802_v63 = vpop.f32.mrf.mxu2  ;;  %v8146_v52 = vpop.f32.mrf.mxu0  ;;  %v12030_v25 = vor.u32 %v14015_v30, %v12029_v3 }
 0x97b   : > { %v9830_v39 = vadd.f32 %v17372_v59, %v9698_v35  ;;  %v8145_v18 = vadd.f32 %v8144_v6, %v7816_v2  ;;  %v8475_v45 = vpop.f32.mrf.mxu1  ;;  %v12018_v6 = vor.u32 %v14008_v56, %v12015_v49 }
 0x97d   : > { %v9958_v40 = vmax.f32 %v9830_v39, 0.0  ;;  %v8474_v50 = vadd.f32 %v8473_v8, %v8145_v18  ;;  %v12026_v8 = vor.u32 %v14009_v15, %v12023_v32  ;;  %v14019_v32 = vld [vmem:[%s15291_s13 + $0xc7c] sm:$0xf] }
 0x97f   : > { %v14541_v5 = vpack.c.bf16 %v9958_v40, %v9957_v55  ;;  %v8803_v11 = vadd.f32 %v8802_v63, %v8474_v50  ;;  %v17571_v55 = vld [vmem:[#allocation9] ss:$0 sm:$0xff] }
 0x980   : > { %v7817_v41 = vpop.f32.mrf.mxu3  ;;  %v18488_v50 = vld [vmem:[#allocation71_spill] sm:$0xff] }
 0x981   : > { %14757 = vst [vmem:[%s17185_s23 + $0xc8] sm:$0xff] %v14541_v5   ;;  %v7818_v59 = vadd.f32 %v7817_v41, %v18487_v20  ;;  %v9699_v2 = vmul.f32 %v17568_v60, %v8803_v11  ;;  %v12059_v41 = vld [vmem:[%s15291_s13 + $0xca4] sm:$0xf0]  ;;  %v12065_v11 = vld [vmem:[%s15291_s13 + $0xc80] sm:$0xf] }
 0x982   : > { %v8804_v57 = vpop.f32.mrf.mxu2  ;;  %v8149_v7 = vpop.f32.mrf.mxu0  ;;  %v14025_v20 = vld [vmem:[%s15291_s13 + $0xca8] sm:$0xf0] }
 0x983   : > { %v8147_v29 = vadd.f32 %v8146_v52, %v7818_v59  ;;  %v8478_v35 = vpop.f32.mrf.mxu1  ;;  %v9831_v52 = vadd.f32 %v17571_v55, %v9699_v2  ;;  %v12073_v59 = vld [vmem:[%s15291_s13 + $0xc88] sm:$0xf] }
 0x984   : > { %v18489_v2 = vld [vmem:[#allocation72_spill] sm:$0xff] }
 0x985   : > { %v8476_v39 = vadd.f32 %v8475_v45, %v8147_v29  ;;  %7859 = vmatmul.bf16.gmra.mxu3 %v12018_v6  ;;  %8188 = vmatmul.bf16.gmra.mxu0 %v12022_v42  ;;  %v9959_v5 = vmax.f32 %v9831_v52, 0.0  ;;  %v14026_v6 = vld [vmem:[%s15291_s13 + $0xcb0] sm:$0xf0]  ;;  %v14020_v42 = vld [vmem:[%s15291_s13 + $0xc84] sm:$0xf] }
 0x986   : > { %8517 = vmatmul.bf16.gmra.mxu1 %v12026_v8 }
 0x987   : > { %8846 = vmatmul.bf16.gmra.mxu2 %v12030_v25  ;;  %v8805_v63 = vadd.f32 %v8804_v57, %v8476_v39  ;;  %v12067_v25 = vld [vmem:[%s15291_s13 + $0xcac] sm:$0xf0] }
 0x988   : > { %v7820_v18 = vpop.f32.mrf.mxu3 }
 0x989   : > { %v9700_v40 = vmul.f32 %v17568_v60, %v8805_v63  ;;  %v7821_v45 = vadd.f32 %v7820_v18, %v18488_v50  ;;  %v12066_v18 = vor.u32 %v14025_v20, %v12065_v11 }
 0x98a   : > { %v8807_v56 = vpop.f32.mrf.mxu2  ;;  %v8151_v49 = vpop.f32.mrf.mxu0 }
 0x98b   : > { %v9832_v33 = vadd.f32 %v17571_v55, %v9700_v40  ;;  %v8150_v54 = vadd.f32 %v8149_v7, %v7821_v45  ;;  %v8480_v3 = vpop.f32.mrf.mxu1  ;;  %v12062_v7 = vor.u32 %v14019_v32, %v12059_v41  ;;  %v12074_v40 = vor.u32 %v14026_v6, %v12073_v59 }
 0x98d   : > { %v9960_v30 = vmax.f32 %v9832_v33, 0.0  ;;  %v8479_v15 = vadd.f32 %v8478_v35, %v8150_v54  ;;  %v12070_v35 = vor.u32 %v14020_v42, %v12067_v25  ;;  %v14030_v25 = vld [vmem:[%s15291_s13 + $0xcd4] sm:$0xf] }
 0x98f   : > { %v14546_v57 = vpack.c.bf16 %v9960_v30, %v9959_v5  ;;  %v8808_v29 = vadd.f32 %v8807_v56, %v8479_v15 }
 0x990   : > { %v7822_v8 = vpop.f32.mrf.mxu3 }
 0x991   : > { %14758 = vst [vmem:[%s17185_s23 + $0xd0] sm:$0xff] %v14546_v57   ;;  %v7823_v39 = vadd.f32 %v7822_v8, %v18489_v2  ;;  %v9701_v33 = vmul.f32 %v17568_v60, %v8808_v29  ;;  %v12103_v8 = vld [vmem:[%s15291_s13 + $0xcfc] sm:$0xf0]  ;;  %v12109_v29 = vld [vmem:[%s15291_s13 + $0xcd8] sm:$0xf] }
 0x992   : > { %v8809_v63 = vpop.f32.mrf.mxu2  ;;  %v8154_v52 = vpop.f32.mrf.mxu0  ;;  %v14036_v2 = vld [vmem:[%s15291_s13 + $0xd00] sm:$0xf0] }
 0x993   : > { %v8152_v50 = vadd.f32 %v8151_v49, %v7823_v39  ;;  %v8483_v45 = vpop.f32.mrf.mxu1  ;;  %v9833_v30 = vadd.f32 %v17571_v55, %v9701_v33  ;;  %v18490_v49 = vld [vmem:[#allocation73_spill] sm:$0xff]  ;;  %v12117_v39 = vld [vmem:[%s15291_s13 + $0xce0] sm:$0xf]  ;;  %v18491_v33 = vld [vmem:[#allocation74_spill] sm:$0xff] }
 0x995   : > { %v8481_v54 = vadd.f32 %v8480_v3, %v8152_v50  ;;  %7864 = vmatmul.bf16.gmra.mxu3 %v12062_v7  ;;  %8193 = vmatmul.bf16.gmra.mxu0 %v12066_v18  ;;  %v9961_v57 = vmax.f32 %v9833_v30, 0.0  ;;  %v14037_v7 = vld [vmem:[%s15291_s13 + $0xd08] sm:$0xf0]  ;;  %v14031_v18 = vld [vmem:[%s15291_s13 + $0xcdc] sm:$0xf] }
 0x996   : > { %8522 = vmatmul.bf16.gmra.mxu1 %v12070_v35 }
 0x997   : > { %8851 = vmatmul.bf16.gmra.mxu2 %v12074_v40  ;;  %v8810_v56 = vadd.f32 %v8809_v63, %v8481_v54  ;;  %v12111_v40 = vld [vmem:[%s15291_s13 + $0xd04] sm:$0xf0] }
 0x998   : > { %v7825_v5 = vpop.f32.mrf.mxu3 }
 0x999   : > { %v9702_v15 = vmul.f32 %v17568_v60, %v8810_v56  ;;  %v7826_v32 = vadd.f32 %v7825_v5, %v18490_v49  ;;  %v12110_v5 = vor.u32 %v14036_v2, %v12109_v29 }
 0x99a   : > { %v8812_v3 = vpop.f32.mrf.mxu2  ;;  %v8156_v41 = vpop.f32.mrf.mxu0 }
 0x99b   : > { %v9834_v11 = vadd.f32 %v17571_v55, %v9702_v15  ;;  %v8155_v20 = vadd.f32 %v8154_v52, %v7826_v32  ;;  %v8485_v59 = vpop.f32.mrf.mxu1  ;;  %v12106_v52 = vor.u32 %v14030_v25, %v12103_v8  ;;  %v12118_v15 = vor.u32 %v14037_v7, %v12117_v39 }
 0x99d   : > { %v9962_v6 = vmax.f32 %v9834_v11, 0.0  ;;  %v8484_v42 = vadd.f32 %v8483_v45, %v8155_v20  ;;  %v12114_v45 = vor.u32 %v14031_v18, %v12111_v40  ;;  %v14041_v40 = vld [vmem:[%s15291_s13 + $0xd2c] sm:$0xf] }
 0x99f   : > { %v14551_v63 = vpack.c.bf16 %v9962_v6, %v9961_v57  ;;  %v8813_v50 = vadd.f32 %v8812_v3, %v8484_v42 }
 0x9a0   : > { %v7827_v35 = vpop.f32.mrf.mxu3 }
 0x9a1   : > { %14759 = vst [vmem:[%s17185_s23 + $0xd8] sm:$0xff] %v14551_v63   ;;  %v7828_v54 = vadd.f32 %v7827_v35, %v18491_v33  ;;  %v9703_v11 = vmul.f32 %v17568_v60, %v8813_v50  ;;  %v12147_v35 = vld [vmem:[%s15291_s13 + $0xd54] sm:$0xf0]  ;;  %v12153_v50 = vld [vmem:[%s15291_s13 + $0xd30] sm:$0xf] }
 0x9a2   : > { %v8814_v56 = vpop.f32.mrf.mxu2  ;;  %v8159_v30 = vpop.f32.mrf.mxu0  ;;  %v14047_v33 = vld [vmem:[%s15291_s13 + $0xd58] sm:$0xf0] }
 0x9a3   : > { %v8157_v49 = vadd.f32 %v8156_v41, %v7828_v54  ;;  %v8488_v32 = vpop.f32.mrf.mxu1  ;;  %v9835_v6 = vadd.f32 %v17571_v55, %v9703_v11  ;;  %v18492_v41 = vld [vmem:[#allocation75_spill] sm:$0xff]  ;;  %v12161_v54 = vld [vmem:[%s15291_s13 + $0xd38] sm:$0xf]  ;;  %v18493_v11 = vld [vmem:[#allocation76_spill] sm:$0xff] }
 0x9a5   : > { %v8486_v20 = vadd.f32 %v8485_v59, %v8157_v49  ;;  %7869 = vmatmul.bf16.gmra.mxu3 %v12106_v52  ;;  %8198 = vmatmul.bf16.gmra.mxu0 %v12110_v5  ;;  %v9963_v63 = vmax.f32 %v9835_v6, 0.0  ;;  %v14048_v52 = vld [vmem:[%s15291_s13 + $0xd60] sm:$0xf0]  ;;  %v14042_v5 = vld [vmem:[%s15291_s13 + $0xd34] sm:$0xf] }
 0x9a6   : > { %8527 = vmatmul.bf16.gmra.mxu1 %v12114_v45 }
 0x9a7   : > { %8856 = vmatmul.bf16.gmra.mxu2 %v12118_v15  ;;  %v8815_v3 = vadd.f32 %v8814_v56, %v8486_v20  ;;  %v12155_v15 = vld [vmem:[%s15291_s13 + $0xd5c] sm:$0xf0] }
 0x9a8   : > { %v7830_v57 = vpop.f32.mrf.mxu3 }
 0x9a9   : > { %v9704_v42 = vmul.f32 %v17568_v60, %v8815_v3  ;;  %v7831_v25 = vadd.f32 %v7830_v57, %v18492_v41  ;;  %v12154_v57 = vor.u32 %v14047_v33, %v12153_v50 }
 0x9aa   : > { %v8817_v59 = vpop.f32.mrf.mxu2  ;;  %v8161_v8 = vpop.f32.mrf.mxu0 }
 0x9ab   : > { %v9836_v29 = vadd.f32 %v17571_v55, %v9704_v42  ;;  %v8160_v2 = vadd.f32 %v8159_v30, %v7831_v25  ;;  %v8490_v39 = vpop.f32.mrf.mxu1  ;;  %v12150_v30 = vor.u32 %v14041_v40, %v12147_v35  ;;  %v12162_v42 = vor.u32 %v14048_v52, %v12161_v54 }
 0x9ad   : > { %v9964_v7 = vmax.f32 %v9836_v29, 0.0  ;;  %v8489_v18 = vadd.f32 %v8488_v32, %v8160_v2  ;;  %v12158_v32 = vor.u32 %v14042_v5, %v12155_v15  ;;  %v14052_v5 = vld [vmem:[%s15291_s13 + $0xd84] sm:$0xf]  ;;  %v12191_v15 = vld [vmem:[%s15291_s13 + $0xdac] sm:$0xf0] }
 0x9af   : > { %v14556_v56 = vpack.c.bf16 %v9964_v7, %v9963_v63  ;;  %v8818_v49 = vadd.f32 %v8817_v59, %v8489_v18 }
 0x9b0   : > { %v7832_v45 = vpop.f32.mrf.mxu3 }
 0x9b1   : > { %14760 = vst [vmem:[%s17185_s23 + $0xe0] sm:$0xff] %v14556_v56   ;;  %v7833_v20 = vadd.f32 %v7832_v45, %v18493_v11  ;;  %v9705_v29 = vmul.f32 %v17568_v60, %v8818_v49  ;;  %v12197_v45 = vld [vmem:[%s15291_s13 + $0xd88] sm:$0xf]  ;;  %v14058_v49 = vld [vmem:[%s15291_s13 + $0xdb0] sm:$0xf0] }
 0x9b2   : > { %v8819_v3 = vpop.f32.mrf.mxu2  ;;  %v8164_v6 = vpop.f32.mrf.mxu0  ;;  %v12205_v11 = vld [vmem:[%s15291_s13 + $0xd90] sm:$0xf] }
 0x9b3   : > { %v8162_v41 = vadd.f32 %v8161_v8, %v7833_v20  ;;  %v8493_v25 = vpop.f32.mrf.mxu1  ;;  %v9837_v7 = vadd.f32 %v17571_v55, %v9705_v29 }
 0x9b5   : > { %v8491_v2 = vadd.f32 %v8490_v39, %v8162_v41  ;;  %7874 = vmatmul.bf16.gmra.mxu3 %v12150_v30  ;;  %8203 = vmatmul.bf16.gmra.mxu0 %v12154_v57  ;;  %v9965_v54 = vmax.f32 %v9837_v7, 0.0  ;;  %v12199_v30 = vld [vmem:[%s15291_s13 + $0xdb4] sm:$0xf0] }
 0x9b6   : > { %8532 = vmatmul.bf16.gmra.mxu1 %v12158_v32  ;;  %v18494_v32 = vld [vmem:[#allocation77_spill] sm:$0xff] }
 0x9b7   : > { %8861 = vmatmul.bf16.gmra.mxu2 %v12162_v42  ;;  %v8820_v59 = vadd.f32 %v8819_v3, %v8491_v2  ;;  %v14059_v3 = vld [vmem:[%s15291_s13 + $0xdb8] sm:$0xf0]  ;;  %v12198_v2 = vor.u32 %v14058_v49, %v12197_v45 }
 0x9b8   : > { %v7835_v63 = vpop.f32.mrf.mxu3 }
 0x9b9   : > { %v9706_v18 = vmul.f32 %v17568_v60, %v8820_v59  ;;  %v7836_v8 = vadd.f32 %v7835_v63, %v16690_v38  ;;  %v14053_v38 = vld [vmem:[%s15291_s13 + $0xd8c] sm:$0xf]  ;;  %v12206_v63 = vor.u32 %v14059_v3, %v12205_v11  ;;  %v14063_v3 = vld [vmem:[%s15291_s13 + $0xddc] sm:$0xf] }
 0x9ba   : > { %v8822_v39 = vpop.f32.mrf.mxu2  ;;  %v8166_v40 = vpop.f32.mrf.mxu0 }
 0x9bb   : > { %v9838_v35 = vadd.f32 %v17571_v55, %v9706_v18  ;;  %v8165_v50 = vadd.f32 %v8164_v6, %v7836_v8  ;;  %v8495_v33 = vpop.f32.mrf.mxu1  ;;  %v12194_v6 = vor.u32 %v14052_v5, %v12191_v15 }
 0x9bd   : > { %v9966_v56 = vmax.f32 %v9838_v35, 0.0  ;;  %v8494_v52 = vadd.f32 %v8493_v25, %v8165_v50  ;;  %v12202_v25 = vor.u32 %v14053_v38, %v12199_v30  ;;  %v12235_v38 = vld [vmem:[%s15291_s13 + $0xe04] sm:$0xf0]  ;;  %v12241_v30 = vld [vmem:[%s15291_s13 + $0xde0] sm:$0xf] }
 0x9bf   : > { %v14561_v20 = vpack.c.bf16 %v9966_v56, %v9965_v54  ;;  %v8823_v42 = vadd.f32 %v8822_v39, %v8494_v52 }
 0x9c0   : > { %v7837_v57 = vpop.f32.mrf.mxu3 }
 0x9c1   : > { %14761 = vst [vmem:[%s17185_s23 + $0xe8] sm:$0xff] %v14561_v20   ;;  %v7838_v41 = vadd.f32 %v7837_v57, %v18494_v32  ;;  %v9707_v8 = vmul.f32 %v17568_v60, %v8823_v42  ;;  %v14069_v57 = vld [vmem:[%s15291_s13 + $0xe08] sm:$0xf0]  ;;  %v12249_v42 = vld [vmem:[%s15291_s13 + $0xde8] sm:$0xf] }
 0x9c2   : > { %v8824_v29 = vpop.f32.mrf.mxu2  ;;  %v8169_v59 = vpop.f32.mrf.mxu0 }
 0x9c3   : > { %v8167_v7 = vadd.f32 %v8166_v40, %v7838_v41  ;;  %v8498_v18 = vpop.f32.mrf.mxu1  ;;  %v9839_v54 = vadd.f32 %v17571_v55, %v9707_v8  ;;  %v14070_v41 = vld [vmem:[%s15291_s13 + $0xe10] sm:$0xf0]  ;;  %v12242_v8 = vor.u32 %v14069_v57, %v12241_v30 }
 0x9c5   : > { %v8496_v35 = vadd.f32 %v8495_v33, %v8167_v7  ;;  %7879 = vmatmul.bf16.gmra.mxu3 %v12194_v6  ;;  %8208 = vmatmul.bf16.gmra.mxu0 %v12198_v2  ;;  %v9967_v49 = vmax.f32 %v9839_v54, 0.0 }
 0x9c6   : > { %8537 = vmatmul.bf16.gmra.mxu1 %v12202_v25 }
 0x9c7   : > { %8866 = vmatmul.bf16.gmra.mxu2 %v12206_v63  ;;  %v8825_v39 = vadd.f32 %v8824_v29, %v8496_v35  ;;  %v12243_v29 = vld [vmem:[%s15291_s13 + $0xe0c] sm:$0xf0]  ;;  %v18495_v63 = vld [vmem:[#allocation78_spill] sm:$0xff] }
 0x9c8   : > { %v7840_v50 = vpop.f32.mrf.mxu3 }
 0x9c9   : > { %v9708_v56 = vmul.f32 %v17568_v60, %v8825_v39  ;;  %v7841_v40 = vadd.f32 %v7840_v50, %v16701_v47  ;;  %v14064_v47 = vld [vmem:[%s15291_s13 + $0xde4] sm:$0xf]  ;;  %v12250_v39 = vor.u32 %v14070_v41, %v12249_v42  ;;  %v12279_v41 = vld [vmem:[%s15291_s13 + $0xe5c] sm:$0xf0] }
 0x9ca   : > { %v8827_v33 = vpop.f32.mrf.mxu2  ;;  %v8171_v52 = vpop.f32.mrf.mxu0 }
 0x9cb   : > { %v9840_v5 = vadd.f32 %v17571_v55, %v9708_v56  ;;  %v8170_v15 = vadd.f32 %v8169_v59, %v7841_v40  ;;  %v8500_v45 = vpop.f32.mrf.mxu1  ;;  %v12238_v59 = vor.u32 %v14063_v3, %v12235_v38 }
 0x9cd   : > { %v9968_v11 = vmax.f32 %v9840_v5, 0.0  ;;  %v8499_v20 = vadd.f32 %v8498_v18, %v8170_v15  ;;  %v12246_v18 = vor.u32 %v14064_v47, %v12243_v29  ;;  %v12285_v47 = vld [vmem:[%s15291_s13 + $0xe38] sm:$0xf]  ;;  %v14080_v29 = vld [vmem:[%s15291_s13 + $0xe60] sm:$0xf0] }
 0x9cf   : > { %v14566_v32 = vpack.c.bf16 %v9968_v11, %v9967_v49  ;;  %v8828_v2 = vadd.f32 %v8827_v33, %v8499_v20 }
 0x9d0   : > { %v7842_v6 = vpop.f32.mrf.mxu3 }
 0x9d1   : > { %14762 = vst [vmem:[%s17185_s23 + $0xf0] sm:$0xff] %v14566_v32   ;;  %v7843_v25 = vadd.f32 %v7842_v6, %v18495_v63  ;;  %v9709_v56 = vmul.f32 %v17568_v60, %v8828_v2  ;;  %v14074_v32 = vld [vmem:[%s15291_s13 + $0xe34] sm:$0xf]  ;;  %v12293_v6 = vld [vmem:[%s15291_s13 + $0xe40] sm:$0xf] }
 0x9d2   : > { %v8829_v7 = vpop.f32.mrf.mxu2  ;;  %v8174_v35 = vpop.f32.mrf.mxu0  ;;  %v14081_v63 = vld [vmem:[%s15291_s13 + $0xe68] sm:$0xf0] }
 0x9d3   : > { %v8172_v50 = vadd.f32 %v8171_v52, %v7843_v25  ;;  %v8503_v54 = vpop.f32.mrf.mxu1  ;;  %v9841_v15 = vadd.f32 %v17571_v55, %v9709_v56  ;;  %v12287_v25 = vld [vmem:[%s15291_s13 + $0xe64] sm:$0xf0]  ;;  %v12294_v56 = vor.u32 %v14081_v63, %v12293_v6  ;;  %v12329_v6 = vld [vmem:[%s15291_s13 + $0xe90] sm:$0xf]  ;;  %v12337_v63 = vld [vmem:[%s15291_s13 + $0xe98] sm:$0xf] }
 0x9d5   : > { %v8501_v40 = vadd.f32 %v8500_v45, %v8172_v50  ;;  %7884 = vmatmul.bf16.gmra.mxu3 %v12238_v59  ;;  %8213 = vmatmul.bf16.gmra.mxu0 %v12242_v8  ;;  %v9969_v30 = vmax.f32 %v9841_v15, 0.0 }
 0x9d6   : > { %8542 = vmatmul.bf16.gmra.mxu1 %v12246_v18  ;;  %v12286_v18 = vor.u32 %v14080_v29, %v12285_v47  ;;  %v14085_v47 = vld [vmem:[%s15291_s13 + $0xe8c] sm:$0xf]  ;;  %v12323_v29 = vld [vmem:[%s15291_s13 + $0xeb4] sm:$0xf0] }
 0x9d7   : > { %8871 = vmatmul.bf16.gmra.mxu2 %v12250_v39  ;;  %v8830_v33 = vadd.f32 %v8829_v7, %v8501_v40 }
 0x9d8   : > { %v7845_v5 = vpop.f32.mrf.mxu3 }
 0x9d9   : > { %v9710_v49 = vmul.f32 %v17568_v60, %v8830_v33  ;;  %v7846_v52 = vadd.f32 %v7845_v5, %v16715_v58  ;;  %v14075_v58 = vld [vmem:[%s15291_s13 + $0xe3c] sm:$0xf] }
 0x9da   : > { %v8832_v45 = vpop.f32.mrf.mxu2  ;;  %v8176_v11 = vpop.f32.mrf.mxu0 }
 0x9db   : > { %v9842_v20 = vadd.f32 %v17571_v55, %v9710_v49  ;;  %v8175_v3 = vadd.f32 %v8174_v35, %v7846_v52  ;;  %v8505_v38 = vpop.f32.mrf.mxu1  ;;  %v12282_v35 = vor.u32 %v14074_v32, %v12279_v41 }
 0x9dd   : > { %v9970_v57 = vmax.f32 %v9842_v20, 0.0  ;;  %v8504_v42 = vadd.f32 %v8503_v54, %v8175_v3  ;;  %v12290_v54 = vor.u32 %v14075_v58, %v12287_v25  ;;  %v14092_v25 = vld [vmem:[%s15291_s13 + $0xec0] sm:$0xf0] }
 0x9df   : > { %v14571_v2 = vpack.c.bf16 %v9970_v57, %v9969_v30  ;;  %v8833_v59 = vadd.f32 %v8832_v45, %v8504_v42 }
 0x9e0   : > { %v7847_v7 = vpop.f32.mrf.mxu3 }
 0x9e1   : > { %14763 = vst [vmem:[%s17185_s23 + $0xf8] sm:$0xff] %v14571_v2   ;;  %v7848_v8 = vadd.f32 %v7847_v7, %v16721_v46  ;;  %v9711_v5 = vmul.f32 %v17568_v60, %v8833_v59  ;;  %v14091_v2 = vld [vmem:[%s15291_s13 + $0xeb8] sm:$0xf0]  ;;  %v12331_v7 = vld [vmem:[%s15291_s13 + $0xebc] sm:$0xf0] }
 0x9e2   : > { %v8834_v39 = vpop.f32.mrf.mxu2  ;;  %v8179_v50 = vpop.f32.mrf.mxu0 }
 0x9e3   : > { %v8177_v40 = vadd.f32 %v8176_v11, %v7848_v8  ;;  %v8508_v33 = vpop.f32.mrf.mxu1  ;;  %v9843_v52 = vadd.f32 %v17571_v55, %v9711_v5 }
 0x9e5   : > { %v8506_v15 = vadd.f32 %v8505_v38, %v8177_v40  ;;  %7889 = vmatmul.bf16.gmra.mxu3 %v12282_v35  ;;  %8218 = vmatmul.bf16.gmra.mxu0 %v12286_v18  ;;  %v9971_v42 = vmax.f32 %v9843_v52, 0.0  ;;  %v12326_v18 = vor.u32 %v14085_v47, %v12323_v29  ;;  %v14096_v47 = vld [vmem:[%s15291_s13 + $0xee4] sm:$0xf]  ;;  %v12367_v29 = vld [vmem:[%s15291_s13 + $0xf0c] sm:$0xf0] }
 0x9e6   : > { %8547 = vmatmul.bf16.gmra.mxu1 %v12290_v54  ;;  %v12338_v54 = vor.u32 %v14092_v25, %v12337_v63  ;;  %v12381_v63 = vld [vmem:[%s15291_s13 + $0xef0] sm:$0xf]  ;;  %v14103_v25 = vld [vmem:[%s15291_s13 + $0xf18] sm:$0xf0] }
 0x9e7   : > { %8876 = vmatmul.bf16.gmra.mxu2 %v12294_v56  ;;  %v8835_v49 = vadd.f32 %v8834_v39, %v8506_v15 }
 0x9e8   : > { %v7850_v46 = vpop.f32.mrf.mxu3 }
 0x9e9   : > { %v9712_v45 = vmul.f32 %v17568_v60, %v8835_v49  ;;  %v7851_v11 = vadd.f32 %v7850_v46, %v16729_v9  ;;  %v14086_v9 = vld [vmem:[%s15291_s13 + $0xe94] sm:$0xf] }
 0x9ea   : > { %v8837_v20 = vpop.f32.mrf.mxu2  ;;  %v8181_v3 = vpop.f32.mrf.mxu0  ;;  %v12334_v40 = vor.u32 %v14086_v9, %v12331_v7  ;;  %v12375_v9 = vld [vmem:[%s15291_s13 + $0xf14] sm:$0xf0] }
 0x9eb   : > { %v9844_v38 = vadd.f32 %v17571_v55, %v9712_v45  ;;  %v8180_v30 = vadd.f32 %v8179_v50, %v7851_v11  ;;  %v8510_v57 = vpop.f32.mrf.mxu1  ;;  %v12330_v50 = vor.u32 %v14091_v2, %v12329_v6  ;;  %v12373_v6 = vld [vmem:[%s15291_s13 + $0xee8] sm:$0xf]  ;;  %v14102_v2 = vld [vmem:[%s15291_s13 + $0xf10] sm:$0xf0] }
 0x9ed   : > { %v9972_v32 = vmax.f32 %v9844_v38, 0.0  ;;  %v8509_v41 = vadd.f32 %v8508_v33, %v8180_v30 }
 0x9ef   : > { %v14576_v58 = vpack.c.bf16 %v9972_v32, %v9971_v42  ;;  %v8838_v8 = vadd.f32 %v8837_v20, %v8509_v41 }
 0x9f0   : > { %v7852_v59 = vpop.f32.mrf.mxu3 }
 0x9f1   : > { %14764 = vst [vmem:[%s17185_s23 + $0x100] sm:$0xff] %v14576_v58   ;;  %v7853_v39 = vadd.f32 %v7852_v59, %v16735_v27  ;;  %v9713_v15 = vmul.f32 %v17568_v60, %v8838_v8 }
 0x9f2   : > { %v8839_v35 = vpop.f32.mrf.mxu2  ;;  %v8184_v56 = vpop.f32.mrf.mxu0 }
 0x9f3   : > { %v8182_v33 = vadd.f32 %v8181_v3, %v7853_v39  ;;  %v8513_v5 = vpop.f32.mrf.mxu1  ;;  %v9845_v52 = vadd.f32 %v17571_v55, %v9713_v15 }
 0x9f5   : > { %v8511_v49 = vadd.f32 %v8510_v57, %v8182_v33  ;;  %7894 = vmatmul.bf16.gmra.mxu3 %v12326_v18  ;;  %8223 = vmatmul.bf16.gmra.mxu0 %v12330_v50  ;;  %v9973_v42 = vmax.f32 %v9845_v52, 0.0  ;;  %v12374_v18 = vor.u32 %v14102_v2, %v12373_v6  ;;  %v12425_v6 = vld [vmem:[%s15291_s13 + $0xf48] sm:$0xf] }
 0x9f6   : > { %8552 = vmatmul.bf16.gmra.mxu1 %v12334_v40 }
 0x9f7   : > { %8881 = vmatmul.bf16.gmra.mxu2 %v12338_v54  ;;  %v8840_v46 = vadd.f32 %v8839_v35, %v8511_v49  ;;  %v12370_v35 = vor.u32 %v14096_v47, %v12367_v29  ;;  %v12417_v47 = vld [vmem:[%s15291_s13 + $0xf40] sm:$0xf]  ;;  %v14113_v29 = vld [vmem:[%s15291_s13 + $0xf68] sm:$0xf0] }
 0x9f8   : > { %v7855_v27 = vpop.f32.mrf.mxu3 }
 0x9f9   : > { %v9714_v45 = vmul.f32 %v17568_v60, %v8840_v46  ;;  %v7856_v11 = vadd.f32 %v7855_v27, %v16743_v34  ;;  %v14097_v34 = vld [vmem:[%s15291_s13 + $0xeec] sm:$0xf] }
 0x9fa   : > { %v8842_v20 = vpop.f32.mrf.mxu2  ;;  %v8186_v3 = vpop.f32.mrf.mxu0  ;;  %v12378_v54 = vor.u32 %v14097_v34, %v12375_v9 }
 0x9fb   : > { %v9846_v38 = vadd.f32 %v17571_v55, %v9714_v45  ;;  %v8185_v30 = vadd.f32 %v8184_v56, %v7856_v11  ;;  %v8515_v57 = vpop.f32.mrf.mxu1  ;;  %v12382_v56 = vor.u32 %v14103_v25, %v12381_v63  ;;  %v14114_v63 = vld [vmem:[%s15291_s13 + $0xf70] sm:$0xf0] }
 0x9fd   : > { %v9974_v32 = vmax.f32 %v9846_v38, 0.0  ;;  %v8514_v41 = vadd.f32 %v8513_v5, %v8185_v30 }
 0x9ff   : > { %v14581_v58 = vpack.c.bf16 %v9974_v32, %v9973_v42  ;;  %v8843_v59 = vadd.f32 %v8842_v20, %v8514_v41  ;;  %v14107_v32 = vld [vmem:[%s15291_s13 + $0xf3c] sm:$0xf]  ;;  %v12411_v41 = vld [vmem:[%s15291_s13 + $0xf64] sm:$0xf0] }
 0xa00   : > { %v7857_v7 = vpop.f32.mrf.mxu3 }
 0xa01   : > { %14765 = vst [vmem:[%s17185_s23 + $0x108] sm:$0xff] %v14581_v58   ;;  %v7858_v8 = vadd.f32 %v7857_v7, %v16749_v51  ;;  %v9715_v5 = vmul.f32 %v17568_v60, %v8843_v59  ;;  %v12419_v58 = vld [vmem:[%s15291_s13 + $0xf6c] sm:$0xf0]  ;;  %v12414_v59 = vor.u32 %v14107_v32, %v12411_v41  ;;  %v12469_v32 = vld [vmem:[%s15291_s13 + $0xfa0] sm:$0xf] }
 0xa02   : > { %v8844_v39 = vpop.f32.mrf.mxu2  ;;  %v8189_v50 = vpop.f32.mrf.mxu0 }
 0xa03   : > { %v8187_v40 = vadd.f32 %v8186_v3, %v7858_v8  ;;  %v8518_v33 = vpop.f32.mrf.mxu1  ;;  %v9847_v46 = vadd.f32 %v17571_v55, %v9715_v5  ;;  %v12418_v8 = vor.u32 %v14113_v29, %v12417_v47  ;;  %v14125_v47 = vld [vmem:[%s15291_s13 + $0xfc8] sm:$0xf0]  ;;  %v12463_v29 = vld [vmem:[%s15291_s13 + $0xfc4] sm:$0xf0] }
 0xa05   : > { %v8516_v15 = vadd.f32 %v8515_v57, %v8187_v40  ;;  %7899 = vmatmul.bf16.gmra.mxu3 %v12370_v35  ;;  %8228 = vmatmul.bf16.gmra.mxu0 %v12374_v18  ;;  %v9975_v30 = vmax.f32 %v9847_v46, 0.0  ;;  %v12426_v35 = vor.u32 %v14114_v63, %v12425_v6 }
 0xa06   : > { %8557 = vmatmul.bf16.gmra.mxu1 %v12378_v54 }
 0xa07   : > { %8886 = vmatmul.bf16.gmra.mxu2 %v12382_v56  ;;  %v8845_v49 = vadd.f32 %v8844_v39, %v8516_v15 }
 0xa08   : > { %v7860_v51 = vpop.f32.mrf.mxu3 }
 0xa09   : > { %v9716_v27 = vmul.f32 %v17568_v60, %v8845_v49  ;;  %v7861_v52 = vadd.f32 %v7860_v51, %v16757_v31  ;;  %v14108_v31 = vld [vmem:[%s15291_s13 + $0xf44] sm:$0xf] }
 0xa0a   : > { %v8847_v45 = vpop.f32.mrf.mxu2  ;;  %v8191_v11 = vpop.f32.mrf.mxu0  ;;  %v12422_v18 = vor.u32 %v14108_v31, %v12419_v58 }
 0xa0b   : > { %v9848_v20 = vadd.f32 %v17571_v55, %v9716_v27  ;;  %v8190_v3 = vadd.f32 %v8189_v50, %v7861_v52  ;;  %v8520_v38 = vpop.f32.mrf.mxu1 }
 0xa0d   : > { %v9976_v57 = vmax.f32 %v9848_v20, 0.0  ;;  %v8519_v42 = vadd.f32 %v8518_v33, %v8190_v3 }
 0xa0f   : > { %v14586_v2 = vpack.c.bf16 %v9976_v57, %v9975_v30  ;;  %v8848_v34 = vadd.f32 %v8847_v45, %v8519_v42  ;;  %v12455_v30 = vld [vmem:[%s15291_s13 + $0xfbc] sm:$0xf0]  ;;  %v12461_v57 = vld [vmem:[%s15291_s13 + $0xf98] sm:$0xf]  ;;  %v14124_v42 = vld [vmem:[%s15291_s13 + $0xfc0] sm:$0xf0] }
 0xa10   : > { %v7862_v25 = vpop.f32.mrf.mxu3 }
 0xa11   : > { %14766 = vst [vmem:[%s17185_s23 + $0x110] sm:$0xff] %v14586_v2   ;;  %v7863_v9 = vadd.f32 %v7862_v25, %v16763_v4  ;;  %v9717_v54 = vmul.f32 %v17568_v60, %v8848_v34  ;;  %v12462_v25 = vor.u32 %v14124_v42, %v12461_v57 }
 0xa12   : > { %v8849_v7 = vpop.f32.mrf.mxu2  ;;  %v8194_v39 = vpop.f32.mrf.mxu0 }
 0xa13   : > { %v8192_v50 = vadd.f32 %v8191_v11, %v7863_v9  ;;  %v8523_v56 = vpop.f32.mrf.mxu1  ;;  %v9849_v5 = vadd.f32 %v17571_v55, %v9717_v54  ;;  %v12470_v9 = vor.u32 %v14125_v47, %v12469_v32  ;;  %v18496_v32 = vld [vmem:[#allocation79_spill] sm:$0xff] }
 0xa15   : > { %v8521_v40 = vadd.f32 %v8520_v38, %v8192_v50  ;;  %7904 = vmatmul.bf16.gmra.mxu3 %v12414_v59  ;;  %8233 = vmatmul.bf16.gmra.mxu0 %v12418_v8  ;;  %v9977_v11 = vmax.f32 %v9849_v5, 0.0  ;;  %v14118_v38 = vld [vmem:[%s15291_s13 + $0xf94] sm:$0xf] }
 0xa16   : > { %8562 = vmatmul.bf16.gmra.mxu1 %v12422_v18  ;;  %v12458_v58 = vor.u32 %v14118_v38, %v12455_v30  ;;  %v14136_v38 = vld [vmem:[%s15291_s13 + $0x1020] sm:$0xf0]  ;;  %v12507_v30 = vld [vmem:[%s15291_s13 + $0x101c] sm:$0xf0] }
 0xa17   : > { %8891 = vmatmul.bf16.gmra.mxu2 %v12426_v35  ;;  %v8850_v33 = vadd.f32 %v8849_v7, %v8521_v40 }
 0xa18   : > { %v7865_v4 = vpop.f32.mrf.mxu3 }
 0xa19   : > { %v9718_v15 = vmul.f32 %v17568_v60, %v8850_v33  ;;  %v7866_v49 = vadd.f32 %v7865_v4, %v16771_v62  ;;  %v14119_v62 = vld [vmem:[%s15291_s13 + $0xf9c] sm:$0xf] }
 0xa1a   : > { %v8852_v51 = vpop.f32.mrf.mxu2  ;;  %v8196_v46 = vpop.f32.mrf.mxu0  ;;  %v12466_v7 = vor.u32 %v14119_v62, %v12463_v29 }
 0xa1b   : > { %v9850_v27 = vadd.f32 %v17571_v55, %v9718_v15  ;;  %v8195_v52 = vadd.f32 %v8194_v39, %v7866_v49  ;;  %v8525_v45 = vpop.f32.mrf.mxu1 }
 0xa1d   : > { %v9978_v20 = vmax.f32 %v9850_v27, 0.0  ;;  %v8524_v3 = vadd.f32 %v8523_v56, %v8195_v52  ;;  %v14129_v27 = vld [vmem:[%s15291_s13 + $0xfec] sm:$0xf]  ;;  %v12499_v52 = vld [vmem:[%s15291_s13 + $0x1014] sm:$0xf0] }
 0xa1e   : > { %v12502_v62 = vor.u32 %v14129_v27, %v12499_v52  ;;  %v14147_v27 = vld [vmem:[%s15291_s13 + $0x1078] sm:$0xf0]  ;;  %v12551_v52 = vld [vmem:[%s15291_s13 + $0x1074] sm:$0xf0] }
 0xa1f   : > { %v14591_v41 = vpack.c.bf16 %v9978_v20, %v9977_v11  ;;  %v8853_v2 = vadd.f32 %v8852_v51, %v8524_v3  ;;  %v14135_v11 = vld [vmem:[%s15291_s13 + $0x1018] sm:$0xf0]  ;;  %v12513_v20 = vld [vmem:[%s15291_s13 + $0xff8] sm:$0xf] }
 0xa20   : > { %v7867_v6 = vpop.f32.mrf.mxu3 }
 0xa21   : > { %14767 = vst [vmem:[%s17185_s23 + $0x118] sm:$0xff] %v14591_v41   ;;  %v7868_v63 = vadd.f32 %v7867_v6, %v16777_v44  ;;  %v9719_v39 = vmul.f32 %v17568_v60, %v8853_v2  ;;  %v12514_v2 = vor.u32 %v14136_v38, %v12513_v20 }
 0xa22   : > { %v8854_v31 = vpop.f32.mrf.mxu2  ;;  %v8199_v34 = vpop.f32.mrf.mxu0 }
 0xa23   : > { %v8197_v59 = vadd.f32 %v8196_v46, %v7868_v63  ;;  %v8528_v8 = vpop.f32.mrf.mxu1  ;;  %v9851_v50 = vadd.f32 %v17571_v55, %v9719_v39 }
 0xa25   : > { %v8526_v35 = vadd.f32 %v8525_v45, %v8197_v59  ;;  %7909 = vmatmul.bf16.gmra.mxu3 %v12458_v58  ;;  %8238 = vmatmul.bf16.gmra.mxu0 %v12462_v25  ;;  %v9979_v49 = vmax.f32 %v9851_v50, 0.0  ;;  %v12505_v45 = vld [vmem:[%s15291_s13 + $0xff0] sm:$0xf] }
 0xa26   : > { %8567 = vmatmul.bf16.gmra.mxu1 %v12466_v7  ;;  %v12506_v29 = vor.u32 %v14135_v11, %v12505_v45 }
 0xa27   : > { %8896 = vmatmul.bf16.gmra.mxu2 %v12470_v9  ;;  %v8855_v18 = vadd.f32 %v8854_v31, %v8526_v35 }
 0xa28   : > { %v7870_v44 = vpop.f32.mrf.mxu3 }
 0xa29   : > { %v9720_v56 = vmul.f32 %v17568_v60, %v8855_v18  ;;  %v7871_v54 = vadd.f32 %v7870_v44, %v16785_v61  ;;  %v14130_v61 = vld [vmem:[%s15291_s13 + $0xff4] sm:$0xf] }
 0xa2a   : > { %v8857_v40 = vpop.f32.mrf.mxu2  ;;  %v8201_v33 = vpop.f32.mrf.mxu0  ;;  %v12510_v63 = vor.u32 %v14130_v61, %v12507_v30 }
 0xa2b   : > { %v9852_v4 = vadd.f32 %v17571_v55, %v9720_v56  ;;  %v8200_v5 = vadd.f32 %v8199_v34, %v7871_v54  ;;  %v8530_v15 = vpop.f32.mrf.mxu1 }
 0xa2d   : > { %v9980_v51 = vmax.f32 %v9852_v4, 0.0  ;;  %v8529_v46 = vadd.f32 %v8528_v8, %v8200_v5  ;;  %v14140_v4 = vld [vmem:[%s15291_s13 + $0x1044] sm:$0xf]  ;;  %v12543_v5 = vld [vmem:[%s15291_s13 + $0x106c] sm:$0xf0] }
 0xa2e   : > { %v12546_v38 = vor.u32 %v14140_v4, %v12543_v5 }
 0xa2f   : > { %v14596_v3 = vpack.c.bf16 %v9980_v51, %v9979_v49  ;;  %v8858_v42 = vadd.f32 %v8857_v40, %v8529_v46  ;;  %v14146_v49 = vld [vmem:[%s15291_s13 + $0x1070] sm:$0xf0]  ;;  %v12557_v51 = vld [vmem:[%s15291_s13 + $0x1050] sm:$0xf] }
 0xa30   : > { %v7872_v57 = vpop.f32.mrf.mxu3 }
 0xa31   : > { %14768 = vst [vmem:[%s17185_s23 + $0x120] sm:$0xff] %v14596_v3   ;;  %v7873_v41 = vadd.f32 %v7872_v57, %v18496_v32  ;;  %v9721_v25 = vmul.f32 %v17568_v60, %v8858_v42  ;;  %v12558_v57 = vor.u32 %v14147_v27, %v12557_v51 }
 0xa32   : > { %v8859_v47 = vpop.f32.mrf.mxu2  ;;  %v8204_v6 = vpop.f32.mrf.mxu0 }
 0xa33   : > { %v8202_v31 = vadd.f32 %v8201_v33, %v7873_v41  ;;  %v8533_v58 = vpop.f32.mrf.mxu1  ;;  %v9853_v59 = vadd.f32 %v17571_v55, %v9721_v25 }
 0xa35   : > { %v8531_v34 = vadd.f32 %v8530_v15, %v8202_v31  ;;  %7914 = vmatmul.bf16.gmra.mxu3 %v12502_v62  ;;  %8243 = vmatmul.bf16.gmra.mxu0 %v12506_v29  ;;  %v9981_v54 = vmax.f32 %v9853_v59, 0.0  ;;  %v12549_v15 = vld [vmem:[%s15291_s13 + $0x1048] sm:$0xf] }
 0xa36   : > { %8572 = vmatmul.bf16.gmra.mxu1 %v12510_v63  ;;  %v12550_v61 = vor.u32 %v14146_v49, %v12549_v15 }
 0xa37   : > { %8901 = vmatmul.bf16.gmra.mxu2 %v12514_v2  ;;  %v8860_v9 = vadd.f32 %v8859_v47, %v8531_v34 }
 0xa38   : > { %v7875_v7 = vpop.f32.mrf.mxu3 }
 0xa39   : > { %v9722_v8 = vmul.f32 %v17568_v60, %v8860_v9  ;;  %v7876_v39 = vadd.f32 %v7875_v7, %v16802_v1  ;;  %v14141_v1 = vld [vmem:[%s15291_s13 + $0x104c] sm:$0xf] }
 0xa3a   : > { %v8862_v35 = vpop.f32.mrf.mxu2  ;;  %v8206_v18 = vpop.f32.mrf.mxu0  ;;  %v12554_v42 = vor.u32 %v14141_v1, %v12551_v52  ;;  %v17767_v52 = vld [vmem:[#allocation8] ss:$0 sm:$0xff] }
 0xa3b   : > { %v9854_v44 = vadd.f32 %v17571_v55, %v9722_v8  ;;  %v8205_v50 = vadd.f32 %v8204_v6, %v7876_v39  ;;  %v8535_v56 = vpop.f32.mrf.mxu1  ;;  %v14151_v39 = vld [vmem:[%s15291_s13 + $0x109c] sm:$0xf] }
 0xa3d   : > { %v9982_v40 = vmax.f32 %v9854_v44, 0.0  ;;  %v8534_v33 = vadd.f32 %v8533_v58, %v8205_v50  ;;  %v14157_v44 = vld [vmem:[%s15291_s13 + $0x10c8] sm:$0xf0] }
 0xa3f   : > { %v14601_v46 = vpack.c.bf16 %v9982_v40, %v9981_v54  ;;  %v8863_v11 = vadd.f32 %v8862_v35, %v8534_v33  ;;  %v12587_v35 = vld [vmem:[%s15291_s13 + $0x10c4] sm:$0xf0]  ;;  %v12595_v54 = vld [vmem:[%s15291_s13 + $0x10cc] sm:$0xf0] }
 0xa40   : > { %v7877_v45 = vpop.f32.mrf.mxu3  ;;  %v12590_v5 = vor.u32 %v14151_v39, %v12587_v35 }
 0xa41   : > { %14769 = vst [vmem:[%s17185_s23 + $0x128] sm:$0xff] %v14601_v46   ;;  %v7878_v20 = vadd.f32 %v7877_v45, %v16805_v22  ;;  %v9723_v47 = vmul.f32 %v17568_v60, %v8863_v11 }
 0xa42   : > { %v8864_v3 = vpop.f32.mrf.mxu2  ;;  %v8209_v30 = vpop.f32.mrf.mxu0 }
 0xa43   : > { %v8207_v32 = vadd.f32 %v8206_v18, %v7878_v20  ;;  %v8538_v41 = vpop.f32.mrf.mxu1  ;;  %v9855_v6 = vadd.f32 %v17571_v55, %v9723_v47  ;;  %v12593_v18 = vld [vmem:[%s15291_s13 + $0x10a0] sm:$0xf] }
 0xa44   : > { %v12594_v15 = vor.u32 %v14157_v44, %v12593_v18 }
 0xa45   : > { %v8536_v62 = vadd.f32 %v8535_v56, %v8207_v32  ;;  %7919 = vmatmul.bf16.gmra.mxu3 %v12546_v38  ;;  %8248 = vmatmul.bf16.gmra.mxu0 %v12550_v61  ;;  %v9983_v7 = vmax.f32 %v9855_v6, 0.0  ;;  %v14158_v56 = vld [vmem:[%s15291_s13 + $0x10d0] sm:$0xf0] }
 0xa46   : > { %8577 = vmatmul.bf16.gmra.mxu1 %v12554_v42  ;;  %v14162_v6 = vld [vmem:[%s15291_s13 + $0x10f4] sm:$0xf] }
 0xa47   : > { %8906 = vmatmul.bf16.gmra.mxu2 %v12558_v57  ;;  %v8865_v29 = vadd.f32 %v8864_v3, %v8536_v62  ;;  %v17770_v3 = vld [vmem:[#allocation9] ss:$0 sm:$0xff] }
 0xa48   : > { %v7880_v22 = vpop.f32.mrf.mxu3 }
 0xa49   : > { %v9724_v2 = vmul.f32 %v17568_v60, %v8865_v29  ;;  %v7881_v63 = vadd.f32 %v7880_v22, %v16813_v53  ;;  %v12601_v60 = vld [vmem:[%s15291_s13 + $0x10a8] sm:$0xf]  ;;  %v14152_v53 = vld [vmem:[%s15291_s13 + $0x10a4] sm:$0xf] }
 0xa4a   : > { %v8867_v31 = vpop.f32.mrf.mxu2  ;;  %v8211_v58 = vpop.f32.mrf.mxu0  ;;  %v12602_v51 = vor.u32 %v14158_v56, %v12601_v60  ;;  %v12598_v46 = vor.u32 %v14152_v53, %v12595_v54 }
 0xa4b   : > { %v9856_v25 = vadd.f32 %v17571_v55, %v9724_v2  ;;  %v8210_v34 = vadd.f32 %v8209_v30, %v7881_v63  ;;  %v8540_v9 = vpop.f32.mrf.mxu1  ;;  %v12631_v2 = vld [vmem:[%s15291_s13 + $0x111c] sm:$0xf0]  ;;  %v12637_v63 = vld [vmem:[%s15291_s13 + $0x10f8] sm:$0xf] }
 0xa4c   : > { %v12634_v35 = vor.u32 %v14162_v6, %v12631_v2 }
 0xa4d   : > { %v9984_v59 = vmax.f32 %v9856_v25, 0.0  ;;  %v8539_v8 = vadd.f32 %v8538_v41, %v8210_v34  ;;  %v14169_v34 = vld [vmem:[%s15291_s13 + $0x1128] sm:$0xf0] }
 0xa4f   : > { %v14606_v50 = vpack.c.bf16 %v9984_v59, %v9983_v7  ;;  %v8868_v33 = vadd.f32 %v8867_v31, %v8539_v8  ;;  %v14168_v31 = vld [vmem:[%s15291_s13 + $0x1120] sm:$0xf0] }
 0xa50   : > { %v7882_v40 = vpop.f32.mrf.mxu3  ;;  %v12638_v18 = vor.u32 %v14168_v31, %v12637_v63 }
 0xa51   : > { %14770 = vst [vmem:[%s17185_s23 + $0x130] sm:$0xff] %v14606_v50   ;;  %v7883_v55 = vadd.f32 %v7882_v40, %v16819_v12  ;;  %v9725_v45 = vmul.f32 %v17767_v52, %v8868_v33 }
 0xa52   : > { %v8869_v4 = vpop.f32.mrf.mxu2  ;;  %v8214_v49 = vpop.f32.mrf.mxu0 }
 0xa53   : > { %v8212_v27 = vadd.f32 %v8211_v58, %v7883_v55  ;;  %v8543_v1 = vpop.f32.mrf.mxu1  ;;  %v9857_v38 = vadd.f32 %v17770_v3, %v9725_v45  ;;  %v12645_v58 = vld [vmem:[%s15291_s13 + $0x1100] sm:$0xf] }
 0xa54   : > { %v12646_v60 = vor.u32 %v14169_v34, %v12645_v58 }
 0xa55   : > { %v8541_v11 = vadd.f32 %v8540_v9, %v8212_v27  ;;  %7924 = vmatmul.bf16.gmra.mxu3 %v12590_v5  ;;  %8253 = vmatmul.bf16.gmra.mxu0 %v12594_v15  ;;  %v9985_v62 = vmax.f32 %v9857_v38, 0.0  ;;  %v12639_v9 = vld [vmem:[%s15291_s13 + $0x1124] sm:$0xf0]  ;;  %v12681_v38 = vld [vmem:[%s15291_s13 + $0x1150] sm:$0xf] }
 0xa56   : > { %8582 = vmatmul.bf16.gmra.mxu1 %v12598_v46 }
 0xa57   : > { %8911 = vmatmul.bf16.gmra.mxu2 %v12602_v51  ;;  %v8870_v12 = vadd.f32 %v8869_v4, %v8541_v11 }
 0xa58   : > { %v7885_v20 = vpop.f32.mrf.mxu3 }
 0xa59   : > { %v9726_v61 = vmul.f32 %v17767_v52, %v8870_v12  ;;  %v7886_v30 = vadd.f32 %v7885_v20, %v16827_v13  ;;  %v14163_v13 = vld [vmem:[%s15291_s13 + $0x10fc] sm:$0xf]  ;;  %v14173_v12 = vld [vmem:[%s15291_s13 + $0x114c] sm:$0xf]  ;;  %v12675_v20 = vld [vmem:[%s15291_s13 + $0x1174] sm:$0xf0] }
 0xa5a   : > { %v8872_v57 = vpop.f32.mrf.mxu2  ;;  %v8216_v42 = vpop.f32.mrf.mxu0  ;;  %v12642_v50 = vor.u32 %v14163_v13, %v12639_v9 }
 0xa5b   : > { %v9858_v32 = vadd.f32 %v17770_v3, %v9726_v61  ;;  %v8215_v41 = vadd.f32 %v8214_v49, %v7886_v30  ;;  %v8545_v47 = vpop.f32.mrf.mxu1  ;;  %v14179_v61 = vld [vmem:[%s15291_s13 + $0x1178] sm:$0xf0]  ;;  %v12689_v30 = vld [vmem:[%s15291_s13 + $0x1158] sm:$0xf] }
 0xa5c   : > { %v12682_v6 = vor.u32 %v14179_v61, %v12681_v38 }
 0xa5d   : > { %v9986_v29 = vmax.f32 %v9858_v32, 0.0  ;;  %v8544_v22 = vadd.f32 %v8543_v1, %v8215_v41  ;;  %v12683_v32 = vld [vmem:[%s15291_s13 + $0x117c] sm:$0xf0] }
 0xa5f   : > { %v14611_v25 = vpack.c.bf16 %v9986_v29, %v9985_v62  ;;  %v8873_v59 = vadd.f32 %v8872_v57, %v8544_v22  ;;  %v12678_v22 = vor.u32 %v14173_v12, %v12675_v20 }
 0xa60   : > { %v7887_v7 = vpop.f32.mrf.mxu3 }
 0xa61   : > { %14771 = vst [vmem:[%s17185_s23 + $0x138] sm:$0xff] %v14611_v25   ;;  %v7888_v8 = vadd.f32 %v7887_v7, %v16833_v43  ;;  %v9727_v54 = vmul.f32 %v17767_v52, %v8873_v59 }
 0xa62   : > { %v8874_v39 = vpop.f32.mrf.mxu2  ;;  %v8219_v44 = vpop.f32.mrf.mxu0 }
 0xa63   : > { %v8217_v56 = vadd.f32 %v8216_v42, %v7888_v8  ;;  %v8548_v53 = vpop.f32.mrf.mxu1  ;;  %v9859_v55 = vadd.f32 %v17770_v3, %v9727_v54  ;;  %v14180_v42 = vld [vmem:[%s15291_s13 + $0x1180] sm:$0xf0] }
 0xa64   : > { %v12690_v63 = vor.u32 %v14180_v42, %v12689_v30  ;;  %v14184_v54 = vld [vmem:[%s15291_s13 + $0x11a4] sm:$0xf] }
 0xa65   : > { %v8546_v40 = vadd.f32 %v8545_v47, %v8217_v56  ;;  %7929 = vmatmul.bf16.gmra.mxu3 %v12634_v35  ;;  %8258 = vmatmul.bf16.gmra.mxu0 %v12638_v18  ;;  %v9987_v1 = vmax.f32 %v9859_v55, 0.0  ;;  %v12733_v55 = vld [vmem:[%s15291_s13 + $0x11b0] sm:$0xf] }
 0xa66   : > { %8587 = vmatmul.bf16.gmra.mxu1 %v12642_v50 }
 0xa67   : > { %8916 = vmatmul.bf16.gmra.mxu2 %v12646_v60  ;;  %v8875_v33 = vadd.f32 %v8874_v39, %v8546_v40  ;;  %v12719_v40 = vld [vmem:[%s15291_s13 + $0x11cc] sm:$0xf0] }
 0xa68   : > { %v7890_v43 = vpop.f32.mrf.mxu3 }
 0xa69   : > { %v9728_v4 = vmul.f32 %v17767_v52, %v8875_v33  ;;  %v7891_v5 = vadd.f32 %v7890_v43, %v16841_v21  ;;  %v14174_v21 = vld [vmem:[%s15291_s13 + $0x1154] sm:$0xf]  ;;  %v12725_v33 = vld [vmem:[%s15291_s13 + $0x11a8] sm:$0xf] }
 0xa6a   : > { %v8877_v15 = vpop.f32.mrf.mxu2  ;;  %v8221_v49 = vpop.f32.mrf.mxu0  ;;  %v12686_v31 = vor.u32 %v14174_v21, %v12683_v32  ;;  %v14190_v43 = vld [vmem:[%s15291_s13 + $0x11d0] sm:$0xf0] }
 0xa6b   : > { %v9860_v51 = vadd.f32 %v17770_v3, %v9728_v4  ;;  %v8220_v46 = vadd.f32 %v8219_v44, %v7891_v5  ;;  %v8550_v27 = vpop.f32.mrf.mxu1  ;;  %v14191_v5 = vld [vmem:[%s15291_s13 + $0x11d8] sm:$0xf0] }
 0xa6c   : > { %v12734_v12 = vor.u32 %v14191_v5, %v12733_v55 }
 0xa6d   : > { %v9988_v45 = vmax.f32 %v9860_v51, 0.0  ;;  %v8549_v11 = vadd.f32 %v8548_v53, %v8220_v46 }
 0xa6f   : > { %v14616_v57 = vpack.c.bf16 %v9988_v45, %v9987_v1  ;;  %v8878_v47 = vadd.f32 %v8877_v15, %v8549_v11  ;;  %v12727_v15 = vld [vmem:[%s15291_s13 + $0x11d4] sm:$0xf0]  ;;  %v12722_v1 = vor.u32 %v14184_v54, %v12719_v40  ;;  %v12726_v45 = vor.u32 %v14190_v43, %v12725_v33 }
 0xa70   : > { %v7892_v41 = vpop.f32.mrf.mxu3 }
 0xa71   : > { %14772 = vst [vmem:[%s17185_s23 + $0x140] sm:$0xff] %v14616_v57   ;;  %v7893_v62 = vadd.f32 %v7892_v41, %v16847_v48  ;;  %v9729_v34 = vmul.f32 %v17767_v52, %v8878_v47 }
 0xa72   : > { %v8879_v29 = vpop.f32.mrf.mxu2  ;;  %v8224_v2 = vpop.f32.mrf.mxu0 }
 0xa73   : > { %v8222_v58 = vadd.f32 %v8221_v49, %v7893_v62  ;;  %v8553_v25 = vpop.f32.mrf.mxu1  ;;  %v9861_v7 = vadd.f32 %v17770_v3, %v9729_v34  ;;  %v12769_v34 = vld [vmem:[%s15291_s13 + $0x1200] sm:$0xf] }
 0xa75   : > { %v8551_v13 = vadd.f32 %v8550_v27, %v8222_v58  ;;  %7934 = vmatmul.bf16.gmra.mxu3 %v12678_v22  ;;  %8263 = vmatmul.bf16.gmra.mxu0 %v12682_v6  ;;  %v9989_v50 = vmax.f32 %v9861_v7, 0.0  ;;  %v14195_v58 = vld [vmem:[%s15291_s13 + $0x11fc] sm:$0xf]  ;;  %v14202_v7 = vld [vmem:[%s15291_s13 + $0x1230] sm:$0xf0] }
 0xa76   : > { %8592 = vmatmul.bf16.gmra.mxu1 %v12686_v31 }
 0xa77   : > { %8921 = vmatmul.bf16.gmra.mxu2 %v12690_v63  ;;  %v8880_v9 = vadd.f32 %v8879_v29, %v8551_v13  ;;  %v14201_v13 = vld [vmem:[%s15291_s13 + $0x1228] sm:$0xf0] }
 0xa78   : > { %v7895_v48 = vpop.f32.mrf.mxu3 }
 0xa79   : > { %v9730_v59 = vmul.f32 %v17767_v52, %v8880_v9  ;;  %v7896_v8 = vadd.f32 %v7895_v48, %v16855_v36  ;;  %v14185_v36 = vld [vmem:[%s15291_s13 + $0x11ac] sm:$0xf]  ;;  %v12777_v9 = vld [vmem:[%s15291_s13 + $0x1208] sm:$0xf] }
 0xa7a   : > { %v8882_v39 = vpop.f32.mrf.mxu2  ;;  %v8226_v35 = vpop.f32.mrf.mxu0  ;;  %v12730_v20 = vor.u32 %v14185_v36, %v12727_v15 }
 0xa7b   : > { %v9862_v18 = vadd.f32 %v17770_v3, %v9730_v59  ;;  %v8225_v44 = vadd.f32 %v8224_v2, %v7896_v8  ;;  %v8555_v60 = vpop.f32.mrf.mxu1  ;;  %v12771_v59 = vld [vmem:[%s15291_s13 + $0x122c] sm:$0xf0] }
 0xa7d   : > { %v9990_v56 = vmax.f32 %v9862_v18, 0.0  ;;  %v8554_v53 = vadd.f32 %v8553_v25, %v8225_v44  ;;  %v12763_v25 = vld [vmem:[%s15291_s13 + $0x1224] sm:$0xf0] }
 0xa7e   : > { %v12766_v44 = vor.u32 %v14195_v58, %v12763_v25 }
 0xa7f   : > { %v14621_v4 = vpack.c.bf16 %v9990_v56, %v9989_v50  ;;  %v8883_v51 = vadd.f32 %v8882_v39, %v8554_v53  ;;  %v12778_v56 = vor.u32 %v14202_v7, %v12777_v9 }
 0xa80   : > { %v7897_v49 = vpop.f32.mrf.mxu3 }
 0xa81   : > { %14773 = vst [vmem:[%s17185_s23 + $0x148] sm:$0xff] %v14621_v4   ;;  %v7898_v46 = vadd.f32 %v7897_v49, %v16861_v28  ;;  %v9731_v30 = vmul.f32 %v17767_v52, %v8883_v51 }
 0xa82   : > { %v8884_v27 = vpop.f32.mrf.mxu2  ;;  %v8229_v11 = vpop.f32.mrf.mxu0 }
 0xa83   : > { %v8227_v38 = vadd.f32 %v8226_v35, %v7898_v46  ;;  %v8558_v61 = vpop.f32.mrf.mxu1  ;;  %v9863_v21 = vadd.f32 %v17770_v3, %v9731_v30  ;;  %v12821_v30 = vld [vmem:[%s15291_s13 + $0x1260] sm:$0xf] }
 0xa85   : > { %v8556_v57 = vadd.f32 %v8555_v60, %v8227_v38  ;;  %7939 = vmatmul.bf16.gmra.mxu3 %v12722_v1  ;;  %8268 = vmatmul.bf16.gmra.mxu0 %v12726_v45  ;;  %v9991_v2 = vmax.f32 %v9863_v21, 0.0  ;;  %v12770_v60 = vor.u32 %v14201_v13, %v12769_v34  ;;  %v12813_v38 = vld [vmem:[%s15291_s13 + $0x1258] sm:$0xf] }
 0xa86   : > { %8597 = vmatmul.bf16.gmra.mxu1 %v12730_v20  ;;  %v12807_v20 = vld [vmem:[%s15291_s13 + $0x127c] sm:$0xf0] }
 0xa87   : > { %8926 = vmatmul.bf16.gmra.mxu2 %v12734_v12  ;;  %v8885_v42 = vadd.f32 %v8884_v27, %v8556_v57  ;;  %v14206_v12 = vld [vmem:[%s15291_s13 + $0x1254] sm:$0xf] }
 0xa88   : > { %v7900_v28 = vpop.f32.mrf.mxu3 }
 0xa89   : > { %v9732_v32 = vmul.f32 %v17767_v52, %v8885_v42  ;;  %v7901_v41 = vadd.f32 %v7900_v28, %v16869_v17  ;;  %v14196_v17 = vld [vmem:[%s15291_s13 + $0x1204] sm:$0xf]  ;;  %v14213_v42 = vld [vmem:[%s15291_s13 + $0x1288] sm:$0xf0]  ;;  %v12815_v28 = vld [vmem:[%s15291_s13 + $0x1284] sm:$0xf0] }
 0xa8a   : > { %v8887_v47 = vpop.f32.mrf.mxu2  ;;  %v8231_v62 = vpop.f32.mrf.mxu0  ;;  %v12774_v53 = vor.u32 %v14196_v17, %v12771_v59 }
 0xa8b   : > { %v9864_v29 = vadd.f32 %v17770_v3, %v9732_v32  ;;  %v8230_v22 = vadd.f32 %v8229_v11, %v7901_v41  ;;  %v8560_v6 = vpop.f32.mrf.mxu1 }
 0xa8d   : > { %v9992_v63 = vmax.f32 %v9864_v29, 0.0  ;;  %v8559_v31 = vadd.f32 %v8558_v61, %v8230_v22  ;;  %v14212_v61 = vld [vmem:[%s15291_s13 + $0x1280] sm:$0xf0] }
 0xa8e   : > { %v12814_v29 = vor.u32 %v14212_v61, %v12813_v38 }
 0xa8f   : > { %v14626_v48 = vpack.c.bf16 %v9992_v63, %v9991_v2  ;;  %v8888_v39 = vadd.f32 %v8887_v47, %v8559_v31 }
 0xa90   : > { %v7902_v8 = vpop.f32.mrf.mxu3 }
 0xa91   : > { %14774 = vst [vmem:[%s17185_s23 + $0x150] sm:$0xff] %v14626_v48   ;;  %v7903_v35 = vadd.f32 %v7902_v8, %v16875_v0  ;;  %v9733_v33 = vmul.f32 %v17767_v52, %v8888_v39 }
 0xa92   : > { %v8889_v18 = vpop.f32.mrf.mxu2  ;;  %v8234_v50 = vpop.f32.mrf.mxu0 }
 0xa93   : > { %v8232_v54 = vadd.f32 %v8231_v62, %v7903_v35  ;;  %v8563_v40 = vpop.f32.mrf.mxu1  ;;  %v9865_v4 = vadd.f32 %v17770_v3, %v9733_v33  ;;  %v12810_v62 = vor.u32 %v14206_v12, %v12807_v20  ;;  %v14224_v33 = vld [vmem:[%s15291_s13 + $0x12e0] sm:$0xf0] }
 0xa95   : > { %v8561_v43 = vadd.f32 %v8560_v6, %v8232_v54  ;;  %7944 = vmatmul.bf16.gmra.mxu3 %v12766_v44  ;;  %8273 = vmatmul.bf16.gmra.mxu0 %v12770_v60  ;;  %v9993_v1 = vmax.f32 %v9865_v4, 0.0  ;;  %v12822_v6 = vor.u32 %v14213_v42, %v12821_v30  ;;  %v14217_v60 = vld [vmem:[%s15291_s13 + $0x12ac] sm:$0xf]  ;;  %v12865_v54 = vld [vmem:[%s15291_s13 + $0x12b8] sm:$0xf] }
 0xa96   : > { %8602 = vmatmul.bf16.gmra.mxu1 %v12774_v53  ;;  %v14223_v53 = vld [vmem:[%s15291_s13 + $0x12d8] sm:$0xf0] }
 0xa97   : > { %8931 = vmatmul.bf16.gmra.mxu2 %v12778_v56  ;;  %v8890_v55 = vadd.f32 %v8889_v18, %v8561_v43  ;;  %v12857_v56 = vld [vmem:[%s15291_s13 + $0x12b0] sm:$0xf]  ;;  %v12859_v43 = vld [vmem:[%s15291_s13 + $0x12dc] sm:$0xf0] }
 0xa98   : > { %v7905_v0 = vpop.f32.mrf.mxu3 }
 0xa99   : > { %v9734_v5 = vmul.f32 %v17767_v52, %v8890_v55  ;;  %v7906_v36 = vadd.f32 %v7905_v0, %v16883_v19  ;;  %v14207_v19 = vld [vmem:[%s15291_s13 + $0x125c] sm:$0xf] }
 0xa9a   : > { %v8892_v15 = vpop.f32.mrf.mxu2  ;;  %v8236_v49 = vpop.f32.mrf.mxu0  ;;  %v12818_v2 = vor.u32 %v14207_v19, %v12815_v28 }
 0xa9b   : > { %v9866_v51 = vadd.f32 %v17770_v3, %v9734_v5  ;;  %v8235_v46 = vadd.f32 %v8234_v50, %v7906_v36  ;;  %v8565_v27 = vpop.f32.mrf.mxu1  ;;  %v12851_v50 = vld [vmem:[%s15291_s13 + $0x12d4] sm:$0xf0] }
 0xa9c   : > { %v12854_v36 = vor.u32 %v14217_v60, %v12851_v50 }
 0xa9d   : > { %v9994_v45 = vmax.f32 %v9866_v51, 0.0  ;;  %v8564_v11 = vadd.f32 %v8563_v40, %v8235_v46  ;;  %v12866_v51 = vor.u32 %v14224_v33, %v12865_v54 }
 0xa9f   : > { %v14631_v57 = vpack.c.bf16 %v9994_v45, %v9993_v1  ;;  %v8893_v32 = vadd.f32 %v8892_v15, %v8564_v11  ;;  %v12858_v15 = vor.u32 %v14223_v53, %v12857_v56 }
 0xaa0   : > { %v7907_v21 = vpop.f32.mrf.mxu3 }
 0xaa1   : > { %14775 = vst [vmem:[%s17185_s23 + $0x158] sm:$0xff] %v14631_v57   ;;  %v7908_v41 = vadd.f32 %v7907_v21, %v16889_v10  ;;  %v9735_v58 = vmul.f32 %v17767_v52, %v8893_v32 }
 0xaa2   : > { %v8894_v47 = vpop.f32.mrf.mxu2  ;;  %v8239_v22 = vpop.f32.mrf.mxu0 }
 0xaa3   : > { %v8237_v63 = vadd.f32 %v8236_v49, %v7908_v41  ;;  %v8568_v31 = vpop.f32.mrf.mxu1  ;;  %v9867_v13 = vadd.f32 %v17770_v3, %v9735_v58 }
 0xaa5   : > { %v8566_v25 = vadd.f32 %v8565_v27, %v8237_v63  ;;  %7949 = vmatmul.bf16.gmra.mxu3 %v12810_v62  ;;  %8278 = vmatmul.bf16.gmra.mxu0 %v12814_v29  ;;  %v9995_v35 = vmax.f32 %v9867_v13, 0.0  ;;  %v12895_v62 = vld [vmem:[%s15291_s13 + $0x132c] sm:$0xf0]  ;;  %v12901_v29 = vld [vmem:[%s15291_s13 + $0x1308] sm:$0xf] }
 0xaa6   : > { %8607 = vmatmul.bf16.gmra.mxu1 %v12818_v2  ;;  %v14235_v63 = vld [vmem:[%s15291_s13 + $0x1338] sm:$0xf0] }
 0xaa7   : > { %8936 = vmatmul.bf16.gmra.mxu2 %v12822_v6  ;;  %v8895_v34 = vadd.f32 %v8894_v47, %v8566_v25  ;;  %v14228_v47 = vld [vmem:[%s15291_s13 + $0x1304] sm:$0xf]  ;;  %v12909_v6 = vld [vmem:[%s15291_s13 + $0x1310] sm:$0xf] }
 0xaa8   : > { %v7910_v10 = vpop.f32.mrf.mxu3  ;;  %v12898_v13 = vor.u32 %v14228_v47, %v12895_v62 }
 0xaa9   : > { %v9736_v9 = vmul.f32 %v17767_v52, %v8895_v34  ;;  %v7911_v48 = vadd.f32 %v7910_v10, %v16897_v37  ;;  %v14218_v37 = vld [vmem:[%s15291_s13 + $0x12b4] sm:$0xf] }
 0xaaa   : > { %v8897_v7 = vpop.f32.mrf.mxu2  ;;  %v8241_v17 = vpop.f32.mrf.mxu0  ;;  %v12862_v46 = vor.u32 %v14218_v37, %v12859_v43 }
 0xaab   : > { %v9868_v59 = vadd.f32 %v17770_v3, %v9736_v9  ;;  %v8240_v8 = vadd.f32 %v8239_v22, %v7911_v48  ;;  %v8570_v39 = vpop.f32.mrf.mxu1  ;;  %v14234_v22 = vld [vmem:[%s15291_s13 + $0x1330] sm:$0xf0] }
 0xaac   : > { %v12902_v9 = vor.u32 %v14234_v22, %v12901_v29 }
 0xaad   : > { %v9996_v18 = vmax.f32 %v9868_v59, 0.0  ;;  %v8569_v44 = vadd.f32 %v8568_v31, %v8240_v8  ;;  %v12903_v31 = vld [vmem:[%s15291_s13 + $0x1334] sm:$0xf0] }
 0xaaf   : > { %v14636_v40 = vpack.c.bf16 %v9996_v18, %v9995_v35  ;;  %v8898_v0 = vadd.f32 %v8897_v7, %v8569_v44  ;;  %v12910_v7 = vor.u32 %v14235_v63, %v12909_v6 }
 0xab0   : > { %v7912_v55 = vpop.f32.mrf.mxu3 }
 0xab1   : > { %14776 = vst [vmem:[%s17185_s23 + $0x160] sm:$0xff] %v14636_v40   ;;  %v7913_v4 = vadd.f32 %v7912_v55, %v16903_v14  ;;  %v9737_v45 = vmul.f32 %v17767_v52, %v8898_v0  ;;  %v14239_v0 = vld [vmem:[%s15291_s13 + $0x135c] sm:$0xf] }
 0xab2   : > { %v8899_v5 = vpop.f32.mrf.mxu2  ;;  %v8244_v49 = vpop.f32.mrf.mxu0 }
 0xab3   : > { %v8242_v27 = vadd.f32 %v8241_v17, %v7913_v4  ;;  %v8573_v1 = vpop.f32.mrf.mxu1  ;;  %v9869_v20 = vadd.f32 %v17770_v3, %v9737_v45  ;;  %v12939_v4 = vld [vmem:[%s15291_s13 + $0x1384] sm:$0xf0] }
 0xab5   : > { %v8571_v11 = vadd.f32 %v8570_v39, %v8242_v27  ;;  %7954 = vmatmul.bf16.gmra.mxu3 %v12854_v36  ;;  %8283 = vmatmul.bf16.gmra.mxu0 %v12858_v15  ;;  %v9997_v21 = vmax.f32 %v9869_v20, 0.0  ;;  %v14245_v36 = vld [vmem:[%s15291_s13 + $0x1388] sm:$0xf0]  ;;  %v12953_v15 = vld [vmem:[%s15291_s13 + $0x1368] sm:$0xf] }
 0xab6   : > { %8612 = vmatmul.bf16.gmra.mxu1 %v12862_v46  ;;  %v12947_v46 = vld [vmem:[%s15291_s13 + $0x138c] sm:$0xf0] }
 0xab7   : > { %8941 = vmatmul.bf16.gmra.mxu2 %v12866_v51  ;;  %v8900_v12 = vadd.f32 %v8899_v5, %v8571_v11  ;;  %v12945_v5 = vld [vmem:[%s15291_s13 + $0x1360] sm:$0xf]  ;;  %v14246_v51 = vld [vmem:[%s15291_s13 + $0x1390] sm:$0xf0] }
 0xab8   : > { %v7915_v14 = vpop.f32.mrf.mxu3 }
 0xab9   : > { %v9738_v38 = vmul.f32 %v17767_v52, %v8900_v12  ;;  %v7916_v61 = vadd.f32 %v7915_v14, %v16914_v26  ;;  %v14229_v26 = vld [vmem:[%s15291_s13 + $0x130c] sm:$0xf]  ;;  %v12942_v12 = vor.u32 %v14239_v0, %v12939_v4  ;;  %v12946_v14 = vor.u32 %v14245_v36, %v12945_v5 }
 0xaba   : > { %v8902_v30 = vpop.f32.mrf.mxu2  ;;  %v8246_v57 = vpop.f32.mrf.mxu0  ;;  %v12906_v17 = vor.u32 %v14229_v26, %v12903_v31  ;;  %v18499_v4 = vld [vmem:[#allocation85_spill] sm:$0xff] }
 0xabb   : > { %v9870_v42 = vadd.f32 %v17770_v3, %v9738_v38  ;;  %v8245_v19 = vadd.f32 %v8244_v49, %v7916_v61  ;;  %v8575_v28 = vpop.f32.mrf.mxu1  ;;  %v12954_v38 = vor.u32 %v14246_v51, %v12953_v15 }
 0xabd   : > { %v9998_v32 = vmax.f32 %v9870_v42, 0.0  ;;  %v8574_v41 = vadd.f32 %v8573_v1, %v8245_v19 }
 0xabf   : > { %v14641_v2 = vpack.c.bf16 %v9998_v32, %v9997_v21  ;;  %v8903_v25 = vadd.f32 %v8902_v30, %v8574_v41  ;;  %v18497_v41 = vld [vmem:[#allocation81_spill] sm:$0xff] }
 0xac0   : > { %v7917_v58 = vpop.f32.mrf.mxu3 }
 0xac1   : > { %14777 = vst [vmem:[%s17185_s23 + $0x168] sm:$0xff] %v14641_v2   ;;  %v7918_v34 = vadd.f32 %v7917_v58, %v16917_v16  ;;  %v9739_v39 = vmul.f32 %v17767_v52, %v8903_v25  ;;  %v14250_v58 = vld [vmem:[%s15291_s13 + $0x13b4] sm:$0xf]  ;;  %v12983_v25 = vld [vmem:[%s15291_s13 + $0x13dc] sm:$0xf0] }
 0xac2   : > { %v8904_v10 = vpop.f32.mrf.mxu2  ;;  %v8249_v48 = vpop.f32.mrf.mxu0 }
 0xac3   : > { %v8247_v59 = vadd.f32 %v8246_v57, %v7918_v34  ;;  %v8578_v8 = vpop.f32.mrf.mxu1  ;;  %v9871_v44 = vadd.f32 %v17770_v3, %v9739_v39  ;;  %v12989_v34 = vld [vmem:[%s15291_s13 + $0x13b8] sm:$0xf]  ;;  %v18498_v39 = vld [vmem:[#allocation83_spill] sm:$0xff] }
 0xac5   : > { %v8576_v35 = vadd.f32 %v8575_v28, %v8247_v59  ;;  %7959 = vmatmul.bf16.gmra.mxu3 %v12898_v13  ;;  %8288 = vmatmul.bf16.gmra.mxu0 %v12902_v9  ;;  %v9999_v37 = vmax.f32 %v9871_v44, 0.0  ;;  %v12997_v13 = vld [vmem:[%s15291_s13 + $0x13c0] sm:$0xf] }
 0xac6   : > { %8617 = vmatmul.bf16.gmra.mxu1 %v12906_v17  ;;  %v12991_v17 = vld [vmem:[%s15291_s13 + $0x13e4] sm:$0xf0] }
 0xac7   : > { %8946 = vmatmul.bf16.gmra.mxu2 %v12910_v7  ;;  %v8905_v18 = vadd.f32 %v8904_v10, %v8576_v35  ;;  %v14256_v10 = vld [vmem:[%s15291_s13 + $0x13e0] sm:$0xf0]  ;;  %v14251_v7 = vld [vmem:[%s15291_s13 + $0x13bc] sm:$0xf] }
 0xac8   : > { %v7920_v16 = vpop.f32.mrf.mxu3  ;;  %v12990_v44 = vor.u32 %v14256_v10, %v12989_v34  ;;  %v18501_v34 = vld [vmem:[#allocation89_spill] sm:$0xff] }
 0xac9   : > { %v9740_v60 = vmul.f32 %v17767_v52, %v8905_v18  ;;  %v7921_v50 = vadd.f32 %v7920_v16, %v16925_v23  ;;  %v14240_v23 = vld [vmem:[%s15291_s13 + $0x1364] sm:$0xf]  ;;  %v12986_v16 = vor.u32 %v14250_v58, %v12983_v25 }
 0xaca   : > { %v8907_v56 = vpop.f32.mrf.mxu2  ;;  %v8251_v53 = vpop.f32.mrf.mxu0  ;;  %v12950_v61 = vor.u32 %v14240_v23, %v12947_v46 }
 0xacb   : > { %v9872_v54 = vadd.f32 %v17770_v3, %v9740_v60  ;;  %v8250_v40 = vadd.f32 %v8249_v48, %v7921_v50  ;;  %v8580_v33 = vpop.f32.mrf.mxu1  ;;  %v14257_v48 = vld [vmem:[%s15291_s13 + $0x13e8] sm:$0xf0] }
 0xacc   : > { %v12998_v50 = vor.u32 %v14257_v48, %v12997_v13 }
 0xacd   : > { %v10000_v43 = vmax.f32 %v9872_v54, 0.0  ;;  %v8579_v55 = vadd.f32 %v8578_v8, %v8250_v40 }
 0xacf   : > { %v14646_v49 = vpack.c.bf16 %v10000_v43, %v9999_v37  ;;  %v8908_v1 = vadd.f32 %v8907_v56, %v8579_v55  ;;  %v12994_v56 = vor.u32 %v14251_v7, %v12991_v17 }
 0xad0   : > { %v7922_v27 = vpop.f32.mrf.mxu3 }
 0xad1   : > { %14778 = vst [vmem:[%s17185_s23 + $0x170] sm:$0xff] %v14646_v49   ;;  %v7923_v45 = vadd.f32 %v7922_v27, %v16931_v24  ;;  %v9741_v42 = vmul.f32 %v17767_v52, %v8908_v1 }
 0xad2   : > { %v8909_v11 = vpop.f32.mrf.mxu2  ;;  %v8254_v20 = vpop.f32.mrf.mxu0 }
 0xad3   : > { %v8252_v30 = vadd.f32 %v8251_v53, %v7923_v45  ;;  %v8583_v57 = vpop.f32.mrf.mxu1  ;;  %v9873_v21 = vadd.f32 %v17770_v3, %v9741_v42  ;;  %v14261_v45 = vld [vmem:[%s15291_s13 + $0x140c] sm:$0xf] }
 0xad5   : > { %v8581_v19 = vadd.f32 %v8580_v33, %v8252_v30  ;;  %7964 = vmatmul.bf16.gmra.mxu3 %v12942_v12  ;;  %8293 = vmatmul.bf16.gmra.mxu0 %v12946_v14  ;;  %v10001_v63 = vmax.f32 %v9873_v21, 0.0  ;;  %v13033_v12 = vld [vmem:[%s15291_s13 + $0x1410] sm:$0xf]  ;;  %v14267_v14 = vld [vmem:[%s15291_s13 + $0x1438] sm:$0xf0] }
 0xad6   : > { %8622 = vmatmul.bf16.gmra.mxu1 %v12950_v61  ;;  %v14268_v61 = vld [vmem:[%s15291_s13 + $0x1440] sm:$0xf0]  ;;  %v14262_v30 = vld [vmem:[%s15291_s13 + $0x1414] sm:$0xf] }
 0xad7   : > { %8951 = vmatmul.bf16.gmra.mxu2 %v12954_v38  ;;  %v8910_v28 = vadd.f32 %v8909_v11, %v8581_v19  ;;  %v13027_v11 = vld [vmem:[%s15291_s13 + $0x1434] sm:$0xf0] }
 0xad8   : > { %v7925_v24 = vpop.f32.mrf.mxu3 }
 0xad9   : > { %v9742_v32 = vmul.f32 %v17767_v52, %v8910_v28  ;;  %v7926_v47 = vadd.f32 %v7925_v24, %v18497_v41  ;;  %v18500_v28 = vld [vmem:[#allocation87_spill] sm:$0xff]  ;;  %v13034_v41 = vor.u32 %v14267_v14, %v13033_v12  ;;  %v18503_v12 = vld [vmem:[#allocation93_spill] sm:$0xff] }
 0xada   : > { %v8912_v62 = vpop.f32.mrf.mxu2  ;;  %v8256_v29 = vpop.f32.mrf.mxu0 }
 0xadb   : > { %v9874_v22 = vadd.f32 %v17770_v3, %v9742_v32  ;;  %v8255_v6 = vadd.f32 %v8254_v20, %v7926_v47  ;;  %v8585_v2 = vpop.f32.mrf.mxu1  ;;  %v13041_v20 = vld [vmem:[%s15291_s13 + $0x1418] sm:$0xf]  ;;  %v13030_v32 = vor.u32 %v14261_v45, %v13027_v11 }
 0xadd   : > { %v10002_v26 = vmax.f32 %v9874_v22, 0.0  ;;  %v8584_v31 = vadd.f32 %v8583_v57, %v8255_v6  ;;  %v13035_v57 = vld [vmem:[%s15291_s13 + $0x143c] sm:$0xf0] }
 0xadf   : > { %v14651_v9 = vpack.c.bf16 %v10002_v26, %v10001_v63  ;;  %v8913_v8 = vadd.f32 %v8912_v62, %v8584_v31  ;;  %v13042_v62 = vor.u32 %v14268_v61, %v13041_v20 }
 0xae0   : > { %v7927_v59 = vpop.f32.mrf.mxu3 }
 0xae1   : > { %14779 = vst [vmem:[%s17185_s23 + $0x178] sm:$0xff] %v14651_v9   ;;  %v7928_v35 = vadd.f32 %v7927_v59, %v18498_v39  ;;  %v9743_v40 = vmul.f32 %v17767_v52, %v8913_v8 }
 0xae2   : > { %v8914_v18 = vpop.f32.mrf.mxu2  ;;  %v8259_v60 = vpop.f32.mrf.mxu0 }
 0xae3   : > { %v8257_v53 = vadd.f32 %v8256_v29, %v7928_v35  ;;  %v8588_v54 = vpop.f32.mrf.mxu1  ;;  %v9875_v55 = vadd.f32 %v17770_v3, %v9743_v40  ;;  %v13038_v29 = vor.u32 %v14262_v30, %v13035_v57  ;;  %v14272_v35 = vld [vmem:[%s15291_s13 + $0x1464] sm:$0xf] }
 0xae5   : > { %v8586_v33 = vadd.f32 %v8585_v2, %v8257_v53  ;;  %7969 = vmatmul.bf16.gmra.mxu3 %v12986_v16  ;;  %8298 = vmatmul.bf16.gmra.mxu0 %v12990_v44  ;;  %v10003_v46 = vmax.f32 %v9875_v55, 0.0  ;;  %v13077_v16 = vld [vmem:[%s15291_s13 + $0x1468] sm:$0xf]  ;;  %v14278_v44 = vld [vmem:[%s15291_s13 + $0x1490] sm:$0xf0] }
 0xae6   : > { %8627 = vmatmul.bf16.gmra.mxu1 %v12994_v56  ;;  %v14279_v56 = vld [vmem:[%s15291_s13 + $0x1498] sm:$0xf0]  ;;  %v14273_v53 = vld [vmem:[%s15291_s13 + $0x146c] sm:$0xf] }
 0xae7   : > { %8956 = vmatmul.bf16.gmra.mxu2 %v12998_v50  ;;  %v8915_v37 = vadd.f32 %v8914_v18, %v8586_v33  ;;  %v13071_v18 = vld [vmem:[%s15291_s13 + $0x148c] sm:$0xf0] }
 0xae8   : > { %v7930_v43 = vpop.f32.mrf.mxu3 }
 0xae9   : > { %v9744_v0 = vmul.f32 %v17767_v52, %v8915_v37  ;;  %v7931_v5 = vadd.f32 %v7930_v43, %v18499_v4  ;;  %v18502_v37 = vld [vmem:[#allocation91_spill] sm:$0xff]  ;;  %v13078_v4 = vor.u32 %v14278_v44, %v13077_v16  ;;  %v18505_v16 = vld [vmem:[#allocation97_spill] sm:$0xff] }
 0xaea   : > { %v8917_v36 = vpop.f32.mrf.mxu2  ;;  %v8261_v15 = vpop.f32.mrf.mxu0 }
 0xaeb   : > { %v9876_v49 = vadd.f32 %v17770_v3, %v9744_v0  ;;  %v8260_v51 = vadd.f32 %v8259_v60, %v7931_v5  ;;  %v8590_v23 = vpop.f32.mrf.mxu1  ;;  %v13085_v60 = vld [vmem:[%s15291_s13 + $0x1470] sm:$0xf]  ;;  %v13074_v0 = vor.u32 %v14272_v35, %v13071_v18 }
 0xaed   : > { %v10004_v27 = vmax.f32 %v9876_v49, 0.0  ;;  %v8589_v1 = vadd.f32 %v8588_v54, %v8260_v51  ;;  %v13079_v54 = vld [vmem:[%s15291_s13 + $0x1494] sm:$0xf0] }
 0xaef   : > { %v14656_v38 = vpack.c.bf16 %v10004_v27, %v10003_v46  ;;  %v8918_v19 = vadd.f32 %v8917_v36, %v8589_v1  ;;  %v13086_v36 = vor.u32 %v14279_v56, %v13085_v60 }
 0xaf0   : > { %v7932_v42 = vpop.f32.mrf.mxu3 }
 0xaf1   : > { %14780 = vst [vmem:[%s17185_s23 + $0x180] sm:$0xff] %v14656_v38   ;;  %v7933_v24 = vadd.f32 %v7932_v42, %v18500_v28  ;;  %v9745_v2 = vmul.f32 %v17767_v52, %v8918_v19 }
 0xaf2   : > { %v8919_v21 = vpop.f32.mrf.mxu2  ;;  %v8264_v47 = vpop.f32.mrf.mxu0 }
 0xaf3   : > { %v8262_v22 = vadd.f32 %v8261_v15, %v7933_v24  ;;  %v8593_v6 = vpop.f32.mrf.mxu1  ;;  %v9877_v58 = vadd.f32 %v17770_v3, %v9745_v2  ;;  %v13082_v15 = vor.u32 %v14273_v53, %v13079_v54  ;;  %v14283_v24 = vld [vmem:[%s15291_s13 + $0x14bc] sm:$0xf] }
 0xaf5   : > { %v8591_v63 = vadd.f32 %v8590_v23, %v8262_v22  ;;  %7974 = vmatmul.bf16.gmra.mxu3 %v13030_v32  ;;  %8303 = vmatmul.bf16.gmra.mxu0 %v13034_v41  ;;  %v10005_v59 = vmax.f32 %v9877_v58, 0.0  ;;  %v13121_v32 = vld [vmem:[%s15291_s13 + $0x14c0] sm:$0xf]  ;;  %v14289_v41 = vld [vmem:[%s15291_s13 + $0x14e8] sm:$0xf0] }
 0xaf6   : > { %8632 = vmatmul.bf16.gmra.mxu1 %v13038_v29  ;;  %v14290_v29 = vld [vmem:[%s15291_s13 + $0x14f0] sm:$0xf0]  ;;  %v14284_v22 = vld [vmem:[%s15291_s13 + $0x14c4] sm:$0xf] }
 0xaf7   : > { %8961 = vmatmul.bf16.gmra.mxu2 %v13042_v62  ;;  %v8920_v26 = vadd.f32 %v8919_v21, %v8591_v63  ;;  %v13115_v21 = vld [vmem:[%s15291_s13 + $0x14e4] sm:$0xf0] }
 0xaf8   : > { %v7935_v31 = vpop.f32.mrf.mxu3 }
 0xaf9   : > { %v9746_v25 = vmul.f32 %v17767_v52, %v8920_v26  ;;  %v7936_v10 = vadd.f32 %v7935_v31, %v18501_v34  ;;  %v18504_v26 = vld [vmem:[#allocation95_spill] sm:$0xff]  ;;  %v13122_v34 = vor.u32 %v14289_v41, %v13121_v32  ;;  %v18507_v32 = vld [vmem:[#allocation100_spill] sm:$0xff] }
 0xafa   : > { %v8922_v13 = vpop.f32.mrf.mxu2  ;;  %v8266_v9 = vpop.f32.mrf.mxu0 }
 0xafb   : > { %v9878_v48 = vadd.f32 %v17770_v3, %v9746_v25  ;;  %v8265_v7 = vadd.f32 %v8264_v47, %v7936_v10  ;;  %v8595_v17 = vpop.f32.mrf.mxu1  ;;  %v13129_v47 = vld [vmem:[%s15291_s13 + $0x14c8] sm:$0xf]  ;;  %v13118_v25 = vor.u32 %v14283_v24, %v13115_v21 }
 0xafd   : > { %v10006_v8 = vmax.f32 %v9878_v48, 0.0  ;;  %v8594_v39 = vadd.f32 %v8593_v6, %v8265_v7  ;;  %v13123_v6 = vld [vmem:[%s15291_s13 + $0x14ec] sm:$0xf0] }
 0xaff   : > { %v14661_v50 = vpack.c.bf16 %v10006_v8, %v10005_v59  ;;  %v8923_v33 = vadd.f32 %v8922_v13, %v8594_v39  ;;  %v13130_v13 = vor.u32 %v14290_v29, %v13129_v47 }
 0xb00   : > { %v7937_v40 = vpop.f32.mrf.mxu3 }
 0xb01   : > { %14781 = vst [vmem:[%s17185_s23 + $0x188] sm:$0xff] %v14661_v50   ;;  %v7938_v43 = vadd.f32 %v7937_v40, %v18502_v37  ;;  %v9747_v23 = vmul.f32 %v17767_v52, %v8923_v33 }
 0xb02   : > { %v8924_v55 = vpop.f32.mrf.mxu2  ;;  %v8269_v5 = vpop.f32.mrf.mxu0 }
 0xb03   : > { %v8267_v49 = vadd.f32 %v8266_v9, %v7938_v43  ;;  %v8598_v51 = vpop.f32.mrf.mxu1  ;;  %v9879_v45 = vadd.f32 %v17770_v3, %v9747_v23  ;;  %v13126_v9 = vor.u32 %v14284_v22, %v13123_v6  ;;  %v14294_v43 = vld [vmem:[%s15291_s13 + $0x1514] sm:$0xf] }
 0xb05   : > { %v8596_v46 = vadd.f32 %v8595_v17, %v8267_v49  ;;  %7979 = vmatmul.bf16.gmra.mxu3 %v13074_v0  ;;  %8308 = vmatmul.bf16.gmra.mxu0 %v13078_v4  ;;  %v10007_v42 = vmax.f32 %v9879_v45, 0.0  ;;  %v13165_v0 = vld [vmem:[%s15291_s13 + $0x1518] sm:$0xf]  ;;  %v14300_v4 = vld [vmem:[%s15291_s13 + $0x1540] sm:$0xf0] }
 0xb06   : > { %8637 = vmatmul.bf16.gmra.mxu1 %v13082_v15  ;;  %v14295_v15 = vld [vmem:[%s15291_s13 + $0x151c] sm:$0xf]  ;;  %v13167_v49 = vld [vmem:[%s15291_s13 + $0x1544] sm:$0xf0]  ;;  %v13166_v45 = vor.u32 %v14300_v4, %v13165_v0  ;;  %v18509_v0 = vld [vmem:[#allocation101_spill] sm:$0xff] }
 0xb07   : > { %8966 = vmatmul.bf16.gmra.mxu2 %v13086_v36  ;;  %v8925_v27 = vadd.f32 %v8924_v55, %v8596_v46  ;;  %v13159_v55 = vld [vmem:[%s15291_s13 + $0x153c] sm:$0xf0]  ;;  %v14301_v36 = vld [vmem:[%s15291_s13 + $0x1548] sm:$0xf0]  ;;  %v18506_v46 = vld [vmem:[#allocation98_spill] sm:$0xff] }
 0xb08   : > { %v7940_v1 = vpop.f32.mrf.mxu3 }
 0xb09   : > { %v9748_v11 = vmul.f32 %v17767_v52, %v8925_v27  ;;  %v7941_v14 = vadd.f32 %v7940_v1, %v18503_v12  ;;  %v13162_v1 = vor.u32 %v14294_v43, %v13159_v55 }
 0xb0a   : > { %v8927_v20 = vpop.f32.mrf.mxu2  ;;  %v8271_v38 = vpop.f32.mrf.mxu0 }
 0xb0b   : > { %v9880_v61 = vadd.f32 %v17770_v3, %v9748_v11  ;;  %v8270_v30 = vadd.f32 %v8269_v5, %v7941_v14  ;;  %v8600_v57 = vpop.f32.mrf.mxu1  ;;  %v13170_v14 = vor.u32 %v14295_v15, %v13167_v49 }
 0xb0d   : > { %v10008_v19 = vmax.f32 %v9880_v61, 0.0  ;;  %v8599_v28 = vadd.f32 %v8598_v51, %v8270_v30  ;;  %v17966_v61 = vld [vmem:[#allocation8] ss:$0 sm:$0xff] }
 0xb0f   : > { %v14666_v62 = vpack.c.bf16 %v10008_v19, %v10007_v42  ;;  %v8928_v63 = vadd.f32 %v8927_v20, %v8599_v28  ;;  %v17969_v28 = vld [vmem:[#allocation9] ss:$0 sm:$0xff] }
 0xb10   : > { %v7942_v2 = vpop.f32.mrf.mxu3 }
 0xb11   : > { %14782 = vst [vmem:[%s17185_s23 + $0x190] sm:$0xff] %v14666_v62   ;;  %v7943_v31 = vadd.f32 %v7942_v2, %v18504_v26  ;;  %v9749_v17 = vmul.f32 %v17767_v52, %v8928_v63 }
 0xb12   : > { %v8929_v58 = vpop.f32.mrf.mxu2  ;;  %v8274_v10 = vpop.f32.mrf.mxu0 }
 0xb13   : > { %v8272_v48 = vadd.f32 %v8271_v38, %v7943_v31  ;;  %v8603_v7 = vpop.f32.mrf.mxu1  ;;  %v9881_v35 = vadd.f32 %v17770_v3, %v9749_v17  ;;  %v14305_v31 = vld [vmem:[%s15291_s13 + $0x156c] sm:$0xf] }
 0xb15   : > { %v8601_v59 = vadd.f32 %v8600_v57, %v8272_v48  ;;  %7984 = vmatmul.bf16.gmra.mxu3 %v13118_v25  ;;  %8313 = vmatmul.bf16.gmra.mxu0 %v13122_v34  ;;  %v10009_v40 = vmax.f32 %v9881_v35, 0.0  ;;  %v13209_v25 = vld [vmem:[%s15291_s13 + $0x1570] sm:$0xf]  ;;  %v14311_v34 = vld [vmem:[%s15291_s13 + $0x1598] sm:$0xf0] }
 0xb16   : > { %8642 = vmatmul.bf16.gmra.mxu1 %v13126_v9  ;;  %v14312_v9 = vld [vmem:[%s15291_s13 + $0x15a0] sm:$0xf0]  ;;  %v14306_v48 = vld [vmem:[%s15291_s13 + $0x1574] sm:$0xf] }
 0xb17   : > { %8971 = vmatmul.bf16.gmra.mxu2 %v13130_v13  ;;  %v8930_v8 = vadd.f32 %v8929_v58, %v8601_v59  ;;  %v13203_v58 = vld [vmem:[%s15291_s13 + $0x1594] sm:$0xf0] }
 0xb18   : > { %v7945_v39 = vpop.f32.mrf.mxu3 }
 0xb19   : > { %v9750_v18 = vmul.f32 %v17767_v52, %v8930_v8  ;;  %v7946_v44 = vadd.f32 %v7945_v39, %v18505_v16  ;;  %v13173_v52 = vld [vmem:[%s15291_s13 + $0x1520] sm:$0xf]  ;;  %v13210_v16 = vor.u32 %v14311_v34, %v13209_v25 }
 0xb1a   : > { %v8932_v60 = vpop.f32.mrf.mxu2  ;;  %v8276_v50 = vpop.f32.mrf.mxu0  ;;  %v13174_v12 = vor.u32 %v14301_v36, %v13173_v52  ;;  %v18508_v8 = vld [vmem:[#allocation99_spill] sm:$0xff] }
 0xb1b   : > { %v9882_v56 = vadd.f32 %v17770_v3, %v9750_v18  ;;  %v8275_v53 = vadd.f32 %v8274_v10, %v7946_v44  ;;  %v8605_v54 = vpop.f32.mrf.mxu1  ;;  %v13217_v10 = vld [vmem:[%s15291_s13 + $0x1578] sm:$0xf]  ;;  %v13206_v18 = vor.u32 %v14305_v31, %v13203_v58  ;;  %v18511_v25 = vld [vmem:[#allocation103_spill] sm:$0xff] }
 0xb1d   : > { %v10010_v33 = vmax.f32 %v9882_v56, 0.0  ;;  %v8604_v37 = vadd.f32 %v8603_v7, %v8275_v53  ;;  %v13211_v7 = vld [vmem:[%s15291_s13 + $0x159c] sm:$0xf0] }
 0xb1f   : > { %v14671_v5 = vpack.c.bf16 %v10010_v33, %v10009_v40  ;;  %v8933_v23 = vadd.f32 %v8932_v60, %v8604_v37  ;;  %v13218_v60 = vor.u32 %v14312_v9, %v13217_v10 }
 0xb20   : > { %v7947_v51 = vpop.f32.mrf.mxu3 }
 0xb21   : > { %14783 = vst [vmem:[%s17185_s23 + $0x198] sm:$0xff] %v14671_v5   ;;  %v7948_v3 = vadd.f32 %v7947_v51, %v18506_v46  ;;  %v9751_v30 = vmul.f32 %v17966_v61, %v8933_v23 }
 0xb22   : > { %v8934_v27 = vpop.f32.mrf.mxu2  ;;  %v8279_v11 = vpop.f32.mrf.mxu0 }
 0xb23   : > { %v8277_v20 = vadd.f32 %v8276_v50, %v7948_v3  ;;  %v8608_v38 = vpop.f32.mrf.mxu1  ;;  %v9883_v24 = vadd.f32 %v17969_v28, %v9751_v30  ;;  %v13214_v50 = vor.u32 %v14306_v48, %v13211_v7  ;;  %v14316_v3 = vld [vmem:[%s15291_s13 + $0x15c4] sm:$0xf] }
 0xb25   : > { %v8606_v57 = vadd.f32 %v8605_v54, %v8277_v20  ;;  %7989 = vmatmul.bf16.gmra.mxu3 %v13162_v1  ;;  %8318 = vmatmul.bf16.gmra.mxu0 %v13166_v45  ;;  %v10011_v2 = vmax.f32 %v9883_v24, 0.0  ;;  %v13253_v1 = vld [vmem:[%s15291_s13 + $0x15c8] sm:$0xf]  ;;  %v14322_v45 = vld [vmem:[%s15291_s13 + $0x15f0] sm:$0xf0] }
 0xb26   : > { %8647 = vmatmul.bf16.gmra.mxu1 %v13170_v14  ;;  %v14323_v14 = vld [vmem:[%s15291_s13 + $0x15f8] sm:$0xf0]  ;;  %v14317_v20 = vld [vmem:[%s15291_s13 + $0x15cc] sm:$0xf] }
 0xb27   : > { %8976 = vmatmul.bf16.gmra.mxu2 %v13174_v12  ;;  %v8935_v42 = vadd.f32 %v8934_v27, %v8606_v57  ;;  %v13247_v27 = vld [vmem:[%s15291_s13 + $0x15ec] sm:$0xf0] }
 0xb28   : > { %v7950_v19 = vpop.f32.mrf.mxu3 }
 0xb29   : > { %v9752_v21 = vmul.f32 %v17966_v61, %v8935_v42  ;;  %v7951_v41 = vadd.f32 %v7950_v19, %v18507_v32  ;;  %v18510_v42 = vld [vmem:[#allocation102_spill] sm:$0xff]  ;;  %v13254_v32 = vor.u32 %v14322_v45, %v13253_v1 }
 0xb2a   : > { %v8937_v47 = vpop.f32.mrf.mxu2  ;;  %v8281_v62 = vpop.f32.mrf.mxu0  ;;  %v18514_v45 = vld [vmem:[#allocation106_spill] sm:$0xff] }
 0xb2b   : > { %v9884_v29 = vadd.f32 %v17969_v28, %v9752_v21  ;;  %v8280_v22 = vadd.f32 %v8279_v11, %v7951_v41  ;;  %v8610_v6 = vpop.f32.mrf.mxu1  ;;  %v13261_v11 = vld [vmem:[%s15291_s13 + $0x15d0] sm:$0xf]  ;;  %v13250_v21 = vor.u32 %v14316_v3, %v13247_v27 }
 0xb2d   : > { %v10012_v63 = vmax.f32 %v9884_v29, 0.0  ;;  %v8609_v26 = vadd.f32 %v8608_v38, %v8280_v22  ;;  %v13255_v38 = vld [vmem:[%s15291_s13 + $0x15f4] sm:$0xf0] }
 0xb2f   : > { %v14676_v13 = vpack.c.bf16 %v10012_v63, %v10011_v2  ;;  %v8938_v59 = vadd.f32 %v8937_v47, %v8609_v26  ;;  %v13262_v47 = vor.u32 %v14323_v14, %v13261_v11 }
 0xb30   : > { %v7952_v17 = vpop.f32.mrf.mxu3 }
 0xb31   : > { %14784 = vst [vmem:[%s17185_s23 + $0x1a0] sm:$0xff] %v14676_v13   ;;  %v7953_v39 = vadd.f32 %v7952_v17, %v18508_v8  ;;  %v9753_v54 = vmul.f32 %v17966_v61, %v8938_v59 }
 0xb32   : > { %v8939_v35 = vpop.f32.mrf.mxu2  ;;  %v8284_v44 = vpop.f32.mrf.mxu0 }
 0xb33   : > { %v8282_v56 = vadd.f32 %v8281_v62, %v7953_v39  ;;  %v8613_v53 = vpop.f32.mrf.mxu1  ;;  %v9885_v43 = vadd.f32 %v17969_v28, %v9753_v54  ;;  %v13258_v62 = vor.u32 %v14317_v20, %v13255_v38 }
 0xb35   : > { %v8611_v40 = vadd.f32 %v8610_v6, %v8282_v56  ;;  %7994 = vmatmul.bf16.gmra.mxu3 %v13206_v18  ;;  %8323 = vmatmul.bf16.gmra.mxu0 %v13210_v16  ;;  %v10013_v51 = vmax.f32 %v9885_v43, 0.0  ;;  %v18512_v16 = vld [vmem:[#allocation104_spill] sm:$0xff] }
 0xb36   : > { %8652 = vmatmul.bf16.gmra.mxu1 %v13214_v50 }
 0xb37   : > { %8981 = vmatmul.bf16.gmra.mxu2 %v13218_v60  ;;  %v8940_v33 = vadd.f32 %v8939_v35, %v8611_v40 }
 0xb38   : > { %v7955_v37 = vpop.f32.mrf.mxu3 }
 0xb39   : > { %v9754_v55 = vmul.f32 %v17966_v61, %v8940_v33  ;;  %v7956_v4 = vadd.f32 %v7955_v37, %v18509_v0  ;;  %v18513_v0 = vld [vmem:[#allocation105_spill] sm:$0xff] }
 0xb3a   : > { %v8942_v52 = vpop.f32.mrf.mxu2  ;;  %v8286_v5 = vpop.f32.mrf.mxu0 }
 0xb3b   : > { %v9886_v36 = vadd.f32 %v17969_v28, %v9754_v55  ;;  %v8285_v15 = vadd.f32 %v8284_v44, %v7956_v4  ;;  %v8615_v49 = vpop.f32.mrf.mxu1 }
 0xb3d   : > { %v10014_v23 = vmax.f32 %v9886_v36, 0.0  ;;  %v8614_v46 = vadd.f32 %v8613_v53, %v8285_v15 }
 0xb3f   : > { %v14681_v12 = vpack.c.bf16 %v10014_v23, %v10013_v51  ;;  %v8943_v57 = vadd.f32 %v8942_v52, %v8614_v46 }
 0xb40   : > { %v7957_v30 = vpop.f32.mrf.mxu3 }
 0xb41   : > { %14785 = vst [vmem:[%s17185_s23 + $0x1a8] sm:$0xff] %v14681_v12   ;;  %v7958_v19 = vadd.f32 %v7957_v30, %v18510_v42  ;;  %v9755_v6 = vmul.f32 %v17966_v61, %v8943_v57 }
 0xb42   : > { %v8944_v24 = vpop.f32.mrf.mxu2  ;;  %v8289_v41 = vpop.f32.mrf.mxu0 }
 0xb43   : > { %v8287_v29 = vadd.f32 %v8286_v5, %v7958_v19  ;;  %v8618_v22 = vpop.f32.mrf.mxu1  ;;  %v9887_v31 = vadd.f32 %v17969_v28, %v9755_v6 }
 0xb45   : > { %v8616_v2 = vadd.f32 %v8615_v49, %v8287_v29  ;;  %7999 = vmatmul.bf16.gmra.mxu3 %v13250_v21  ;;  %8328 = vmatmul.bf16.gmra.mxu0 %v13254_v32  ;;  %v10015_v17 = vmax.f32 %v9887_v31, 0.0  ;;  %v18515_v32 = vld [vmem:[#allocation107_spill] sm:$0xff] }
 0xb46   : > { %8657 = vmatmul.bf16.gmra.mxu1 %v13258_v62 }
 0xb47   : > { %8986 = vmatmul.bf16.gmra.mxu2 %v13262_v47  ;;  %v8945_v63 = vadd.f32 %v8944_v24, %v8616_v2 }
 0xb48   : > { %v7960_v26 = vpop.f32.mrf.mxu3 }
 0xb49   : > { %v9756_v58 = vmul.f32 %v17966_v61, %v8945_v63  ;;  %v7961_v34 = vadd.f32 %v7960_v26, %v18511_v25 }
 0xb4a   : > { %v8947_v10 = vpop.f32.mrf.mxu2  ;;  %v8291_v13 = vpop.f32.mrf.mxu0 }
 0xb4b   : > { %v9888_v9 = vadd.f32 %v17969_v28, %v9756_v58  ;;  %v8290_v48 = vadd.f32 %v8289_v41, %v7961_v34  ;;  %v8620_v7 = vpop.f32.mrf.mxu1  ;;  %v18516_v34 = vld [vmem:[#allocation108_spill] sm:$0xff] }
 0xb4d   : > { %v10016_v59 = vmax.f32 %v9888_v9, 0.0  ;;  %v8619_v8 = vadd.f32 %v8618_v22, %v8290_v48 }
 0xb4f   : > { %v14686_v39 = vpack.c.bf16 %v10016_v59, %v10015_v17  ;;  %v8948_v18 = vadd.f32 %v8947_v10, %v8619_v8 }
 0xb50   : > { %v7962_v35 = vpop.f32.mrf.mxu3 }
 0xb51   : > { %14786 = vst [vmem:[%s17185_s23 + $0x1b0] sm:$0xff] %v14686_v39   ;;  %v7963_v44 = vadd.f32 %v7962_v35, %v18512_v16  ;;  %v9757_v54 = vmul.f32 %v17966_v61, %v8948_v18  ;;  %v18517_v16 = vld [vmem:[#allocation109_spill] sm:$0xff] }
 0xb52   : > { %v8949_v60 = vpop.f32.mrf.mxu2  ;;  %v8294_v50 = vpop.f32.mrf.mxu0 }
 0xb53   : > { %v8292_v56 = vadd.f32 %v8291_v13, %v7963_v44  ;;  %v8623_v53 = vpop.f32.mrf.mxu1  ;;  %v9889_v43 = vadd.f32 %v17969_v28, %v9757_v54 }
 0xb55   : > { %v8621_v40 = vadd.f32 %v8620_v7, %v8292_v56  ;;  %v10017_v51 = vmax.f32 %v9889_v43, 0.0 }
 0xb57   : > { %v8950_v33 = vadd.f32 %v8949_v60, %v8621_v40 }
 0xb58   : > { %v7965_v37 = vpop.f32.mrf.mxu3 }
 0xb59   : > { %v9758_v55 = vmul.f32 %v17966_v61, %v8950_v33  ;;  %v7966_v4 = vadd.f32 %v7965_v37, %v18513_v0 }
 0xb5a   : > { %v8952_v52 = vpop.f32.mrf.mxu2  ;;  %v8296_v5 = vpop.f32.mrf.mxu0 }
 0xb5b   : > { %v9890_v36 = vadd.f32 %v17969_v28, %v9758_v55  ;;  %v8295_v15 = vadd.f32 %v8294_v50, %v7966_v4  ;;  %v8625_v49 = vpop.f32.mrf.mxu1  ;;  %v18518_v4 = vld [vmem:[#allocation110_spill] sm:$0xff] }
 0xb5d   : > { %v10018_v23 = vmax.f32 %v9890_v36, 0.0  ;;  %v8624_v46 = vadd.f32 %v8623_v53, %v8295_v15 }
 0xb5f   : > { %v14691_v3 = vpack.c.bf16 %v10018_v23, %v10017_v51  ;;  %v8953_v1 = vadd.f32 %v8952_v52, %v8624_v46 }
 0xb60   : > { %v7967_v27 = vpop.f32.mrf.mxu3 }
 0xb61   : > { %14787 = vst [vmem:[%s17185_s23 + $0x1b8] sm:$0xff] %v14691_v3   ;;  %v7968_v11 = vadd.f32 %v7967_v27, %v18514_v45  ;;  %v9759_v30 = vmul.f32 %v17966_v61, %v8953_v1  ;;  %v18519_v45 = vld [vmem:[#allocation111_spill] sm:$0xff] }
 0xb62   : > { %v8954_v12 = vpop.f32.mrf.mxu2  ;;  %v8299_v14 = vpop.f32.mrf.mxu0 }
 0xb63   : > { %v8297_v20 = vadd.f32 %v8296_v5, %v7968_v11  ;;  %v8628_v38 = vpop.f32.mrf.mxu1  ;;  %v9891_v24 = vadd.f32 %v17969_v28, %v9759_v30 }
 0xb65   : > { %v8626_v57 = vadd.f32 %v8625_v49, %v8297_v20  ;;  %v10019_v2 = vmax.f32 %v9891_v24, 0.0 }
 0xb67   : > { %v8955_v42 = vadd.f32 %v8954_v12, %v8626_v57 }
 0xb68   : > { %v7970_v19 = vpop.f32.mrf.mxu3 }
 0xb69   : > { %v9760_v21 = vmul.f32 %v17966_v61, %v8955_v42  ;;  %v7971_v41 = vadd.f32 %v7970_v19, %v18515_v32 }
 0xb6a   : > { %v8957_v47 = vpop.f32.mrf.mxu2  ;;  %v8301_v62 = vpop.f32.mrf.mxu0 }
 0xb6b   : > { %v9892_v29 = vadd.f32 %v17969_v28, %v9760_v21  ;;  %v8300_v22 = vadd.f32 %v8299_v14, %v7971_v41  ;;  %v8630_v6 = vpop.f32.mrf.mxu1  ;;  %v18520_v41 = vld [vmem:[#allocation112_spill] sm:$0xff] }
 0xb6d   : > { %v10020_v63 = vmax.f32 %v9892_v29, 0.0  ;;  %v8629_v26 = vadd.f32 %v8628_v38, %v8300_v22 }
 0xb6f   : > { %v14696_v31 = vpack.c.bf16 %v10020_v63, %v10019_v2  ;;  %v8958_v25 = vadd.f32 %v8957_v47, %v8629_v26 }
 0xb70   : > { %v7972_v58 = vpop.f32.mrf.mxu3 }
 0xb71   : > { %14788 = vst [vmem:[%s17185_s23 + $0x1c0] sm:$0xff] %v14696_v31   ;;  %v7973_v10 = vadd.f32 %v7972_v58, %v18516_v34  ;;  %v9761_v17 = vmul.f32 %v17966_v61, %v8958_v25  ;;  %v18521_v34 = vld [vmem:[#allocation113_spill] sm:$0xff] }
 0xb72   : > { %v8959_v13 = vpop.f32.mrf.mxu2  ;;  %v8304_v9 = vpop.f32.mrf.mxu0 }
 0xb73   : > { %v8302_v48 = vadd.f32 %v8301_v62, %v7973_v10  ;;  %v8633_v7 = vpop.f32.mrf.mxu1  ;;  %v9893_v35 = vadd.f32 %v17969_v28, %v9761_v17 }
 0xb75   : > { %v8631_v59 = vadd.f32 %v8630_v6, %v8302_v48  ;;  %v10021_v40 = vmax.f32 %v9893_v35, 0.0 }
 0xb77   : > { %v8960_v8 = vadd.f32 %v8959_v13, %v8631_v59 }
 0xb78   : > { %v7975_v39 = vpop.f32.mrf.mxu3 }
 0xb79   : > { %v9762_v18 = vmul.f32 %v17966_v61, %v8960_v8  ;;  %v7976_v44 = vadd.f32 %v7975_v39, %v18517_v16 }
 0xb7a   : > { %v8962_v60 = vpop.f32.mrf.mxu2  ;;  %v8306_v50 = vpop.f32.mrf.mxu0 }
 0xb7b   : > { %v9894_v56 = vadd.f32 %v17969_v28, %v9762_v18  ;;  %v8305_v53 = vadd.f32 %v8304_v9, %v7976_v44  ;;  %v8635_v54 = vpop.f32.mrf.mxu1  ;;  %v18522_v44 = vld [vmem:[#allocation114_spill] sm:$0xff] }
 0xb7d   : > { %v10022_v33 = vmax.f32 %v9894_v56, 0.0  ;;  %v8634_v37 = vadd.f32 %v8633_v7, %v8305_v53 }
 0xb7f   : > { %v14701_v43 = vpack.c.bf16 %v10022_v33, %v10021_v40  ;;  %v8963_v0 = vadd.f32 %v8962_v60, %v8634_v37 }
 0xb80   : > { %v7977_v55 = vpop.f32.mrf.mxu3 }
 0xb81   : > { %14789 = vst [vmem:[%s17185_s23 + $0x1c8] sm:$0xff] %v14701_v43   ;;  %v7978_v52 = vadd.f32 %v7977_v55, %v18518_v4  ;;  %v9763_v51 = vmul.f32 %v17966_v61, %v8963_v0  ;;  %v18523_v4 = vld [vmem:[#allocation38_spill] sm:$0xff] }
 0xb82   : > { %v8964_v5 = vpop.f32.mrf.mxu2  ;;  %v8309_v36 = vpop.f32.mrf.mxu0 }
 0xb83   : > { %v8307_v15 = vadd.f32 %v8306_v50, %v7978_v52  ;;  %v8638_v49 = vpop.f32.mrf.mxu1  ;;  %v9895_v27 = vadd.f32 %v17969_v28, %v9763_v51 }
 0xb85   : > { %v8636_v23 = vadd.f32 %v8635_v54, %v8307_v15  ;;  %v10023_v57 = vmax.f32 %v9895_v27, 0.0 }
 0xb87   : > { %v8965_v46 = vadd.f32 %v8964_v5, %v8636_v23 }
 0xb88   : > { %v7980_v3 = vpop.f32.mrf.mxu3 }
 0xb89   : > { %v9764_v1 = vmul.f32 %v17966_v61, %v8965_v46  ;;  %v7981_v11 = vadd.f32 %v7980_v3, %v18519_v45 }
 0xb8a   : > { %v8967_v12 = vpop.f32.mrf.mxu2  ;;  %v8311_v14 = vpop.f32.mrf.mxu0 }
 0xb8b   : > { %v9896_v20 = vadd.f32 %v17969_v28, %v9764_v1  ;;  %v8310_v38 = vadd.f32 %v8309_v36, %v7981_v11  ;;  %v8640_v30 = vpop.f32.mrf.mxu1  ;;  %v18524_v11 = vld [vmem:[#allocation80_spill] sm:$0xff] }
 0xb8d   : > { %v10024_v42 = vmax.f32 %v9896_v20, 0.0  ;;  %v8639_v19 = vadd.f32 %v8638_v49, %v8310_v38 }
 0xb8f   : > { %v14706_v24 = vpack.c.bf16 %v10024_v42, %v10023_v57  ;;  %v8968_v32 = vadd.f32 %v8967_v12, %v8639_v19 }
 0xb90   : > { %v7982_v21 = vpop.f32.mrf.mxu3 }
 0xb91   : > { %14790 = vst [vmem:[%s17185_s23 + $0x1d0] sm:$0xff] %v14706_v24   ;;  %v7983_v47 = vadd.f32 %v7982_v21, %v18520_v41  ;;  %v9765_v2 = vmul.f32 %v17966_v61, %v8968_v32  ;;  %v18525_v41 = vld [vmem:[#allocation40_spill] sm:$0xff] }
 0xb92   : > { %v8969_v62 = vpop.f32.mrf.mxu2  ;;  %v8314_v29 = vpop.f32.mrf.mxu0 }
 0xb93   : > { %v8312_v22 = vadd.f32 %v8311_v14, %v7983_v47  ;;  %v8643_v6 = vpop.f32.mrf.mxu1  ;;  %v9897_v58 = vadd.f32 %v17969_v28, %v9765_v2 }
 0xb95   : > { %v8641_v63 = vadd.f32 %v8640_v30, %v8312_v22  ;;  %v10025_v59 = vmax.f32 %v9897_v58, 0.0 }
 0xb97   : > { %v8970_v26 = vadd.f32 %v8969_v62, %v8641_v63 }
 0xb98   : > { %v7985_v31 = vpop.f32.mrf.mxu3 }
 0xb99   : > { %v9766_v25 = vmul.f32 %v17966_v61, %v8970_v26  ;;  %v7986_v10 = vadd.f32 %v7985_v31, %v18521_v34 }
 0xb9a   : > { %v8972_v13 = vpop.f32.mrf.mxu2  ;;  %v8316_v9 = vpop.f32.mrf.mxu0 }
 0xb9b   : > { %v9898_v48 = vadd.f32 %v17969_v28, %v9766_v25  ;;  %v8315_v7 = vadd.f32 %v8314_v29, %v7986_v10  ;;  %v8645_v17 = vpop.f32.mrf.mxu1  ;;  %v18526_v10 = vld [vmem:[#allocation82_spill] sm:$0xff] }
 0xb9d   : > { %v10026_v8 = vmax.f32 %v9898_v48, 0.0  ;;  %v8644_v39 = vadd.f32 %v8643_v6, %v8315_v7 }
 0xb9f   : > { %v14711_v35 = vpack.c.bf16 %v10026_v8, %v10025_v59  ;;  %v8973_v16 = vadd.f32 %v8972_v13, %v8644_v39 }
 0xba0   : > { %v7987_v18 = vpop.f32.mrf.mxu3 }
 0xba1   : > { %14791 = vst [vmem:[%s17185_s23 + $0x1d8] sm:$0xff] %v14711_v35   ;;  %v7988_v60 = vadd.f32 %v7987_v18, %v18522_v44  ;;  %v9767_v40 = vmul.f32 %v17966_v61, %v8973_v16  ;;  %v18527_v16 = vld [vmem:[#allocation42_spill] sm:$0xff] }
 0xba2   : > { %v8974_v50 = vpop.f32.mrf.mxu2  ;;  %v8319_v56 = vpop.f32.mrf.mxu0 }
 0xba3   : > { %v8317_v53 = vadd.f32 %v8316_v9, %v7988_v60  ;;  %v8648_v54 = vpop.f32.mrf.mxu1  ;;  %v9899_v55 = vadd.f32 %v17969_v28, %v9767_v40 }
 0xba5   : > { %v8646_v33 = vadd.f32 %v8645_v17, %v8317_v53  ;;  %v10027_v23 = vmax.f32 %v9899_v55, 0.0 }
 0xba7   : > { %v8975_v37 = vadd.f32 %v8974_v50, %v8646_v33 }
 0xba8   : > { %v7990_v43 = vpop.f32.mrf.mxu3 }
 0xba9   : > { %v9768_v0 = vmul.f32 %v17966_v61, %v8975_v37  ;;  %v7991_v52 = vadd.f32 %v7990_v43, %v18523_v4 }
 0xbaa   : > { %v8977_v5 = vpop.f32.mrf.mxu2  ;;  %v8321_v36 = vpop.f32.mrf.mxu0 }
 0xbab   : > { %v9900_v15 = vadd.f32 %v17969_v28, %v9768_v0  ;;  %v8320_v49 = vadd.f32 %v8319_v56, %v7991_v52  ;;  %v8650_v51 = vpop.f32.mrf.mxu1  ;;  %v18528_v0 = vld [vmem:[#allocation84_spill] sm:$0xff] }
 0xbad   : > { %v10028_v46 = vmax.f32 %v9900_v15, 0.0  ;;  %v8649_v3 = vadd.f32 %v8648_v54, %v8320_v49 }
 0xbaf   : > { %v14716_v27 = vpack.c.bf16 %v10028_v46, %v10027_v23  ;;  %v8978_v45 = vadd.f32 %v8977_v5, %v8649_v3 }
 0xbb0   : > { %v7992_v1 = vpop.f32.mrf.mxu3 }
 0xbb1   : > { %14792 = vst [vmem:[%s17185_s23 + $0x1e0] sm:$0xff] %v14716_v27   ;;  %v7993_v12 = vadd.f32 %v7992_v1, %v18524_v11  ;;  %v9769_v30 = vmul.f32 %v17966_v61, %v8978_v45 }
 0xbb2   : > { %v8979_v14 = vpop.f32.mrf.mxu2  ;;  %v8324_v38 = vpop.f32.mrf.mxu0 }
 0xbb3   : > { %v8322_v20 = vadd.f32 %v8321_v36, %v7993_v12  ;;  %v8653_v42 = vpop.f32.mrf.mxu1  ;;  %v9901_v21 = vadd.f32 %v17969_v28, %v9769_v30 }
 0xbb5   : > { %v8651_v57 = vadd.f32 %v8650_v51, %v8322_v20  ;;  %v10029_v6 = vmax.f32 %v9901_v21, 0.0 }
 0xbb7   : > { %v8980_v19 = vadd.f32 %v8979_v14, %v8651_v57 }
 0xbb8   : > { %v7995_v24 = vpop.f32.mrf.mxu3 }
 0xbb9   : > { %v9770_v32 = vmul.f32 %v17966_v61, %v8980_v19  ;;  %v7996_v47 = vadd.f32 %v7995_v24, %v18525_v41 }
 0xbba   : > { %v8982_v62 = vpop.f32.mrf.mxu2  ;;  %v8326_v26 = vpop.f32.mrf.mxu0 }
 0xbbb   : > { %v9902_v29 = vadd.f32 %v17969_v28, %v9770_v32  ;;  %v8325_v22 = vadd.f32 %v8324_v38, %v7996_v47  ;;  %v8655_v58 = vpop.f32.mrf.mxu1 }
 0xbbd   : > { %v10030_v2 = vmax.f32 %v9902_v29, 0.0  ;;  %v8654_v63 = vadd.f32 %v8653_v42, %v8325_v22 }
 0xbbf   : > { %v14721_v31 = vpack.c.bf16 %v10030_v2, %v10029_v6  ;;  %v8983_v34 = vadd.f32 %v8982_v62, %v8654_v63 }
 0xbc0   : > { %v7997_v25 = vpop.f32.mrf.mxu3 }
 0xbc1   : > { %14793 = vst [vmem:[%s17185_s23 + $0x1e8] sm:$0xff] %v14721_v31   ;;  %v7998_v13 = vadd.f32 %v7997_v25, %v18526_v10  ;;  %v9771_v7 = vmul.f32 %v17966_v61, %v8983_v34 }
 0xbc2   : > { %v8984_v9 = vpop.f32.mrf.mxu2  ;;  %v8329_v8 = vpop.f32.mrf.mxu0 }
 0xbc3   : > { %v8327_v48 = vadd.f32 %v8326_v26, %v7998_v13  ;;  %v9903_v35 = vadd.f32 %v17969_v28, %v9771_v7  ;;  %v8658_v60 = vpop.f32.mrf.mxu1 }
 0xbc5   : > { %v8656_v17 = vadd.f32 %v8655_v58, %v8327_v48  ;;  %v10031_v54 = vmax.f32 %v9903_v35, 0.0 }
 0xbc7   : > { %v8985_v59 = vadd.f32 %v8984_v9, %v8656_v17 }
 0xbc8   : > { %v8000_v39 = vpop.f32.mrf.mxu3 }
 0xbc9   : > { %v9772_v18 = vmul.f32 %v17966_v61, %v8985_v59  ;;  %v8001_v44 = vadd.f32 %v8000_v39, %v18527_v16 }
 0xbca   : > { %v8987_v53 = vpop.f32.mrf.mxu2  ;;  %v8331_v52 = vpop.f32.mrf.mxu0 }
 0xbcb   : > { %v9904_v50 = vadd.f32 %v17969_v28, %v9772_v18  ;;  %v8330_v56 = vadd.f32 %v8329_v8, %v8001_v44  ;;  %v8660_v36 = vpop.f32.mrf.mxu1 }
 0xbcd   : > { %v10032_v40 = vmax.f32 %v9904_v50, 0.0  ;;  %v8659_v33 = vadd.f32 %v8658_v60, %v8330_v56 }
 0xbcf   : > { %v14726_v37 = vpack.c.bf16 %v10032_v40, %v10031_v54  ;;  %v8988_v55 = vadd.f32 %v8987_v53, %v8659_v33 }
 0xbd0   : > { %v8002_v43 = vpop.f32.mrf.mxu3 }
 0xbd1   : > { %14794 = vst [vmem:[%s17185_s23 + $0x1f0] sm:$0xff] %v14726_v37   ;;  %v8003_v4 = vadd.f32 %v8002_v43, %v18528_v0  ;;  %v9773_v15 = vmul.f32 %v17966_v61, %v8988_v55 }
 0xbd2   : > { %v8989_v51 = vpop.f32.mrf.mxu2 }
 0xbd3   : > { %v8332_v5 = vadd.f32 %v8331_v52, %v8003_v4  ;;  %v9905_v46 = vadd.f32 %v17969_v28, %v9773_v15 }
 0xbd5   : > { %v8661_v49 = vadd.f32 %v8660_v36, %v8332_v5  ;;  %v10033_v1 = vmax.f32 %v9905_v46, 0.0 }
 0xbd7   : > { %v8990_v23 = vadd.f32 %v8989_v51, %v8661_v49 }
 0xbd9   : > { %v9774_v3 = vmul.f32 %v17966_v61, %v8990_v23 }
 0xbdb   : > { %v9906_v27 = vadd.f32 %v17969_v28, %v9774_v3 }
 0xbdd   : > { %v10034_v45 = vmax.f32 %v9906_v27, 0.0 }
 0xbdf   : > { %v14731_v11 = vpack.c.bf16 %v10034_v45, %v10033_v1 }
 0xbe1   : > { %14795 = vst [vmem:[%s17185_s23 + $0x1f8] sm:$0xff] %v14731_v11  }
 0xbe2   : > { %15079 = shalt.err (!%p15076_p0)
}
 0xbe3   : > { %s15151_s6 = smov 64   ;;  %s15152_s13 = smov 4  }
 0xbe4   : > { %14837 = dma.vmem_to_hbm [thread:$0]  (%p15269_p5), %s10306_s14, 8192, %s10308_s21, %s10292_s18, %s15151_s6, %s15151_s6, %s15152_s13  }
 0xbe5 PF: > { %s10322_s1 = sand.u32 1, %s15122_s15   ;;  %p14854_p3 = pnand %p10438_p11, %p15227_p6 }
 0xbe6   : > { %s10323_s23 = scalar_lea.sflag [#allocation5], %s10322_s1 }
 0xbe7   : > { %p14855_p7 = pneg %p14854_p3 }
 0xbe9   : > { %15117 = dma.done.wait (%p14855_p7), %s10323_s23, 8192  }
 0xbea   : > { %15119 = vsyncadd (%p14855_p7), %s10323_s23, 4294959104  ;;  %s22_s20 = sadd.s32 1, %s15142_s20   ;;  %s18529_s15 = smov %s15126_s16 }
 0xbeb   : > { %p19_p9 = scmp.ge.s32.totalorder %s22_s20, 4   ;;  %s18530_s16 = smov %s15130_s17 }
 0xbec   : > { %s18531_s17 = smov %s15278_s11  ;;  %s18532_s18 = smov %s15138_s19 }
 0xbed   : > { %s18533_s19 = smov %s18535_s29  ;;  %21 = sbr.rel (!%p19_p9) target bundleno = 10 (0xa), region = 108 }
 0xbf2   :  { %10329 = vsyncpa [#allocation4], 1 }
 0xbf3   :  { %10331 = vsyncpa [#allocation4 + $0x1], 1 }
 0xbf4   :  { %10332 = vsyncpa [#allocation7], 1 }
 0xbf5   :  { %10333 = vsyncpa [#allocation10], 1 }
 0xbf6   :  { %10334 = vsyncpa [#allocation5], 1 }
 0xbf7   :  { %10336 = vsyncpa [#allocation5 + $0x1], 1 }

</bundles_post_ra>
